<compile_context>
chip_gen: v7x
topology: tpu7x:2x2x1
jax: 0.10.0
libtpu: 0.0.40
codegen_flags: <defaults>
</compile_context>

<pallas_src>
import jax
import jax.numpy as jnp
from jax.experimental import pallas as pl
from jax.experimental.pallas import tpu as pltpu


# ------------------------- fused perceptual-loss kernel ------------------------

def _perceptual_fused_kernel(sr_ref, hr_ref, w1_ref, b1_ref, w2_ref, b2_ref,
                             out_ref, h1pad_ref):
    """One grid step == one batch element.

    sr_ref, hr_ref : (H+2, W+2, 1)  zero-padded single-channel images (f32)
    w1_ref         : (9, C)         conv1 weights with the RGB repeat folded in (f32)
    b1_ref         : (1, C)         conv1 bias (f32)
    w2_ref         : (9*C, C)       conv2 weights, tap-major (bf16)
    b2_ref         : (1, C)         conv2 bias (f32)
    out_ref        : (1, C)         per-(image, channel) sum of squared feature diffs
    h1pad_ref      : (H+2, W+2, C)  VMEM scratch: zero-padded conv1 activation
    """
    Hp, Wp, _ = sr_ref.shape
    H, W = Hp - 2, Wp - 2
    C = h1pad_ref.shape[-1]

    # Zero the scratch once per step: the interior is fully rewritten for each
    # of the two images below; the 1-pixel padding ring stays zero.
    h1pad_ref[...] = jnp.zeros_like(h1pad_ref)

    def features(img_ref):
        # ---- conv1 + ReLU.  Cin == 1 (RGB repeat folded into the weights), so
        # the 3x3 conv is 9 shifted broadcast-MACs on the VPU.
        acc1 = jnp.zeros((H, W, C), jnp.float32)
        t = 0
        for dy in range(3):
            for dx in range(3):
                tap = img_ref[dy:dy + H, dx:dx + W, :]                # (H, W, 1)
                acc1 = acc1 + tap * w1_ref[t:t + 1, :].reshape(1, 1, C)
                t += 1
        h1 = jnp.maximum(acc1 + b1_ref[...].reshape(1, 1, C), 0.0)
        h1pad_ref[1:H + 1, 1:W + 1, :] = h1                           # same-pad in VMEM

        # ---- conv2 + ReLU: 9 accumulated GEMMs over shifted views of the
        # padded activation (MXU, bf16 operands, f32 accumulation).
        acc2 = jnp.zeros((H * W, C), jnp.float32)
        t = 0
        for dy in range(3):
            for dx in range(3):
                tap = h1pad_ref[dy:dy + H, dx:dx + W, :].reshape(H * W, C)
                acc2 = acc2 + jnp.dot(tap.astype(jnp.bfloat16),
                                      w2_ref[t * C:(t + 1) * C, :],
                                      preferred_element_type=jnp.float32)
                t += 1
        return jnp.maximum(acc2 + b2_ref[...], 0.0)                   # (H*W, C)

    d = features(sr_ref) - features(hr_ref)                           # (H*W, C)
    out_ref[...] = jnp.sum(d * d, axis=0, keepdims=True)              # (1, C)


# ------------------------------ wrapper / module -------------------------------

class SmallVGGFeatures:
    """Deterministic stand-in for the injected vgg_model (VGG features[:4]):
    conv3x3(3->C)+ReLU, conv3x3(C->C)+ReLU.  Weights in HWIO layout."""

    def __init__(self, key, c1=8):
        k1, k2, k3, k4 = jax.random.split(key, 4)
        self.w1 = 0.1 * jax.random.normal(k1, (3, 3, 3, c1), jnp.float32)
        self.b1 = 0.1 * jax.random.normal(k2, (c1,), jnp.float32)
        self.w2 = 0.1 * jax.random.normal(k3, (3, 3, c1, c1), jnp.float32)
        self.b2 = 0.1 * jax.random.normal(k4, (c1,), jnp.float32)


def perceptual_loss(vgg, sr_img, hr_img):
    """MSE(vgg(sr.repeat(1,3,1,1)), vgg(hr.repeat(1,3,1,1))) for NCHW inputs."""
    N, Cin, H, W = sr_img.shape
    assert Cin == 1, "PerceptualLoss repeats a single channel to RGB"
    C = vgg.w1.shape[-1]

    # Fold x.repeat(1, 3, 1, 1) into conv1: with identical RGB channels,
    # conv(w1, tile(x, 3)) == conv(w1.sum(in_channel), x)  (exact identity).
    w1_fold = jnp.sum(vgg.w1, axis=2).reshape(9, C).astype(jnp.float32)
    b1 = vgg.b1.reshape(1, C).astype(jnp.float32)
    w2_flat = vgg.w2.reshape(9 * C, C).astype(jnp.bfloat16)       # bf16 MXU operands
    b2 = vgg.b2.reshape(1, C).astype(jnp.float32)

    def pad_nhwc(x_nchw):
        x = jnp.transpose(x_nchw.astype(jnp.float32), (0, 2, 3, 1))   # NCHW -> NHWC
        return jnp.pad(x, ((0, 0), (1, 1), (1, 1), (0, 0)))           # conv1 same-pad

    sr_pad = pad_nhwc(sr_img)
    hr_pad = pad_nhwc(hr_img)

    img_spec = pl.BlockSpec((None, H + 2, W + 2, 1), lambda n: (n, 0, 0, 0))
    partials = pl.pallas_call(
        _perceptual_fused_kernel,
        out_shape=jax.ShapeDtypeStruct((N, 1, C), jnp.float32),
        grid=(N,),
        in_specs=[
            img_spec,                                      # sr (padded, 1 channel)
            img_spec,                                      # hr (padded, 1 channel)
            pl.BlockSpec((9, C), lambda n: (0, 0)),        # w1 (folded)
            pl.BlockSpec((1, C), lambda n: (0, 0)),        # b1
            pl.BlockSpec((9 * C, C), lambda n: (0, 0)),    # w2 (bf16)
            pl.BlockSpec((1, C), lambda n: (0, 0)),        # b2
        ],
        out_specs=pl.BlockSpec((None, 1, C), lambda n: (n, 0, 0)),
        scratch_shapes=[pltpu.VMEM((H + 2, W + 2, C), jnp.float32)],
        compiler_params=pltpu.CompilerParams(
            dimension_semantics=("parallel",)),
    )(sr_pad, hr_pad, w1_fold, b1, w2_flat, b2)

    # nn.MSELoss(): mean over all N*H*W*C feature elements.
    return jnp.sum(partials) / float(N * H * W * C)


# ----------------------------------- main --------------------------------------

if __name__ == "__main__":
    key = jax.random.PRNGKey(0)
    kx, ky, kv = jax.random.split(key, 3)

    N, Cin, H, W = 2, 1, 16, 16                    # grayscale inputs, like the module
    sr = jax.random.normal(kx, (N, Cin, H, W), jnp.float32)
    hr = jax.random.normal(ky, (N, Cin, H, W), jnp.float32)

    vgg = SmallVGGFeatures(kv, c1=8)

    loss_fn = jax.jit(lambda a, b: perceptual_loss(vgg, a, b))
    loss = jax.block_until_ready(loss_fn(sr, hr))

    # plain-JAX reference of the ORIGINAL semantics (RGB tile + 2x lax.conv + MSE)
    def _ref_conv(x, w, b):
        y = jax.lax.conv_general_dilated(
            x, w, window_strides=(1, 1), padding="SAME",
            dimension_numbers=("NHWC", "HWIO", "NHWC"),
            precision=jax.lax.Precision.HIGHEST)
        return jnp.maximum(y + b, 0.0)

    def _ref_features(x_nchw):
        rgb = jnp.tile(x_nchw, (1, 3, 1, 1))                  # torch: repeat(1,3,1,1)
        x = jnp.transpose(rgb, (0, 2, 3, 1)).astype(jnp.float32)
        return _ref_conv(_ref_conv(x, vgg.w1, vgg.b1), vgg.w2, vgg.b2)

    ref = jnp.mean((_ref_features(sr) - _ref_features(hr)) ** 2)
    assert jnp.allclose(loss, ref, rtol=2e-2, atol=1e-4), (float(loss), float(ref))

    print("KERNEL_OK")
</pallas_src>

<mosaic_0001>
module attributes {stable_mosaic.version = 11 : i64} {
  func.func @_perceptual_fused_kernel(%arg0: i32, %arg1: memref<1x18x18x1xf32, #tpu.memory_space<vmem>>, %arg2: memref<1x18x18x1xf32, #tpu.memory_space<vmem>>, %arg3: memref<9x8xf32, #tpu.memory_space<vmem>>, %arg4: memref<1x8xf32, #tpu.memory_space<vmem>>, %arg5: memref<72x8xbf16, #tpu.memory_space<vmem>>, %arg6: memref<1x8xf32, #tpu.memory_space<vmem>>, %arg7: memref<1x1x8xf32, #tpu.memory_space<vmem>>, %arg8: memref<18x18x8xf32, #tpu.memory_space<vmem>>) attributes {dimension_semantics = [#tpu.dimension_semantics<parallel>], iteration_bounds = array<i64: 2>, scalar_prefetch = 0 : i64, scratch_operands = 1 : i64, tpu.core_type = #tpu.core_type<tc>, window_params = [{transform_indices = @transform_0, window_bounds = array<i64: 1, 18, 18, 1>}, {transform_indices = @transform_1, window_bounds = array<i64: 1, 18, 18, 1>}, {pipeline_mode = #tpu.pipeline_mode<synchronous>, transform_indices = @transform_2, window_bounds = array<i64: 9, 8>}, {pipeline_mode = #tpu.pipeline_mode<synchronous>, transform_indices = @transform_3, window_bounds = array<i64: 1, 8>}, {pipeline_mode = #tpu.pipeline_mode<synchronous>, transform_indices = @transform_4, window_bounds = array<i64: 72, 8>}, {pipeline_mode = #tpu.pipeline_mode<synchronous>, transform_indices = @transform_5, window_bounds = array<i64: 1, 8>}, {transform_indices = @transform_6, window_bounds = array<i64: 1, 1, 8>}]} {
    %cst = arith.constant 0.000000e+00 : f32
    %0 = vector.broadcast %cst : f32 to vector<18x18x8xf32>
    %c0 = arith.constant 0 : index
    %c0_0 = arith.constant 0 : index
    %c0_1 = arith.constant 0 : index
    %1 = vector.load %arg8[%c0, %c0_0, %c0_1] : memref<18x18x8xf32, #tpu.memory_space<vmem>>, vector<18x18x8xf32>
    tpu.vector_store %arg8[%c0, %c0_0, %c0_1], %0 {strides = array<i32>} : memref<18x18x8xf32, #tpu.memory_space<vmem>>, vector<18x18x8xf32>,
    %cst_2 = arith.constant 0.000000e+00 : f32
    %2 = vector.broadcast %cst_2 : f32 to vector<16x16x8xf32>
    %c0_3 = arith.constant 0 : index
    %c0_4 = arith.constant 0 : index
    %c0_5 = arith.constant 0 : index
    %c0_6 = arith.constant 0 : index
    %3 = vector.load %arg1[%c0_3, %c0_4, %c0_5, %c0_6] : memref<1x18x18x1xf32, #tpu.memory_space<vmem>>, vector<1x16x16x1xf32>
    %4 = vector.shape_cast %3 : vector<1x16x16x1xf32> to vector<16x16x1xf32>
    %c0_7 = arith.constant 0 : index
    %c0_8 = arith.constant 0 : index
    %5 = vector.load %arg3[%c0_7, %c0_8] : memref<9x8xf32, #tpu.memory_space<vmem>>, vector<1x8xf32>
    %6 = vector.shape_cast %5 : vector<1x8xf32> to vector<1x1x8xf32>
    %7 = vector.broadcast %4 : vector<16x16x1xf32> to vector<16x16x8xf32>
    %8 = vector.broadcast %6 : vector<1x1x8xf32> to vector<16x16x8xf32>
    %9 = arith.mulf %7, %8 : vector<16x16x8xf32>
    %10 = arith.addf %2, %9 : vector<16x16x8xf32>
    %c0_9 = arith.constant 0 : index
    %c0_10 = arith.constant 0 : index
    %c1 = arith.constant 1 : index
    %c0_11 = arith.constant 0 : index
    %11 = vector.load %arg1[%c0_9, %c0_10, %c1, %c0_11] : memref<1x18x18x1xf32, #tpu.memory_space<vmem>>, vector<1x16x16x1xf32>
    %12 = vector.shape_cast %11 : vector<1x16x16x1xf32> to vector<16x16x1xf32>
    %c1_12 = arith.constant 1 : index
    %c0_13 = arith.constant 0 : index
    %13 = vector.load %arg3[%c1_12, %c0_13] : memref<9x8xf32, #tpu.memory_space<vmem>>, vector<1x8xf32>
    %14 = vector.shape_cast %13 : vector<1x8xf32> to vector<1x1x8xf32>
    %15 = vector.broadcast %12 : vector<16x16x1xf32> to vector<16x16x8xf32>
    %16 = vector.broadcast %14 : vector<1x1x8xf32> to vector<16x16x8xf32>
    %17 = arith.mulf %15, %16 : vector<16x16x8xf32>
    %18 = arith.addf %10, %17 : vector<16x16x8xf32>
    %c0_14 = arith.constant 0 : index
    %c0_15 = arith.constant 0 : index
    %c2 = arith.constant 2 : index
    %c0_16 = arith.constant 0 : index
    %19 = vector.load %arg1[%c0_14, %c0_15, %c2, %c0_16] : memref<1x18x18x1xf32, #tpu.memory_space<vmem>>, vector<1x16x16x1xf32>
    %20 = vector.shape_cast %19 : vector<1x16x16x1xf32> to vector<16x16x1xf32>
    %c2_17 = arith.constant 2 : index
    %c0_18 = arith.constant 0 : index
    %21 = vector.load %arg3[%c2_17, %c0_18] : memref<9x8xf32, #tpu.memory_space<vmem>>, vector<1x8xf32>
    %22 = vector.shape_cast %21 : vector<1x8xf32> to vector<1x1x8xf32>
    %23 = vector.broadcast %20 : vector<16x16x1xf32> to vector<16x16x8xf32>
    %24 = vector.broadcast %22 : vector<1x1x8xf32> to vector<16x16x8xf32>
    %25 = arith.mulf %23, %24 : vector<16x16x8xf32>
    %26 = arith.addf %18, %25 : vector<16x16x8xf32>
    %c0_19 = arith.constant 0 : index
    %c1_20 = arith.constant 1 : index
    %c0_21 = arith.constant 0 : index
    %c0_22 = arith.constant 0 : index
    %27 = vector.load %arg1[%c0_19, %c1_20, %c0_21, %c0_22] : memref<1x18x18x1xf32, #tpu.memory_space<vmem>>, vector<1x16x16x1xf32>
    %28 = vector.shape_cast %27 : vector<1x16x16x1xf32> to vector<16x16x1xf32>
    %c3 = arith.constant 3 : index
    %c0_23 = arith.constant 0 : index
    %29 = vector.load %arg3[%c3, %c0_23] : memref<9x8xf32, #tpu.memory_space<vmem>>, vector<1x8xf32>
    %30 = vector.shape_cast %29 : vector<1x8xf32> to vector<1x1x8xf32>
    %31 = vector.broadcast %28 : vector<16x16x1xf32> to vector<16x16x8xf32>
    %32 = vector.broadcast %30 : vector<1x1x8xf32> to vector<16x16x8xf32>
    %33 = arith.mulf %31, %32 : vector<16x16x8xf32>
    %34 = arith.addf %26, %33 : vector<16x16x8xf32>
    %c0_24 = arith.constant 0 : index
    %c1_25 = arith.constant 1 : index
    %c1_26 = arith.constant 1 : index
    %c0_27 = arith.constant 0 : index
    %35 = vector.load %arg1[%c0_24, %c1_25, %c1_26, %c0_27] : memref<1x18x18x1xf32, #tpu.memory_space<vmem>>, vector<1x16x16x1xf32>
    %36 = vector.shape_cast %35 : vector<1x16x16x1xf32> to vector<16x16x1xf32>
    %c4 = arith.constant 4 : index
    %c0_28 = arith.constant 0 : index
    %37 = vector.load %arg3[%c4, %c0_28] : memref<9x8xf32, #tpu.memory_space<vmem>>, vector<1x8xf32>
    %38 = vector.shape_cast %37 : vector<1x8xf32> to vector<1x1x8xf32>
    %39 = vector.broadcast %36 : vector<16x16x1xf32> to vector<16x16x8xf32>
    %40 = vector.broadcast %38 : vector<1x1x8xf32> to vector<16x16x8xf32>
    %41 = arith.mulf %39, %40 : vector<16x16x8xf32>
    %42 = arith.addf %34, %41 : vector<16x16x8xf32>
    %c0_29 = arith.constant 0 : index
    %c1_30 = arith.constant 1 : index
    %c2_31 = arith.constant 2 : index
    %c0_32 = arith.constant 0 : index
    %43 = vector.load %arg1[%c0_29, %c1_30, %c2_31, %c0_32] : memref<1x18x18x1xf32, #tpu.memory_space<vmem>>, vector<1x16x16x1xf32>
    %44 = vector.shape_cast %43 : vector<1x16x16x1xf32> to vector<16x16x1xf32>
    %c5 = arith.constant 5 : index
    %c0_33 = arith.constant 0 : index
    %45 = vector.load %arg3[%c5, %c0_33] : memref<9x8xf32, #tpu.memory_space<vmem>>, vector<1x8xf32>
    %46 = vector.shape_cast %45 : vector<1x8xf32> to vector<1x1x8xf32>
    %47 = vector.broadcast %44 : vector<16x16x1xf32> to vector<16x16x8xf32>
    %48 = vector.broadcast %46 : vector<1x1x8xf32> to vector<16x16x8xf32>
    %49 = arith.mulf %47, %48 : vector<16x16x8xf32>
    %50 = arith.addf %42, %49 : vector<16x16x8xf32>
    %c0_34 = arith.constant 0 : index
    %c2_35 = arith.constant 2 : index
    %c0_36 = arith.constant 0 : index
    %c0_37 = arith.constant 0 : index
    %51 = vector.load %arg1[%c0_34, %c2_35, %c0_36, %c0_37] : memref<1x18x18x1xf32, #tpu.memory_space<vmem>>, vector<1x16x16x1xf32>
    %52 = vector.shape_cast %51 : vector<1x16x16x1xf32> to vector<16x16x1xf32>
    %c6 = arith.constant 6 : index
    %c0_38 = arith.constant 0 : index
    %53 = vector.load %arg3[%c6, %c0_38] : memref<9x8xf32, #tpu.memory_space<vmem>>, vector<1x8xf32>
    %54 = vector.shape_cast %53 : vector<1x8xf32> to vector<1x1x8xf32>
    %55 = vector.broadcast %52 : vector<16x16x1xf32> to vector<16x16x8xf32>
    %56 = vector.broadcast %54 : vector<1x1x8xf32> to vector<16x16x8xf32>
    %57 = arith.mulf %55, %56 : vector<16x16x8xf32>
    %58 = arith.addf %50, %57 : vector<16x16x8xf32>
    %c0_39 = arith.constant 0 : index
    %c2_40 = arith.constant 2 : index
    %c1_41 = arith.constant 1 : index
    %c0_42 = arith.constant 0 : index
    %59 = vector.load %arg1[%c0_39, %c2_40, %c1_41, %c0_42] : memref<1x18x18x1xf32, #tpu.memory_space<vmem>>, vector<1x16x16x1xf32>
    %60 = vector.shape_cast %59 : vector<1x16x16x1xf32> to vector<16x16x1xf32>
    %c7 = arith.constant 7 : index
    %c0_43 = arith.constant 0 : index
    %61 = vector.load %arg3[%c7, %c0_43] : memref<9x8xf32, #tpu.memory_space<vmem>>, vector<1x8xf32>
    %62 = vector.shape_cast %61 : vector<1x8xf32> to vector<1x1x8xf32>
    %63 = vector.broadcast %60 : vector<16x16x1xf32> to vector<16x16x8xf32>
    %64 = vector.broadcast %62 : vector<1x1x8xf32> to vector<16x16x8xf32>
    %65 = arith.mulf %63, %64 : vector<16x16x8xf32>
    %66 = arith.addf %58, %65 : vector<16x16x8xf32>
    %c0_44 = arith.constant 0 : index
    %c2_45 = arith.constant 2 : index
    %c2_46 = arith.constant 2 : index
    %c0_47 = arith.constant 0 : index
    %67 = vector.load %arg1[%c0_44, %c2_45, %c2_46, %c0_47] : memref<1x18x18x1xf32, #tpu.memory_space<vmem>>, vector<1x16x16x1xf32>
    %68 = vector.shape_cast %67 : vector<1x16x16x1xf32> to vector<16x16x1xf32>
    %c8 = arith.constant 8 : index
    %c0_48 = arith.constant 0 : index
    %69 = vector.load %arg3[%c8, %c0_48] : memref<9x8xf32, #tpu.memory_space<vmem>>, vector<1x8xf32>
    %70 = vector.shape_cast %69 : vector<1x8xf32> to vector<1x1x8xf32>
    %71 = vector.broadcast %68 : vector<16x16x1xf32> to vector<16x16x8xf32>
    %72 = vector.broadcast %70 : vector<1x1x8xf32> to vector<16x16x8xf32>
    %73 = arith.mulf %71, %72 : vector<16x16x8xf32>
    %74 = arith.addf %66, %73 : vector<16x16x8xf32>
    %c0_49 = arith.constant 0 : index
    %c0_50 = arith.constant 0 : index
    %75 = vector.load %arg4[%c0_49, %c0_50] : memref<1x8xf32, #tpu.memory_space<vmem>>, vector<1x8xf32>
    %76 = vector.shape_cast %75 : vector<1x8xf32> to vector<1x1x8xf32>
    %77 = vector.broadcast %76 : vector<1x1x8xf32> to vector<16x16x8xf32>
    %78 = arith.addf %74, %77 : vector<16x16x8xf32>
    %cst_51 = arith.constant 0.000000e+00 : f32
    %79 = vector.broadcast %cst_51 : f32 to vector<16x16x8xf32>
    %80 = arith.maximumf %78, %79 : vector<16x16x8xf32>
    %c1_52 = arith.constant 1 : index
    %c1_53 = arith.constant 1 : index
    %c0_54 = arith.constant 0 : index
    %81 = vector.load %arg8[%c1_52, %c1_53, %c0_54] : memref<18x18x8xf32, #tpu.memory_space<vmem>>, vector<16x16x8xf32>
    tpu.vector_store %arg8[%c1_52, %c1_53, %c0_54], %80 {strides = array<i32>} : memref<18x18x8xf32, #tpu.memory_space<vmem>>, vector<16x16x8xf32>,
    %cst_55 = arith.constant 0.000000e+00 : f32
    %82 = vector.broadcast %cst_55 : f32 to vector<256x8xf32>
    %c0_56 = arith.constant 0 : index
    %c0_57 = arith.constant 0 : index
    %c0_58 = arith.constant 0 : index
    %83 = vector.load %arg8[%c0_56, %c0_57, %c0_58] : memref<18x18x8xf32, #tpu.memory_space<vmem>>, vector<16x16x8xf32>
    %84 = vector.shape_cast %83 : vector<16x16x8xf32> to vector<256x8xf32>
    %85 = arith.truncf %84 : vector<256x8xf32> to vector<256x8xbf16>
    %c0_59 = arith.constant 0 : index
    %c0_60 = arith.constant 0 : index
    %86 = vector.load %arg5[%c0_59, %c0_60] : memref<72x8xbf16, #tpu.memory_space<vmem>>, vector<8x8xbf16>
    %cst_61 = arith.constant dense<0.000000e+00> : vector<256x8xf32>
    %87 = tpu.matmul %85, %86, %cst_61 {dimension_numbers = #tpu.dot_dimension_numbers<[1], [0], [0], [1], [0, 0, 1, 1], [], []>} : vector<256x8xbf16>, vector<8x8xbf16>, vector<256x8xf32> -> vector<256x8xf32>
    %88 = arith.addf %82, %87 : vector<256x8xf32>
    %c0_62 = arith.constant 0 : index
    %c1_63 = arith.constant 1 : index
    %c0_64 = arith.constant 0 : index
    %89 = vector.load %arg8[%c0_62, %c1_63, %c0_64] : memref<18x18x8xf32, #tpu.memory_space<vmem>>, vector<16x16x8xf32>
    %90 = vector.shape_cast %89 : vector<16x16x8xf32> to vector<256x8xf32>
    %91 = arith.truncf %90 : vector<256x8xf32> to vector<256x8xbf16>
    %c8_65 = arith.constant 8 : index
    %c0_66 = arith.constant 0 : index
    %92 = vector.load %arg5[%c8_65, %c0_66] : memref<72x8xbf16, #tpu.memory_space<vmem>>, vector<8x8xbf16>
    %cst_67 = arith.constant dense<0.000000e+00> : vector<256x8xf32>
    %93 = tpu.matmul %91, %92, %cst_67 {dimension_numbers = #tpu.dot_dimension_numbers<[1], [0], [0], [1], [0, 0, 1, 1], [], []>} : vector<256x8xbf16>, vector<8x8xbf16>, vector<256x8xf32> -> vector<256x8xf32>
    %94 = arith.addf %88, %93 : vector<256x8xf32>
    %c0_68 = arith.constant 0 : index
    %c2_69 = arith.constant 2 : index
    %c0_70 = arith.constant 0 : index
    %95 = vector.load %arg8[%c0_68, %c2_69, %c0_70] : memref<18x18x8xf32, #tpu.memory_space<vmem>>, vector<16x16x8xf32>
    %96 = vector.shape_cast %95 : vector<16x16x8xf32> to vector<256x8xf32>
    %97 = arith.truncf %96 : vector<256x8xf32> to vector<256x8xbf16>
    %c16 = arith.constant 16 : index
    %c0_71 = arith.constant 0 : index
    %98 = vector.load %arg5[%c16, %c0_71] : memref<72x8xbf16, #tpu.memory_space<vmem>>, vector<8x8xbf16>
    %cst_72 = arith.constant dense<0.000000e+00> : vector<256x8xf32>
    %99 = tpu.matmul %97, %98, %cst_72 {dimension_numbers = #tpu.dot_dimension_numbers<[1], [0], [0], [1], [0, 0, 1, 1], [], []>} : vector<256x8xbf16>, vector<8x8xbf16>, vector<256x8xf32> -> vector<256x8xf32>
    %100 = arith.addf %94, %99 : vector<256x8xf32>
    %c1_73 = arith.constant 1 : index
    %c0_74 = arith.constant 0 : index
    %c0_75 = arith.constant 0 : index
    %101 = vector.load %arg8[%c1_73, %c0_74, %c0_75] : memref<18x18x8xf32, #tpu.memory_space<vmem>>, vector<16x16x8xf32>
    %102 = vector.shape_cast %101 : vector<16x16x8xf32> to vector<256x8xf32>
    %103 = arith.truncf %102 : vector<256x8xf32> to vector<256x8xbf16>
    %c24 = arith.constant 24 : index
    %c0_76 = arith.constant 0 : index
    %104 = vector.load %arg5[%c24, %c0_76] : memref<72x8xbf16, #tpu.memory_space<vmem>>, vector<8x8xbf16>
    %cst_77 = arith.constant dense<0.000000e+00> : vector<256x8xf32>
    %105 = tpu.matmul %103, %104, %cst_77 {dimension_numbers = #tpu.dot_dimension_numbers<[1], [0], [0], [1], [0, 0, 1, 1], [], []>} : vector<256x8xbf16>, vector<8x8xbf16>, vector<256x8xf32> -> vector<256x8xf32>
    %106 = arith.addf %100, %105 : vector<256x8xf32>
    %c1_78 = arith.constant 1 : index
    %c1_79 = arith.constant 1 : index
    %c0_80 = arith.constant 0 : index
    %107 = vector.load %arg8[%c1_78, %c1_79, %c0_80] : memref<18x18x8xf32, #tpu.memory_space<vmem>>, vector<16x16x8xf32>
    %108 = vector.shape_cast %107 : vector<16x16x8xf32> to vector<256x8xf32>
    %109 = arith.truncf %108 : vector<256x8xf32> to vector<256x8xbf16>
    %c32 = arith.constant 32 : index
    %c0_81 = arith.constant 0 : index
    %110 = vector.load %arg5[%c32, %c0_81] : memref<72x8xbf16, #tpu.memory_space<vmem>>, vector<8x8xbf16>
    %cst_82 = arith.constant dense<0.000000e+00> : vector<256x8xf32>
    %111 = tpu.matmul %109, %110, %cst_82 {dimension_numbers = #tpu.dot_dimension_numbers<[1], [0], [0], [1], [0, 0, 1, 1], [], []>} : vector<256x8xbf16>, vector<8x8xbf16>, vector<256x8xf32> -> vector<256x8xf32>
    %112 = arith.addf %106, %111 : vector<256x8xf32>
    %c1_83 = arith.constant 1 : index
    %c2_84 = arith.constant 2 : index
    %c0_85 = arith.constant 0 : index
    %113 = vector.load %arg8[%c1_83, %c2_84, %c0_85] : memref<18x18x8xf32, #tpu.memory_space<vmem>>, vector<16x16x8xf32>
    %114 = vector.shape_cast %113 : vector<16x16x8xf32> to vector<256x8xf32>
    %115 = arith.truncf %114 : vector<256x8xf32> to vector<256x8xbf16>
    %c40 = arith.constant 40 : index
    %c0_86 = arith.constant 0 : index
    %116 = vector.load %arg5[%c40, %c0_86] : memref<72x8xbf16, #tpu.memory_space<vmem>>, vector<8x8xbf16>
    %cst_87 = arith.constant dense<0.000000e+00> : vector<256x8xf32>
    %117 = tpu.matmul %115, %116, %cst_87 {dimension_numbers = #tpu.dot_dimension_numbers<[1], [0], [0], [1], [0, 0, 1, 1], [], []>} : vector<256x8xbf16>, vector<8x8xbf16>, vector<256x8xf32> -> vector<256x8xf32>
    %118 = arith.addf %112, %117 : vector<256x8xf32>
    %c2_88 = arith.constant 2 : index
    %c0_89 = arith.constant 0 : index
    %c0_90 = arith.constant 0 : index
    %119 = vector.load %arg8[%c2_88, %c0_89, %c0_90] : memref<18x18x8xf32, #tpu.memory_space<vmem>>, vector<16x16x8xf32>
    %120 = vector.shape_cast %119 : vector<16x16x8xf32> to vector<256x8xf32>
    %121 = arith.truncf %120 : vector<256x8xf32> to vector<256x8xbf16>
    %c48 = arith.constant 48 : index
    %c0_91 = arith.constant 0 : index
    %122 = vector.load %arg5[%c48, %c0_91] : memref<72x8xbf16, #tpu.memory_space<vmem>>, vector<8x8xbf16>
    %cst_92 = arith.constant dense<0.000000e+00> : vector<256x8xf32>
    %123 = tpu.matmul %121, %122, %cst_92 {dimension_numbers = #tpu.dot_dimension_numbers<[1], [0], [0], [1], [0, 0, 1, 1], [], []>} : vector<256x8xbf16>, vector<8x8xbf16>, vector<256x8xf32> -> vector<256x8xf32>
    %124 = arith.addf %118, %123 : vector<256x8xf32>
    %c2_93 = arith.constant 2 : index
    %c1_94 = arith.constant 1 : index
    %c0_95 = arith.constant 0 : index
    %125 = vector.load %arg8[%c2_93, %c1_94, %c0_95] : memref<18x18x8xf32, #tpu.memory_space<vmem>>, vector<16x16x8xf32>
    %126 = vector.shape_cast %125 : vector<16x16x8xf32> to vector<256x8xf32>
    %127 = arith.truncf %126 : vector<256x8xf32> to vector<256x8xbf16>
    %c56 = arith.constant 56 : index
    %c0_96 = arith.constant 0 : index
    %128 = vector.load %arg5[%c56, %c0_96] : memref<72x8xbf16, #tpu.memory_space<vmem>>, vector<8x8xbf16>
    %cst_97 = arith.constant dense<0.000000e+00> : vector<256x8xf32>
    %129 = tpu.matmul %127, %128, %cst_97 {dimension_numbers = #tpu.dot_dimension_numbers<[1], [0], [0], [1], [0, 0, 1, 1], [], []>} : vector<256x8xbf16>, vector<8x8xbf16>, vector<256x8xf32> -> vector<256x8xf32>
    %130 = arith.addf %124, %129 : vector<256x8xf32>
    %c2_98 = arith.constant 2 : index
    %c2_99 = arith.constant 2 : index
    %c0_100 = arith.constant 0 : index
    %131 = vector.load %arg8[%c2_98, %c2_99, %c0_100] : memref<18x18x8xf32, #tpu.memory_space<vmem>>, vector<16x16x8xf32>
    %132 = vector.shape_cast %131 : vector<16x16x8xf32> to vector<256x8xf32>
    %133 = arith.truncf %132 : vector<256x8xf32> to vector<256x8xbf16>
    %c64 = arith.constant 64 : index
    %c0_101 = arith.constant 0 : index
    %134 = vector.load %arg5[%c64, %c0_101] : memref<72x8xbf16, #tpu.memory_space<vmem>>, vector<8x8xbf16>
    %cst_102 = arith.constant dense<0.000000e+00> : vector<256x8xf32>
    %135 = tpu.matmul %133, %134, %cst_102 {dimension_numbers = #tpu.dot_dimension_numbers<[1], [0], [0], [1], [0, 0, 1, 1], [], []>} : vector<256x8xbf16>, vector<8x8xbf16>, vector<256x8xf32> -> vector<256x8xf32>
    %136 = arith.addf %130, %135 : vector<256x8xf32>
    %c0_103 = arith.constant 0 : index
    %c0_104 = arith.constant 0 : index
    %137 = vector.load %arg6[%c0_103, %c0_104] : memref<1x8xf32, #tpu.memory_space<vmem>>, vector<1x8xf32>
    %138 = vector.broadcast %137 : vector<1x8xf32> to vector<256x8xf32>
    %139 = arith.addf %136, %138 : vector<256x8xf32>
    %cst_105 = arith.constant 0.000000e+00 : f32
    %140 = vector.broadcast %cst_105 : f32 to vector<256x8xf32>
    %141 = arith.maximumf %139, %140 : vector<256x8xf32>
    %cst_106 = arith.constant 0.000000e+00 : f32
    %142 = vector.broadcast %cst_106 : f32 to vector<16x16x8xf32>
    %c0_107 = arith.constant 0 : index
    %c0_108 = arith.constant 0 : index
    %c0_109 = arith.constant 0 : index
    %c0_110 = arith.constant 0 : index
    %143 = vector.load %arg2[%c0_107, %c0_108, %c0_109, %c0_110] : memref<1x18x18x1xf32, #tpu.memory_space<vmem>>, vector<1x16x16x1xf32>
    %144 = vector.shape_cast %143 : vector<1x16x16x1xf32> to vector<16x16x1xf32>
    %c0_111 = arith.constant 0 : index
    %c0_112 = arith.constant 0 : index
    %145 = vector.load %arg3[%c0_111, %c0_112] : memref<9x8xf32, #tpu.memory_space<vmem>>, vector<1x8xf32>
    %146 = vector.shape_cast %145 : vector<1x8xf32> to vector<1x1x8xf32>
    %147 = vector.broadcast %144 : vector<16x16x1xf32> to vector<16x16x8xf32>
    %148 = vector.broadcast %146 : vector<1x1x8xf32> to vector<16x16x8xf32>
    %149 = arith.mulf %147, %148 : vector<16x16x8xf32>
    %150 = arith.addf %142, %149 : vector<16x16x8xf32>
    %c0_113 = arith.constant 0 : index
    %c0_114 = arith.constant 0 : index
    %c1_115 = arith.constant 1 : index
    %c0_116 = arith.constant 0 : index
    %151 = vector.load %arg2[%c0_113, %c0_114, %c1_115, %c0_116] : memref<1x18x18x1xf32, #tpu.memory_space<vmem>>, vector<1x16x16x1xf32>
    %152 = vector.shape_cast %151 : vector<1x16x16x1xf32> to vector<16x16x1xf32>
    %c1_117 = arith.constant 1 : index
    %c0_118 = arith.constant 0 : index
    %153 = vector.load %arg3[%c1_117, %c0_118] : memref<9x8xf32, #tpu.memory_space<vmem>>, vector<1x8xf32>
    %154 = vector.shape_cast %153 : vector<1x8xf32> to vector<1x1x8xf32>
    %155 = vector.broadcast %152 : vector<16x16x1xf32> to vector<16x16x8xf32>
    %156 = vector.broadcast %154 : vector<1x1x8xf32> to vector<16x16x8xf32>
    %157 = arith.mulf %155, %156 : vector<16x16x8xf32>
    %158 = arith.addf %150, %157 : vector<16x16x8xf32>
    %c0_119 = arith.constant 0 : index
    %c0_120 = arith.constant 0 : index
    %c2_121 = arith.constant 2 : index
    %c0_122 = arith.constant 0 : index
    %159 = vector.load %arg2[%c0_119, %c0_120, %c2_121, %c0_122] : memref<1x18x18x1xf32, #tpu.memory_space<vmem>>, vector<1x16x16x1xf32>
    %160 = vector.shape_cast %159 : vector<1x16x16x1xf32> to vector<16x16x1xf32>
    %c2_123 = arith.constant 2 : index
    %c0_124 = arith.constant 0 : index
    %161 = vector.load %arg3[%c2_123, %c0_124] : memref<9x8xf32, #tpu.memory_space<vmem>>, vector<1x8xf32>
    %162 = vector.shape_cast %161 : vector<1x8xf32> to vector<1x1x8xf32>
    %163 = vector.broadcast %160 : vector<16x16x1xf32> to vector<16x16x8xf32>
    %164 = vector.broadcast %162 : vector<1x1x8xf32> to vector<16x16x8xf32>
    %165 = arith.mulf %163, %164 : vector<16x16x8xf32>
    %166 = arith.addf %158, %165 : vector<16x16x8xf32>
    %c0_125 = arith.constant 0 : index
    %c1_126 = arith.constant 1 : index
    %c0_127 = arith.constant 0 : index
    %c0_128 = arith.constant 0 : index
    %167 = vector.load %arg2[%c0_125, %c1_126, %c0_127, %c0_128] : memref<1x18x18x1xf32, #tpu.memory_space<vmem>>, vector<1x16x16x1xf32>
    %168 = vector.shape_cast %167 : vector<1x16x16x1xf32> to vector<16x16x1xf32>
    %c3_129 = arith.constant 3 : index
    %c0_130 = arith.constant 0 : index
    %169 = vector.load %arg3[%c3_129, %c0_130] : memref<9x8xf32, #tpu.memory_space<vmem>>, vector<1x8xf32>
    %170 = vector.shape_cast %169 : vector<1x8xf32> to vector<1x1x8xf32>
    %171 = vector.broadcast %168 : vector<16x16x1xf32> to vector<16x16x8xf32>
    %172 = vector.broadcast %170 : vector<1x1x8xf32> to vector<16x16x8xf32>
    %173 = arith.mulf %171, %172 : vector<16x16x8xf32>
    %174 = arith.addf %166, %173 : vector<16x16x8xf32>
    %c0_131 = arith.constant 0 : index
    %c1_132 = arith.constant 1 : index
    %c1_133 = arith.constant 1 : index
    %c0_134 = arith.constant 0 : index
    %175 = vector.load %arg2[%c0_131, %c1_132, %c1_133, %c0_134] : memref<1x18x18x1xf32, #tpu.memory_space<vmem>>, vector<1x16x16x1xf32>
    %176 = vector.shape_cast %175 : vector<1x16x16x1xf32> to vector<16x16x1xf32>
    %c4_135 = arith.constant 4 : index
    %c0_136 = arith.constant 0 : index
    %177 = vector.load %arg3[%c4_135, %c0_136] : memref<9x8xf32, #tpu.memory_space<vmem>>, vector<1x8xf32>
    %178 = vector.shape_cast %177 : vector<1x8xf32> to vector<1x1x8xf32>
    %179 = vector.broadcast %176 : vector<16x16x1xf32> to vector<16x16x8xf32>
    %180 = vector.broadcast %178 : vector<1x1x8xf32> to vector<16x16x8xf32>
    %181 = arith.mulf %179, %180 : vector<16x16x8xf32>
    %182 = arith.addf %174, %181 : vector<16x16x8xf32>
    %c0_137 = arith.constant 0 : index
    %c1_138 = arith.constant 1 : index
    %c2_139 = arith.constant 2 : index
    %c0_140 = arith.constant 0 : index
    %183 = vector.load %arg2[%c0_137, %c1_138, %c2_139, %c0_140] : memref<1x18x18x1xf32, #tpu.memory_space<vmem>>, vector<1x16x16x1xf32>
    %184 = vector.shape_cast %183 : vector<1x16x16x1xf32> to vector<16x16x1xf32>
    %c5_141 = arith.constant 5 : index
    %c0_142 = arith.constant 0 : index
    %185 = vector.load %arg3[%c5_141, %c0_142] : memref<9x8xf32, #tpu.memory_space<vmem>>, vector<1x8xf32>
    %186 = vector.shape_cast %185 : vector<1x8xf32> to vector<1x1x8xf32>
    %187 = vector.broadcast %184 : vector<16x16x1xf32> to vector<16x16x8xf32>
    %188 = vector.broadcast %186 : vector<1x1x8xf32> to vector<16x16x8xf32>
    %189 = arith.mulf %187, %188 : vector<16x16x8xf32>
    %190 = arith.addf %182, %189 : vector<16x16x8xf32>
    %c0_143 = arith.constant 0 : index
    %c2_144 = arith.constant 2 : index
    %c0_145 = arith.constant 0 : index
    %c0_146 = arith.constant 0 : index
    %191 = vector.load %arg2[%c0_143, %c2_144, %c0_145, %c0_146] : memref<1x18x18x1xf32, #tpu.memory_space<vmem>>, vector<1x16x16x1xf32>
    %192 = vector.shape_cast %191 : vector<1x16x16x1xf32> to vector<16x16x1xf32>
    %c6_147 = arith.constant 6 : index
    %c0_148 = arith.constant 0 : index
    %193 = vector.load %arg3[%c6_147, %c0_148] : memref<9x8xf32, #tpu.memory_space<vmem>>, vector<1x8xf32>
    %194 = vector.shape_cast %193 : vector<1x8xf32> to vector<1x1x8xf32>
    %195 = vector.broadcast %192 : vector<16x16x1xf32> to vector<16x16x8xf32>
    %196 = vector.broadcast %194 : vector<1x1x8xf32> to vector<16x16x8xf32>
    %197 = arith.mulf %195, %196 : vector<16x16x8xf32>
    %198 = arith.addf %190, %197 : vector<16x16x8xf32>
    %c0_149 = arith.constant 0 : index
    %c2_150 = arith.constant 2 : index
    %c1_151 = arith.constant 1 : index
    %c0_152 = arith.constant 0 : index
    %199 = vector.load %arg2[%c0_149, %c2_150, %c1_151, %c0_152] : memref<1x18x18x1xf32, #tpu.memory_space<vmem>>, vector<1x16x16x1xf32>
    %200 = vector.shape_cast %199 : vector<1x16x16x1xf32> to vector<16x16x1xf32>
    %c7_153 = arith.constant 7 : index
    %c0_154 = arith.constant 0 : index
    %201 = vector.load %arg3[%c7_153, %c0_154] : memref<9x8xf32, #tpu.memory_space<vmem>>, vector<1x8xf32>
    %202 = vector.shape_cast %201 : vector<1x8xf32> to vector<1x1x8xf32>
    %203 = vector.broadcast %200 : vector<16x16x1xf32> to vector<16x16x8xf32>
    %204 = vector.broadcast %202 : vector<1x1x8xf32> to vector<16x16x8xf32>
    %205 = arith.mulf %203, %204 : vector<16x16x8xf32>
    %206 = arith.addf %198, %205 : vector<16x16x8xf32>
    %c0_155 = arith.constant 0 : index
    %c2_156 = arith.constant 2 : index
    %c2_157 = arith.constant 2 : index
    %c0_158 = arith.constant 0 : index
    %207 = vector.load %arg2[%c0_155, %c2_156, %c2_157, %c0_158] : memref<1x18x18x1xf32, #tpu.memory_space<vmem>>, vector<1x16x16x1xf32>
    %208 = vector.shape_cast %207 : vector<1x16x16x1xf32> to vector<16x16x1xf32>
    %c8_159 = arith.constant 8 : index
    %c0_160 = arith.constant 0 : index
    %209 = vector.load %arg3[%c8_159, %c0_160] : memref<9x8xf32, #tpu.memory_space<vmem>>, vector<1x8xf32>
    %210 = vector.shape_cast %209 : vector<1x8xf32> to vector<1x1x8xf32>
    %211 = vector.broadcast %208 : vector<16x16x1xf32> to vector<16x16x8xf32>
    %212 = vector.broadcast %210 : vector<1x1x8xf32> to vector<16x16x8xf32>
    %213 = arith.mulf %211, %212 : vector<16x16x8xf32>
    %214 = arith.addf %206, %213 : vector<16x16x8xf32>
    %c0_161 = arith.constant 0 : index
    %c0_162 = arith.constant 0 : index
    %215 = vector.load %arg4[%c0_161, %c0_162] : memref<1x8xf32, #tpu.memory_space<vmem>>, vector<1x8xf32>
    %216 = vector.shape_cast %215 : vector<1x8xf32> to vector<1x1x8xf32>
    %217 = vector.broadcast %216 : vector<1x1x8xf32> to vector<16x16x8xf32>
    %218 = arith.addf %214, %217 : vector<16x16x8xf32>
    %cst_163 = arith.constant 0.000000e+00 : f32
    %219 = vector.broadcast %cst_163 : f32 to vector<16x16x8xf32>
    %220 = arith.maximumf %218, %219 : vector<16x16x8xf32>
    %c1_164 = arith.constant 1 : index
    %c1_165 = arith.constant 1 : index
    %c0_166 = arith.constant 0 : index
    %221 = vector.load %arg8[%c1_164, %c1_165, %c0_166] : memref<18x18x8xf32, #tpu.memory_space<vmem>>, vector<16x16x8xf32>
    tpu.vector_store %arg8[%c1_164, %c1_165, %c0_166], %220 {strides = array<i32>} : memref<18x18x8xf32, #tpu.memory_space<vmem>>, vector<16x16x8xf32>,
    %cst_167 = arith.constant 0.000000e+00 : f32
    %222 = vector.broadcast %cst_167 : f32 to vector<256x8xf32>
    %c0_168 = arith.constant 0 : index
    %c0_169 = arith.constant 0 : index
    %c0_170 = arith.constant 0 : index
    %223 = vector.load %arg8[%c0_168, %c0_169, %c0_170] : memref<18x18x8xf32, #tpu.memory_space<vmem>>, vector<16x16x8xf32>
    %224 = vector.shape_cast %223 : vector<16x16x8xf32> to vector<256x8xf32>
    %225 = arith.truncf %224 : vector<256x8xf32> to vector<256x8xbf16>
    %c0_171 = arith.constant 0 : index
    %c0_172 = arith.constant 0 : index
    %226 = vector.load %arg5[%c0_171, %c0_172] : memref<72x8xbf16, #tpu.memory_space<vmem>>, vector<8x8xbf16>
    %cst_173 = arith.constant dense<0.000000e+00> : vector<256x8xf32>
    %227 = tpu.matmul %225, %226, %cst_173 {dimension_numbers = #tpu.dot_dimension_numbers<[1], [0], [0], [1], [0, 0, 1, 1], [], []>} : vector<256x8xbf16>, vector<8x8xbf16>, vector<256x8xf32> -> vector<256x8xf32>
    %228 = arith.addf %222, %227 : vector<256x8xf32>
    %c0_174 = arith.constant 0 : index
    %c1_175 = arith.constant 1 : index
    %c0_176 = arith.constant 0 : index
    %229 = vector.load %arg8[%c0_174, %c1_175, %c0_176] : memref<18x18x8xf32, #tpu.memory_space<vmem>>, vector<16x16x8xf32>
    %230 = vector.shape_cast %229 : vector<16x16x8xf32> to vector<256x8xf32>
    %231 = arith.truncf %230 : vector<256x8xf32> to vector<256x8xbf16>
    %c8_177 = arith.constant 8 : index
    %c0_178 = arith.constant 0 : index
    %232 = vector.load %arg5[%c8_177, %c0_178] : memref<72x8xbf16, #tpu.memory_space<vmem>>, vector<8x8xbf16>
    %cst_179 = arith.constant dense<0.000000e+00> : vector<256x8xf32>
    %233 = tpu.matmul %231, %232, %cst_179 {dimension_numbers = #tpu.dot_dimension_numbers<[1], [0], [0], [1], [0, 0, 1, 1], [], []>} : vector<256x8xbf16>, vector<8x8xbf16>, vector<256x8xf32> -> vector<256x8xf32>
    %234 = arith.addf %228, %233 : vector<256x8xf32>
    %c0_180 = arith.constant 0 : index
    %c2_181 = arith.constant 2 : index
    %c0_182 = arith.constant 0 : index
    %235 = vector.load %arg8[%c0_180, %c2_181, %c0_182] : memref<18x18x8xf32, #tpu.memory_space<vmem>>, vector<16x16x8xf32>
    %236 = vector.shape_cast %235 : vector<16x16x8xf32> to vector<256x8xf32>
    %237 = arith.truncf %236 : vector<256x8xf32> to vector<256x8xbf16>
    %c16_183 = arith.constant 16 : index
    %c0_184 = arith.constant 0 : index
    %238 = vector.load %arg5[%c16_183, %c0_184] : memref<72x8xbf16, #tpu.memory_space<vmem>>, vector<8x8xbf16>
    %cst_185 = arith.constant dense<0.000000e+00> : vector<256x8xf32>
    %239 = tpu.matmul %237, %238, %cst_185 {dimension_numbers = #tpu.dot_dimension_numbers<[1], [0], [0], [1], [0, 0, 1, 1], [], []>} : vector<256x8xbf16>, vector<8x8xbf16>, vector<256x8xf32> -> vector<256x8xf32>
    %240 = arith.addf %234, %239 : vector<256x8xf32>
    %c1_186 = arith.constant 1 : index
    %c0_187 = arith.constant 0 : index
    %c0_188 = arith.constant 0 : index
    %241 = vector.load %arg8[%c1_186, %c0_187, %c0_188] : memref<18x18x8xf32, #tpu.memory_space<vmem>>, vector<16x16x8xf32>
    %242 = vector.shape_cast %241 : vector<16x16x8xf32> to vector<256x8xf32>
    %243 = arith.truncf %242 : vector<256x8xf32> to vector<256x8xbf16>
    %c24_189 = arith.constant 24 : index
    %c0_190 = arith.constant 0 : index
    %244 = vector.load %arg5[%c24_189, %c0_190] : memref<72x8xbf16, #tpu.memory_space<vmem>>, vector<8x8xbf16>
    %cst_191 = arith.constant dense<0.000000e+00> : vector<256x8xf32>
    %245 = tpu.matmul %243, %244, %cst_191 {dimension_numbers = #tpu.dot_dimension_numbers<[1], [0], [0], [1], [0, 0, 1, 1], [], []>} : vector<256x8xbf16>, vector<8x8xbf16>, vector<256x8xf32> -> vector<256x8xf32>
    %246 = arith.addf %240, %245 : vector<256x8xf32>
    %c1_192 = arith.constant 1 : index
    %c1_193 = arith.constant 1 : index
    %c0_194 = arith.constant 0 : index
    %247 = vector.load %arg8[%c1_192, %c1_193, %c0_194] : memref<18x18x8xf32, #tpu.memory_space<vmem>>, vector<16x16x8xf32>
    %248 = vector.shape_cast %247 : vector<16x16x8xf32> to vector<256x8xf32>
    %249 = arith.truncf %248 : vector<256x8xf32> to vector<256x8xbf16>
    %c32_195 = arith.constant 32 : index
    %c0_196 = arith.constant 0 : index
    %250 = vector.load %arg5[%c32_195, %c0_196] : memref<72x8xbf16, #tpu.memory_space<vmem>>, vector<8x8xbf16>
    %cst_197 = arith.constant dense<0.000000e+00> : vector<256x8xf32>
    %251 = tpu.matmul %249, %250, %cst_197 {dimension_numbers = #tpu.dot_dimension_numbers<[1], [0], [0], [1], [0, 0, 1, 1], [], []>} : vector<256x8xbf16>, vector<8x8xbf16>, vector<256x8xf32> -> vector<256x8xf32>
    %252 = arith.addf %246, %251 : vector<256x8xf32>
    %c1_198 = arith.constant 1 : index
    %c2_199 = arith.constant 2 : index
    %c0_200 = arith.constant 0 : index
    %253 = vector.load %arg8[%c1_198, %c2_199, %c0_200] : memref<18x18x8xf32, #tpu.memory_space<vmem>>, vector<16x16x8xf32>
    %254 = vector.shape_cast %253 : vector<16x16x8xf32> to vector<256x8xf32>
    %255 = arith.truncf %254 : vector<256x8xf32> to vector<256x8xbf16>
    %c40_201 = arith.constant 40 : index
    %c0_202 = arith.constant 0 : index
    %256 = vector.load %arg5[%c40_201, %c0_202] : memref<72x8xbf16, #tpu.memory_space<vmem>>, vector<8x8xbf16>
    %cst_203 = arith.constant dense<0.000000e+00> : vector<256x8xf32>
    %257 = tpu.matmul %255, %256, %cst_203 {dimension_numbers = #tpu.dot_dimension_numbers<[1], [0], [0], [1], [0, 0, 1, 1], [], []>} : vector<256x8xbf16>, vector<8x8xbf16>, vector<256x8xf32> -> vector<256x8xf32>
    %258 = arith.addf %252, %257 : vector<256x8xf32>
    %c2_204 = arith.constant 2 : index
    %c0_205 = arith.constant 0 : index
    %c0_206 = arith.constant 0 : index
    %259 = vector.load %arg8[%c2_204, %c0_205, %c0_206] : memref<18x18x8xf32, #tpu.memory_space<vmem>>, vector<16x16x8xf32>
    %260 = vector.shape_cast %259 : vector<16x16x8xf32> to vector<256x8xf32>
    %261 = arith.truncf %260 : vector<256x8xf32> to vector<256x8xbf16>
    %c48_207 = arith.constant 48 : index
    %c0_208 = arith.constant 0 : index
    %262 = vector.load %arg5[%c48_207, %c0_208] : memref<72x8xbf16, #tpu.memory_space<vmem>>, vector<8x8xbf16>
    %cst_209 = arith.constant dense<0.000000e+00> : vector<256x8xf32>
    %263 = tpu.matmul %261, %262, %cst_209 {dimension_numbers = #tpu.dot_dimension_numbers<[1], [0], [0], [1], [0, 0, 1, 1], [], []>} : vector<256x8xbf16>, vector<8x8xbf16>, vector<256x8xf32> -> vector<256x8xf32>
    %264 = arith.addf %258, %263 : vector<256x8xf32>
    %c2_210 = arith.constant 2 : index
    %c1_211 = arith.constant 1 : index
    %c0_212 = arith.constant 0 : index
    %265 = vector.load %arg8[%c2_210, %c1_211, %c0_212] : memref<18x18x8xf32, #tpu.memory_space<vmem>>, vector<16x16x8xf32>
    %266 = vector.shape_cast %265 : vector<16x16x8xf32> to vector<256x8xf32>
    %267 = arith.truncf %266 : vector<256x8xf32> to vector<256x8xbf16>
    %c56_213 = arith.constant 56 : index
    %c0_214 = arith.constant 0 : index
    %268 = vector.load %arg5[%c56_213, %c0_214] : memref<72x8xbf16, #tpu.memory_space<vmem>>, vector<8x8xbf16>
    %cst_215 = arith.constant dense<0.000000e+00> : vector<256x8xf32>
    %269 = tpu.matmul %267, %268, %cst_215 {dimension_numbers = #tpu.dot_dimension_numbers<[1], [0], [0], [1], [0, 0, 1, 1], [], []>} : vector<256x8xbf16>, vector<8x8xbf16>, vector<256x8xf32> -> vector<256x8xf32>
    %270 = arith.addf %264, %269 : vector<256x8xf32>
    %c2_216 = arith.constant 2 : index
    %c2_217 = arith.constant 2 : index
    %c0_218 = arith.constant 0 : index
    %271 = vector.load %arg8[%c2_216, %c2_217, %c0_218] : memref<18x18x8xf32, #tpu.memory_space<vmem>>, vector<16x16x8xf32>
    %272 = vector.shape_cast %271 : vector<16x16x8xf32> to vector<256x8xf32>
    %273 = arith.truncf %272 : vector<256x8xf32> to vector<256x8xbf16>
    %c64_219 = arith.constant 64 : index
    %c0_220 = arith.constant 0 : index
    %274 = vector.load %arg5[%c64_219, %c0_220] : memref<72x8xbf16, #tpu.memory_space<vmem>>, vector<8x8xbf16>
    %cst_221 = arith.constant dense<0.000000e+00> : vector<256x8xf32>
    %275 = tpu.matmul %273, %274, %cst_221 {dimension_numbers = #tpu.dot_dimension_numbers<[1], [0], [0], [1], [0, 0, 1, 1], [], []>} : vector<256x8xbf16>, vector<8x8xbf16>, vector<256x8xf32> -> vector<256x8xf32>
    %276 = arith.addf %270, %275 : vector<256x8xf32>
    %c0_222 = arith.constant 0 : index
    %c0_223 = arith.constant 0 : index
    %277 = vector.load %arg6[%c0_222, %c0_223] : memref<1x8xf32, #tpu.memory_space<vmem>>, vector<1x8xf32>
    %278 = vector.broadcast %277 : vector<1x8xf32> to vector<256x8xf32>
    %279 = arith.addf %276, %278 : vector<256x8xf32>
    %cst_224 = arith.constant 0.000000e+00 : f32
    %280 = vector.broadcast %cst_224 : f32 to vector<256x8xf32>
    %281 = arith.maximumf %279, %280 : vector<256x8xf32>
    %282 = arith.subf %141, %281 : vector<256x8xf32>
    %283 = arith.mulf %282, %282 : vector<256x8xf32>
    %cst_225 = arith.constant dense<0.000000e+00> : vector<8xf32>
    %284 = vector.multi_reduction <add>, %283, %cst_225 [0] : vector<256x8xf32> to vector<8xf32>
    %285 = vector.shape_cast %284 : vector<8xf32> to vector<1x8xf32>
    %c0_226 = arith.constant 0 : index
    %c0_227 = arith.constant 0 : index
    %c0_228 = arith.constant 0 : index
    %286 = vector.load %arg7[%c0_226, %c0_227, %c0_228] : memref<1x1x8xf32, #tpu.memory_space<vmem>>, vector<1x1x8xf32>
    %287 = vector.shape_cast %286 : vector<1x1x8xf32> to vector<1x8xf32>
    %288 = vector.shape_cast %285 : vector<1x8xf32> to vector<1x1x8xf32>
    tpu.vector_store %arg7[%c0_226, %c0_227, %c0_228], %288 {strides = array<i32>} : memref<1x1x8xf32, #tpu.memory_space<vmem>>, vector<1x1x8xf32>,
    return
  }
  func.func @transform_0(%arg0: i32) -> (i32, i32, i32, i32) {
    %c0_i32 = arith.constant 0 : i32
    %c0_i32_0 = arith.constant 0 : i32
    %c0_i32_1 = arith.constant 0 : i32
    %c0_i32_2 = arith.constant 0 : i32
    return %arg0, %c0_i32, %c0_i32_0, %c0_i32_1 : i32, i32, i32, i32
  }
  func.func @transform_1(%arg0: i32) -> (i32, i32, i32, i32) {
    %c0_i32 = arith.constant 0 : i32
    %c0_i32_0 = arith.constant 0 : i32
    %c0_i32_1 = arith.constant 0 : i32
    %c0_i32_2 = arith.constant 0 : i32
    return %arg0, %c0_i32, %c0_i32_0, %c0_i32_1 : i32, i32, i32, i32
  }
  func.func @transform_2(%arg0: i32) -> (i32, i32) {
    %c0_i32 = arith.constant 0 : i32
    %c0_i32_0 = arith.constant 0 : i32
    %c0_i32_1 = arith.constant 0 : i32
    return %c0_i32, %c0_i32_0 : i32, i32
  }
  func.func @transform_3(%arg0: i32) -> (i32, i32) {
    %c0_i32 = arith.constant 0 : i32
    %c0_i32_0 = arith.constant 0 : i32
    %c0_i32_1 = arith.constant 0 : i32
    return %c0_i32, %c0_i32_0 : i32, i32
  }
  func.func @transform_4(%arg0: i32) -> (i32, i32) {
    %c0_i32 = arith.constant 0 : i32
    %c0_i32_0 = arith.constant 0 : i32
    %c0_i32_1 = arith.constant 0 : i32
    return %c0_i32, %c0_i32_0 : i32, i32
  }
  func.func @transform_5(%arg0: i32) -> (i32, i32) {
    %c0_i32 = arith.constant 0 : i32
    %c0_i32_0 = arith.constant 0 : i32
    %c0_i32_1 = arith.constant 0 : i32
    return %c0_i32, %c0_i32_0 : i32, i32
  }
  func.func @transform_6(%arg0: i32) -> (i32, i32, i32) {
    %c0_i32 = arith.constant 0 : i32
    %c0_i32_0 = arith.constant 0 : i32
    %c0_i32_1 = arith.constant 0 : i32
    return %arg0, %c0_i32, %c0_i32_0 : i32, i32, i32
  }
}

</mosaic_0001>

<bundles_post_ra>
// kernel: _lambda_.1
= control target key start
LH: loop header
LB: loop body
LE: loop exit
PB: predicated region body
PF: predicated region fallthrough
CT: control target
= control target key end

     0   :  { %s12947_s21 = smov 0   ;;  %s17963_s0 = inlined_call_operand.vmem [shape: f32[2,18,18,1], index: 0, kind: input, shape index: {}]   ;;  %s17964_s1 = inlined_call_operand.vmem [shape: f32[2,18,18,1], index: 1, kind: input, shape index: {}]   ;;  %s17965_s2 = inlined_call_operand.vmem [shape: f32[9,8], index: 2, kind: input, shape index: {}]   ;;  %s17966_s3 = inlined_call_operand.vmem [shape: f32[1,8], index: 3, kind: input, shape index: {}]   ;;  %s17967_s4 = inlined_call_operand.vmem [shape: bf16[72,8], index: 4, kind: input, shape index: {}]   ;;  %s17968_s5 = inlined_call_operand.vmem [shape: f32[1,8], index: 5, kind: input, shape index: {}]   ;;  %s17969_s6 = inlined_call_operand.vmem [shape: f32[2,1,8], index: 6, kind: output, shape index: {}]  }
   0x1 LB: > { %s10718_s22 = sadd.s32 4294967295, %s12908_s21   ;;  %p10722_p0 = scmp.ge.s32.totalorder %s12908_s21, 1  ;;  %s12908_s21 = sphi %s12947_s21, %s16_s21  }
   0x2   : > { %p222_p1 = scmp.lt.s32.totalorder %s12908_s21, 3 }
   0x4   : > { %p223_p2 = pnand %p10722_p0, %p222_p1 }
   0x6   : > { %226 = sbr.rel (%p223_p2) target bundleno = 2050 (0x802), region = 44 }
   0xd   : > { %p255_p3 = scmp.lt.s32.totalorder %s10718_s22, 1  ;;  %v12910_v0 = vmov 0   ;;  %vm269_vm0 = vcmask 64512   ;;  %vm272_vm1 = vcmask 58368   ;;  %vm2926_vm2 = vcmask 1043456  }
   0xe   : > { %12881 = vset.pattern.permute.xlu1 %v12910_v0  ;;  %12880 = vset.pattern.permute.xlu0 %v12910_v0  ;;  %vm10657_vm3 = vcmask 57344  }
   0xf   : > { %s18740_s22 = smov (!%p255_p3, %s10718_s22), 1 }
  0x10   : > { %s12869_s23 = smul.u32 432, %s18740_s22 }
  0x12   : > { %s12963_s26 = scalar_lea.vmem %s17963_s0, %s12869_s23  ;;  %s14348_s13 = scalar_lea.vmem %s17964_s1, %s12869_s23 }
  0x13   : > { %v12966_v1 = vld [vmem:[%s12963_s26 + $0x18] sm:$0xff]  ;;  %v325_v2 = vld [vmem:[%s12963_s26] sm:$0xff]  ;;  %v326_v4 = vld [vmem:[%s12963_s26 + $0x8] sm:$0xff]  ;;  %s267_s23 = scalar_lea.vmem %s17969_s6, %s18740_s22 }
  0x14   : > { %370 = vperm.xlu1 %12881, %v12966_v1   ;;  %360 = vperm.xlu0 %12880, %v325_v2   ;;  %v12971_v3 = vld [vmem:[%s12963_s26 + $0x20] sm:$0xff]  ;;  %v12976_v5 = vld [vmem:[%s12963_s26 + $0x38] sm:$0xff]  ;;  %v12979_v6 = vld [vmem:[%s12963_s26 + $0x30] sm:$0xff] }
  0x15   : > { %v12984_v7 = vld [vmem:[%s12963_s26 + $0x50] sm:$0xff]  ;;  %v12987_v8 = vld [vmem:[%s12963_s26 + $0x48] sm:$0xff]  ;;  %v12995_v10 = vld [vmem:[%s12963_s26 + $0x60] sm:$0xff] }
  0x16   : > { %v12992_v9 = vld [vmem:[%s12963_s26 + $0x68] sm:$0xff]  ;;  %v13000_v11 = vld [vmem:[%s12963_s26 + $0x80] sm:$0xff]  ;;  %v13003_v12 = vld [vmem:[%s12963_s26 + $0x78] sm:$0xff] }
  0x17   : > { %v13008_v13 = vld [vmem:[%s12963_s26 + $0x98] sm:$0xff]  ;;  %v13011_v14 = vld [vmem:[%s12963_s26 + $0x90] sm:$0xff]  ;;  %v13019_v16 = vld [vmem:[%s12963_s26 + $0xa8] sm:$0xff] }
  0x18   : > { %375 = vperm.xlu1 %12881, %v12971_v3   ;;  %365 = vperm.xlu0 %12880, %v326_v4   ;;  %v13016_v15 = vld [vmem:[%s12963_s26 + $0xb0] sm:$0xff]  ;;  %v13024_v17 = vld [vmem:[%s12963_s26 + $0xc8] sm:$0xff]  ;;  %v13027_v18 = vld [vmem:[%s12963_s26 + $0xc0] sm:$0xff] }
  0x19   : > { %v13032_v19 = vld [vmem:[%s12963_s26 + $0xe0] sm:$0xff]  ;;  %v13035_v20 = vld [vmem:[%s12963_s26 + $0xd8] sm:$0xff]  ;;  %v13043_v22 = vld [vmem:[%s12963_s26 + $0xf0] sm:$0xff] }
  0x1a   : > { %v13040_v21 = vld [vmem:[%s12963_s26 + $0xf8] sm:$0xff]  ;;  %v13048_v23 = vld [vmem:[%s12963_s26 + $0x110] sm:$0xff]  ;;  %v13051_v24 = vld [vmem:[%s12963_s26 + $0x108] sm:$0xff] }
  0x1b   : > { %v13056_v25 = vld [vmem:[%s12963_s26 + $0x128] sm:$0xff]  ;;  %v13059_v26 = vld [vmem:[%s12963_s26 + $0x120] sm:$0xff]  ;;  %v13067_v28 = vld [vmem:[%s12963_s26 + $0x138] sm:$0xff] }
  0x1c   : > { %385 = vperm.xlu1 %12881, %v12976_v5   ;;  %380 = vperm.xlu0 %12880, %v12979_v6   ;;  %v13064_v27 = vld [vmem:[%s12963_s26 + $0x140] sm:$0xff]  ;;  %v13072_v29 = vld [vmem:[%s12963_s26 + $0x158] sm:$0xff]  ;;  %v13075_v30 = vld [vmem:[%s12963_s26 + $0x150] sm:$0xff] }
  0x1d   : > { %v13080_v31 = vld [vmem:[%s12963_s26 + $0x170] sm:$0xff]  ;;  %v13083_v32 = vld [vmem:[%s12963_s26 + $0x168] sm:$0xff]  ;;  %v13093_v36 = vld [vmem:[%s12963_s26 + $0x19] sm:$0xff] }
  0x1e   : > { %v587_v33 = vld [vmem:[%s12963_s26 + $0x9] sm:$0xff]  ;;  %v586_v34 = vld [vmem:[%s12963_s26 + $0x1] sm:$0xff]  ;;  %v13098_v37 = vld [vmem:[%s12963_s26 + $0x39] sm:$0xff] }
  0x1f   : > { %v13090_v35 = vld [vmem:[%s12963_s26 + $0x21] sm:$0xff]  ;;  %v13101_v38 = vld [vmem:[%s12963_s26 + $0x31] sm:$0xff]  ;;  %v13109_v40 = vld [vmem:[%s12963_s26 + $0x49] sm:$0xff] }
  0x20   : > { %395 = vperm.xlu1 %12881, %v12984_v7   ;;  %390 = vperm.xlu0 %12880, %v12987_v8   ;;  %v13106_v39 = vld [vmem:[%s12963_s26 + $0x51] sm:$0xff]  ;;  %v13114_v41 = vld [vmem:[%s12963_s26 + $0x69] sm:$0xff]  ;;  %v13117_v42 = vld [vmem:[%s12963_s26 + $0x61] sm:$0xff] }
  0x21   : > { %v13122_v43 = vld [vmem:[%s12963_s26 + $0x81] sm:$0xff]  ;;  %v13125_v44 = vld [vmem:[%s12963_s26 + $0x79] sm:$0xff]  ;;  %v13133_v46 = vld [vmem:[%s12963_s26 + $0x91] sm:$0xff] }
  0x22   : > { %v13130_v45 = vld [vmem:[%s12963_s26 + $0x99] sm:$0xff]  ;;  %v13138_v47 = vld [vmem:[%s12963_s26 + $0xb1] sm:$0xff]  ;;  %v13141_v48 = vld [vmem:[%s12963_s26 + $0xa9] sm:$0xff] }
  0x23   : > { %v13146_v49 = vld [vmem:[%s12963_s26 + $0xc9] sm:$0xff]  ;;  %v13149_v50 = vld [vmem:[%s12963_s26 + $0xc1] sm:$0xff]  ;;  %v13157_v52 = vld [vmem:[%s12963_s26 + $0xd9] sm:$0xff] }
  0x24   : > { %405 = vperm.xlu1 %12881, %v12992_v9   ;;  %400 = vperm.xlu0 %12880, %v12995_v10   ;;  %v13154_v51 = vld [vmem:[%s12963_s26 + $0xe1] sm:$0xff]  ;;  %v13162_v53 = vld [vmem:[%s12963_s26 + $0xf9] sm:$0xff]  ;;  %v13165_v54 = vld [vmem:[%s12963_s26 + $0xf1] sm:$0xff] }
  0x25   : > { %v13170_v55 = vld [vmem:[%s12963_s26 + $0x111] sm:$0xff]  ;;  %v13173_v56 = vld [vmem:[%s12963_s26 + $0x109] sm:$0xff]  ;;  %v13181_v58 = vld [vmem:[%s12963_s26 + $0x121] sm:$0xff] }
  0x26   : > { %v13178_v57 = vld [vmem:[%s12963_s26 + $0x129] sm:$0xff]  ;;  %v13186_v59 = vld [vmem:[%s12963_s26 + $0x141] sm:$0xff]  ;;  %v13189_v60 = vld [vmem:[%s12963_s26 + $0x139] sm:$0xff] }
  0x27   : > { %18019 = vst [vmem:[#allocation3_spill] sm:$0xff] %v13189_v60  ;;  %v13194_v61 = vld [vmem:[%s12963_s26 + $0x159] sm:$0xff]  ;;  %v13197_v62 = vld [vmem:[%s12963_s26 + $0x151] sm:$0xff]  ;;  %v13205_v0 = vld [vmem:[%s12963_s26 + $0x169] sm:$0xff] }
  0x28   : > { %415 = vperm.xlu1 %12881, %v13000_v11   ;;  %410 = vperm.xlu0 %12880, %v13003_v12   ;;  %18020 = vst [vmem:[#allocation4_spill] sm:$0xff] %v13194_v61  ;;  %18021 = vst [vmem:[#allocation5_spill] sm:$0xff] %v13197_v62  ;;  %v13202_v63 = vld [vmem:[%s12963_s26 + $0x171] sm:$0xff]  ;;  %v847_v4 = vld [vmem:[%s12963_s26 + $0x2] sm:$0xff] }
  0x29   : > { %18022 = vst [vmem:[#allocation6_spill] sm:$0xff] %v13202_v63  ;;  %18023 = vst [vmem:[#allocation7_spill] sm:$0xff] %v13205_v0  ;;  %v848_v2 = vld [vmem:[%s12963_s26 + $0xa] sm:$0xff] }
  0x2c   : > { %425 = vperm.xlu1 %12881, %v13008_v13   ;;  %420 = vperm.xlu0 %12880, %v13011_v14  }
  0x30   : > { %435 = vperm.xlu1 %12881, %v13016_v15   ;;  %430 = vperm.xlu0 %12880, %v13019_v16  }
  0x34   : > { %445 = vperm.xlu1 %12881, %v13024_v17   ;;  %440 = vperm.xlu0 %12880, %v13027_v18  }
  0x38   : > { %455 = vperm.xlu1 %12881, %v13032_v19   ;;  %450 = vperm.xlu0 %12880, %v13035_v20  }
  0x3c   : > { %465 = vperm.xlu1 %12881, %v13040_v21   ;;  %460 = vperm.xlu0 %12880, %v13043_v22  }
  0x40   : > { %475 = vperm.xlu1 %12881, %v13048_v23   ;;  %470 = vperm.xlu0 %12880, %v13051_v24  }
  0x44   : > { %485 = vperm.xlu1 %12881, %v13056_v25   ;;  %480 = vperm.xlu0 %12880, %v13059_v26  }
  0x48   : > { %495 = vperm.xlu1 %12881, %v13064_v27   ;;  %490 = vperm.xlu0 %12880, %v13067_v28  }
  0x4c   : > { %505 = vperm.xlu1 %12881, %v13072_v29   ;;  %500 = vperm.xlu0 %12880, %v13075_v30  }
  0x50   : > { %515 = vperm.xlu1 %12881, %v13080_v31   ;;  %510 = vperm.xlu0 %12880, %v13083_v32  }
  0x54   : > { %626 = vperm.xlu1 %12881, %v587_v33   ;;  %621 = vperm.xlu0 %12880, %v586_v34  }
  0x58   : > { %636 = vperm.xlu1 %12881, %v13090_v35   ;;  %631 = vperm.xlu0 %12880, %v13093_v36  }
  0x5c   : > { %646 = vperm.xlu1 %12881, %v13098_v37   ;;  %641 = vperm.xlu0 %12880, %v13101_v38  }
  0x60   : > { %656 = vperm.xlu1 %12881, %v13106_v39   ;;  %651 = vperm.xlu0 %12880, %v13109_v40  }
  0x64   : > { %666 = vperm.xlu1 %12881, %v13114_v41   ;;  %661 = vperm.xlu0 %12880, %v13117_v42  }
  0x68   : > { %676 = vperm.xlu1 %12881, %v13122_v43   ;;  %671 = vperm.xlu0 %12880, %v13125_v44  }
  0x6c   : > { %686 = vperm.xlu1 %12881, %v13130_v45   ;;  %681 = vperm.xlu0 %12880, %v13133_v46  }
  0x70   : > { %696 = vperm.xlu1 %12881, %v13138_v47   ;;  %691 = vperm.xlu0 %12880, %v13141_v48  }
  0x74   : > { %706 = vperm.xlu1 %12881, %v13146_v49   ;;  %701 = vperm.xlu0 %12880, %v13149_v50  }
  0x78   : > { %716 = vperm.xlu1 %12881, %v13154_v51   ;;  %711 = vperm.xlu0 %12880, %v13157_v52  }
  0x7c   : > { %726 = vperm.xlu1 %12881, %v13162_v53   ;;  %721 = vperm.xlu0 %12880, %v13165_v54  }
  0x80   : > { %736 = vperm.xlu1 %12881, %v13170_v55   ;;  %731 = vperm.xlu0 %12880, %v13173_v56  }
  0x84   : > { %746 = vperm.xlu1 %12881, %v13178_v57   ;;  %741 = vperm.xlu0 %12880, %v13181_v58  }
  0x88   : > { %756 = vperm.xlu1 %12881, %v13186_v59   ;;  %751 = vperm.xlu0 %12880, %v13189_v60  }
  0x8c   : > { %766 = vperm.xlu1 %12881, %v13194_v61   ;;  %761 = vperm.xlu0 %12880, %v13197_v62   ;;  %v13216_v62 = vld [vmem:[%s12963_s26 + $0x22] sm:$0xff]  ;;  %v13219_v61 = vld [vmem:[%s12963_s26 + $0x1a] sm:$0xff] }
  0x8d   : > { %18026 = vst [vmem:[#allocation10_spill] sm:$0xff] %v13216_v62  ;;  %18027 = vst [vmem:[#allocation11_spill] sm:$0xff] %v13219_v61 }
  0x90   : > { %776 = vperm.xlu1 %12881, %v13202_v63   ;;  %771 = vperm.xlu0 %12880, %v13205_v0  }
  0x93   : > { %v13211_v33 = vpop.permute.xlu1 %370  ;;  %v13213_v34 = vpop.permute.xlu0 %360 }
  0x94   : > { %18024 = vst [vmem:[#allocation8_spill] sm:$0xff] %v13211_v33  ;;  %18025 = vst [vmem:[#allocation9_spill] sm:$0xff] %v13213_v34  ;;  %887 = vperm.xlu1 %12881, %v848_v2   ;;  %882 = vperm.xlu0 %12880, %v847_v4   ;;  %v13228_v33 = vld [vmem:[%s12963_s26 + $0x3a] sm:$0xff]  ;;  %v13231_v34 = vld [vmem:[%s12963_s26 + $0x32] sm:$0xff] }
  0x95   : > { %18030 = vst [vmem:[#allocation14_spill] sm:$0xff] %v13228_v33  ;;  %18031 = vst [vmem:[#allocation15_spill] sm:$0xff] %v13231_v34 }
  0x97   : > { %v13221_v60 = vpop.permute.xlu1 %375  ;;  %v13223_v63 = vpop.permute.xlu0 %365 }
  0x98   : > { %18028 = vst [vmem:[#allocation12_spill] sm:$0xff] %v13221_v60  ;;  %18029 = vst [vmem:[#allocation13_spill] sm:$0xff] %v13223_v63  ;;  %897 = vperm.xlu1 %12881, %v13216_v62   ;;  %892 = vperm.xlu0 %12880, %v13219_v61   ;;  %v13240_v63 = vld [vmem:[%s12963_s26 + $0x52] sm:$0xff]  ;;  %v13243_v60 = vld [vmem:[%s12963_s26 + $0x4a] sm:$0xff] }
  0x99   : > { %18034 = vst [vmem:[#allocation18_spill] sm:$0xff] %v13240_v63  ;;  %18035 = vst [vmem:[#allocation19_spill] sm:$0xff] %v13243_v60 }
  0x9b   : > { %v13233_v2 = vpop.permute.xlu1 %385  ;;  %v13235_v4 = vpop.permute.xlu0 %380 }
  0x9c   : > { %18032 = vst [vmem:[#allocation16_spill] sm:$0xff] %v13233_v2  ;;  %18033 = vst [vmem:[#allocation17_spill] sm:$0xff] %v13235_v4  ;;  %907 = vperm.xlu1 %12881, %v13228_v33   ;;  %902 = vperm.xlu0 %12880, %v13231_v34   ;;  %v13252_v4 = vld [vmem:[%s12963_s26 + $0x6a] sm:$0xff]  ;;  %v13255_v2 = vld [vmem:[%s12963_s26 + $0x62] sm:$0xff] }
  0x9d   : > { %18038 = vst [vmem:[#allocation22_spill] sm:$0xff] %v13252_v4  ;;  %18039 = vst [vmem:[#allocation23_spill] sm:$0xff] %v13255_v2 }
  0x9f   : > { %v13245_v62 = vpop.permute.xlu1 %395  ;;  %v13247_v61 = vpop.permute.xlu0 %390 }
  0xa0   : > { %18036 = vst [vmem:[#allocation20_spill] sm:$0xff] %v13245_v62  ;;  %18037 = vst [vmem:[#allocation21_spill] sm:$0xff] %v13247_v61  ;;  %917 = vperm.xlu1 %12881, %v13240_v63   ;;  %912 = vperm.xlu0 %12880, %v13243_v60   ;;  %v13264_v61 = vld [vmem:[%s12963_s26 + $0x82] sm:$0xff]  ;;  %v13267_v62 = vld [vmem:[%s12963_s26 + $0x7a] sm:$0xff] }
  0xa1   : > { %18042 = vst [vmem:[#allocation26_spill] sm:$0xff] %v13264_v61  ;;  %18043 = vst [vmem:[#allocation27_spill] sm:$0xff] %v13267_v62 }
  0xa3   : > { %v13257_v33 = vpop.permute.xlu1 %405  ;;  %v13259_v34 = vpop.permute.xlu0 %400 }
  0xa4   : > { %18040 = vst [vmem:[#allocation24_spill] sm:$0xff] %v13257_v33  ;;  %18041 = vst [vmem:[#allocation25_spill] sm:$0xff] %v13259_v34  ;;  %927 = vperm.xlu1 %12881, %v13252_v4   ;;  %922 = vperm.xlu0 %12880, %v13255_v2   ;;  %v13276_v34 = vld [vmem:[%s12963_s26 + $0x9a] sm:$0xff]  ;;  %v13279_v33 = vld [vmem:[%s12963_s26 + $0x92] sm:$0xff] }
  0xa5   : > { %18046 = vst [vmem:[#allocation30_spill] sm:$0xff] %v13276_v34  ;;  %18047 = vst [vmem:[#allocation31_spill] sm:$0xff] %v13279_v33 }
  0xa7   : > { %v13269_v63 = vpop.permute.xlu1 %415  ;;  %v13271_v60 = vpop.permute.xlu0 %410 }
  0xa8   : > { %18044 = vst [vmem:[#allocation28_spill] sm:$0xff] %v13269_v63  ;;  %18045 = vst [vmem:[#allocation29_spill] sm:$0xff] %v13271_v60  ;;  %937 = vperm.xlu1 %12881, %v13264_v61   ;;  %932 = vperm.xlu0 %12880, %v13267_v62   ;;  %v13288_v60 = vld [vmem:[%s12963_s26 + $0xb2] sm:$0xff]  ;;  %v13291_v63 = vld [vmem:[%s12963_s26 + $0xaa] sm:$0xff] }
  0xa9   : > { %18050 = vst [vmem:[#allocation34_spill] sm:$0xff] %v13288_v60  ;;  %18051 = vst [vmem:[#allocation35_spill] sm:$0xff] %v13291_v63 }
  0xab   : > { %v13281_v4 = vpop.permute.xlu1 %425  ;;  %v13283_v2 = vpop.permute.xlu0 %420 }
  0xac   : > { %18048 = vst [vmem:[#allocation32_spill] sm:$0xff] %v13281_v4  ;;  %18049 = vst [vmem:[#allocation33_spill] sm:$0xff] %v13283_v2  ;;  %947 = vperm.xlu1 %12881, %v13276_v34   ;;  %942 = vperm.xlu0 %12880, %v13279_v33   ;;  %v13300_v2 = vld [vmem:[%s12963_s26 + $0xca] sm:$0xff]  ;;  %v13303_v4 = vld [vmem:[%s12963_s26 + $0xc2] sm:$0xff] }
  0xad   : > { %18054 = vst [vmem:[#allocation38_spill] sm:$0xff] %v13300_v2  ;;  %18055 = vst [vmem:[#allocation39_spill] sm:$0xff] %v13303_v4 }
  0xaf   : > { %v13293_v61 = vpop.permute.xlu1 %435  ;;  %v13295_v62 = vpop.permute.xlu0 %430 }
  0xb0   : > { %18052 = vst [vmem:[#allocation36_spill] sm:$0xff] %v13293_v61  ;;  %18053 = vst [vmem:[#allocation37_spill] sm:$0xff] %v13295_v62  ;;  %957 = vperm.xlu1 %12881, %v13288_v60   ;;  %952 = vperm.xlu0 %12880, %v13291_v63   ;;  %v13312_v62 = vld [vmem:[%s12963_s26 + $0xe2] sm:$0xff]  ;;  %v13315_v61 = vld [vmem:[%s12963_s26 + $0xda] sm:$0xff] }
  0xb1   : > { %18058 = vst [vmem:[#allocation42_spill] sm:$0xff] %v13312_v62  ;;  %18059 = vst [vmem:[#allocation43_spill] sm:$0xff] %v13315_v61 }
  0xb3   : > { %v13305_v34 = vpop.permute.xlu1 %445  ;;  %v13307_v33 = vpop.permute.xlu0 %440 }
  0xb4   : > { %18056 = vst [vmem:[#allocation40_spill] sm:$0xff] %v13305_v34  ;;  %18057 = vst [vmem:[#allocation41_spill] sm:$0xff] %v13307_v33  ;;  %967 = vperm.xlu1 %12881, %v13300_v2   ;;  %962 = vperm.xlu0 %12880, %v13303_v4   ;;  %v13324_v33 = vld [vmem:[%s12963_s26 + $0xfa] sm:$0xff]  ;;  %v13327_v34 = vld [vmem:[%s12963_s26 + $0xf2] sm:$0xff] }
  0xb5   : > { %18062 = vst [vmem:[#allocation46_spill] sm:$0xff] %v13324_v33  ;;  %18063 = vst [vmem:[#allocation47_spill] sm:$0xff] %v13327_v34 }
  0xb7   : > { %v13317_v60 = vpop.permute.xlu1 %455  ;;  %v13319_v63 = vpop.permute.xlu0 %450 }
  0xb8   : > { %18060 = vst [vmem:[#allocation44_spill] sm:$0xff] %v13317_v60  ;;  %18061 = vst [vmem:[#allocation45_spill] sm:$0xff] %v13319_v63  ;;  %977 = vperm.xlu1 %12881, %v13312_v62   ;;  %972 = vperm.xlu0 %12880, %v13315_v61   ;;  %v13336_v63 = vld [vmem:[%s12963_s26 + $0x112] sm:$0xff]  ;;  %v13339_v60 = vld [vmem:[%s12963_s26 + $0x10a] sm:$0xff] }
  0xb9   : > { %18066 = vst [vmem:[#allocation50_spill] sm:$0xff] %v13336_v63  ;;  %18067 = vst [vmem:[#allocation51_spill] sm:$0xff] %v13339_v60 }
  0xbb   : > { %v13329_v2 = vpop.permute.xlu1 %465  ;;  %v13331_v4 = vpop.permute.xlu0 %460 }
  0xbc   : > { %18064 = vst [vmem:[#allocation48_spill] sm:$0xff] %v13329_v2  ;;  %18065 = vst [vmem:[#allocation49_spill] sm:$0xff] %v13331_v4  ;;  %987 = vperm.xlu1 %12881, %v13324_v33   ;;  %982 = vperm.xlu0 %12880, %v13327_v34   ;;  %v13348_v4 = vld [vmem:[%s12963_s26 + $0x12a] sm:$0xff]  ;;  %v13351_v2 = vld [vmem:[%s12963_s26 + $0x122] sm:$0xff] }
  0xbd   : > { %18070 = vst [vmem:[#allocation54_spill] sm:$0xff] %v13348_v4  ;;  %18071 = vst [vmem:[#allocation55_spill] sm:$0xff] %v13351_v2 }
  0xbf   : > { %v13341_v62 = vpop.permute.xlu1 %475  ;;  %v13343_v61 = vpop.permute.xlu0 %470 }
  0xc0   : > { %18068 = vst [vmem:[#allocation52_spill] sm:$0xff] %v13341_v62  ;;  %18069 = vst [vmem:[#allocation53_spill] sm:$0xff] %v13343_v61  ;;  %997 = vperm.xlu1 %12881, %v13336_v63   ;;  %992 = vperm.xlu0 %12880, %v13339_v60   ;;  %v13360_v61 = vld [vmem:[%s12963_s26 + $0x142] sm:$0xff]  ;;  %v13363_v62 = vld [vmem:[%s12963_s26 + $0x13a] sm:$0xff] }
  0xc1   : > { %18074 = vst [vmem:[#allocation58_spill] sm:$0xff] %v13360_v61  ;;  %18075 = vst [vmem:[#allocation59_spill] sm:$0xff] %v13363_v62 }
  0xc3   : > { %v13353_v33 = vpop.permute.xlu1 %485  ;;  %v13355_v34 = vpop.permute.xlu0 %480 }
  0xc4   : > { %18072 = vst [vmem:[#allocation56_spill] sm:$0xff] %v13353_v33  ;;  %18073 = vst [vmem:[#allocation57_spill] sm:$0xff] %v13355_v34  ;;  %1007 = vperm.xlu1 %12881, %v13348_v4   ;;  %1002 = vperm.xlu0 %12880, %v13351_v2   ;;  %v13372_v33 = vld [vmem:[%s12963_s26 + $0x15a] sm:$0xff]  ;;  %v13375_v34 = vld [vmem:[%s12963_s26 + $0x152] sm:$0xff] }
  0xc5   : > { %18078 = vst [vmem:[#allocation62_spill] sm:$0xff] %v13375_v34  ;;  %v13384_v2 = vld [vmem:[%s12963_s26 + $0x172] sm:$0xff] }
  0xc7   : > { %v13365_v63 = vpop.permute.xlu1 %495  ;;  %v13367_v60 = vpop.permute.xlu0 %490 }
  0xc8   : > { %18076 = vst [vmem:[#allocation60_spill] sm:$0xff] %v13365_v63  ;;  %18077 = vst [vmem:[#allocation61_spill] sm:$0xff] %v13367_v60  ;;  %1017 = vperm.xlu1 %12881, %v13360_v61   ;;  %1012 = vperm.xlu0 %12880, %v13363_v62   ;;  %v13387_v63 = vld [vmem:[%s12963_s26 + $0x16a] sm:$0xff] }
  0xcb   : > { %v13377_v0 = vpop.permute.xlu1 %505  ;;  %v13379_v4 = vpop.permute.xlu0 %500 }
  0xcc   : > { %18079 = vst [vmem:[#allocation63_spill] sm:$0xff] %v13377_v0  ;;  %18080 = vst [vmem:[#allocation64_spill] sm:$0xff] %v13379_v4  ;;  %1027 = vperm.xlu1 %12881, %v13372_v33   ;;  %1022 = vperm.xlu0 %12880, %v13375_v34  }
  0xcf   : > { %v13389_v60 = vpop.permute.xlu1 %515  ;;  %v13391_v61 = vpop.permute.xlu0 %510 }
  0xd0   : > { %18081 = vst [vmem:[#allocation65_spill] sm:$0xff] %v13389_v60  ;;  %18082 = vst [vmem:[#allocation66_spill] sm:$0xff] %v13391_v61  ;;  %1037 = vperm.xlu1 %12881, %v13384_v2   ;;  %1032 = vperm.xlu0 %12880, %v13387_v63  }
  0xd3   : > { %v13395_v62 = vpop.permute.xlu1 %626  ;;  %v13397_v0 = vpop.permute.xlu0 %621 }
  0xd4   : > { %18083 = vst [vmem:[#allocation67_spill] sm:$0xff] %v13397_v0  ;;  %1149 = vperm.xlu1 %12881, %v12971_v3   ;;  %1144 = vperm.xlu0 %12880, %v12966_v1  }
  0xd7   : > { %v13401_v4 = vpop.permute.xlu1 %636  ;;  %v13403_v34 = vpop.permute.xlu0 %631 }
  0xd8   : > { %1159 = vperm.xlu1 %12881, %v12976_v5   ;;  %1154 = vperm.xlu0 %12880, %v12979_v6  }
  0xdb   : > { %v13407_v61 = vpop.permute.xlu1 %646  ;;  %v13409_v60 = vpop.permute.xlu0 %641 }
  0xdc   : > { %1169 = vperm.xlu1 %12881, %v12984_v7   ;;  %1164 = vperm.xlu0 %12880, %v12987_v8  }
  0xdf   : > { %v13413_v0 = vpop.permute.xlu1 %656  ;;  %v13415_v3 = vpop.permute.xlu0 %651 }
  0xe0   : > { %1179 = vperm.xlu1 %12881, %v12992_v9   ;;  %1174 = vperm.xlu0 %12880, %v12995_v10  }
  0xe3   : > { %v13419_v1 = vpop.permute.xlu1 %666  ;;  %v13421_v5 = vpop.permute.xlu0 %661 }
  0xe4   : > { %1189 = vperm.xlu1 %12881, %v13000_v11   ;;  %1184 = vperm.xlu0 %12880, %v13003_v12  }
  0xe7   : > { %v13425_v6 = vpop.permute.xlu1 %676  ;;  %v13427_v7 = vpop.permute.xlu0 %671 }
  0xe8   : > { %1199 = vperm.xlu1 %12881, %v13008_v13   ;;  %1194 = vperm.xlu0 %12880, %v13011_v14  }
  0xeb   : > { %v13431_v8 = vpop.permute.xlu1 %686  ;;  %v13433_v9 = vpop.permute.xlu0 %681 }
  0xec   : > { %1209 = vperm.xlu1 %12881, %v13016_v15   ;;  %1204 = vperm.xlu0 %12880, %v13019_v16  }
  0xef   : > { %v13437_v10 = vpop.permute.xlu1 %696  ;;  %v13439_v11 = vpop.permute.xlu0 %691 }
  0xf0   : > { %1219 = vperm.xlu1 %12881, %v13024_v17   ;;  %1214 = vperm.xlu0 %12880, %v13027_v18  }
  0xf3   : > { %v13443_v12 = vpop.permute.xlu1 %706  ;;  %v13445_v13 = vpop.permute.xlu0 %701 }
  0xf4   : > { %1229 = vperm.xlu1 %12881, %v13032_v19   ;;  %1224 = vperm.xlu0 %12880, %v13035_v20  }
  0xf7   : > { %v13449_v14 = vpop.permute.xlu1 %716  ;;  %v13451_v15 = vpop.permute.xlu0 %711 }
  0xf8   : > { %1239 = vperm.xlu1 %12881, %v13040_v21   ;;  %1234 = vperm.xlu0 %12880, %v13043_v22  }
  0xfb   : > { %v13455_v16 = vpop.permute.xlu1 %726  ;;  %v13457_v17 = vpop.permute.xlu0 %721 }
  0xfc   : > { %1249 = vperm.xlu1 %12881, %v13048_v23   ;;  %1244 = vperm.xlu0 %12880, %v13051_v24  }
  0xff   : > { %v13461_v18 = vpop.permute.xlu1 %736  ;;  %v13463_v19 = vpop.permute.xlu0 %731 }
 0x100   : > { %1259 = vperm.xlu1 %12881, %v13056_v25   ;;  %1254 = vperm.xlu0 %12880, %v13059_v26   ;;  %v13486_v26 = vld [vmem:[%s12963_s26 + $0x188] sm:$0xff] }
 0x103   : > { %v13467_v20 = vpop.permute.xlu1 %746  ;;  %v13469_v21 = vpop.permute.xlu0 %741 }
 0x104   : > { %1269 = vperm.xlu1 %12881, %v13064_v27   ;;  %1264 = vperm.xlu0 %12880, %v13067_v28   ;;  %v13489_v27 = vld [vmem:[%s12963_s26 + $0x180] sm:$0xff] }
 0x107   : > { %v13473_v22 = vpop.permute.xlu1 %756  ;;  %v13475_v23 = vpop.permute.xlu0 %751 }
 0x108   : > { %18084 = vst [vmem:[#allocation68_spill] sm:$0xff] %v13473_v22  ;;  %1279 = vperm.xlu1 %12881, %v13072_v29   ;;  %1274 = vperm.xlu0 %12880, %v13075_v30  }
 0x10b   : > { %v13479_v24 = vpop.permute.xlu1 %766  ;;  %v13481_v25 = vpop.permute.xlu0 %761 }
 0x10c   : > { %18085 = vst [vmem:[#allocation69_spill] sm:$0xff] %v13479_v24  ;;  %18086 = vst [vmem:[#allocation70_spill] sm:$0xff] %v13481_v25  ;;  %1289 = vperm.xlu1 %12881, %v13080_v31   ;;  %1284 = vperm.xlu0 %12880, %v13083_v32   ;;  %v18299_v25 = vld [vmem:[#allocation67_spill] sm:$0xff] }
 0x10f   : > { %v13491_v28 = vpop.permute.xlu1 %776  ;;  %v13493_v22 = vpop.permute.xlu0 %771 }
 0x110   : > { %18087 = vst [vmem:[#allocation71_spill] sm:$0xff] %v13491_v28  ;;  %18088 = vst [vmem:[#allocation72_spill] sm:$0xff] %v13493_v22  ;;  %1299 = vperm.xlu1 %12881, %v13486_v26   ;;  %1294 = vperm.xlu0 %12880, %v13489_v27  }
 0x113   : > { %v13497_v29 = vpop.permute.xlu1 %887  ;;  %v13499_v30 = vpop.permute.xlu0 %882 }
 0x114   : > { %18089 = vst [vmem:[#allocation73_spill] sm:$0xff] %v13497_v29  ;;  %18090 = vst [vmem:[#allocation74_spill] sm:$0xff] %v13499_v30  ;;  %1410 = vperm.xlu1 %12881, %v13090_v35   ;;  %1405 = vperm.xlu0 %12880, %v13093_v36  }
 0x117   : > { %v13503_v31 = vpop.permute.xlu1 %897  ;;  %v13505_v32 = vpop.permute.xlu0 %892 }
 0x118   : > { %18091 = vst [vmem:[#allocation75_spill] sm:$0xff] %v13503_v31  ;;  %18092 = vst [vmem:[#allocation76_spill] sm:$0xff] %v13505_v32  ;;  %1420 = vperm.xlu1 %12881, %v13098_v37   ;;  %1415 = vperm.xlu0 %12880, %v13101_v38   ;;  %v18293_v32 = vld [vmem:[#allocation53_spill] sm:$0xff]  ;;  %v18295_v31 = vld [vmem:[#allocation56_spill] sm:$0xff] }
 0x11b   : > { %v13509_v22 = vpop.permute.xlu1 %907  ;;  %v13511_v28 = vpop.permute.xlu0 %902 }
 0x11c   : > { %18093 = vst [vmem:[#allocation77_spill] sm:$0xff] %v13509_v22  ;;  %18094 = vst [vmem:[#allocation78_spill] sm:$0xff] %v13511_v28  ;;  %1430 = vperm.xlu1 %12881, %v13106_v39   ;;  %1425 = vperm.xlu0 %12880, %v13109_v40   ;;  %v18290_v22 = vld [vmem:[#allocation49_spill] sm:$0xff] }
 0x11f   : > { %v13515_v30 = vpop.permute.xlu1 %917  ;;  %v13517_v35 = vpop.permute.xlu0 %912 }
 0x120   : > { %18095 = vst [vmem:[#allocation79_spill] sm:$0xff] %v13515_v30  ;;  %18096 = vst [vmem:[#allocation80_spill] sm:$0xff] %v13517_v35  ;;  %1440 = vperm.xlu1 %12881, %v13114_v41   ;;  %1435 = vperm.xlu0 %12880, %v13117_v42   ;;  %v10911_v35 = vld [vmem:[%s12963_s26 + $0x10a] sm:$0xff]  ;;  %v18289_v30 = vld [vmem:[#allocation48_spill] sm:$0xff] }
 0x123   : > { %v13521_v36 = vpop.permute.xlu1 %927  ;;  %v13523_v37 = vpop.permute.xlu0 %922 }
 0x124   : > { %18097 = vst [vmem:[#allocation81_spill] sm:$0xff] %v13521_v36  ;;  %18098 = vst [vmem:[#allocation82_spill] sm:$0xff] %v13523_v37  ;;  %1450 = vperm.xlu1 %12881, %v13122_v43   ;;  %1445 = vperm.xlu0 %12880, %v13125_v44   ;;  %v18284_v37 = vld [vmem:[#allocation37_spill] sm:$0xff] }
 0x127   : > { %v13527_v38 = vpop.permute.xlu1 %937  ;;  %v13529_v39 = vpop.permute.xlu0 %932 }
 0x128   : > { %18099 = vst [vmem:[#allocation83_spill] sm:$0xff] %v13527_v38  ;;  %18100 = vst [vmem:[#allocation84_spill] sm:$0xff] %v13529_v39  ;;  %1460 = vperm.xlu1 %12881, %v13130_v45   ;;  %1455 = vperm.xlu0 %12880, %v13133_v46  }
 0x12b   : > { %v13533_v40 = vpop.permute.xlu1 %947  ;;  %v13535_v41 = vpop.permute.xlu0 %942 }
 0x12c   : > { %18101 = vst [vmem:[#allocation85_spill] sm:$0xff] %v13533_v40  ;;  %18102 = vst [vmem:[#allocation86_spill] sm:$0xff] %v13535_v41  ;;  %1470 = vperm.xlu1 %12881, %v13138_v47   ;;  %1465 = vperm.xlu0 %12880, %v13141_v48   ;;  %v18279_v41 = vld [vmem:[#allocation32_spill] sm:$0xff] }
 0x12f   : > { %v13539_v42 = vpop.permute.xlu1 %957  ;;  %v13541_v43 = vpop.permute.xlu0 %952 }
 0x130   : > { %18103 = vst [vmem:[#allocation87_spill] sm:$0xff] %v13539_v42  ;;  %18104 = vst [vmem:[#allocation88_spill] sm:$0xff] %v13541_v43  ;;  %1480 = vperm.xlu1 %12881, %v13146_v49   ;;  %1475 = vperm.xlu0 %12880, %v13149_v50   ;;  %v18278_v42 = vld [vmem:[#allocation29_spill] sm:$0xff] }
 0x133   : > { %v13545_v44 = vpop.permute.xlu1 %967  ;;  %v13547_v45 = vpop.permute.xlu0 %962 }
 0x134   : > { %18105 = vst [vmem:[#allocation89_spill] sm:$0xff] %v13545_v44  ;;  %18106 = vst [vmem:[#allocation90_spill] sm:$0xff] %v13547_v45  ;;  %1490 = vperm.xlu1 %12881, %v13154_v51   ;;  %1485 = vperm.xlu0 %12880, %v13157_v52   ;;  %v18272_v45 = vld [vmem:[#allocation17_spill] sm:$0xff] }
 0x137   : > { %v13551_v46 = vpop.permute.xlu1 %977  ;;  %v13553_v47 = vpop.permute.xlu0 %972 }
 0x138   : > { %18107 = vst [vmem:[#allocation91_spill] sm:$0xff] %v13551_v46  ;;  %18108 = vst [vmem:[#allocation92_spill] sm:$0xff] %v13553_v47  ;;  %1500 = vperm.xlu1 %12881, %v13162_v53   ;;  %1495 = vperm.xlu0 %12880, %v13165_v54   ;;  %v18115_v54 = vld [vmem:[#allocation3_spill] sm:$0xff]  ;;  %v18136_v47 = vld [vmem:[#allocation18_spill] sm:$0xff] }
 0x139   : > { %v10909_v46 = vld [vmem:[%s12963_s26 + $0xf2] sm:$0xff] }
 0x13b   : > { %v13557_v48 = vpop.permute.xlu1 %987  ;;  %v13559_v49 = vpop.permute.xlu0 %982 }
 0x13c   : > { %18109 = vst [vmem:[#allocation93_spill] sm:$0xff] %v13557_v48  ;;  %18110 = vst [vmem:[#allocation94_spill] sm:$0xff] %v13559_v49  ;;  %1510 = vperm.xlu1 %12881, %v13170_v55   ;;  %1505 = vperm.xlu0 %12880, %v13173_v56  }
 0x13f   : > { %v13563_v50 = vpop.permute.xlu1 %997  ;;  %v13565_v51 = vpop.permute.xlu0 %992 }
 0x140   : > { %18111 = vst [vmem:[#allocation95_spill] sm:$0xff] %v13563_v50  ;;  %18112 = vst [vmem:[#allocation96_spill] sm:$0xff] %v13565_v51  ;;  %1520 = vperm.xlu1 %12881, %v13178_v57   ;;  %1515 = vperm.xlu0 %12880, %v13181_v58   ;;  %v18118_v50 = vld [vmem:[#allocation4_spill] sm:$0xff]  ;;  %v18119_v51 = vld [vmem:[#allocation5_spill] sm:$0xff] }
 0x141   : > { %v18122_v58 = vld [vmem:[#allocation6_spill] sm:$0xff] }
 0x143   : > { %v13569_v52 = vpop.permute.xlu1 %1007  ;;  %v13571_v53 = vpop.permute.xlu0 %1002 }
 0x144   : > { %18113 = vst [vmem:[#allocation97_spill] sm:$0xff] %v13569_v52  ;;  %18114 = vst [vmem:[#allocation98_spill] sm:$0xff] %v13571_v53  ;;  %1530 = vperm.xlu1 %12881, %v13186_v59   ;;  %1525 = vperm.xlu0 %12880, %v18115_v54   ;;  %v18123_v52 = vld [vmem:[#allocation7_spill] sm:$0xff]  ;;  %v13591_v59 = vld [vmem:[%s12963_s26 + $0x181] sm:$0xff] }
 0x145   : > { %v13588_v53 = vld [vmem:[%s12963_s26 + $0x189] sm:$0xff] }
 0x147   : > { %v13575_v55 = vpop.permute.xlu1 %1017  ;;  %v13577_v56 = vpop.permute.xlu0 %1012 }
 0x148   : > { %18116 = vst [vmem:[#allocation3_spill] sm:$0xff] %v13575_v55  ;;  %18117 = vst [vmem:[#allocation99_spill] sm:$0xff] %v13577_v56  ;;  %1540 = vperm.xlu1 %12881, %v18118_v50   ;;  %1535 = vperm.xlu0 %12880, %v18119_v51   ;;  %v18132_v56 = vld [vmem:[#allocation14_spill] sm:$0xff] }
 0x14b   : > { %v13581_v49 = vpop.permute.xlu1 %1027  ;;  %v13583_v57 = vpop.permute.xlu0 %1022 }
 0x14c   : > { %18120 = vst [vmem:[#allocation4_spill] sm:$0xff] %v13581_v49  ;;  %18121 = vst [vmem:[#allocation5_spill] sm:$0xff] %v13583_v57  ;;  %1550 = vperm.xlu1 %12881, %v18122_v58   ;;  %1545 = vperm.xlu0 %12880, %v18123_v52   ;;  %v18128_v57 = vld [vmem:[#allocation10_spill] sm:$0xff]  ;;  %v18129_v58 = vld [vmem:[#allocation11_spill] sm:$0xff] }
 0x14f   : > { %v13593_v54 = vpop.permute.xlu1 %1037  ;;  %v13595_v55 = vpop.permute.xlu0 %1032 }
 0x150   : > { %18124 = vst [vmem:[#allocation6_spill] sm:$0xff] %v13593_v54  ;;  %18125 = vst [vmem:[#allocation7_spill] sm:$0xff] %v13595_v55  ;;  %1560 = vperm.xlu1 %12881, %v13588_v53   ;;  %1555 = vperm.xlu0 %12880, %v13591_v59   ;;  %v18133_v54 = vld [vmem:[#allocation15_spill] sm:$0xff] }
 0x153   : > { %v13599_v50 = vpop.permute.xlu1 %1149  ;;  %v13601_v51 = vpop.permute.xlu0 %1144 }
 0x154   : > { %18126 = vst [vmem:[#allocation100_spill] sm:$0xff] %v13599_v50  ;;  %18127 = vst [vmem:[#allocation101_spill] sm:$0xff] %v13601_v51  ;;  %1671 = vperm.xlu1 %12881, %v18128_v57   ;;  %1666 = vperm.xlu0 %12880, %v18129_v58   ;;  %v18137_v50 = vld [vmem:[#allocation19_spill] sm:$0xff]  ;;  %v18140_v58 = vld [vmem:[#allocation22_spill] sm:$0xff] }
 0x157   : > { %v13605_v52 = vpop.permute.xlu1 %1159  ;;  %v13607_v49 = vpop.permute.xlu0 %1154 }
 0x158   : > { %18130 = vst [vmem:[#allocation10_spill] sm:$0xff] %v13605_v52  ;;  %18131 = vst [vmem:[#allocation11_spill] sm:$0xff] %v13607_v49  ;;  %1681 = vperm.xlu1 %12881, %v18132_v56   ;;  %1676 = vperm.xlu0 %12880, %v18133_v54   ;;  %v18141_v52 = vld [vmem:[#allocation23_spill] sm:$0xff]  ;;  %v18144_v54 = vld [vmem:[#allocation26_spill] sm:$0xff] }
 0x15b   : > { %v13611_v55 = vpop.permute.xlu1 %1169  ;;  %v13613_v48 = vpop.permute.xlu0 %1164 }
 0x15c   : > { %18134 = vst [vmem:[#allocation14_spill] sm:$0xff] %v13611_v55  ;;  %18135 = vst [vmem:[#allocation15_spill] sm:$0xff] %v13613_v48  ;;  %1691 = vperm.xlu1 %12881, %v18136_v47   ;;  %1686 = vperm.xlu0 %12880, %v18137_v50   ;;  %v18145_v55 = vld [vmem:[#allocation27_spill] sm:$0xff]  ;;  %v18148_v50 = vld [vmem:[#allocation30_spill] sm:$0xff] }
 0x15f   : > { %v13617_v51 = vpop.permute.xlu1 %1179  ;;  %v13619_v57 = vpop.permute.xlu0 %1174 }
 0x160   : > { %18138 = vst [vmem:[#allocation18_spill] sm:$0xff] %v13617_v51  ;;  %18139 = vst [vmem:[#allocation19_spill] sm:$0xff] %v13619_v57  ;;  %1701 = vperm.xlu1 %12881, %v18140_v58   ;;  %1696 = vperm.xlu0 %12880, %v18141_v52   ;;  %v18149_v51 = vld [vmem:[#allocation31_spill] sm:$0xff]  ;;  %v18152_v52 = vld [vmem:[#allocation34_spill] sm:$0xff] }
 0x163   : > { %v13623_v49 = vpop.permute.xlu1 %1189  ;;  %v13625_v56 = vpop.permute.xlu0 %1184 }
 0x164   : > { %18142 = vst [vmem:[#allocation22_spill] sm:$0xff] %v13623_v49  ;;  %18143 = vst [vmem:[#allocation23_spill] sm:$0xff] %v13625_v56  ;;  %1711 = vperm.xlu1 %12881, %v18144_v54   ;;  %1706 = vperm.xlu0 %12880, %v18145_v55   ;;  %v18153_v49 = vld [vmem:[#allocation35_spill] sm:$0xff]  ;;  %v18156_v55 = vld [vmem:[#allocation38_spill] sm:$0xff] }
 0x167   : > { %v13629_v48 = vpop.permute.xlu1 %1199  ;;  %v13631_v47 = vpop.permute.xlu0 %1194 }
 0x168   : > { %18146 = vst [vmem:[#allocation26_spill] sm:$0xff] %v13629_v48  ;;  %18147 = vst [vmem:[#allocation27_spill] sm:$0xff] %v13631_v47  ;;  %1721 = vperm.xlu1 %12881, %v18148_v50   ;;  %1716 = vperm.xlu0 %12880, %v18149_v51   ;;  %v18157_v48 = vld [vmem:[#allocation39_spill] sm:$0xff]  ;;  %v18160_v51 = vld [vmem:[#allocation42_spill] sm:$0xff] }
 0x16b   : > { %v13635_v57 = vpop.permute.xlu1 %1209  ;;  %v13637_v58 = vpop.permute.xlu0 %1204 }
 0x16c   : > { %18150 = vst [vmem:[#allocation30_spill] sm:$0xff] %v13635_v57  ;;  %18151 = vst [vmem:[#allocation31_spill] sm:$0xff] %v13637_v58  ;;  %1731 = vperm.xlu1 %12881, %v18152_v52   ;;  %1726 = vperm.xlu0 %12880, %v18153_v49   ;;  %v18161_v57 = vld [vmem:[#allocation43_spill] sm:$0xff]  ;;  %v18164_v49 = vld [vmem:[#allocation46_spill] sm:$0xff] }
 0x16f   : > { %v13641_v56 = vpop.permute.xlu1 %1219  ;;  %v13643_v54 = vpop.permute.xlu0 %1214 }
 0x170   : > { %18154 = vst [vmem:[#allocation34_spill] sm:$0xff] %v13641_v56  ;;  %18155 = vst [vmem:[#allocation35_spill] sm:$0xff] %v13643_v54  ;;  %1741 = vperm.xlu1 %12881, %v18156_v55   ;;  %1736 = vperm.xlu0 %12880, %v18157_v48   ;;  %v18165_v56 = vld [vmem:[#allocation47_spill] sm:$0xff]  ;;  %v18168_v48 = vld [vmem:[#allocation50_spill] sm:$0xff] }
 0x173   : > { %v13647_v47 = vpop.permute.xlu1 %1229  ;;  %v13649_v50 = vpop.permute.xlu0 %1224 }
 0x174   : > { %18158 = vst [vmem:[#allocation38_spill] sm:$0xff] %v13647_v47  ;;  %18159 = vst [vmem:[#allocation39_spill] sm:$0xff] %v13649_v50  ;;  %1751 = vperm.xlu1 %12881, %v18160_v51   ;;  %1746 = vperm.xlu0 %12880, %v18161_v57   ;;  %v18169_v47 = vld [vmem:[#allocation51_spill] sm:$0xff]  ;;  %v18172_v51 = vld [vmem:[#allocation54_spill] sm:$0xff] }
 0x177   : > { %v13653_v58 = vpop.permute.xlu1 %1239  ;;  %v13655_v52 = vpop.permute.xlu0 %1234 }
 0x178   : > { %18162 = vst [vmem:[#allocation42_spill] sm:$0xff] %v13653_v58  ;;  %18163 = vst [vmem:[#allocation43_spill] sm:$0xff] %v13655_v52  ;;  %1761 = vperm.xlu1 %12881, %v18164_v49   ;;  %1756 = vperm.xlu0 %12880, %v18165_v56   ;;  %v18173_v52 = vld [vmem:[#allocation55_spill] sm:$0xff]  ;;  %v10910_v58 = vld [vmem:[%s12963_s26 + $0xfa] sm:$0xff] }
 0x17b   : > { %v13659_v54 = vpop.permute.xlu1 %1249  ;;  %v13661_v55 = vpop.permute.xlu0 %1244 }
 0x17c   : > { %18166 = vst [vmem:[#allocation46_spill] sm:$0xff] %v13659_v54  ;;  %18167 = vst [vmem:[#allocation47_spill] sm:$0xff] %v13661_v55  ;;  %1771 = vperm.xlu1 %12881, %v18168_v48   ;;  %1766 = vperm.xlu0 %12880, %v18169_v47   ;;  %v18176_v54 = vld [vmem:[#allocation58_spill] sm:$0xff]  ;;  %v18177_v55 = vld [vmem:[#allocation59_spill] sm:$0xff] }
 0x17f   : > { %v13665_v50 = vpop.permute.xlu1 %1259  ;;  %v13667_v57 = vpop.permute.xlu0 %1254 }
 0x180   : > { %18170 = vst [vmem:[#allocation50_spill] sm:$0xff] %v13665_v50  ;;  %18171 = vst [vmem:[#allocation51_spill] sm:$0xff] %v13667_v57  ;;  %1781 = vperm.xlu1 %12881, %v18172_v51   ;;  %1776 = vperm.xlu0 %12880, %v18173_v52   ;;  %v18180_v57 = vld [vmem:[#allocation62_spill] sm:$0xff] }
 0x183   : > { %v13671_v49 = vpop.permute.xlu1 %1269  ;;  %v13673_v56 = vpop.permute.xlu0 %1264 }
 0x184   : > { %18174 = vst [vmem:[#allocation54_spill] sm:$0xff] %v13671_v49  ;;  %18175 = vst [vmem:[#allocation55_spill] sm:$0xff] %v13673_v56  ;;  %1791 = vperm.xlu1 %12881, %v18176_v54   ;;  %1786 = vperm.xlu0 %12880, %v18177_v55   ;;  %v13690_v54 = vld [vmem:[%s12963_s26 + $0x18a] sm:$0xff]  ;;  %v13693_v55 = vld [vmem:[%s12963_s26 + $0x182] sm:$0xff] }
 0x185   : > { %18183 = vst [vmem:[#allocation103_spill] sm:$0xff] %v13690_v54  ;;  %18184 = vst [vmem:[#allocation104_spill] sm:$0xff] %v13693_v55  ;;  %v10832_v56 = vld [vmem:[%s12963_s26 + $0x68] sm:$0xff]  ;;  %v10831_v49 = vld [vmem:[%s12963_s26 + $0x60] sm:$0xff] }
 0x187   : > { %v13677_v47 = vpop.permute.xlu1 %1279  ;;  %v13679_v48 = vpop.permute.xlu0 %1274 }
 0x188   : > { %18178 = vst [vmem:[#allocation58_spill] sm:$0xff] %v13677_v47  ;;  %18179 = vst [vmem:[#allocation59_spill] sm:$0xff] %v13679_v48  ;;  %1801 = vperm.xlu1 %12881, %v13372_v33   ;;  %1796 = vperm.xlu0 %12880, %v18180_v57   ;;  %v10828_v57 = vld [vmem:[%s12963_s26 + $0x38] sm:$0xff] }
 0x18b   : > { %v13683_v51 = vpop.permute.xlu1 %1289  ;;  %v13685_v52 = vpop.permute.xlu0 %1284 }
 0x18c   : > { %18181 = vst [vmem:[#allocation62_spill] sm:$0xff] %v13683_v51  ;;  %18182 = vst [vmem:[#allocation102_spill] sm:$0xff] %v13685_v52  ;;  %1811 = vperm.xlu1 %12881, %v13384_v2   ;;  %1806 = vperm.xlu0 %12880, %v13387_v63   ;;  %v10827_v52 = vld [vmem:[%s12963_s26 + $0x30] sm:$0xff] }
 0x18d   : > { %v10830_v2 = vld [vmem:[%s12963_s26 + $0x50] sm:$0xff] }
 0x18f   : > { %v13695_v47 = vpop.permute.xlu1 %1299  ;;  %v13697_v33 = vpop.permute.xlu0 %1294 }
 0x190   : > { %18185 = vst [vmem:[#allocation105_spill] sm:$0xff] %v13695_v47  ;;  %18186 = vst [vmem:[#allocation106_spill] sm:$0xff] %v13697_v33  ;;  %1821 = vperm.xlu1 %12881, %v13690_v54   ;;  %1816 = vperm.xlu0 %12880, %v13693_v55   ;;  %v10829_v47 = vld [vmem:[%s12963_s26 + $0x48] sm:$0xff] }
 0x193   : > { %v13703_v51 = vpop.permute.xlu1 %1410  ;;  %v13705_v63 = vpop.permute.xlu0 %1405 }
 0x194   : > { %18187 = vst [vmem:[#allocation107_spill] sm:$0xff] %v13703_v51  ;;  %18188 = vst [vmem:[#allocation108_spill] sm:$0xff] %v13705_v63  ;;  %1933 = vperm.xlu1 %12881, %v10828_v57   ;;  %1928 = vperm.xlu0 %12880, %v10827_v52   ;;  %v10834_v52 = vld [vmem:[%s12963_s26 + $0x80] sm:$0xff]  ;;  %v10833_v57 = vld [vmem:[%s12963_s26 + $0x78] sm:$0xff] }
 0x197   : > { %v13709_v48 = vpop.permute.xlu1 %1420  ;;  %v13711_v33 = vpop.permute.xlu0 %1415 }
 0x198   : > { %18189 = vst [vmem:[#allocation109_spill] sm:$0xff] %v13709_v48  ;;  %18190 = vst [vmem:[#allocation110_spill] sm:$0xff] %v13711_v33  ;;  %1943 = vperm.xlu1 %12881, %v10830_v2   ;;  %1938 = vperm.xlu0 %12880, %v10829_v47   ;;  %v10836_v47 = vld [vmem:[%s12963_s26 + $0x98] sm:$0xff]  ;;  %v10835_v2 = vld [vmem:[%s12963_s26 + $0x90] sm:$0xff] }
 0x19b   : > { %v13715_v50 = vpop.permute.xlu1 %1430  ;;  %v13717_v51 = vpop.permute.xlu0 %1425 }
 0x19c   : > { %18191 = vst [vmem:[#allocation111_spill] sm:$0xff] %v13715_v50  ;;  %18192 = vst [vmem:[#allocation112_spill] sm:$0xff] %v13717_v51  ;;  %1953 = vperm.xlu1 %12881, %v10832_v56   ;;  %1948 = vperm.xlu0 %12880, %v10831_v49   ;;  %v10838_v49 = vld [vmem:[%s12963_s26 + $0xb0] sm:$0xff]  ;;  %v10837_v56 = vld [vmem:[%s12963_s26 + $0xa8] sm:$0xff] }
 0x19f   : > { %v13721_v63 = vpop.permute.xlu1 %1440  ;;  %v13723_v48 = vpop.permute.xlu0 %1435 }
 0x1a0   : > { %18193 = vst [vmem:[#allocation113_spill] sm:$0xff] %v13721_v63  ;;  %18194 = vst [vmem:[#allocation114_spill] sm:$0xff] %v13723_v48  ;;  %1963 = vperm.xlu1 %12881, %v10834_v52   ;;  %1958 = vperm.xlu0 %12880, %v10833_v57   ;;  %v10840_v52 = vld [vmem:[%s12963_s26 + $0xc8] sm:$0xff]  ;;  %v10839_v57 = vld [vmem:[%s12963_s26 + $0xc0] sm:$0xff] }
 0x1a3   : > { %v13727_v33 = vpop.permute.xlu1 %1450  ;;  %v13729_v50 = vpop.permute.xlu0 %1445 }
 0x1a4   : > { %18195 = vst [vmem:[#allocation115_spill] sm:$0xff] %v13727_v33  ;;  %18196 = vst [vmem:[#allocation116_spill] sm:$0xff] %v13729_v50  ;;  %1973 = vperm.xlu1 %12881, %v10836_v47   ;;  %1968 = vperm.xlu0 %12880, %v10835_v2   ;;  %v10842_v47 = vld [vmem:[%s12963_s26 + $0xe0] sm:$0xff]  ;;  %v10841_v2 = vld [vmem:[%s12963_s26 + $0xd8] sm:$0xff] }
 0x1a7   : > { %v13733_v51 = vpop.permute.xlu1 %1460  ;;  %v13735_v63 = vpop.permute.xlu0 %1455 }
 0x1a8   : > { %18197 = vst [vmem:[#allocation117_spill] sm:$0xff] %v13733_v51  ;;  %18198 = vst [vmem:[#allocation118_spill] sm:$0xff] %v13735_v63  ;;  %1983 = vperm.xlu1 %12881, %v10838_v49   ;;  %1978 = vperm.xlu0 %12880, %v10837_v56   ;;  %v10844_v49 = vld [vmem:[%s12963_s26 + $0xf8] sm:$0xff]  ;;  %v10843_v56 = vld [vmem:[%s12963_s26 + $0xf0] sm:$0xff] }
 0x1ab   : > { %v13739_v48 = vpop.permute.xlu1 %1470  ;;  %v13741_v33 = vpop.permute.xlu0 %1465 }
 0x1ac   : > { %18199 = vst [vmem:[#allocation119_spill] sm:$0xff] %v13739_v48  ;;  %18200 = vst [vmem:[#allocation120_spill] sm:$0xff] %v13741_v33  ;;  %1993 = vperm.xlu1 %12881, %v10840_v52   ;;  %1988 = vperm.xlu0 %12880, %v10839_v57   ;;  %v10846_v52 = vld [vmem:[%s12963_s26 + $0x110] sm:$0xff]  ;;  %v10845_v57 = vld [vmem:[%s12963_s26 + $0x108] sm:$0xff] }
 0x1af   : > { %v13745_v50 = vpop.permute.xlu1 %1480  ;;  %v13747_v51 = vpop.permute.xlu0 %1475 }
 0x1b0   : > { %18201 = vst [vmem:[#allocation121_spill] sm:$0xff] %v13745_v50  ;;  %18202 = vst [vmem:[#allocation122_spill] sm:$0xff] %v13747_v51  ;;  %2003 = vperm.xlu1 %12881, %v10842_v47   ;;  %1998 = vperm.xlu0 %12880, %v10841_v2   ;;  %v10848_v47 = vld [vmem:[%s12963_s26 + $0x128] sm:$0xff]  ;;  %v10847_v2 = vld [vmem:[%s12963_s26 + $0x120] sm:$0xff] }
 0x1b3   : > { %v13751_v63 = vpop.permute.xlu1 %1490  ;;  %v13753_v48 = vpop.permute.xlu0 %1485 }
 0x1b4   : > { %18203 = vst [vmem:[#allocation123_spill] sm:$0xff] %v13751_v63  ;;  %18204 = vst [vmem:[#allocation124_spill] sm:$0xff] %v13753_v48  ;;  %2013 = vperm.xlu1 %12881, %v10844_v49   ;;  %2008 = vperm.xlu0 %12880, %v10843_v56   ;;  %v10850_v49 = vld [vmem:[%s12963_s26 + $0x140] sm:$0xff]  ;;  %v10849_v56 = vld [vmem:[%s12963_s26 + $0x138] sm:$0xff] }
 0x1b7   : > { %v13757_v33 = vpop.permute.xlu1 %1500  ;;  %v13759_v50 = vpop.permute.xlu0 %1495 }
 0x1b8   : > { %18205 = vst [vmem:[#allocation125_spill] sm:$0xff] %v13757_v33  ;;  %18206 = vst [vmem:[#allocation126_spill] sm:$0xff] %v13759_v50  ;;  %2023 = vperm.xlu1 %12881, %v10846_v52   ;;  %2018 = vperm.xlu0 %12880, %v10845_v57   ;;  %v10852_v52 = vld [vmem:[%s12963_s26 + $0x158] sm:$0xff]  ;;  %v10851_v57 = vld [vmem:[%s12963_s26 + $0x150] sm:$0xff] }
 0x1bb   : > { %v13763_v51 = vpop.permute.xlu1 %1510  ;;  %v13765_v63 = vpop.permute.xlu0 %1505 }
 0x1bc   : > { %18207 = vst [vmem:[#allocation127_spill] sm:$0xff] %v13763_v51  ;;  %18208 = vst [vmem:[#allocation128_spill] sm:$0xff] %v13765_v63  ;;  %2033 = vperm.xlu1 %12881, %v10848_v47   ;;  %2028 = vperm.xlu0 %12880, %v10847_v2   ;;  %v10854_v47 = vld [vmem:[%s12963_s26 + $0x170] sm:$0xff]  ;;  %v10853_v2 = vld [vmem:[%s12963_s26 + $0x168] sm:$0xff] }
 0x1bf   : > { %v13769_v48 = vpop.permute.xlu1 %1520  ;;  %v13771_v33 = vpop.permute.xlu0 %1515 }
 0x1c0   : > { %18209 = vst [vmem:[#allocation129_spill] sm:$0xff] %v13769_v48  ;;  %18210 = vst [vmem:[#allocation130_spill] sm:$0xff] %v13771_v33  ;;  %2043 = vperm.xlu1 %12881, %v10850_v49   ;;  %2038 = vperm.xlu0 %12880, %v10849_v56  }
 0x1c3   : > { %v13775_v50 = vpop.permute.xlu1 %1530  ;;  %v13777_v51 = vpop.permute.xlu0 %1525 }
 0x1c4   : > { %18211 = vst [vmem:[#allocation131_spill] sm:$0xff] %v13775_v50  ;;  %18212 = vst [vmem:[#allocation132_spill] sm:$0xff] %v13777_v51  ;;  %2053 = vperm.xlu1 %12881, %v10852_v52   ;;  %2048 = vperm.xlu0 %12880, %v10851_v57   ;;  %v10858_v52 = vld [vmem:[%s12963_s26 + $0x1a0] sm:$0xff]  ;;  %v10857_v57 = vld [vmem:[%s12963_s26 + $0x198] sm:$0xff] }
 0x1c5   : > { %v18271_v50 = vld [vmem:[#allocation16_spill] sm:$0xff] }
 0x1c7   : > { %v13781_v63 = vpop.permute.xlu1 %1540  ;;  %v13783_v48 = vpop.permute.xlu0 %1535 }
 0x1c8   : > { %18213 = vst [vmem:[#allocation133_spill] sm:$0xff] %v13781_v63  ;;  %18214 = vst [vmem:[#allocation134_spill] sm:$0xff] %v13783_v48  ;;  %2063 = vperm.xlu1 %12881, %v10854_v47   ;;  %2058 = vperm.xlu0 %12880, %v10853_v2   ;;  %v10861_v47 = vld [vmem:[%s12963_s26 + $0x39] sm:$0xff]  ;;  %v10860_v2 = vld [vmem:[%s12963_s26 + $0x31] sm:$0xff] }
 0x1cb   : > { %v13785_v49 = vpop.permute.xlu1 %1550  ;;  %v13787_v56 = vpop.permute.xlu0 %1545 }
 0x1cc   : > { %18215 = vst [vmem:[#allocation135_spill] sm:$0xff] %v13785_v49  ;;  %18216 = vst [vmem:[#allocation136_spill] sm:$0xff] %v13787_v56  ;;  %2073 = vperm.xlu1 %12881, %v13486_v26   ;;  %2068 = vperm.xlu0 %12880, %v13489_v27   ;;  %v10863_v26 = vld [vmem:[%s12963_s26 + $0x51] sm:$0xff]  ;;  %v10862_v27 = vld [vmem:[%s12963_s26 + $0x49] sm:$0xff] }
 0x1cf   : > { %v13793_v51 = vpop.permute.xlu1 %1560  ;;  %v13795_v63 = vpop.permute.xlu0 %1555 }
 0x1d0   : > { %18217 = vst [vmem:[#allocation137_spill] sm:$0xff] %v13793_v51  ;;  %18218 = vst [vmem:[#allocation138_spill] sm:$0xff] %v13795_v63  ;;  %2083 = vperm.xlu1 %12881, %v10858_v52   ;;  %2078 = vperm.xlu0 %12880, %v10857_v57   ;;  %v10865_v52 = vld [vmem:[%s12963_s26 + $0x69] sm:$0xff]  ;;  %v10864_v57 = vld [vmem:[%s12963_s26 + $0x61] sm:$0xff] }
 0x1d3   : > { %v13799_v49 = vpop.permute.xlu1 %1671  ;;  %v13801_v56 = vpop.permute.xlu0 %1666 }
 0x1d4   : > { %18219 = vst [vmem:[#allocation139_spill] sm:$0xff] %v13799_v49  ;;  %18220 = vst [vmem:[#allocation140_spill] sm:$0xff] %v13801_v56  ;;  %2194 = vperm.xlu1 %12881, %v10861_v47   ;;  %2189 = vperm.xlu0 %12880, %v10860_v2   ;;  %v10867_v47 = vld [vmem:[%s12963_s26 + $0x81] sm:$0xff]  ;;  %v10866_v2 = vld [vmem:[%s12963_s26 + $0x79] sm:$0xff] }
 0x1d7   : > { %v13805_v48 = vpop.permute.xlu1 %1681  ;;  %v13807_v51 = vpop.permute.xlu0 %1676 }
 0x1d8   : > { %18221 = vst [vmem:[#allocation141_spill] sm:$0xff] %v13805_v48  ;;  %18222 = vst [vmem:[#allocation142_spill] sm:$0xff] %v13807_v51  ;;  %2204 = vperm.xlu1 %12881, %v10863_v26   ;;  %2199 = vperm.xlu0 %12880, %v10862_v27   ;;  %v10869_v26 = vld [vmem:[%s12963_s26 + $0x99] sm:$0xff]  ;;  %v10868_v27 = vld [vmem:[%s12963_s26 + $0x91] sm:$0xff] }
 0x1db   : > { %v13811_v63 = vpop.permute.xlu1 %1691  ;;  %v13813_v49 = vpop.permute.xlu0 %1686 }
 0x1dc   : > { %18223 = vst [vmem:[#allocation143_spill] sm:$0xff] %v13811_v63  ;;  %18224 = vst [vmem:[#allocation144_spill] sm:$0xff] %v13813_v49  ;;  %2214 = vperm.xlu1 %12881, %v10865_v52   ;;  %2209 = vperm.xlu0 %12880, %v10864_v57   ;;  %v10871_v52 = vld [vmem:[%s12963_s26 + $0xb1] sm:$0xff]  ;;  %v10870_v57 = vld [vmem:[%s12963_s26 + $0xa9] sm:$0xff] }
 0x1df   : > { %v13817_v56 = vpop.permute.xlu1 %1701  ;;  %v13819_v48 = vpop.permute.xlu0 %1696 }
 0x1e0   : > { %18225 = vst [vmem:[#allocation145_spill] sm:$0xff] %v13817_v56  ;;  %18226 = vst [vmem:[#allocation146_spill] sm:$0xff] %v13819_v48  ;;  %2224 = vperm.xlu1 %12881, %v10867_v47   ;;  %2219 = vperm.xlu0 %12880, %v10866_v2   ;;  %v10873_v47 = vld [vmem:[%s12963_s26 + $0xc9] sm:$0xff]  ;;  %v10872_v2 = vld [vmem:[%s12963_s26 + $0xc1] sm:$0xff] }
 0x1e3   : > { %v13823_v51 = vpop.permute.xlu1 %1711  ;;  %v13825_v63 = vpop.permute.xlu0 %1706 }
 0x1e4   : > { %18227 = vst [vmem:[#allocation147_spill] sm:$0xff] %v13823_v51  ;;  %18228 = vst [vmem:[#allocation148_spill] sm:$0xff] %v13825_v63  ;;  %2234 = vperm.xlu1 %12881, %v10869_v26   ;;  %2229 = vperm.xlu0 %12880, %v10868_v27   ;;  %v10875_v26 = vld [vmem:[%s12963_s26 + $0xe1] sm:$0xff]  ;;  %v10874_v27 = vld [vmem:[%s12963_s26 + $0xd9] sm:$0xff] }
 0x1e7   : > { %v13829_v49 = vpop.permute.xlu1 %1721  ;;  %v13831_v56 = vpop.permute.xlu0 %1716 }
 0x1e8   : > { %18229 = vst [vmem:[#allocation149_spill] sm:$0xff] %v13829_v49  ;;  %18230 = vst [vmem:[#allocation150_spill] sm:$0xff] %v13831_v56  ;;  %2244 = vperm.xlu1 %12881, %v10871_v52   ;;  %2239 = vperm.xlu0 %12880, %v10870_v57   ;;  %v10877_v52 = vld [vmem:[%s12963_s26 + $0xf9] sm:$0xff]  ;;  %v10876_v57 = vld [vmem:[%s12963_s26 + $0xf1] sm:$0xff] }
 0x1eb   : > { %v13835_v48 = vpop.permute.xlu1 %1731  ;;  %v13837_v51 = vpop.permute.xlu0 %1726 }
 0x1ec   : > { %18231 = vst [vmem:[#allocation151_spill] sm:$0xff] %v13835_v48  ;;  %18232 = vst [vmem:[#allocation152_spill] sm:$0xff] %v13837_v51  ;;  %2254 = vperm.xlu1 %12881, %v10873_v47   ;;  %2249 = vperm.xlu0 %12880, %v10872_v2   ;;  %v10879_v47 = vld [vmem:[%s12963_s26 + $0x111] sm:$0xff]  ;;  %v10878_v2 = vld [vmem:[%s12963_s26 + $0x109] sm:$0xff] }
 0x1ef   : > { %v13841_v63 = vpop.permute.xlu1 %1741  ;;  %v13843_v49 = vpop.permute.xlu0 %1736 }
 0x1f0   : > { %18233 = vst [vmem:[#allocation153_spill] sm:$0xff] %v13841_v63  ;;  %18234 = vst [vmem:[#allocation154_spill] sm:$0xff] %v13843_v49  ;;  %2264 = vperm.xlu1 %12881, %v10875_v26   ;;  %2259 = vperm.xlu0 %12880, %v10874_v27   ;;  %v10881_v26 = vld [vmem:[%s12963_s26 + $0x129] sm:$0xff]  ;;  %v10880_v27 = vld [vmem:[%s12963_s26 + $0x121] sm:$0xff] }
 0x1f3   : > { %v13847_v56 = vpop.permute.xlu1 %1751  ;;  %v13849_v48 = vpop.permute.xlu0 %1746 }
 0x1f4   : > { %18235 = vst [vmem:[#allocation155_spill] sm:$0xff] %v13847_v56  ;;  %18236 = vst [vmem:[#allocation156_spill] sm:$0xff] %v13849_v48  ;;  %2274 = vperm.xlu1 %12881, %v10877_v52   ;;  %2269 = vperm.xlu0 %12880, %v10876_v57   ;;  %v10883_v52 = vld [vmem:[%s12963_s26 + $0x141] sm:$0xff]  ;;  %v10882_v57 = vld [vmem:[%s12963_s26 + $0x139] sm:$0xff] }
 0x1f7   : > { %v13853_v51 = vpop.permute.xlu1 %1761  ;;  %v13855_v63 = vpop.permute.xlu0 %1756 }
 0x1f8   : > { %18237 = vst [vmem:[#allocation157_spill] sm:$0xff] %v13853_v51  ;;  %18238 = vst [vmem:[#allocation158_spill] sm:$0xff] %v13855_v63  ;;  %2284 = vperm.xlu1 %12881, %v10879_v47   ;;  %2279 = vperm.xlu0 %12880, %v10878_v2   ;;  %v10885_v47 = vld [vmem:[%s12963_s26 + $0x159] sm:$0xff]  ;;  %v10884_v2 = vld [vmem:[%s12963_s26 + $0x151] sm:$0xff] }
 0x1fb   : > { %v13859_v49 = vpop.permute.xlu1 %1771  ;;  %v13861_v56 = vpop.permute.xlu0 %1766 }
 0x1fc   : > { %18239 = vst [vmem:[#allocation159_spill] sm:$0xff] %v13859_v49  ;;  %18240 = vst [vmem:[#allocation160_spill] sm:$0xff] %v13861_v56  ;;  %2294 = vperm.xlu1 %12881, %v10881_v26   ;;  %2289 = vperm.xlu0 %12880, %v10880_v27   ;;  %v10887_v26 = vld [vmem:[%s12963_s26 + $0x171] sm:$0xff]  ;;  %v10886_v27 = vld [vmem:[%s12963_s26 + $0x169] sm:$0xff] }
 0x1ff   : > { %v13865_v48 = vpop.permute.xlu1 %1781  ;;  %v13867_v51 = vpop.permute.xlu0 %1776 }
 0x200   : > { %18241 = vst [vmem:[#allocation161_spill] sm:$0xff] %v13865_v48  ;;  %18242 = vst [vmem:[#allocation162_spill] sm:$0xff] %v13867_v51  ;;  %2304 = vperm.xlu1 %12881, %v10883_v52   ;;  %2299 = vperm.xlu0 %12880, %v10882_v57  }
 0x203   : > { %v13871_v63 = vpop.permute.xlu1 %1791  ;;  %v13873_v49 = vpop.permute.xlu0 %1786 }
 0x204   : > { %18243 = vst [vmem:[#allocation163_spill] sm:$0xff] %v13871_v63  ;;  %18244 = vst [vmem:[#allocation164_spill] sm:$0xff] %v13873_v49  ;;  %2314 = vperm.xlu1 %12881, %v10885_v47   ;;  %2309 = vperm.xlu0 %12880, %v10884_v2   ;;  %v10891_v47 = vld [vmem:[%s12963_s26 + $0x1a1] sm:$0xff]  ;;  %v10890_v2 = vld [vmem:[%s12963_s26 + $0x199] sm:$0xff] }
 0x207   : > { %v13877_v56 = vpop.permute.xlu1 %1801  ;;  %v13879_v48 = vpop.permute.xlu0 %1796 }
 0x208   : > { %18245 = vst [vmem:[#allocation165_spill] sm:$0xff] %v13877_v56  ;;  %18246 = vst [vmem:[#allocation166_spill] sm:$0xff] %v13879_v48  ;;  %2324 = vperm.xlu1 %12881, %v10887_v26   ;;  %2319 = vperm.xlu0 %12880, %v10886_v27   ;;  %v10894_v56 = vld [vmem:[%s12963_s26 + $0x3a] sm:$0xff]  ;;  %v10893_v48 = vld [vmem:[%s12963_s26 + $0x32] sm:$0xff] }
 0x20b   : > { %v13881_v52 = vpop.permute.xlu1 %1811  ;;  %v13883_v57 = vpop.permute.xlu0 %1806 }
 0x20c   : > { %18247 = vst [vmem:[#allocation167_spill] sm:$0xff] %v13881_v52  ;;  %18248 = vst [vmem:[#allocation168_spill] sm:$0xff] %v13883_v57  ;;  %2334 = vperm.xlu1 %12881, %v13588_v53   ;;  %2329 = vperm.xlu0 %12880, %v13591_v59   ;;  %v12911_v57 = vmov 0.0   ;;  %v10896_v53 = vld [vmem:[%s12963_s26 + $0x52] sm:$0xff]  ;;  %v10895_v59 = vld [vmem:[%s12963_s26 + $0x4a] sm:$0xff] }
 0x20d   : > { %275 = vst.msk [vmem:[#allocation2 + $0x20] sm:$0xff] %vm269_vm0, %v12911_v57  ;;  %270 = vst.msk [vmem:[#allocation2] sm:$0xff] %vm269_vm0, %v12911_v57 }
 0x20e   : > { %271 = vst.msk [vmem:[#allocation2 + $0x8] sm:$0xff] %vm269_vm0, %v12911_v57  ;;  %274 = vst.msk [vmem:[#allocation2 + $0x18] sm:$0xff] %vm269_vm0, %v12911_v57 }
 0x20f   : > { %v13889_v49 = vpop.permute.xlu1 %1821  ;;  %v13891_v63 = vpop.permute.xlu0 %1816  ;;  %277 = vst.msk [vmem:[#allocation2 + $0x30] sm:$0xff] %vm269_vm0, %v12911_v57  ;;  %278 = vst.msk [vmem:[#allocation2 + $0x38] sm:$0xff] %vm269_vm0, %v12911_v57 }
 0x210   : > { %18249 = vst [vmem:[#allocation169_spill] sm:$0xff] %v13889_v49  ;;  %18250 = vst [vmem:[#allocation170_spill] sm:$0xff] %v13891_v63  ;;  %2344 = vperm.xlu1 %12881, %v10891_v47   ;;  %2339 = vperm.xlu0 %12880, %v10890_v2   ;;  %v10898_v47 = vld [vmem:[%s12963_s26 + $0x6a] sm:$0xff]  ;;  %v10897_v2 = vld [vmem:[%s12963_s26 + $0x62] sm:$0xff] }
 0x211   : > { %280 = vst.msk [vmem:[#allocation2 + $0x48] sm:$0xff] %vm269_vm0, %v12911_v57  ;;  %281 = vst.msk [vmem:[#allocation2 + $0x50] sm:$0xff] %vm269_vm0, %v12911_v57  ;;  %v10900_v63 = vld [vmem:[%s12963_s26 + $0x82] sm:$0xff] }
 0x212   : > { %283 = vst.msk [vmem:[#allocation2 + $0x60] sm:$0xff] %vm269_vm0, %v12911_v57  ;;  %284 = vst.msk [vmem:[#allocation2 + $0x68] sm:$0xff] %vm269_vm0, %v12911_v57 }
 0x213   : > { %v13895_v26 = vpop.permute.xlu1 %1933  ;;  %v13897_v27 = vpop.permute.xlu0 %1928  ;;  %286 = vst.msk [vmem:[#allocation2 + $0x78] sm:$0xff] %vm269_vm0, %v12911_v57  ;;  %287 = vst.msk [vmem:[#allocation2 + $0x80] sm:$0xff] %vm269_vm0, %v12911_v57 }
 0x214   : > { %18251 = vst [vmem:[#allocation171_spill] sm:$0xff] %v13895_v26  ;;  %18252 = vst [vmem:[#allocation172_spill] sm:$0xff] %v13897_v27  ;;  %2455 = vperm.xlu1 %12881, %v10894_v56   ;;  %2450 = vperm.xlu0 %12880, %v10893_v48  }
 0x215   : > { %289 = vst.msk [vmem:[#allocation2 + $0x90] sm:$0xff] %vm269_vm0, %v12911_v57  ;;  %290 = vst.msk [vmem:[#allocation2 + $0x98] sm:$0xff] %vm269_vm0, %v12911_v57 }
 0x216   : > { %292 = vst.msk [vmem:[#allocation2 + $0xa8] sm:$0xff] %vm269_vm0, %v12911_v57  ;;  %293 = vst.msk [vmem:[#allocation2 + $0xb0] sm:$0xff] %vm269_vm0, %v12911_v57 }
 0x217   : > { %295 = vst.msk [vmem:[#allocation2 + $0xc0] sm:$0xff] %vm269_vm0, %v12911_v57  ;;  %296 = vst.msk [vmem:[#allocation2 + $0xc8] sm:$0xff] %vm269_vm0, %v12911_v57  ;;  %v13955_v48 = vpop.permute.xlu1 %1943  ;;  %v13957_v56 = vpop.permute.xlu0 %1938 }
 0x218   : > { %298 = vst.msk [vmem:[#allocation2 + $0xd8] sm:$0xff] %vm269_vm0, %v12911_v57  ;;  %299 = vst.msk [vmem:[#allocation2 + $0xe0] sm:$0xff] %vm269_vm0, %v12911_v57  ;;  %2465 = vperm.xlu1 %12881, %v10896_v53   ;;  %2460 = vperm.xlu0 %12880, %v10895_v59   ;;  %v10902_v53 = vld [vmem:[%s12963_s26 + $0x9a] sm:$0xff]  ;;  %v10901_v59 = vld [vmem:[%s12963_s26 + $0x92] sm:$0xff] }
 0x219   : > { %301 = vst.msk [vmem:[#allocation2 + $0xf0] sm:$0xff] %vm269_vm0, %v12911_v57  ;;  %302 = vst.msk [vmem:[#allocation2 + $0xf8] sm:$0xff] %vm269_vm0, %v12911_v57 }
 0x21a   : > { %304 = vst.msk [vmem:[#allocation2 + $0x108] sm:$0xff] %vm269_vm0, %v12911_v57  ;;  %305 = vst.msk [vmem:[#allocation2 + $0x110] sm:$0xff] %vm269_vm0, %v12911_v57 }
 0x21b   : > { %307 = vst.msk [vmem:[#allocation2 + $0x120] sm:$0xff] %vm269_vm0, %v12911_v57  ;;  %308 = vst.msk [vmem:[#allocation2 + $0x128] sm:$0xff] %vm269_vm0, %v12911_v57  ;;  %v13961_v27 = vpop.permute.xlu1 %1953  ;;  %v13963_v26 = vpop.permute.xlu0 %1948 }
 0x21c   : > { %310 = vst.msk [vmem:[#allocation2 + $0x138] sm:$0xff] %vm269_vm0, %v12911_v57  ;;  %311 = vst.msk [vmem:[#allocation2 + $0x140] sm:$0xff] %vm269_vm0, %v12911_v57  ;;  %2475 = vperm.xlu1 %12881, %v10898_v47   ;;  %2470 = vperm.xlu0 %12880, %v10897_v2  }
 0x21d   : > { %313 = vst.msk [vmem:[#allocation2 + $0x150] sm:$0xff] %vm269_vm0, %v12911_v57  ;;  %314 = vst.msk [vmem:[#allocation2 + $0x158] sm:$0xff] %vm269_vm0, %v12911_v57 }
 0x21e   : > { %316 = vst.msk [vmem:[#allocation2 + $0x168] sm:$0xff] %vm269_vm0, %v12911_v57  ;;  %317 = vst.msk [vmem:[#allocation2 + $0x170] sm:$0xff] %vm269_vm0, %v12911_v57 }
 0x21f   : > { %319 = vst.msk [vmem:[#allocation2 + $0x180] sm:$0xff] %vm269_vm0, %v12911_v57  ;;  %320 = vst.msk [vmem:[#allocation2 + $0x188] sm:$0xff] %vm269_vm0, %v12911_v57  ;;  %v13967_v49 = vpop.permute.xlu1 %1963  ;;  %v13969_v52 = vpop.permute.xlu0 %1958 }
 0x220   : > { %322 = vst.msk [vmem:[#allocation2 + $0x198] sm:$0xff] %vm269_vm0, %v12911_v57  ;;  %323 = vst.msk [vmem:[#allocation2 + $0x1a0] sm:$0xff] %vm269_vm0, %v12911_v57  ;;  %2485 = vperm.xlu1 %12881, %v10900_v63   ;;  %v2829_v63 = vld [vmem:[#allocation2 + $0x1] sm:$0xff] }
 0x221   : > { %276 = vst.msk [vmem:[#allocation2 + $0x28] sm:$0x3] %vm272_vm1, %v12911_v57  ;;  %273 = vst.msk [vmem:[#allocation2 + $0x10] sm:$0x3] %vm272_vm1, %v12911_v57 }
 0x222   : > { %279 = vst.msk [vmem:[#allocation2 + $0x40] sm:$0x3] %vm272_vm1, %v12911_v57  ;;  %282 = vst.msk [vmem:[#allocation2 + $0x58] sm:$0x3] %vm272_vm1, %v12911_v57 }
 0x223   : > { %285 = vst.msk [vmem:[#allocation2 + $0x70] sm:$0x3] %vm272_vm1, %v12911_v57  ;;  %288 = vst.msk [vmem:[#allocation2 + $0x88] sm:$0x3] %vm272_vm1, %v12911_v57  ;;  %v13978_v47 = vpop.permute.xlu0 %1968 }
 0x224   : > { %291 = vst.msk [vmem:[#allocation2 + $0xa0] sm:$0x3] %vm272_vm1, %v12911_v57  ;;  %294 = vst.msk [vmem:[#allocation2 + $0xb8] sm:$0x3] %vm272_vm1, %v12911_v57  ;;  %2495 = vperm.xlu1 %12881, %v10902_v53  }
 0x225   : > { %297 = vst.msk [vmem:[#allocation2 + $0xd0] sm:$0x3] %vm272_vm1, %v12911_v57  ;;  %300 = vst.msk [vmem:[#allocation2 + $0xe8] sm:$0x3] %vm272_vm1, %v12911_v57 }
 0x226   : > { %303 = vst.msk [vmem:[#allocation2 + $0x100] sm:$0x3] %vm272_vm1, %v12911_v57  ;;  %306 = vst.msk [vmem:[#allocation2 + $0x118] sm:$0x3] %vm272_vm1, %v12911_v57 }
 0x227   : > { %309 = vst.msk [vmem:[#allocation2 + $0x130] sm:$0x3] %vm272_vm1, %v12911_v57  ;;  %312 = vst.msk [vmem:[#allocation2 + $0x148] sm:$0x3] %vm272_vm1, %v12911_v57 }
 0x228   : > { %315 = vst.msk [vmem:[#allocation2 + $0x160] sm:$0x3] %vm272_vm1, %v12911_v57  ;;  %318 = vst.msk [vmem:[#allocation2 + $0x178] sm:$0x3] %vm272_vm1, %v12911_v57 }
 0x229   : > { %321 = vst.msk [vmem:[#allocation2 + $0x190] sm:$0x3] %vm272_vm1, %v12911_v57  ;;  %324 = vst.msk [vmem:[#allocation2 + $0x1a8] sm:$0x3] %vm272_vm1, %v12911_v57  ;;  %v10899_v57 = vld [vmem:[%s12963_s26 + $0x7a] sm:$0xff] }
 0x22a   : > { %18253 = vst [vmem:[#allocation173_spill] sm:$0xff] %v13955_v48  ;;  %18254 = vst [vmem:[#allocation174_spill] sm:$0xff] %v13957_v56  ;;  %2480 = vperm.xlu0 %12880, %v10899_v57   ;;  %v10903_v56 = vld [vmem:[%s12963_s26 + $0xaa] sm:$0xff] }
 0x22b   : > { %18255 = vst [vmem:[#allocation175_spill] sm:$0xff] %v13961_v27  ;;  %18256 = vst [vmem:[#allocation176_spill] sm:$0xff] %v13963_v26  ;;  %v2877_v27 = vld [vmem:[%s17967_s4 + $0x4] sm:$0xf]  ;;  %v13976_v26 = vpop.permute.xlu1 %1973  ;;  %v10906_v48 = vld [vmem:[%s12963_s26 + $0xca] sm:$0xff] }
 0x22c   : > { %18257 = vst [vmem:[#allocation177_spill] sm:$0xff] %v13967_v49  ;;  %18258 = vst [vmem:[#allocation178_spill] sm:$0xff] %v13969_v52  ;;  %12851 = vmatprep.subr.msk.bf16.mxu0 %vm2926_vm2, %v2877_v27  ;;  %v2928_v2 = vsel %vm2926_vm2, %v2877_v27, 0  ;;  %v2830_v52 = vld [vmem:[#allocation2 + $0x9] sm:$0xff]  ;;  %v10904_v49 = vld [vmem:[%s12963_s26 + $0xb2] sm:$0xff] }
 0x22d   : > { %18259 = vst [vmem:[#allocation179_spill] sm:$0xff] %v13976_v26  ;;  %18260 = vst [vmem:[#allocation180_spill] sm:$0xff] %v13978_v47  ;;  %v2861_v57 = vpack.c.bf16 %v2830_v52, %v2829_v63  ;;  %11728 = vmatpush3.bf16.msra.mxu0 %v2928_v2  ;;  %v13987_v47 = vpop.permute.xlu0 %1978  ;;  %2505 = vperm.xlu1 %12881, %v10904_v49   ;;  %v10905_v27 = vld [vmem:[%s12963_s26 + $0xc2] sm:$0xff]  ;;  %v10725_v52 = vld [vmem:[%s17965_s2] ss:$0 sm:$0xff] }
 0x22e   : > { %2490 = vperm.xlu0 %12880, %v10901_v59   ;;  %18262 = vst [vmem:[#allocation182_spill] sm:$0xff] %v13987_v47  ;;  %v10908_v59 = vld [vmem:[%s12963_s26 + $0xe2] sm:$0xff]  ;;  %v10907_v2 = vld [vmem:[%s12963_s26 + $0xda] sm:$0xff]  ;;  %v527_v33 = vmul.f32 %v10725_v52, %v18271_v50  ;;  %v14014_v44 = vmul.f32 %v10725_v52, %v18272_v45  ;;  %v14032_v45 = vmul.f32 %v10725_v52, %v18278_v42 }
 0x22f   : > { %11729 = vmatprep.mubr.msk.bf16.mxu0 %vm269_vm0, %v2861_v57  ;;  %v13985_v26 = vpop.permute.xlu1 %1983  ;;  %v18269_v47 = vld [vmem:[#allocation12_spill] sm:$0xff]  ;;  %v14053_v42 = vld [vmem:[%s17965_s2 + $0x1] ss:$0 sm:$0xff]  ;;  %v14070_v28 = vmul.f32 %v10725_v52, %v18289_v30 }
 0x230   : > { %18261 = vst [vmem:[#allocation181_spill] sm:$0xff] %v13985_v26  ;;  %v784_v30 = vmul.f32 %v14053_v42, %v13395_v62 }
 0x231   : > { %v13993_v53 = vpop.permute.xlu0 %1988  ;;  %2515 = vperm.xlu1 %12881, %v10906_v48   ;;  %v525_v48 = vmul.f32 %v10725_v52, %v18269_v47 }
 0x232   : > { %2500 = vperm.xlu0 %12880, %v10903_v56   ;;  %18264 = vst [vmem:[#allocation184_spill] sm:$0xff] %v13993_v53  ;;  %v18267_v56 = vld [vmem:[#allocation8_spill] sm:$0xff] }
 0x233   : > { %v13991_v51 = vpop.permute.xlu1 %1993  ;;  %v14005_v57 = vmul.f32 %v10725_v52, %v18267_v56  ;;  %v18274_v56 = vld [vmem:[#allocation21_spill] sm:$0xff] }
 0x234   : > { %18263 = vst [vmem:[#allocation183_spill] sm:$0xff] %v13991_v51  ;;  %v18268_v51 = vld [vmem:[#allocation9_spill] sm:$0xff]  ;;  %v14020_v43 = vmul.f32 %v10725_v52, %v18274_v56 }
 0x235   : > { %v14002_v49 = vpop.permute.xlu0 %1998  ;;  %2525 = vperm.xlu1 %12881, %v10908_v59   ;;  %v522_v53 = vmul.f32 %v10725_v52, %v18268_v51  ;;  %v18275_v59 = vld [vmem:[#allocation24_spill] sm:$0xff]  ;;  %v18276_v51 = vld [vmem:[#allocation25_spill] sm:$0xff] }
 0x236   : > { %2510 = vperm.xlu0 %12880, %v10905_v27   ;;  %18266 = vst [vmem:[#allocation186_spill] sm:$0xff] %v14002_v49  ;;  %v18270_v27 = vld [vmem:[#allocation13_spill] sm:$0xff]  ;;  %v14026_v47 = vmul.f32 %v10725_v52, %v18276_v51  ;;  %v18283_v51 = vld [vmem:[#allocation36_spill] sm:$0xff] }
 0x237   : > { %v14000_v63 = vpop.permute.xlu1 %2003  ;;  %v523_v26 = vmul.f32 %v10725_v52, %v18270_v27  ;;  %v18277_v27 = vld [vmem:[#allocation28_spill] sm:$0xff]  ;;  %v14045_v38 = vmul.f32 %v10725_v52, %v18283_v51  ;;  %v18288_v51 = vld [vmem:[#allocation45_spill] sm:$0xff] }
 0x238   : > { %18265 = vst [vmem:[#allocation185_spill] sm:$0xff] %v14000_v63  ;;  %v18273_v63 = vld [vmem:[#allocation20_spill] sm:$0xff]  ;;  %v14029_v50 = vmul.f32 %v10725_v52, %v18277_v27  ;;  %v14048_v27 = vmul.f32 %v10725_v52, %v18284_v37  ;;  %v14065_v36 = vmul.f32 %v10725_v52, %v18288_v51  ;;  %v18297_v51 = vld [vmem:[#allocation57_spill] sm:$0xff] }
 0x239   : > { %v14017_v49 = vmul.f32 %v10725_v52, %v18273_v63  ;;  %v14035_v63 = vmul.f32 %v10725_v52, %v18279_v41  ;;  %v14039_v56 = vpop.permute.xlu0 %2008  ;;  %2535 = vperm.xlu1 %12881, %v10910_v58   ;;  %v18285_v41 = vld [vmem:[#allocation40_spill] sm:$0xff]  ;;  %v14073_v58 = vmul.f32 %v10725_v52, %v18290_v22  ;;  %v14085_v29 = vmul.f32 %v10725_v52, %v18297_v51 }
 0x23a   : > { %2520 = vperm.xlu0 %12880, %v10907_v2   ;;  %v14023_v2 = vmul.f32 %v10725_v52, %v18275_v59  ;;  %18281 = vst [vmem:[#allocation9_spill] sm:$0xff] %v14039_v56  ;;  %v18282_v59 = vld [vmem:[#allocation33_spill] sm:$0xff]  ;;  %v10912_v37 = vld [vmem:[%s12963_s26 + $0x112] sm:$0xff]  ;;  %v783_v22 = vmul.f32 %v14053_v42, %v18299_v25  ;;  %v786_v51 = vmul.f32 %v14053_v42, %v13401_v4  ;;  %v18309_v4 = vld [vmem:[#allocation66_spill] sm:$0xff] }
 0x23b   : > { %v14037_v40 = vpop.permute.xlu1 %2013  ;;  %v14042_v39 = vmul.f32 %v10725_v52, %v18282_v59  ;;  %v18286_v56 = vld [vmem:[#allocation41_spill] sm:$0xff]  ;;  %v18287_v59 = vld [vmem:[#allocation44_spill] sm:$0xff]  ;;  %18298 = vst [vmem:[#allocation17_spill] sm:$0xff] %v14085_v29  ;;  %v18306_v29 = vld [vmem:[#allocation63_spill] sm:$0xff] }
 0x23c   : > { %18280 = vst [vmem:[#allocation8_spill] sm:$0xff] %v14037_v40  ;;  %v14056_v40 = vmul.f32 %v10725_v52, %v18285_v41  ;;  %v14059_v55 = vmul.f32 %v10725_v52, %v18286_v56  ;;  %v14062_v54 = vmul.f32 %v10725_v52, %v18287_v59  ;;  %v14079_v56 = vmul.f32 %v10725_v52, %v18293_v32  ;;  %v18302_v32 = vld [vmem:[#allocation60_spill] sm:$0xff] }
 0x23d   : > { %v14082_v59 = vmul.f32 %v10725_v52, %v18295_v31  ;;  %2545 = vperm.xlu1 %12881, %v10912_v37   ;;  %v14104_v62 = vmul.f32 %v10725_v52, %v18306_v29  ;;  %v14119_v37 = vmul.f32 %v10725_v52, %v18309_v4  ;;  %v787_v29 = vmul.f32 %v14053_v42, %v13409_v60 }
 0x23e   : > { %2530 = vperm.xlu0 %12880, %v10909_v46   ;;  %v18291_v46 = vld [vmem:[#allocation52_spill] sm:$0xff]  ;;  %18294 = vst [vmem:[#allocation13_spill] sm:$0xff] %v14079_v56  ;;  %v14096_v56 = vmul.f32 %v10725_v52, %v18302_v32  ;;  %v788_v32 = vmul.f32 %v14053_v42, %v13407_v61  ;;  %v789_v61 = vmul.f32 %v14053_v42, %v13415_v3 }
 0x23f   : > { %v14076_v41 = vmul.f32 %v10725_v52, %v18291_v46  ;;  %18296 = vst [vmem:[#allocation16_spill] sm:$0xff] %v14082_v59  ;;  %v14091_v24 = vpop.permute.xlu1 %2023  ;;  %v14093_v46 = vpop.permute.xlu0 %2018  ;;  %v18307_v59 = vld [vmem:[#allocation64_spill] sm:$0xff]  ;;  %v14137_v60 = vadd.f32 %v786_v51, %v525_v48  ;;  %v796_v48 = vmul.f32 %v14053_v42, %v13431_v8 }
 0x240   : > { %18300 = vst [vmem:[#allocation20_spill] sm:$0xff] %v14091_v24  ;;  %18301 = vst [vmem:[#allocation21_spill] sm:$0xff] %v14093_v46  ;;  %v14107_v25 = vmul.f32 %v10725_v52, %v18307_v59  ;;  %v785_v46 = vmul.f32 %v14053_v42, %v13403_v34  ;;  %v10914_v24 = vld [vmem:[%s12963_s26 + $0x12a] sm:$0xff]  ;;  %v14125_v59 = vadd.f32 %v784_v30, %v523_v26  ;;  %v10916_v30 = vld [vmem:[%s12963_s26 + $0x142] sm:$0xff] }
 0x241   : > { %18292 = vst [vmem:[#allocation12_spill] sm:$0xff] %v14076_v41  ;;  %18303 = vst [vmem:[#allocation24_spill] sm:$0xff] %v14096_v56  ;;  %v18304_v41 = vld [vmem:[#allocation61_spill] sm:$0xff]  ;;  %v14127_v34 = vadd.f32 %v783_v22, %v522_v53  ;;  %v794_v26 = vmul.f32 %v14053_v42, %v13425_v6  ;;  %2555 = vperm.xlu1 %12881, %v10914_v24   ;;  %v14146_v3 = vadd.f32 %v788_v32, %v527_v33 }
 0x242   : > { %v14099_v31 = vmul.f32 %v10725_v52, %v18304_v41  ;;  %2540 = vperm.xlu0 %12880, %v10911_v35   ;;  %v10913_v41 = vld [vmem:[%s12963_s26 + $0x122] sm:$0xff]  ;;  %v790_v35 = vmul.f32 %v14053_v42, %v13413_v0  ;;  %v791_v0 = vmul.f32 %v14053_v42, %v13421_v5  ;;  %v14144_v53 = vadd.f32 %v785_v46, %v14005_v57  ;;  %v10915_v22 = vld [vmem:[%s12963_s26 + $0x13a] sm:$0xff] }
 0x243   : > { %v14135_v4 = vpop.permute.xlu0 %2028  ;;  %v14155_v5 = vadd.f32 %v787_v29, %v14014_v44  ;;  %v795_v24 = vmul.f32 %v14053_v42, %v13433_v9  ;;  %v798_v33 = vmul.f32 %v14053_v42, %v13437_v10  ;;  %v797_v44 = vmul.f32 %v14053_v42, %v13439_v11  ;;  %v10918_v51 = vld [vmem:[%s12963_s26 + $0x15a] sm:$0xff] }
 0x244   : > { %18305 = vst [vmem:[#allocation25_spill] sm:$0xff] %v14099_v31  ;;  %v18308_v31 = vld [vmem:[#allocation65_spill] sm:$0xff]  ;;  %18311 = vst [vmem:[#allocation29_spill] sm:$0xff] %v14135_v4  ;;  %v14158_v6 = vadd.f32 %v790_v35, %v14017_v49  ;;  %v800_v49 = vmul.f32 %v14053_v42, %v13443_v12  ;;  %v14179_v10 = vadd.f32 %v791_v0, %v14026_v47  ;;  %v18316_v29 = vld [vmem:[#allocation68_spill] sm:$0xff] }
 0x245   : > { %v14116_v56 = vmul.f32 %v10725_v52, %v18308_v31  ;;  %v792_v31 = vmul.f32 %v14053_v42, %v13419_v1  ;;  %v14133_v52 = vpop.permute.xlu1 %2033  ;;  %v793_v1 = vmul.f32 %v14053_v42, %v13427_v7  ;;  %v14165_v7 = vadd.f32 %v789_v61, %v14020_v43  ;;  %2565 = vperm.xlu1 %12881, %v10916_v30   ;;  %v10919_v61 = vld [vmem:[%s12963_s26 + $0x16a] sm:$0xff]  ;;  %v18320_v30 = vld [vmem:[#allocation13_spill] sm:$0xff] }
 0x246   : > { %18310 = vst [vmem:[#allocation28_spill] sm:$0xff] %v14133_v52  ;;  %2550 = vperm.xlu0 %12880, %v10913_v41   ;;  %v14182_v43 = vadd.f32 %v794_v26, %v14029_v50  ;;  %v14190_v12 = vadd.f32 %v796_v48, %v14035_v63  ;;  %v802_v46 = vmul.f32 %v14053_v42, %v13449_v14  ;;  %v10917_v50 = vld [vmem:[%s12963_s26 + $0x152] sm:$0xff]  ;;  %v18318_v26 = vld [vmem:[#allocation70_spill] sm:$0xff] }
 0x247   : > { %v14168_v8 = vadd.f32 %v792_v31, %v14023_v2  ;;  %v14176_v9 = vpop.permute.xlu0 %2038  ;;  %v799_v2 = vmul.f32 %v14053_v42, %v13445_v13  ;;  %v14187_v11 = vadd.f32 %v793_v1, %v14032_v45  ;;  %v801_v47 = vmul.f32 %v14053_v42, %v13451_v15  ;;  %v18391_v4 = vld [vmem:[#allocation51_spill] sm:$0xff]  ;;  %v5436_v52 = vld [vmem:[%s14348_s13 + $0x78] sm:$0xff] }
 0x248   : > { %18313 = vst [vmem:[#allocation33_spill] sm:$0xff] %v14176_v9  ;;  %v14199_v32 = vadd.f32 %v795_v24, %v14042_v39  ;;  %v14202_v13 = vadd.f32 %v798_v33, %v14045_v38  ;;  %v804_v45 = vmul.f32 %v14053_v42, %v13455_v16  ;;  %v803_v63 = vmul.f32 %v14053_v42, %v13457_v17  ;;  %v18321_v24 = vld [vmem:[#allocation71_spill] sm:$0xff]  ;;  %v18388_v9 = vld [vmem:[#allocation46_spill] sm:$0xff] }
 0x249   : > { %v14174_v57 = vpop.permute.xlu1 %2043  ;;  %v14209_v41 = vadd.f32 %v797_v44, %v14048_v27  ;;  %v14212_v14 = vadd.f32 %v800_v49, %v14056_v40  ;;  %v806_v15 = vmul.f32 %v14053_v42, %v13461_v18  ;;  %v805_v38 = vmul.f32 %v14053_v42, %v13463_v19  ;;  %2575 = vperm.xlu1 %12881, %v10918_v51  }
 0x24a   : > { %18312 = vst [vmem:[#allocation32_spill] sm:$0xff] %v14174_v57  ;;  %2560 = vperm.xlu0 %12880, %v10915_v22   ;;  %v14223_v17 = vadd.f32 %v799_v2, %v14059_v55  ;;  %v808_v27 = vmul.f32 %v14053_v42, %v13467_v20  ;;  %v807_v40 = vmul.f32 %v14053_v42, %v13469_v21  ;;  %v14242_v20 = vld [vmem:[%s17965_s2 + $0x2] ss:$0 sm:$0xff]  ;;  %v10920_v21 = vld [vmem:[%s12963_s26 + $0x172] sm:$0xff] }
 0x24b   : > { %v14220_v16 = vpop.permute.xlu0 %2048  ;;  %v14230_v18 = vadd.f32 %v802_v46, %v14062_v54  ;;  %v14233_v19 = vadd.f32 %v801_v47, %v14065_v36  ;;  %v810_v35 = vmul.f32 %v14053_v42, %v18316_v29  ;;  %v809_v55 = vmul.f32 %v14053_v42, %v13475_v23  ;;  %v18317_v36 = vld [vmem:[#allocation69_spill] sm:$0xff]  ;;  %v18319_v23 = vld [vmem:[#allocation12_spill] sm:$0xff]  ;;  %v18330_v29 = vld [vmem:[#allocation74_spill] sm:$0xff] }
 0x24c   : > { %18315 = vst [vmem:[#allocation37_spill] sm:$0xff] %v14220_v16  ;;  %v14247_v31 = vadd.f32 %v804_v45, %v14070_v28  ;;  %v14250_v54 = vadd.f32 %v803_v63, %v14073_v58  ;;  %v812_v0 = vmul.f32 %v14053_v42, %v18317_v36  ;;  %v811_v1 = vmul.f32 %v14053_v42, %v18318_v26  ;;  %v18322_v28 = vld [vmem:[#allocation72_spill] sm:$0xff]  ;;  %v18326_v47 = vld [vmem:[#allocation17_spill] sm:$0xff]  ;;  %v18331_v26 = vld [vmem:[#allocation75_spill] sm:$0xff] }
 0x24d   : > { %v14218_v39 = vpop.permute.xlu1 %2053  ;;  %v14257_v48 = vadd.f32 %v806_v15, %v18319_v23  ;;  %v14260_v22 = vadd.f32 %v805_v38, %v18320_v30  ;;  %v814_v33 = vmul.f32 %v14053_v42, %v18321_v24  ;;  %v813_v44 = vmul.f32 %v14053_v42, %v18322_v28  ;;  %v18325_v2 = vld [vmem:[#allocation16_spill] sm:$0xff]  ;;  %2585 = vperm.xlu1 %12881, %v10920_v21   ;;  %v18329_v38 = vld [vmem:[#allocation25_spill] sm:$0xff]  ;;  %v18334_v28 = vld [vmem:[#allocation78_spill] sm:$0xff] }
 0x24e   : > { %18314 = vst [vmem:[#allocation36_spill] sm:$0xff] %v14218_v39  ;;  %2570 = vperm.xlu0 %12880, %v10917_v50   ;;  %v14271_v46 = vadd.f32 %v808_v27, %v18325_v2  ;;  %v14274_v51 = vadd.f32 %v807_v40, %v18326_v47  ;;  %v18327_v50 = vld [vmem:[#allocation73_spill] sm:$0xff]  ;;  %v18328_v63 = vld [vmem:[#allocation24_spill] sm:$0xff]  ;;  %v14282_v42 = vadd.f32 %v809_v55, %v18329_v38  ;;  %v5432_v16 = vld [vmem:[%s14348_s13 + $0x48] sm:$0xff] }
 0x24f   : > { %v14268_v49 = vpop.permute.xlu0 %2058  ;;  %v1045_v45 = vmul.f32 %v14242_v20, %v18327_v50  ;;  %v14279_v15 = vadd.f32 %v810_v35, %v18328_v63  ;;  %v1044_v36 = vmul.f32 %v14242_v20, %v18330_v29  ;;  %v1047_v27 = vmul.f32 %v14242_v20, %v18331_v26  ;;  %v18332_v21 = vld [vmem:[#allocation76_spill] sm:$0xff]  ;;  %v18333_v35 = vld [vmem:[#allocation77_spill] sm:$0xff]  ;;  %v18342_v26 = vld [vmem:[#allocation82_spill] sm:$0xff] }
 0x250   : > { %18324 = vst [vmem:[#allocation41_spill] sm:$0xff] %v14268_v49  ;;  %v14289_v40 = vadd.f32 %v812_v0, %v14104_v62  ;;  %v14292_v23 = vadd.f32 %v811_v1, %v14107_v25  ;;  %v1049_v30 = vmul.f32 %v14242_v20, %v18333_v35  ;;  %v14299_v55 = vadd.f32 %v814_v33, %v14116_v56  ;;  %v18335_v0 = vld [vmem:[#allocation79_spill] sm:$0xff]  ;;  %v18338_v56 = vld [vmem:[#allocation80_spill] sm:$0xff]  ;;  %v18339_v50 = vld [vmem:[#allocation81_spill] sm:$0xff] }
 0x251   : > { %v14266_v58 = vpop.permute.xlu1 %2063  ;;  %v14302_v24 = vadd.f32 %v813_v44, %v14119_v37  ;;  %v1048_v62 = vmul.f32 %v14242_v20, %v18334_v28  ;;  %v1051_v25 = vmul.f32 %v14242_v20, %v18335_v0  ;;  %v14313_v47 = vadd.f32 %v1045_v45, %v14125_v59  ;;  %v18340_v44 = vld [vmem:[#allocation103_spill] sm:$0xff]  ;;  %v18341_v63 = vld [vmem:[#allocation104_spill] sm:$0xff]  ;;  %v10924_v35 = vld [vmem:[%s12963_s26 + $0x1a2] sm:$0xff] }
 0x252   : > { %18323 = vst [vmem:[#allocation40_spill] sm:$0xff] %v14266_v58  ;;  %2580 = vperm.xlu0 %12880, %v10919_v61   ;;  %v1046_v61 = vmul.f32 %v14242_v20, %v18332_v21  ;;  %v1050_v33 = vmul.f32 %v14242_v20, %v18338_v56  ;;  %v1053_v37 = vmul.f32 %v14242_v20, %v18339_v50  ;;  %v18343_v45 = vld [vmem:[#allocation83_spill] sm:$0xff]  ;;  %v10923_v28 = vld [vmem:[%s12963_s26 + $0x19a] sm:$0xff]  ;;  %v18375_v58 = vld [vmem:[#allocation22_spill] sm:$0xff] }
 0x253   : > { %v14310_v2 = vpop.permute.xlu0 %2068  ;;  %2595 = vperm.xlu1 %12881, %v18340_v44   ;;  %v14322_v38 = vadd.f32 %v1044_v36, %v14127_v34  ;;  %v14325_v29 = vadd.f32 %v1047_v27, %v14137_v60  ;;  %v1052_v59 = vmul.f32 %v14242_v20, %v18342_v26  ;;  %v1055_v21 = vmul.f32 %v14242_v20, %v18343_v45  ;;  %v18344_v50 = vld [vmem:[#allocation84_spill] sm:$0xff]  ;;  %v18345_v36 = vld [vmem:[#allocation85_spill] sm:$0xff]  ;;  %v18382_v39 = vld [vmem:[#allocation35_spill] sm:$0xff] }
 0x254   : > { %18337 = vst [vmem:[#allocation45_spill] sm:$0xff] %v14310_v2  ;;  %v14334_v0 = vadd.f32 %v1046_v61, %v14144_v53  ;;  %v14337_v56 = vadd.f32 %v1049_v30, %v14146_v3  ;;  %v1054_v34 = vmul.f32 %v14242_v20, %v18344_v50  ;;  %v1057_v60 = vmul.f32 %v14242_v20, %v18345_v36  ;;  %v18346_v3 = vld [vmem:[#allocation86_spill] sm:$0xff]  ;;  %v18347_v30 = vld [vmem:[#allocation87_spill] sm:$0xff]  ;;  %v18351_v36 = vld [vmem:[#allocation89_spill] sm:$0xff] }
 0x255   : > { %v14308_v1 = vpop.permute.xlu1 %2073  ;;  %v14351_v27 = vadd.f32 %v1048_v62, %v14155_v5  ;;  %v14354_v53 = vadd.f32 %v1051_v25, %v14158_v6  ;;  %v1056_v61 = vmul.f32 %v14242_v20, %v18346_v3  ;;  %v1059_v44 = vmul.f32 %v14242_v20, %v18347_v30  ;;  %v18350_v62 = vld [vmem:[#allocation88_spill] sm:$0xff]  ;;  %v18352_v30 = vld [vmem:[#allocation90_spill] sm:$0xff] }
 0x256   : > { %18336 = vst [vmem:[#allocation44_spill] sm:$0xff] %v14308_v1  ;;  %2590 = vperm.xlu0 %12880, %v18341_v63   ;;  %v14365_v45 = vadd.f32 %v1050_v33, %v14165_v7  ;;  %v14368_v5 = vadd.f32 %v1053_v37, %v14168_v8  ;;  %v1058_v6 = vmul.f32 %v14242_v20, %v18350_v62  ;;  %v5427_v33 = vld [vmem:[%s14348_s13 + $0x8] sm:$0xff]  ;;  %v5426_v8 = vld [vmem:[%s14348_s13] sm:$0xff]  ;;  %v5428_v2 = vld [vmem:[%s14348_s13 + $0x18] sm:$0xff] }
 0x257   : > { %v14362_v26 = vpop.permute.xlu0 %2078  ;;  %2605 = vperm.xlu1 %12881, %v10924_v35   ;;  %v14373_v25 = vadd.f32 %v1052_v59, %v14179_v10  ;;  %v14376_v50 = vadd.f32 %v1055_v21, %v14182_v43  ;;  %v1061_v3 = vmul.f32 %v14242_v20, %v18351_v36  ;;  %v1060_v7 = vmul.f32 %v14242_v20, %v18352_v30  ;;  %v18354_v59 = vld [vmem:[#allocation92_spill] sm:$0xff]  ;;  %v18355_v36 = vld [vmem:[#allocation93_spill] sm:$0xff] }
 0x258   : > { %18349 = vst [vmem:[#allocation49_spill] sm:$0xff] %v14362_v26  ;;  %v14385_v37 = vadd.f32 %v1054_v34, %v14187_v11  ;;  %v14388_v35 = vadd.f32 %v1057_v60, %v14190_v12  ;;  %v1062_v43 = vmul.f32 %v14242_v20, %v18354_v59  ;;  %v14395_v21 = vadd.f32 %v1056_v61, %v14199_v32  ;;  %v18356_v34 = vld [vmem:[#allocation94_spill] sm:$0xff]  ;;  %v18357_v59 = vld [vmem:[#allocation95_spill] sm:$0xff]  ;;  %v18358_v61 = vld [vmem:[#allocation96_spill] sm:$0xff] }
 0x259   : > { %v14360_v63 = vpop.permute.xlu1 %2083  ;;  %v14398_v62 = vadd.f32 %v1059_v44, %v14202_v13  ;;  %v1065_v11 = vmul.f32 %v14242_v20, %v18355_v36  ;;  %v1064_v12 = vmul.f32 %v14242_v20, %v18356_v34  ;;  %v1067_v32 = vmul.f32 %v14242_v20, %v18357_v59  ;;  %v18359_v34 = vld [vmem:[#allocation97_spill] sm:$0xff]  ;;  %v18367_v49 = vld [vmem:[#allocation100_spill] sm:$0xff] }
 0x25a   : > { %18348 = vst [vmem:[#allocation48_spill] sm:$0xff] %v14360_v63  ;;  %2600 = vperm.xlu0 %12880, %v10923_v28   ;;  %v18353_v28 = vld [vmem:[#allocation91_spill] sm:$0xff]  ;;  %v1066_v13 = vmul.f32 %v14242_v20, %v18358_v61  ;;  %v14416_v44 = vadd.f32 %v1061_v3, %v14212_v14  ;;  %v14419_v36 = vadd.f32 %v1060_v7, %v14223_v17  ;;  %v18360_v63 = vld [vmem:[#allocation98_spill] sm:$0xff]  ;;  %v14440_v7 = vld [vmem:[%s17965_s2 + $0x3] ss:$0 sm:$0xff] }
 0x25b   : > { %v1063_v10 = vmul.f32 %v14242_v20, %v18353_v28  ;;  %v14406_v30 = vpop.permute.xlu0 %2189  ;;  %v14409_v28 = vadd.f32 %v1058_v6, %v14209_v41  ;;  %5466 = vperm.xlu1 %12881, %v5427_v33   ;;  %v1069_v26 = vmul.f32 %v14242_v20, %v18359_v34  ;;  %v1068_v41 = vmul.f32 %v14242_v20, %v18360_v63  ;;  %v5429_v6 = vld [vmem:[%s14348_s13 + $0x20] sm:$0xff]  ;;  %v18362_v3 = vld [vmem:[#allocation99_spill] sm:$0xff] }
 0x25c   : > { %v14431_v33 = vadd.f32 %v1062_v43, %v14233_v19  ;;  %v1070_v17 = vmul.f32 %v14242_v20, %v18362_v3  ;;  %v14443_v63 = vadd.f32 %v1065_v11, %v14247_v31  ;;  %v18363_v19 = vld [vmem:[#allocation4_spill] sm:$0xff]  ;;  %v18364_v43 = vld [vmem:[#allocation5_spill] sm:$0xff]  ;;  %v14457_v3 = vadd.f32 %v1067_v32, %v14257_v48  ;;  %v18365_v11 = vld [vmem:[#allocation6_spill] sm:$0xff] }
 0x25d   : > { %v14404_v60 = vpop.permute.xlu1 %2194  ;;  %v14428_v59 = vadd.f32 %v1063_v10, %v14230_v18  ;;  %v14446_v18 = vadd.f32 %v1064_v12, %v14250_v54  ;;  %v1073_v10 = vmul.f32 %v14242_v20, %v18363_v19  ;;  %v1072_v61 = vmul.f32 %v14242_v20, %v18364_v43  ;;  %v18366_v43 = vld [vmem:[#allocation7_spill] sm:$0xff]  ;;  %v5431_v32 = vld [vmem:[%s14348_s13 + $0x38] sm:$0xff] }
 0x25e   : > { %5461 = vperm.xlu0 %12880, %v5426_v8   ;;  %v18361_v8 = vld [vmem:[#allocation3_spill] sm:$0xff]  ;;  %v14460_v31 = vadd.f32 %v1066_v13, %v14260_v22  ;;  %v1075_v54 = vmul.f32 %v14242_v20, %v18365_v11  ;;  %v14465_v12 = vadd.f32 %v1069_v26, %v14271_v46  ;;  %v14468_v19 = vadd.f32 %v1068_v41, %v14274_v51  ;;  %v18369_v26 = vld [vmem:[#allocation10_spill] sm:$0xff] }
 0x25f   : > { %v1071_v14 = vmul.f32 %v14242_v20, %v18361_v8  ;;  %v14454_v8 = vpop.permute.xlu0 %2199  ;;  %5476 = vperm.xlu1 %12881, %v5429_v6   ;;  %v1074_v1 = vmul.f32 %v14242_v20, %v18366_v43  ;;  %v1307_v48 = vmul.f32 %v14440_v7, %v18367_v49  ;;  %v5430_v22 = vld [vmem:[%s14348_s13 + $0x30] sm:$0xff]  ;;  %v14480_v6 = vadd.f32 %v1070_v17, %v14282_v42 }
 0x260   : > { %v1309_v51 = vmul.f32 %v14440_v7, %v18369_v26  ;;  %v14487_v20 = vadd.f32 %v1073_v10, %v14289_v40  ;;  %v14490_v49 = vadd.f32 %v1072_v61, %v14292_v23  ;;  %v18370_v41 = vld [vmem:[#allocation11_spill] sm:$0xff]  ;;  %v14501_v43 = vadd.f32 %v1075_v54, %v14299_v55  ;;  %v18373_v10 = vld [vmem:[#allocation18_spill] sm:$0xff] }
 0x261   : > { %v14452_v34 = vpop.permute.xlu1 %2204  ;;  %v14477_v13 = vadd.f32 %v1071_v14, %v14279_v15  ;;  %v1308_v15 = vmul.f32 %v14440_v7, %v18370_v41  ;;  %v18371_v14 = vld [vmem:[#allocation14_spill] sm:$0xff]  ;;  %v1313_v23 = vmul.f32 %v14440_v7, %v18373_v10  ;;  %v14508_v61 = vadd.f32 %v1074_v1, %v14302_v24  ;;  %v18374_v41 = vld [vmem:[#allocation19_spill] sm:$0xff] }
 0x262   : > { %5471 = vperm.xlu0 %12880, %v5428_v2   ;;  %v18368_v2 = vld [vmem:[#allocation101_spill] sm:$0xff]  ;;  %v1311_v42 = vmul.f32 %v14440_v7, %v18371_v14  ;;  %v14511_v26 = vadd.f32 %v1307_v48, %v14313_v47  ;;  %v1312_v14 = vmul.f32 %v14440_v7, %v18374_v41  ;;  %v1315_v55 = vmul.f32 %v14440_v7, %v18375_v58  ;;  %v5433_v54 = vld [vmem:[%s14348_s13 + $0x50] sm:$0xff]  ;;  %v18377_v1 = vld [vmem:[#allocation26_spill] sm:$0xff] }
 0x263   : > { %v1306_v46 = vmul.f32 %v14440_v7, %v18368_v2  ;;  %v14498_v11 = vpop.permute.xlu0 %2209  ;;  %v18372_v2 = vld [vmem:[#allocation15_spill] sm:$0xff]  ;;  %5486 = vperm.xlu1 %12881, %v5431_v32   ;;  %v14523_v32 = vadd.f32 %v1309_v51, %v14325_v29  ;;  %v1317_v47 = vmul.f32 %v14440_v7, %v18377_v1  ;;  %v14530_v48 = vadd.f32 %v1308_v15, %v14334_v0 }
 0x264   : > { %v1310_v40 = vmul.f32 %v14440_v7, %v18372_v2  ;;  %v14533_v58 = vadd.f32 %v1311_v42, %v14337_v56  ;;  %v18378_v10 = vld [vmem:[#allocation27_spill] sm:$0xff]  ;;  %v14547_v0 = vadd.f32 %v1313_v23, %v14354_v53  ;;  %v14552_v42 = vadd.f32 %v1312_v14, %v14365_v45  ;;  %v5434_v53 = vld [vmem:[%s14348_s13 + $0x60] sm:$0xff] }
 0x265   : > { %v14496_v17 = vpop.permute.xlu1 %2214  ;;  %v14520_v2 = vadd.f32 %v1306_v46, %v14322_v38  ;;  %v1316_v38 = vmul.f32 %v14440_v7, %v18378_v10  ;;  %v18379_v46 = vld [vmem:[#allocation30_spill] sm:$0xff]  ;;  %v18380_v15 = vld [vmem:[#allocation31_spill] sm:$0xff]  ;;  %v14555_v1 = vadd.f32 %v1315_v55, %v14368_v5  ;;  %v14566_v23 = vld [vmem:[%s17967_s4] sm:$0xf]  ;;  %v14572_v45 = vadd.f32 %v1317_v47, %v14376_v50 }
 0x266   : > { %5481 = vperm.xlu0 %12880, %v5430_v22   ;;  %v18376_v22 = vld [vmem:[#allocation23_spill] sm:$0xff]  ;;  %v1319_v29 = vmul.f32 %v14440_v7, %v18379_v46  ;;  %v1318_v56 = vmul.f32 %v14440_v7, %v18380_v15  ;;  %v18381_v10 = vld [vmem:[#allocation34_spill] sm:$0xff]  ;;  %18383 = vst [vmem:[#allocation52_spill] sm:$0xff] %v14566_v23  ;;  %12852 = vmatprep.subr.msk.bf16.mxu0 %vm2926_vm2, %v14566_v23 }
 0x267   : > { %v1314_v24 = vmul.f32 %v14440_v7, %v18376_v22  ;;  %v14541_v41 = vpop.permute.xlu0 %2219  ;;  %v14544_v22 = vadd.f32 %v1310_v40, %v14351_v27  ;;  %5496 = vperm.xlu1 %12881, %v5433_v54   ;;  %v1321_v46 = vmul.f32 %v14440_v7, %v18381_v10  ;;  %v1320_v27 = vmul.f32 %v14440_v7, %v18382_v39  ;;  %v5435_v40 = vld [vmem:[%s14348_s13 + $0x68] sm:$0xff]  ;;  %v18385_v55 = vld [vmem:[#allocation39_spill] sm:$0xff] }
 0x268   : > { %v18384_v5 = vld [vmem:[#allocation38_spill] sm:$0xff]  ;;  %v1322_v54 = vmul.f32 %v14440_v7, %v18385_v55  ;;  %v14581_v39 = vadd.f32 %v1316_v38, %v14385_v37  ;;  %v18387_v47 = vld [vmem:[#allocation43_spill] sm:$0xff]  ;;  %v14595_v55 = vadd.f32 %v1318_v56, %v14395_v21  ;;  %v1327_v37 = vmul.f32 %v14440_v7, %v18388_v9  ;;  %v5437_v56 = vld [vmem:[%s14348_s13 + $0x80] sm:$0xff] }
 0x269   : > { %v14539_v51 = vpop.permute.xlu1 %2224  ;;  %v1323_v14 = vmul.f32 %v14440_v7, %v18384_v5  ;;  %v1324_v15 = vmul.f32 %v14440_v7, %v18387_v47  ;;  %v18389_v38 = vld [vmem:[#allocation47_spill] sm:$0xff]  ;;  %v18390_v47 = vld [vmem:[#allocation50_spill] sm:$0xff]  ;;  %v1328_v21 = vmul.f32 %v14440_v7, %v18391_v4 }
 0x26a   : > { %5491 = vperm.xlu0 %12880, %v5432_v16   ;;  %v14569_v16 = vadd.f32 %v1314_v24, %v14373_v25  ;;  %v14584_v25 = vadd.f32 %v1319_v29, %v14388_v35  ;;  %v18386_v24 = vld [vmem:[#allocation42_spill] sm:$0xff]  ;;  %v1326_v35 = vmul.f32 %v14440_v7, %v18389_v38  ;;  %v14602_v29 = vadd.f32 %v1321_v46, %v14398_v62  ;;  %v18393_v46 = vld [vmem:[#allocation55_spill] sm:$0xff] }
 0x26b   : > { %v1325_v50 = vmul.f32 %v14440_v7, %v18386_v24  ;;  %v14592_v5 = vpop.permute.xlu0 %2229  ;;  %5506 = vperm.xlu1 %12881, %v5435_v40   ;;  %v14605_v24 = vadd.f32 %v1320_v27, %v14409_v28  ;;  %v1329_v57 = vmul.f32 %v14440_v7, %v18390_v47  ;;  %v14614_v9 = vadd.f32 %v1323_v14, %v14416_v44  ;;  %v18394_v38 = vld [vmem:[#allocation58_spill] sm:$0xff]  ;;  %v18395_v14 = vld [vmem:[#allocation59_spill] sm:$0xff] }
 0x26c   : > { %v14617_v40 = vadd.f32 %v1322_v54, %v14419_v36  ;;  %v1330_v28 = vmul.f32 %v14440_v7, %v18393_v46  ;;  %v14627_v4 = vadd.f32 %v1324_v15, %v14431_v33  ;;  %v1333_v44 = vmul.f32 %v14440_v7, %v18394_v38  ;;  %v14636_v54 = vld [vmem:[%s17965_s2 + $0x4] ss:$0 sm:$0xff]  ;;  %v18397_v15 = vld [vmem:[#allocation62_spill] sm:$0xff] }
 0x26d   : > { %v14590_v10 = vpop.permute.xlu1 %2234  ;;  %v14624_v27 = vadd.f32 %v1325_v50, %v14428_v59  ;;  %v1332_v36 = vmul.f32 %v14440_v7, %v18395_v14  ;;  %v14643_v50 = vadd.f32 %v1327_v37, %v14443_v63  ;;  %v14646_v33 = vadd.f32 %v1326_v35, %v14446_v18  ;;  %v18398_v14 = vld [vmem:[#allocation102_spill] sm:$0xff]  ;;  %v5439_v37 = vld [vmem:[%s14348_s13 + $0x98] sm:$0xff]  ;;  %v5438_v18 = vld [vmem:[%s14348_s13 + $0x90] sm:$0xff] }
 0x26e   : > { %5501 = vperm.xlu0 %12880, %v5434_v53   ;;  %v18392_v53 = vld [vmem:[#allocation54_spill] sm:$0xff]  ;;  %v14651_v46 = vadd.f32 %v1329_v57, %v14457_v3  ;;  %v14654_v38 = vadd.f32 %v1328_v21, %v14460_v31  ;;  %v1334_v23 = vmul.f32 %v14440_v7, %v18398_v14  ;;  %v18401_v3 = vld [vmem:[#allocation107_spill] sm:$0xff]  ;;  %v14673_v21 = vadd.f32 %v1333_v44, %v14477_v13 }
 0x26f   : > { %v1331_v62 = vmul.f32 %v14440_v7, %v18392_v53  ;;  %v14640_v59 = vpop.permute.xlu0 %2239  ;;  %v1335_v53 = vmul.f32 %v14440_v7, %v18397_v15  ;;  %5516 = vperm.xlu1 %12881, %v5437_v56   ;;  %v14666_v56 = vadd.f32 %v1330_v28, %v14468_v19  ;;  %v1568_v31 = vmul.f32 %v14636_v54, %v18401_v3  ;;  %v18402_v15 = vld [vmem:[#allocation108_spill] sm:$0xff]  ;;  %v18407_v44 = vld [vmem:[#allocation111_spill] sm:$0xff] }
 0x270   : > { %18396 = vst [vmem:[#allocation53_spill] sm:$0xff] %v14640_v59  ;;  %v18399_v59 = vld [vmem:[#allocation105_spill] sm:$0xff] }
 0x271   : > { %v14638_v47 = vpop.permute.xlu1 %2244  ;;  %v1337_v63 = vmul.f32 %v14440_v7, %v18399_v59  ;;  %v14663_v35 = vadd.f32 %v1331_v62, %v14465_v12  ;;  %v14676_v59 = vadd.f32 %v1332_v36, %v14480_v6  ;;  %v1567_v12 = vmul.f32 %v14636_v54, %v18402_v15  ;;  %v18403_v62 = vld [vmem:[#allocation109_spill] sm:$0xff]  ;;  %v18408_v15 = vld [vmem:[#allocation112_spill] sm:$0xff] }
 0x272   : > { %5511 = vperm.xlu0 %12880, %v5436_v52   ;;  %v18400_v52 = vld [vmem:[#allocation106_spill] sm:$0xff]  ;;  %v1570_v19 = vmul.f32 %v14636_v54, %v18403_v62  ;;  %v14687_v14 = vadd.f32 %v1335_v53, %v14487_v20  ;;  %v1572_v6 = vmul.f32 %v14636_v54, %v18407_v44  ;;  %v14694_v36 = vadd.f32 %v1334_v23, %v14490_v49  ;;  %v5441_v53 = vld [vmem:[%s14348_s13 + $0xb0] sm:$0xff]  ;;  %v18412_v44 = vld [vmem:[#allocation116_spill] sm:$0xff] }
 0x273   : > { %v1336_v57 = vmul.f32 %v14440_v7, %v18400_v52  ;;  %v14684_v7 = vpop.permute.xlu0 %2249  ;;  %v18406_v52 = vld [vmem:[#allocation110_spill] sm:$0xff]  ;;  %5526 = vperm.xlu1 %12881, %v5439_v37   ;;  %v14697_v3 = vadd.f32 %v1337_v63, %v14501_v43  ;;  %v1571_v62 = vmul.f32 %v14636_v54, %v18408_v15  ;;  %v14709_v37 = vadd.f32 %v1568_v31, %v14511_v26  ;;  %v18411_v23 = vld [vmem:[#allocation115_spill] sm:$0xff] }
 0x274   : > { %18405 = vst [vmem:[#allocation57_spill] sm:$0xff] %v14684_v7  ;;  %v1569_v13 = vmul.f32 %v14636_v54, %v18406_v52  ;;  %v18409_v7 = vld [vmem:[#allocation113_spill] sm:$0xff]  ;;  %v1576_v43 = vmul.f32 %v14636_v54, %v18411_v23  ;;  %v14716_v63 = vadd.f32 %v1567_v12, %v14520_v2  ;;  %v14733_v2 = vadd.f32 %v1572_v6, %v14533_v58  ;;  %v18416_v12 = vld [vmem:[#allocation118_spill] sm:$0xff] }
 0x275   : > { %v14682_v28 = vpop.permute.xlu1 %2254  ;;  %v1574_v20 = vmul.f32 %v14636_v54, %v18409_v7  ;;  %v14706_v52 = vadd.f32 %v1336_v57, %v14508_v61  ;;  %v14719_v7 = vadd.f32 %v1570_v19, %v14523_v32  ;;  %v1575_v61 = vmul.f32 %v14636_v54, %v18412_v44  ;;  %v18413_v57 = vld [vmem:[#allocation117_spill] sm:$0xff]  ;;  %v18417_v44 = vld [vmem:[#allocation119_spill] sm:$0xff] }
 0x276   : > { %18404 = vst [vmem:[#allocation56_spill] sm:$0xff] %v14682_v28  ;;  %5521 = vperm.xlu0 %12880, %v5438_v18   ;;  %v5440_v28 = vld [vmem:[%s14348_s13 + $0xa8] sm:$0xff]  ;;  %v1578_v26 = vmul.f32 %v14636_v54, %v18413_v57  ;;  %v1577_v32 = vmul.f32 %v14636_v54, %v18416_v12  ;;  %v14738_v19 = vadd.f32 %v1571_v62, %v14544_v22  ;;  %v5442_v58 = vld [vmem:[%s14348_s13 + $0xc0] sm:$0xff]  ;;  %v18421_v12 = vld [vmem:[#allocation123_spill] sm:$0xff] }
 0x277   : > { %v18410_v18 = vld [vmem:[#allocation114_spill] sm:$0xff]  ;;  %v14727_v15 = vpop.permute.xlu0 %2259  ;;  %5536 = vperm.xlu1 %12881, %v5441_v53   ;;  %v14741_v23 = vadd.f32 %v1574_v20, %v14547_v0  ;;  %v1580_v57 = vmul.f32 %v14636_v54, %v18417_v44  ;;  %v14753_v53 = vadd.f32 %v1576_v43, %v14555_v1  ;;  %v14760_v20 = vadd.f32 %v1575_v61, %v14569_v16 }
 0x278   : > { %v1573_v49 = vmul.f32 %v14636_v54, %v18410_v18  ;;  %18415 = vst [vmem:[#allocation60_spill] sm:$0xff] %v14727_v15  ;;  %v14730_v18 = vadd.f32 %v1569_v13, %v14530_v48  ;;  %v18418_v15 = vld [vmem:[#allocation120_spill] sm:$0xff]  ;;  %v5443_v13 = vld [vmem:[%s14348_s13 + $0xc8] sm:$0xff] }
 0x279   : > { %v14725_v31 = vpop.permute.xlu1 %2264  ;;  %v1579_v48 = vmul.f32 %v14636_v54, %v18418_v15  ;;  %v18420_v62 = vld [vmem:[#allocation122_spill] sm:$0xff]  ;;  %v14763_v15 = vadd.f32 %v1578_v26, %v14572_v45  ;;  %v14781_v26 = vadd.f32 %v1580_v57, %v14584_v25 }
 0x27a   : > { %18414 = vst [vmem:[#allocation67_spill] sm:$0xff] %v14725_v31  ;;  %5531 = vperm.xlu0 %12880, %v5440_v28   ;;  %v14750_v6 = vadd.f32 %v1573_v49, %v14552_v42  ;;  %v18419_v28 = vld [vmem:[#allocation121_spill] sm:$0xff]  ;;  %v1581_v0 = vmul.f32 %v14636_v54, %v18420_v62  ;;  %v1584_v42 = vmul.f32 %v14636_v54, %v18421_v12  ;;  %v18422_v49 = vld [vmem:[#allocation124_spill] sm:$0xff]  ;;  %v18426_v61 = vld [vmem:[#allocation126_spill] sm:$0xff] }
 0x27b   : > { %v1582_v22 = vmul.f32 %v14636_v54, %v18419_v28  ;;  %v1583_v1 = vmul.f32 %v14636_v54, %v18422_v49  ;;  %v14771_v44 = vpop.permute.xlu0 %2269  ;;  %v14774_v28 = vadd.f32 %v1577_v32, %v14581_v39  ;;  %v18425_v62 = vld [vmem:[#allocation125_spill] sm:$0xff]  ;;  %v1585_v45 = vmul.f32 %v14636_v54, %v18426_v61  ;;  %5546 = vperm.xlu1 %12881, %v5443_v13   ;;  %v18427_v49 = vld [vmem:[#allocation127_spill] sm:$0xff]  ;;  %v5444_v31 = vld [vmem:[%s14348_s13 + $0xd8] sm:$0xff] }
 0x27c   : > { %18424 = vst [vmem:[#allocation63_spill] sm:$0xff] %v14771_v44  ;;  %v1586_v16 = vmul.f32 %v14636_v54, %v18425_v62  ;;  %v14784_v12 = vadd.f32 %v1579_v48, %v14595_v55  ;;  %v1588_v44 = vmul.f32 %v14636_v54, %v18427_v49  ;;  %v5445_v32 = vld [vmem:[%s14348_s13 + $0xe0] sm:$0xff]  ;;  %v14796_v13 = vadd.f32 %v1581_v0, %v14605_v24  ;;  %v18430_v57 = vld [vmem:[#allocation130_spill] sm:$0xff]  ;;  %v18431_v61 = vld [vmem:[#allocation131_spill] sm:$0xff] }
 0x27d   : > { %v14769_v43 = vpop.permute.xlu1 %2274  ;;  %v14793_v62 = vadd.f32 %v1582_v22, %v14602_v29  ;;  %v1589_v55 = vmul.f32 %v14636_v54, %v18430_v57  ;;  %v14803_v48 = vadd.f32 %v1584_v42, %v14614_v9  ;;  %v1592_v29 = vmul.f32 %v14636_v54, %v18431_v61  ;;  %v18432_v22 = vld [vmem:[#allocation132_spill] sm:$0xff]  ;;  %v18435_v42 = vld [vmem:[#allocation133_spill] sm:$0xff] }
 0x27e   : > { %18423 = vst [vmem:[#allocation61_spill] sm:$0xff] %v14769_v43  ;;  %5541 = vperm.xlu0 %12880, %v5442_v58   ;;  %v18428_v43 = vld [vmem:[#allocation128_spill] sm:$0xff]  ;;  %v18429_v58 = vld [vmem:[#allocation129_spill] sm:$0xff]  ;;  %v1591_v24 = vmul.f32 %v14636_v54, %v18432_v22  ;;  %v14820_v9 = vadd.f32 %v1585_v45, %v14627_v4  ;;  %v14830_v57 = vadd.f32 %v1588_v44, %v14643_v50 }
 0x27f   : > { %v1587_v39 = vmul.f32 %v14636_v54, %v18428_v43  ;;  %v1590_v25 = vmul.f32 %v14636_v54, %v18429_v58  ;;  %v14806_v43 = vadd.f32 %v1583_v1, %v14617_v40  ;;  %v14814_v49 = vpop.permute.xlu0 %2279  ;;  %v14817_v58 = vadd.f32 %v1586_v16, %v14624_v27  ;;  %v14827_v1 = vld [vmem:[%s17965_s2 + $0x5] ss:$0 sm:$0xff]  ;;  %5556 = vperm.xlu1 %12881, %v5445_v32   ;;  %v18436_v27 = vld [vmem:[#allocation134_spill] sm:$0xff]  ;;  %v18437_v16 = vld [vmem:[#allocation135_spill] sm:$0xff] }
 0x280   : > { %18434 = vst [vmem:[#allocation65_spill] sm:$0xff] %v14814_v49  ;;  %v1594_v40 = vmul.f32 %v14636_v54, %v18435_v42  ;;  %v1593_v4 = vmul.f32 %v14636_v54, %v18436_v27  ;;  %v1596_v45 = vmul.f32 %v14636_v54, %v18437_v16  ;;  %v5447_v22 = vld [vmem:[%s14348_s13 + $0xf8] sm:$0xff]  ;;  %v5446_v42 = vld [vmem:[%s14348_s13 + $0xf0] sm:$0xff]  ;;  %v14845_v32 = vadd.f32 %v1589_v55, %v14654_v38  ;;  %v18439_v44 = vld [vmem:[#allocation137_spill] sm:$0xff] }
 0x281   : > { %v14812_v0 = vpop.permute.xlu1 %2284  ;;  %v14833_v61 = vadd.f32 %v1587_v39, %v14646_v33  ;;  %v14842_v49 = vadd.f32 %v1590_v25, %v14651_v46  ;;  %v1598_v33 = vmul.f32 %v14636_v54, %v18439_v44  ;;  %v14852_v39 = vadd.f32 %v1592_v29, %v14663_v35  ;;  %v18440_v16 = vld [vmem:[#allocation138_spill] sm:$0xff]  ;;  %v18441_v25 = vld [vmem:[#allocation139_spill] sm:$0xff]  ;;  %v18445_v29 = vld [vmem:[#allocation141_spill] sm:$0xff] }
 0x282   : > { %18433 = vst [vmem:[#allocation64_spill] sm:$0xff] %v14812_v0  ;;  %5551 = vperm.xlu0 %12880, %v5444_v31   ;;  %v18438_v31 = vld [vmem:[#allocation136_spill] sm:$0xff]  ;;  %v14855_v27 = vadd.f32 %v1591_v24, %v14666_v56  ;;  %v1597_v46 = vmul.f32 %v14636_v54, %v18440_v16  ;;  %v1829_v38 = vmul.f32 %v14827_v1, %v18441_v25  ;;  %v18446_v16 = vld [vmem:[#allocation142_spill] sm:$0xff] }
 0x283   : > { %v1595_v50 = vmul.f32 %v14636_v54, %v18438_v31  ;;  %v14863_v31 = vpop.permute.xlu0 %2289  ;;  %v14866_v44 = vadd.f32 %v1594_v40, %v14673_v21  ;;  %v18444_v0 = vld [vmem:[#allocation140_spill] sm:$0xff]  ;;  %v1831_v56 = vmul.f32 %v14827_v1, %v18445_v29  ;;  %5566 = vperm.xlu1 %12881, %v5447_v22   ;;  %v14873_v54 = vadd.f32 %v1593_v4, %v14676_v59  ;;  %v5449_v40 = vld [vmem:[%s14348_s13 + $0x110] sm:$0xff]  ;;  %v18449_v4 = vld [vmem:[#allocation145_spill] sm:$0xff] }
 0x284   : > { %18443 = vst [vmem:[#allocation68_spill] sm:$0xff] %v14863_v31  ;;  %v1828_v35 = vmul.f32 %v14827_v1, %v18444_v0  ;;  %v14876_v24 = vadd.f32 %v1596_v45, %v14687_v14  ;;  %v1830_v25 = vmul.f32 %v14827_v1, %v18446_v16  ;;  %v18447_v31 = vld [vmem:[#allocation143_spill] sm:$0xff]  ;;  %v14888_v22 = vadd.f32 %v1598_v33, %v14697_v3  ;;  %v18450_v29 = vld [vmem:[#allocation146_spill] sm:$0xff] }
 0x285   : > { %v14861_v55 = vpop.permute.xlu1 %2294  ;;  %v1833_v21 = vmul.f32 %v14827_v1, %v18447_v31  ;;  %v14885_v0 = vadd.f32 %v1595_v50, %v14694_v36  ;;  %v1835_v14 = vmul.f32 %v14827_v1, %v18449_v4  ;;  %v14895_v45 = vadd.f32 %v1597_v46, %v14706_v52  ;;  %v18451_v50 = vld [vmem:[#allocation147_spill] sm:$0xff]  ;;  %v18454_v46 = vld [vmem:[#allocation148_spill] sm:$0xff] }
 0x286   : > { %18442 = vst [vmem:[#allocation66_spill] sm:$0xff] %v14861_v55  ;;  %5561 = vperm.xlu0 %12880, %v5446_v42   ;;  %v5448_v55 = vld [vmem:[%s14348_s13 + $0x108] sm:$0xff]  ;;  %v18448_v42 = vld [vmem:[#allocation144_spill] sm:$0xff]  ;;  %v14898_v31 = vadd.f32 %v1829_v38, %v14709_v37  ;;  %v1834_v36 = vmul.f32 %v14827_v1, %v18450_v29  ;;  %v1837_v3 = vmul.f32 %v14827_v1, %v18451_v50  ;;  %v18455_v29 = vld [vmem:[#allocation149_spill] sm:$0xff] }
 0x287   : > { %v1832_v59 = vmul.f32 %v14827_v1, %v18448_v42  ;;  %v14906_v16 = vpop.permute.xlu0 %2299  ;;  %v14909_v42 = vadd.f32 %v1828_v35, %v14716_v63  ;;  %v14912_v52 = vadd.f32 %v1831_v56, %v14719_v7  ;;  %v1836_v37 = vmul.f32 %v14827_v1, %v18454_v46  ;;  %5576 = vperm.xlu1 %12881, %v5449_v40   ;;  %v5451_v35 = vld [vmem:[%s14348_s13 + $0x128] sm:$0xff]  ;;  %v5450_v7 = vld [vmem:[%s14348_s13 + $0x120] sm:$0xff] }
 0x288   : > { %18453 = vst [vmem:[#allocation70_spill] sm:$0xff] %v14906_v16  ;;  %v14917_v38 = vadd.f32 %v1830_v25, %v14730_v18  ;;  %v14920_v4 = vadd.f32 %v1833_v21, %v14733_v2  ;;  %v1839_v50 = vmul.f32 %v14827_v1, %v18455_v29  ;;  %v18456_v16 = vld [vmem:[#allocation150_spill] sm:$0xff]  ;;  %v14932_v40 = vadd.f32 %v1835_v14, %v14741_v23  ;;  %v18458_v25 = vld [vmem:[#allocation152_spill] sm:$0xff]  ;;  %v18459_v46 = vld [vmem:[#allocation153_spill] sm:$0xff] }
 0x289   : > { %v14904_v33 = vpop.permute.xlu1 %2304  ;;  %v1838_v63 = vmul.f32 %v14827_v1, %v18456_v16  ;;  %v14929_v56 = vadd.f32 %v1832_v59, %v14738_v19  ;;  %v1840_v2 = vmul.f32 %v14827_v1, %v18458_v25  ;;  %v14939_v21 = vadd.f32 %v1834_v36, %v14750_v6  ;;  %v18460_v59 = vld [vmem:[#allocation154_spill] sm:$0xff]  ;;  %v18463_v25 = vld [vmem:[#allocation155_spill] sm:$0xff]  ;;  %v18464_v36 = vld [vmem:[#allocation156_spill] sm:$0xff] }
 0x28a   : > { %18452 = vst [vmem:[#allocation69_spill] sm:$0xff] %v14904_v33  ;;  %5571 = vperm.xlu0 %12880, %v5448_v55   ;;  %v18457_v55 = vld [vmem:[#allocation151_spill] sm:$0xff]  ;;  %v14942_v16 = vadd.f32 %v1837_v3, %v14753_v53  ;;  %v1843_v19 = vmul.f32 %v14827_v1, %v18459_v46  ;;  %v1842_v23 = vmul.f32 %v14827_v1, %v18460_v59  ;;  %v18465_v59 = vld [vmem:[#allocation157_spill] sm:$0xff]  ;;  %v5452_v33 = vld [vmem:[%s14348_s13 + $0x138] sm:$0xff] }
 0x28b   : > { %v1841_v18 = vmul.f32 %v14827_v1, %v18457_v55  ;;  %v14950_v29 = vpop.permute.xlu0 %2309  ;;  %v14953_v55 = vadd.f32 %v1836_v37, %v14760_v20  ;;  %v1845_v6 = vmul.f32 %v14827_v1, %v18463_v25  ;;  %v1844_v53 = vmul.f32 %v14827_v1, %v18464_v36  ;;  %5586 = vperm.xlu1 %12881, %v5451_v35   ;;  %v5453_v37 = vld [vmem:[%s14348_s13 + $0x140] sm:$0xff] }
 0x28c   : > { %18462 = vst [vmem:[#allocation13_spill] sm:$0xff] %v14950_v29  ;;  %v14960_v3 = vadd.f32 %v1839_v50, %v14763_v15  ;;  %v14963_v46 = vadd.f32 %v1838_v63, %v14774_v28  ;;  %v1847_v29 = vmul.f32 %v14827_v1, %v18465_v59  ;;  %v14975_v35 = vadd.f32 %v1840_v2, %v14784_v12  ;;  %v18468_v50 = vld [vmem:[#allocation160_spill] sm:$0xff]  ;;  %v18469_v36 = vld [vmem:[#allocation161_spill] sm:$0xff] }
 0x28d   : > { %v14948_v14 = vpop.permute.xlu1 %2314  ;;  %v14972_v25 = vadd.f32 %v1841_v18, %v14781_v26  ;;  %v1848_v28 = vmul.f32 %v14827_v1, %v18468_v50  ;;  %v14982_v63 = vadd.f32 %v1843_v19, %v14793_v62  ;;  %v1851_v26 = vmul.f32 %v14827_v1, %v18469_v36  ;;  %v18470_v18 = vld [vmem:[#allocation162_spill] sm:$0xff]  ;;  %v18473_v19 = vld [vmem:[#allocation163_spill] sm:$0xff]  ;;  %v18474_v36 = vld [vmem:[#allocation164_spill] sm:$0xff] }
 0x28e   : > { %18461 = vst [vmem:[#allocation12_spill] sm:$0xff] %v14948_v14  ;;  %5581 = vperm.xlu0 %12880, %v5450_v7   ;;  %v18466_v14 = vld [vmem:[#allocation158_spill] sm:$0xff]  ;;  %v18467_v7 = vld [vmem:[#allocation159_spill] sm:$0xff]  ;;  %v1850_v12 = vmul.f32 %v14827_v1, %v18470_v18  ;;  %v14999_v62 = vadd.f32 %v1844_v53, %v14806_v43  ;;  %v1852_v18 = vmul.f32 %v14827_v1, %v18474_v36  ;;  %v15016_v43 = vld [vmem:[%s17965_s2 + $0x6] ss:$0 sm:$0xff] }
 0x28f   : > { %v1846_v20 = vmul.f32 %v14827_v1, %v18466_v14  ;;  %v1849_v15 = vmul.f32 %v14827_v1, %v18467_v7  ;;  %v14985_v14 = vadd.f32 %v1842_v23, %v14796_v13  ;;  %v14993_v59 = vpop.permute.xlu0 %2319  ;;  %v14996_v7 = vadd.f32 %v1845_v6, %v14803_v48  ;;  %5596 = vperm.xlu1 %12881, %v5453_v37   ;;  %v5455_v6 = vld [vmem:[%s14348_s13 + $0x158] sm:$0xff]  ;;  %v5454_v53 = vld [vmem:[%s14348_s13 + $0x150] sm:$0xff] }
 0x290   : > { %18472 = vst [vmem:[#allocation72_spill] sm:$0xff] %v14993_v59  ;;  %v1853_v13 = vmul.f32 %v14827_v1, %v18473_v19  ;;  %v15004_v23 = vadd.f32 %v1847_v29, %v14817_v58  ;;  %v18475_v59 = vld [vmem:[#allocation165_spill] sm:$0xff]  ;;  %v15024_v58 = vadd.f32 %v1848_v28, %v14833_v61  ;;  %v15034_v19 = vadd.f32 %v1850_v12, %v14845_v32  ;;  %v18478_v36 = vld [vmem:[#allocation168_spill] sm:$0xff] }
 0x291   : > { %v14991_v2 = vpop.permute.xlu1 %2324  ;;  %v15007_v50 = vadd.f32 %v1846_v20, %v14820_v9  ;;  %v1855_v48 = vmul.f32 %v14827_v1, %v18475_v59  ;;  %v18476_v9 = vld [vmem:[#allocation166_spill] sm:$0xff]  ;;  %v18477_v20 = vld [vmem:[#allocation167_spill] sm:$0xff]  ;;  %v15031_v59 = vadd.f32 %v1851_v26, %v14842_v49  ;;  %v15054_v12 = vld [vmem:[%s17965_s2 + $0x7] ss:$0 sm:$0xff] }
 0x292   : > { %18471 = vst [vmem:[#allocation71_spill] sm:$0xff] %v14991_v2  ;;  %5591 = vperm.xlu0 %12880, %v5452_v33   ;;  %v15021_v33 = vadd.f32 %v1849_v15, %v14830_v57  ;;  %v1854_v29 = vmul.f32 %v14827_v1, %v18476_v9  ;;  %v1857_v37 = vmul.f32 %v14827_v1, %v18477_v20  ;;  %v18479_v15 = vld [vmem:[#allocation169_spill] sm:$0xff]  ;;  %v18482_v49 = vld [vmem:[#allocation170_spill] sm:$0xff]  ;;  %v18483_v2 = vld [vmem:[#allocation171_spill] sm:$0xff] }
 0x293   : > { %v1856_v57 = vmul.f32 %v14827_v1, %v18478_v36  ;;  %v1859_v61 = vmul.f32 %v14827_v1, %v18479_v15  ;;  %v15042_v9 = vpop.permute.xlu0 %2329  ;;  %v15045_v20 = vadd.f32 %v1853_v13, %v14852_v39  ;;  %v1858_v26 = vmul.f32 %v14827_v1, %v18482_v49  ;;  %5606 = vperm.xlu1 %12881, %v5455_v6   ;;  %v18484_v39 = vld [vmem:[#allocation172_spill] sm:$0xff]  ;;  %v18485_v1 = vld [vmem:[#allocation173_spill] sm:$0xff] }
 0x294   : > { %18481 = vst [vmem:[#allocation17_spill] sm:$0xff] %v15042_v9  ;;  %v2091_v32 = vmul.f32 %v15016_v43, %v18483_v2  ;;  %v15057_v36 = vadd.f32 %v1852_v18, %v14855_v27  ;;  %v15060_v15 = vadd.f32 %v1855_v48, %v14866_v44  ;;  %v2090_v13 = vmul.f32 %v15016_v43, %v18484_v39  ;;  %v5457_v2 = vld [vmem:[%s14348_s13 + $0x170] sm:$0xff]  ;;  %v5456_v9 = vld [vmem:[%s14348_s13 + $0x168] sm:$0xff] }
 0x295   : > { %v15040_v28 = vpop.permute.xlu1 %2334  ;;  %v2093_v49 = vmul.f32 %v15016_v43, %v18485_v1  ;;  %v15072_v6 = vadd.f32 %v1857_v37, %v14876_v24  ;;  %v18487_v18 = vld [vmem:[#allocation175_spill] sm:$0xff]  ;;  %v15079_v48 = vadd.f32 %v1856_v57, %v14885_v0  ;;  %v15082_v39 = vadd.f32 %v1859_v61, %v14888_v22  ;;  %v18489_v1 = vld [vmem:[#allocation176_spill] sm:$0xff] }
 0x296   : > { %18480 = vst [vmem:[#allocation16_spill] sm:$0xff] %v15040_v28  ;;  %5601 = vperm.xlu0 %12880, %v5454_v53   ;;  %v15069_v28 = vadd.f32 %v1854_v29, %v14873_v54  ;;  %v18486_v53 = vld [vmem:[#allocation174_spill] sm:$0xff]  ;;  %v2095_v44 = vmul.f32 %v15016_v43, %v18487_v18  ;;  %v2094_v54 = vmul.f32 %v15016_v43, %v18489_v1  ;;  %v18491_v18 = vld [vmem:[#allocation177_spill] sm:$0xff] }
 0x297   : > { %v2092_v27 = vmul.f32 %v15016_v43, %v18486_v53  ;;  %18488 = vst [vmem:[#allocation73_spill] sm:$0xff] %v15082_v39  ;;  %v2352_v24 = vmul.f32 %v15054_v12, %v14404_v60  ;;  %v15090_v37 = vpop.permute.xlu0 %2339  ;;  %v15093_v53 = vadd.f32 %v1858_v26, %v14895_v45  ;;  %v2123_v0 = vadd.f32 %v2091_v32, %v14898_v31  ;;  %v18492_v1 = vld [vmem:[#allocation178_spill] sm:$0xff]  ;;  %v18494_v32 = vld [vmem:[#allocation180_spill] sm:$0xff] }
 0x298   : > { %v2351_v22 = vmul.f32 %v15054_v12, %v14406_v30  ;;  %5616 = vperm.xlu1 %12881, %v5457_v2   ;;  %v2122_v57 = vadd.f32 %v2090_v13, %v14909_v42  ;;  %v2125_v61 = vadd.f32 %v2093_v49, %v14912_v52  ;;  %v2097_v60 = vmul.f32 %v15016_v43, %v18491_v18  ;;  %v15107_v45 = vld [vmem:[%s17965_s2 + $0x8] ss:$0 sm:$0xff]  ;;  %v5688_v31 = vld [vmem:[%s14348_s13 + $0x9] sm:$0xff] }
 0x299   : > { %v15088_v29 = vpop.permute.xlu1 %2344  ;;  %18490 = vst [vmem:[#allocation24_spill] sm:$0xff] %v15093_v53  ;;  %v2096_v39 = vmul.f32 %v15016_v43, %v18492_v1  ;;  %v5687_v26 = vld [vmem:[%s14348_s13 + $0x1] sm:$0xff]  ;;  %v2124_v30 = vadd.f32 %v2092_v27, %v14917_v38  ;;  %v18493_v42 = vld [vmem:[#allocation179_spill] sm:$0xff]  ;;  %v2098_v13 = vmul.f32 %v15016_v43, %v18494_v32  ;;  %v2126_v49 = vadd.f32 %v2094_v54, %v14929_v56 }
 0x29a   : > { %5611 = vperm.xlu0 %12880, %v5456_v9   ;;  %v2127_v9 = vadd.f32 %v2095_v44, %v14920_v4  ;;  %v2099_v52 = vmul.f32 %v15016_v43, %v18493_v42  ;;  %v2384_v2 = vadd.f32 %v2352_v24, %v2123_v0  ;;  %v2354_v18 = vmul.f32 %v15054_v12, %v14452_v34  ;;  %v18495_v24 = vld [vmem:[#allocation181_spill] sm:$0xff]  ;;  %v18496_v0 = vld [vmem:[#allocation182_spill] sm:$0xff] }
 0x29b   : > { %v2353_v1 = vmul.f32 %v15054_v12, %v14454_v8  ;;  %v2451_v38 = vpop.permute.xlu0 %2450  ;;  %v2383_v4 = vadd.f32 %v2351_v22, %v2122_v57  ;;  %v2129_v56 = vadd.f32 %v2097_v60, %v14932_v40  ;;  %v2128_v54 = vadd.f32 %v2096_v39, %v14939_v21  ;;  %v15133_v22 = vld [vmem:[%s17966_s3] ss:$0 sm:$0xff] }
 0x29c   : > { %v2612_v44 = vmul.f32 %v15107_v45, %v2451_v38  ;;  %5727 = vperm.xlu1 %12881, %v5688_v31   ;;  %v2101_v34 = vmul.f32 %v15016_v43, %v18495_v24  ;;  %v2100_v8 = vmul.f32 %v15016_v43, %v18496_v0  ;;  %v15139_v57 = vadd.f32 %v2099_v52, %v14942_v16  ;;  %v15145_v60 = vld [vmem:[%s14348_s13 + $0x19] sm:$0xff] }
 0x29d   : > { %v2456_v53 = vpop.permute.xlu1 %2455  ;;  %v15142_v40 = vadd.f32 %v2098_v13, %v14953_v55  ;;  %v2386_v31 = vadd.f32 %v2354_v18, %v2125_v61  ;;  %v2356_v42 = vmul.f32 %v15054_v12, %v14496_v17  ;;  %v2355_v32 = vmul.f32 %v15054_v12, %v14498_v11  ;;  %v18497_v11 = vld [vmem:[#allocation183_spill] sm:$0xff] }
 0x29e   : > { %v2613_v27 = vmul.f32 %v15107_v45, %v2456_v53  ;;  %5722 = vperm.xlu0 %12880, %v5687_v26   ;;  %v15136_v53 = vld [vmem:[%s14348_s13 + $0x21] sm:$0xff]  ;;  %v2644_v39 = vadd.f32 %v2612_v44, %v2383_v4  ;;  %v2385_v26 = vadd.f32 %v2353_v1, %v2124_v30  ;;  %v15157_v61 = vadd.f32 %v2101_v34, %v14960_v3  ;;  %v15168_v1 = vld [vmem:[%s14348_s13 + $0x39] sm:$0xff] }
 0x29f   : > { %v2461_v24 = vpop.permute.xlu0 %2460  ;;  %v15160_v17 = vadd.f32 %v2100_v8, %v14963_v46  ;;  %v2103_v30 = vmul.f32 %v15016_v43, %v18497_v11  ;;  %v2388_v3 = vadd.f32 %v2356_v42, %v2127_v9  ;;  %v2387_v34 = vadd.f32 %v2355_v32, %v2126_v49  ;;  %v18499_v42 = vld [vmem:[#allocation185_spill] sm:$0xff] }
 0x2a0   : > { %v2645_v21 = vadd.f32 %v2613_v27, %v2384_v2  ;;  %v2683_v55 = vadd.f32 %v15133_v22, %v2644_v39  ;;  %v2614_v13 = vmul.f32 %v15107_v45, %v2461_v24  ;;  %5737 = vperm.xlu1 %12881, %v15136_v53   ;;  %v18498_v2 = vld [vmem:[#allocation184_spill] sm:$0xff]  ;;  %v2358_v46 = vmul.f32 %v15054_v12, %v14539_v51  ;;  %v18500_v24 = vld [vmem:[#allocation186_spill] sm:$0xff] }
 0x2a1   : > { %v2466_v38 = vpop.permute.xlu1 %2465  ;;  %v2102_v18 = vmul.f32 %v15016_v43, %v18498_v2  ;;  %v2357_v8 = vmul.f32 %v15054_v12, %v14541_v41  ;;  %v15185_v51 = vadd.f32 %v2103_v30, %v14972_v25  ;;  %v2105_v32 = vmul.f32 %v15016_v43, %v18499_v42  ;;  %v5695_v42 = vld [vmem:[%s14348_s13 + $0x61] sm:$0xff] }
 0x2a2   : > { %v2684_v16 = vadd.f32 %v15133_v22, %v2645_v21  ;;  %v2615_v52 = vmul.f32 %v15107_v45, %v2466_v38  ;;  %5732 = vperm.xlu0 %12880, %v15145_v60   ;;  %v2715_v27 = vmax.f32 %v2683_v55, 0.0  ;;  %v2646_v0 = vadd.f32 %v2614_v13, %v2385_v26  ;;  %v15171_v21 = vld [vmem:[%s14348_s13 + $0x31] sm:$0xff] }
 0x2a3   : > { %v2471_v38 = vpop.permute.xlu0 %2470  ;;  %v15188_v41 = vadd.f32 %v2102_v18, %v14975_v35  ;;  %v15196_v55 = vld [vmem:[%s14348_s13 + $0x51] sm:$0xff]  ;;  %v2390_v25 = vadd.f32 %v2358_v46, %v2129_v56  ;;  %v2389_v30 = vadd.f32 %v2357_v8, %v2128_v54  ;;  %v2360_v35 = vmul.f32 %v15054_v12, %v14590_v10  ;;  %v18502_v8 = vld [vmem:[#allocation9_spill] sm:$0xff] }
 0x2a4   : > { %v2716_v4 = vmax.f32 %v2684_v16, 0.0  ;;  %v2647_v44 = vadd.f32 %v2615_v52, %v2386_v31  ;;  %2748 = vst.msk [vmem:[#allocation2 + $0x19] sm:$0xff] %vm269_vm0, %v2715_v27  ;;  %v2685_v26 = vadd.f32 %v15133_v22, %v2646_v0  ;;  %v2616_v49 = vmul.f32 %v15107_v45, %v2471_v38  ;;  %5747 = vperm.xlu1 %12881, %v15168_v1   ;;  %v5696_v38 = vld [vmem:[%s14348_s13 + $0x69] sm:$0xff] }
 0x2a5   : > { %v2476_v39 = vpop.permute.xlu1 %2475  ;;  %v2104_v16 = vmul.f32 %v15016_v43, %v18500_v24  ;;  %v2359_v18 = vmul.f32 %v15054_v12, %v14592_v5  ;;  %v15213_v10 = vadd.f32 %v2105_v32, %v14982_v63  ;;  %v2392_v63 = vadd.f32 %v2360_v35, %v15139_v57  ;;  %v18503_v24 = vld [vmem:[#allocation53_spill] sm:$0xff] }
 0x2a6   : > { %2749 = vst.msk [vmem:[#allocation2 + $0x21] sm:$0xff] %vm269_vm0, %v2716_v4  ;;  %v2686_v31 = vadd.f32 %v15133_v22, %v2647_v44  ;;  %v2617_v9 = vmul.f32 %v15107_v45, %v2476_v39  ;;  %5742 = vperm.xlu0 %12880, %v15171_v21   ;;  %v2717_v13 = vmax.f32 %v2685_v26, 0.0  ;;  %v2648_v2 = vadd.f32 %v2616_v49, %v2387_v34  ;;  %v15199_v4 = vld [vmem:[%s14348_s13 + $0x49] sm:$0xff]  ;;  %v18501_v34 = vld [vmem:[#allocation8_spill] sm:$0xff] }
 0x2a7   : > { %v15216_v5 = vadd.f32 %v2104_v16, %v14985_v14  ;;  %v2107_v46 = vmul.f32 %v15016_v43, %v18501_v34  ;;  %v2106_v39 = vmul.f32 %v15016_v43, %v18502_v8  ;;  %v2391_v32 = vadd.f32 %v2359_v18, %v15142_v40  ;;  %v5697_v8 = vld [vmem:[%s14348_s13 + $0x79] sm:$0xff] }
 0x2a8   : > { %v2718_v52 = vmax.f32 %v2686_v31, 0.0  ;;  %v2649_v11 = vadd.f32 %v2617_v9, %v2388_v3  ;;  %2750 = vst.msk [vmem:[#allocation2 + $0x31] sm:$0xff] %vm269_vm0, %v2717_v13  ;;  %v2687_v3 = vadd.f32 %v15133_v22, %v2648_v2  ;;  %5757 = vperm.xlu1 %12881, %v15196_v55   ;;  %v2362_v14 = vmul.f32 %v15054_v12, %v14638_v47 }
 0x2a9   : > { %v2486_v27 = vpop.permute.xlu1 %2485  ;;  %v2481_v44 = vpop.permute.xlu0 %2480  ;;  %v2361_v16 = vmul.f32 %v15054_v12, %v18503_v24  ;;  %v15241_v35 = vadd.f32 %v2106_v39, %v14999_v62  ;;  %v18506_v39 = vld [vmem:[#allocation57_spill] sm:$0xff]  ;;  %v18507_v24 = vld [vmem:[#allocation20_spill] sm:$0xff] }
 0x2aa   : > { %2751 = vst.msk [vmem:[#allocation2 + $0x39] sm:$0xff] %vm269_vm0, %v2718_v52  ;;  %v2688_v0 = vadd.f32 %v15133_v22, %v2649_v11  ;;  %v2619_v56 = vmul.f32 %v15107_v45, %v2486_v27  ;;  %v2618_v54 = vmul.f32 %v15107_v45, %v2481_v44  ;;  %5752 = vperm.xlu0 %12880, %v15199_v4   ;;  %v2719_v26 = vmax.f32 %v2687_v3, 0.0  ;;  %v5698_v27 = vld [vmem:[%s14348_s13 + $0x81] sm:$0xff]  ;;  %v18504_v44 = vld [vmem:[#allocation52_spill] sm:$0xff] }
 0x2ab   : > { %v3889_v13 = vld [vmem:[#allocation2 + $0x19] sm:$0xff] }
 0x2ac   : > { %v2720_v31 = vmax.f32 %v2688_v0, 0.0  ;;  %v2651_v9 = vadd.f32 %v2619_v56, %v2390_v25  ;;  %v2650_v49 = vadd.f32 %v2618_v54, %v2389_v30  ;;  %2752 = vst.msk [vmem:[#allocation2 + $0x49] sm:$0xff] %vm269_vm0, %v2719_v26  ;;  %5767 = vperm.xlu1 %12881, %v5696_v38   ;;  %v15238_v30 = vadd.f32 %v2107_v46, %v14996_v7  ;;  %v18505_v46 = vld [vmem:[#allocation56_spill] sm:$0xff] }
 0x2ad   : > { %v3890_v52 = vld [vmem:[#allocation2 + $0x21] sm:$0xff]  ;;  %v2496_v11 = vpop.permute.xlu1 %2495  ;;  %v2491_v2 = vpop.permute.xlu0 %2490  ;;  %v3140_v0 = vsel %vm2926_vm2, %v18504_v44, 0  ;;  %v2394_v38 = vadd.f32 %v2362_v14, %v15157_v61  ;;  %v2393_v7 = vadd.f32 %v2361_v16, %v15160_v17  ;;  %v2364_v62 = vmul.f32 %v15054_v12, %v18505_v46  ;;  %v5699_v44 = vld [vmem:[%s14348_s13 + $0x91] sm:$0xff] }
 0x2ae   : > { %2753 = vst.msk [vmem:[#allocation2 + $0x51] sm:$0xff] %vm269_vm0, %v2720_v31  ;;  %v2690_v57 = vadd.f32 %v15133_v22, %v2651_v9  ;;  %v2689_v40 = vadd.f32 %v15133_v22, %v2650_v49  ;;  %v2621_v25 = vmul.f32 %v15107_v45, %v2496_v11  ;;  %v2620_v47 = vmul.f32 %v15107_v45, %v2491_v2  ;;  %v5700_v2 = vld [vmem:[%s14348_s13 + $0x99] sm:$0xff] }
 0x2af   : > { %5762 = vperm.xlu0 %12880, %v5695_v42   ;;  %v15243_v18 = vpack.c.bf16 %v3890_v52, %v3889_v13  ;;  %v2363_v31 = vmul.f32 %v15054_v12, %v18506_v39  ;;  %v15260_v42 = vld [vmem:[%s17967_s4 + $0x8] sm:$0xf]  ;;  %v4769_v61 = vld [vmem:[#allocation2 + $0x31] sm:$0xff]  ;;  %v2109_v16 = vmul.f32 %v15016_v43, %v18507_v24  ;;  %v18508_v52 = vld [vmem:[#allocation21_spill] sm:$0xff] }
 0x2b0   : > { %v2722_v3 = vmax.f32 %v2690_v57, 0.0  ;;  %v2721_v56 = vmax.f32 %v2689_v40, 0.0  ;;  %v2653_v54 = vadd.f32 %v2621_v25, %v2392_v63  ;;  %v2652_v34 = vadd.f32 %v2620_v47, %v2391_v32  ;;  %5777 = vperm.xlu1 %12881, %v5698_v27  }
 0x2b1   : > { %v4770_v26 = vld [vmem:[#allocation2 + $0x39] sm:$0xff]  ;;  %11730 = vmatmul.mubr.msk.bf16.vlgmr.msra.gmra.mrb[0].mxu0 %vm269_vm0, %v15243_v18  ;;  %v2506_v9 = vpop.permute.xlu1 %2505  ;;  %v2501_v49 = vpop.permute.xlu0 %2500  ;;  %v2108_v13 = vmul.f32 %v15016_v43, %v18508_v52  ;;  %v2396_v27 = vadd.f32 %v2364_v62, %v15185_v51  ;;  %v5701_v52 = vld [vmem:[%s14348_s13 + $0xa9] sm:$0xff] }
 0x2b2   : > { %2755 = vst.msk [vmem:[#allocation2 + $0x69] sm:$0xff] %vm269_vm0, %v2722_v3  ;;  %2754 = vst.msk [vmem:[#allocation2 + $0x61] sm:$0xff] %vm269_vm0, %v2721_v56  ;;  %v2692_v17 = vadd.f32 %v15133_v22, %v2653_v54  ;;  %v2691_v63 = vadd.f32 %v15133_v22, %v2652_v34  ;;  %v2623_v32 = vmul.f32 %v15107_v45, %v2506_v9  ;;  %11762 = vmatpush3.bf16.msra.mxu0 %v3140_v0  ;;  %v18510_v56 = vld [vmem:[#allocation67_spill] sm:$0xff]  ;;  %v18511_v34 = vld [vmem:[#allocation60_spill] sm:$0xff] }
 0x2b3   : > { %v2622_v14 = vmul.f32 %v15107_v45, %v2501_v49  ;;  %5772 = vperm.xlu0 %12880, %v5697_v8   ;;  %v15272_v11 = vpack.c.bf16 %v4770_v26, %v4769_v61  ;;  %12853 = vmatprep.subr.msk.bf16.mxu0 %vm2926_vm2, %v15260_v42  ;;  %v2395_v3 = vadd.f32 %v2363_v31, %v15188_v41  ;;  %v18512_v9 = vld [vmem:[#allocation28_spill] sm:$0xff] }
 0x2b4   : > { %v2724_v57 = vmax.f32 %v2692_v17, 0.0  ;;  %v2723_v40 = vmax.f32 %v2691_v63, 0.0  ;;  %v2655_v25 = vadd.f32 %v2623_v32, %v2394_v38  ;;  %v2366_v54 = vmul.f32 %v15054_v12, %v18510_v56  ;;  %5787 = vperm.xlu1 %12881, %v5700_v2   ;;  %v5702_v17 = vld [vmem:[%s14348_s13 + $0xb1] sm:$0xff] }
 0x2b5   : > { %18509 = vst [vmem:[#allocation25_spill] sm:$0xff] %v15272_v11  ;;  %v2654_v47 = vadd.f32 %v2622_v14, %v2393_v7  ;;  %v2365_v8 = vmul.f32 %v15054_v12, %v18511_v34  ;;  %v4772_v46 = vld [vmem:[#allocation2 + $0x51] sm:$0xff]  ;;  %11733 = vmatprep.mubr.msk.bf16.mxu0 %vm269_vm0, %v15272_v11  ;;  %v2516_v0 = vpop.permute.xlu1 %2515  ;;  %v2511_v38 = vpop.permute.xlu0 %2510  ;;  %v4771_v7 = vld [vmem:[#allocation2 + $0x49] sm:$0xff]  ;;  %v15293_v31 = vadd.f32 %v2109_v16, %v15004_v23  ;;  %v18514_v16 = vld [vmem:[#allocation61_spill] sm:$0xff] }
 0x2b6   : > { %2757 = vst.msk [vmem:[#allocation2 + $0x81] sm:$0xff] %vm269_vm0, %v2724_v57  ;;  %2756 = vst.msk [vmem:[#allocation2 + $0x79] sm:$0xff] %vm269_vm0, %v2723_v40  ;;  %v2694_v51 = vadd.f32 %v15133_v22, %v2655_v25  ;;  %v2625_v62 = vmul.f32 %v15107_v45, %v2516_v0  ;;  %v2624_v39 = vmul.f32 %v15107_v45, %v2511_v38  ;;  %v5704_v38 = vld [vmem:[%s14348_s13 + $0xc9] sm:$0xff] }
 0x2b7   : > { %v2693_v41 = vadd.f32 %v15133_v22, %v2654_v47  ;;  %v15296_v26 = vadd.f32 %v2108_v13, %v15007_v50  ;;  %v2111_v49 = vmul.f32 %v15016_v43, %v18512_v9  ;;  %5782 = vperm.xlu0 %12880, %v5699_v44   ;;  %v15300_v61 = vpack.c.bf16 %v4772_v46, %v4771_v7  ;;  %v18515_v13 = vld [vmem:[#allocation63_spill] sm:$0xff] }
 0x2b8   : > { %v2726_v63 = vmax.f32 %v2694_v51, 0.0  ;;  %v2657_v14 = vadd.f32 %v2625_v62, %v2396_v27  ;;  %v2656_v24 = vadd.f32 %v2624_v39, %v2395_v3  ;;  %v2398_v2 = vadd.f32 %v2366_v54, %v15213_v10  ;;  %5797 = vperm.xlu1 %12881, %v5702_v17   ;;  %v18516_v54 = vld [vmem:[#allocation29_spill] sm:$0xff] }
 0x2b9   : > { %18513 = vst [vmem:[#allocation74_spill] sm:$0xff] %v15300_v61  ;;  %v2725_v32 = vmax.f32 %v2693_v41, 0.0  ;;  %v2397_v23 = vadd.f32 %v2365_v8, %v15216_v5  ;;  %v2368_v50 = vmul.f32 %v15054_v12, %v18514_v16  ;;  %v2367_v57 = vmul.f32 %v15054_v12, %v18515_v13  ;;  %v4774_v40 = vld [vmem:[#allocation2 + $0x69] sm:$0xff]  ;;  %11734 = vmatmul.mubr.msk.bf16.gmra.mrb[4].mxu0 %vm269_vm0, %v15300_v61  ;;  %v2526_v25 = vpop.permute.xlu1 %2525  ;;  %v2521_v47 = vpop.permute.xlu0 %2520  ;;  %v4773_v44 = vld [vmem:[#allocation2 + $0x61] sm:$0xff]  ;;  %v18517_v8 = vld [vmem:[#allocation32_spill] sm:$0xff] }
 0x2ba   : > { %2759 = vst.msk [vmem:[#allocation2 + $0x99] sm:$0xff] %vm269_vm0, %v2726_v63  ;;  %v2696_v10 = vadd.f32 %v15133_v22, %v2657_v14  ;;  %v2695_v5 = vadd.f32 %v15133_v22, %v2656_v24  ;;  %v2627_v27 = vmul.f32 %v15107_v45, %v2526_v25  ;;  %v2626_v3 = vmul.f32 %v15107_v45, %v2521_v47  ;;  %v5703_v39 = vld [vmem:[%s14348_s13 + $0xc1] sm:$0xff] }
 0x2bb   : > { %2758 = vst.msk [vmem:[#allocation2 + $0x91] sm:$0xff] %vm269_vm0, %v2725_v32  ;;  %v15319_v56 = vadd.f32 %v2111_v49, %v15021_v33  ;;  %v2110_v34 = vmul.f32 %v15016_v43, %v18516_v54  ;;  %v2113_v46 = vmul.f32 %v15016_v43, %v18517_v8  ;;  %5792 = vperm.xlu0 %12880, %v5701_v52   ;;  %v18519_v49 = vld [vmem:[#allocation64_spill] sm:$0xff]  ;;  %v18520_v63 = vld [vmem:[#allocation65_spill] sm:$0xff] }
 0x2bc   : > { %v15325_v0 = vpack.c.bf16 %v4774_v40, %v4773_v44  ;;  %v2728_v7 = vmax.f32 %v2696_v10, 0.0  ;;  %v2727_v51 = vmax.f32 %v2695_v5, 0.0  ;;  %v2659_v41 = vadd.f32 %v2627_v27, %v2398_v2  ;;  %5807 = vperm.xlu1 %12881, %v5704_v38   ;;  %v5706_v47 = vld [vmem:[%s14348_s13 + $0xe1] sm:$0xff] }
 0x2bd   : > { %v2658_v62 = vadd.f32 %v2626_v3, %v2397_v23  ;;  %v2400_v9 = vadd.f32 %v2368_v50, %v15238_v30  ;;  %v2399_v33 = vadd.f32 %v2367_v57, %v15241_v35  ;;  %v2370_v17 = vmul.f32 %v15054_v12, %v18519_v49  ;;  %v4776_v14 = vld [vmem:[#allocation2 + $0x81] sm:$0xff]  ;;  %v2536_v24 = vpop.permute.xlu1 %2535  ;;  %v2531_v52 = vpop.permute.xlu0 %2530  ;;  %v4775_v2 = vld [vmem:[#allocation2 + $0x79] sm:$0xff] }
 0x2be   : > { %18518 = vst [vmem:[#allocation75_spill] sm:$0xff] %v15325_v0  ;;  %v2369_v32 = vmul.f32 %v15054_v12, %v18520_v63  ;;  %11737 = vmatprep.mubr.msk.bf16.mxu0 %vm269_vm0, %v15325_v0  ;;  %2761 = vst.msk [vmem:[#allocation2 + $0xb1] sm:$0xff] %vm269_vm0, %v2728_v7  ;;  %v2698_v30 = vadd.f32 %v15133_v22, %v2659_v41  ;;  %v2629_v23 = vmul.f32 %v15107_v45, %v2536_v24  ;;  %v18521_v57 = vld [vmem:[#allocation33_spill] sm:$0xff]  ;;  %v15727_v0 = vld [vmem:[%s17967_s4 + $0x10] sm:$0xf] }
 0x2bf   : > { %2760 = vst.msk [vmem:[#allocation2 + $0xa9] sm:$0xff] %vm269_vm0, %v2727_v51  ;;  %v2697_v35 = vadd.f32 %v15133_v22, %v2658_v62  ;;  %v2628_v16 = vmul.f32 %v15107_v45, %v2531_v52  ;;  %v2142_v50 = vadd.f32 %v2110_v34, %v15024_v58  ;;  %v15345_v13 = vadd.f32 %v2113_v46, %v15031_v59  ;;  %v5705_v3 = vld [vmem:[%s14348_s13 + $0xd9] sm:$0xff]  ;;  %v18523_v58 = vld [vmem:[#allocation66_spill] sm:$0xff] }
 0x2c0   : > { %v2112_v40 = vmul.f32 %v15016_v43, %v18521_v57  ;;  %5802 = vperm.xlu0 %12880, %v5703_v39   ;;  %v15349_v25 = vpack.c.bf16 %v4776_v14, %v4775_v2  ;;  %v2730_v44 = vmax.f32 %v2698_v30, 0.0  ;;  %v2661_v5 = vadd.f32 %v2629_v23, %v2400_v9  ;;  %v18524_v34 = vld [vmem:[#allocation68_spill] sm:$0xff]  ;;  %5817 = vperm.xlu1 %12881, %v5706_v47   ;;  %v18528_v57 = vld [vmem:[#allocation69_spill] sm:$0xff] }
 0x2c1   : > { %v2729_v10 = vmax.f32 %v2697_v35, 0.0  ;;  %v2660_v27 = vadd.f32 %v2628_v16, %v2399_v33  ;;  %v2402_v54 = vadd.f32 %v2370_v17, %v15293_v31  ;;  %v2401_v8 = vadd.f32 %v2369_v32, %v15296_v26  ;;  %v4778_v38 = vld [vmem:[#allocation2 + $0x99] sm:$0xff]  ;;  %v2546_v51 = vpop.permute.xlu1 %2545  ;;  %v2541_v41 = vpop.permute.xlu0 %2540  ;;  %v5707_v35 = vld [vmem:[%s14348_s13 + $0xf1] sm:$0xff] }
 0x2c2   : > { %18522 = vst [vmem:[#allocation76_spill] sm:$0xff] %v15349_v25  ;;  %v2372_v59 = vmul.f32 %v15054_v12, %v18523_v58  ;;  %v2371_v46 = vmul.f32 %v15054_v12, %v18524_v34  ;;  %v4777_v7 = vld [vmem:[#allocation2 + $0x91] sm:$0xff]  ;;  %11738 = vmatmul.mubr.msk.bf16.gmra.mrb[8].mxu0 %vm269_vm0, %v15349_v25  ;;  %2763 = vst.msk [vmem:[#allocation2 + $0xc9] sm:$0xff] %vm269_vm0, %v2730_v44  ;;  %v2700_v31 = vadd.f32 %v15133_v22, %v2661_v5  ;;  %v18526_v17 = vld [vmem:[#allocation37_spill] sm:$0xff] }
 0x2c3   : > { %2762 = vst.msk [vmem:[#allocation2 + $0xc1] sm:$0xff] %vm269_vm0, %v2729_v10  ;;  %v2699_v26 = vadd.f32 %v15133_v22, %v2660_v27  ;;  %v2631_v62 = vmul.f32 %v15107_v45, %v2546_v51  ;;  %v2630_v39 = vmul.f32 %v15107_v45, %v2541_v41  ;;  %v2144_v9 = vadd.f32 %v2112_v40, %v15034_v19  ;;  %v18525_v33 = vld [vmem:[#allocation36_spill] sm:$0xff]  ;;  %v18529_v40 = vld [vmem:[#allocation70_spill] sm:$0xff] }
 0x2c4   : > { %v2115_v49 = vmul.f32 %v15016_v43, %v18525_v33  ;;  %v2114_v63 = vmul.f32 %v15016_v43, %v18526_v17  ;;  %5812 = vperm.xlu0 %12880, %v5705_v3   ;;  %v15372_v32 = vpack.c.bf16 %v4778_v38, %v4777_v7  ;;  %v5708_v14 = vld [vmem:[%s14348_s13 + $0xf9] sm:$0xff]  ;;  %v2732_v24 = vmax.f32 %v2700_v31, 0.0  ;;  %v5710_v38 = vld [vmem:[%s14348_s13 + $0x111] sm:$0xff]  ;;  %v11212_v25 = vld [vmem:[%s14348_s13 + $0x69] sm:$0xff] }
 0x2c5   : > { %v2731_v52 = vmax.f32 %v2699_v26, 0.0  ;;  %v2663_v2 = vadd.f32 %v2631_v62, %v2402_v54  ;;  %v2662_v30 = vadd.f32 %v2630_v39, %v2401_v8  ;;  %v2404_v23 = vadd.f32 %v2372_v59, %v15319_v56  ;;  %v4780_v44 = vld [vmem:[#allocation2 + $0xb1] sm:$0xff]  ;;  %v2556_v5 = vpop.permute.xlu1 %2555  ;;  %v2551_v27 = vpop.permute.xlu0 %2550  ;;  %5827 = vperm.xlu1 %12881, %v5708_v14   ;;  %v5709_v26 = vld [vmem:[%s14348_s13 + $0x109] sm:$0xff] }
 0x2c6   : > { %18527 = vst [vmem:[#allocation77_spill] sm:$0xff] %v15372_v32  ;;  %v2403_v16 = vadd.f32 %v2371_v46, %v2142_v50  ;;  %v2374_v19 = vmul.f32 %v15054_v12, %v18528_v57  ;;  %v2373_v47 = vmul.f32 %v15054_v12, %v18529_v40  ;;  %v4779_v10 = vld [vmem:[#allocation2 + $0xa9] sm:$0xff]  ;;  %11741 = vmatprep.mubr.msk.bf16.mxu0 %vm269_vm0, %v15372_v32  ;;  %2765 = vst.msk [vmem:[#allocation2 + $0xe1] sm:$0xff] %vm269_vm0, %v2732_v24  ;;  %v18530_v59 = vld [vmem:[#allocation40_spill] sm:$0xff] }
 0x2c7   : > { %2764 = vst.msk [vmem:[#allocation2 + $0xd9] sm:$0xff] %vm269_vm0, %v2731_v52  ;;  %v2702_v56 = vadd.f32 %v15133_v22, %v2663_v2  ;;  %v2701_v50 = vadd.f32 %v15133_v22, %v2662_v30  ;;  %v2633_v3 = vmul.f32 %v15107_v45, %v2556_v5  ;;  %v2632_v54 = vmul.f32 %v15107_v45, %v2551_v27  ;;  %v18532_v33 = vld [vmem:[#allocation12_spill] sm:$0xff]  ;;  %v5712_v40 = vld [vmem:[%s14348_s13 + $0x129] sm:$0xff]  ;;  %v5711_v27 = vld [vmem:[%s14348_s13 + $0x121] sm:$0xff] }
 0x2c8   : > { %v2147_v8 = vadd.f32 %v2115_v49, %v15045_v20  ;;  %v2146_v58 = vadd.f32 %v2114_v63, %v15057_v36  ;;  %v2117_v34 = vmul.f32 %v15016_v43, %v18530_v59  ;;  %5822 = vperm.xlu0 %12880, %v5707_v35   ;;  %v15393_v46 = vpack.c.bf16 %v4780_v44, %v4779_v10  ;;  %v18533_v49 = vld [vmem:[#allocation13_spill] sm:$0xff] }
 0x2c9   : > { %v2734_v7 = vmax.f32 %v2702_v56, 0.0  ;;  %v2733_v51 = vmax.f32 %v2701_v50, 0.0  ;;  %v2665_v41 = vadd.f32 %v2633_v3, %v2404_v23  ;;  %v2664_v31 = vadd.f32 %v2632_v54, %v2403_v16  ;;  %v4782_v17 = vld [vmem:[#allocation2 + $0xc9] sm:$0xff]  ;;  %v2566_v14 = vpop.permute.xlu1 %2565  ;;  %v2561_v24 = vpop.permute.xlu0 %2560  ;;  %5837 = vperm.xlu1 %12881, %v5710_v38   ;;  %v18534_v35 = vld [vmem:[#allocation41_spill] sm:$0xff]  ;;  %v18535_v16 = vld [vmem:[#allocation44_spill] sm:$0xff] }
 0x2ca   : > { %18531 = vst [vmem:[#allocation78_spill] sm:$0xff] %v15393_v46  ;;  %v2406_v62 = vadd.f32 %v2374_v19, %v15345_v13  ;;  %v2405_v39 = vadd.f32 %v2373_v47, %v2144_v9  ;;  %v2376_v20 = vmul.f32 %v15054_v12, %v18532_v33  ;;  %v2375_v36 = vmul.f32 %v15054_v12, %v18533_v49  ;;  %v4781_v63 = vld [vmem:[#allocation2 + $0xc1] sm:$0xff]  ;;  %v18537_v3 = vld [vmem:[#allocation71_spill] sm:$0xff]  ;;  %v18538_v54 = vld [vmem:[#allocation72_spill] sm:$0xff] }
 0x2cb   : > { %11742 = vmatmul.mubr.msk.bf16.gmra.mrb[12].mxu0 %vm269_vm0, %v15393_v46  ;;  %2767 = vst.msk [vmem:[#allocation2 + $0xf9] sm:$0xff] %vm269_vm0, %v2734_v7  ;;  %2766 = vst.msk [vmem:[#allocation2 + $0xf1] sm:$0xff] %vm269_vm0, %v2733_v51  ;;  %v2704_v13 = vadd.f32 %v15133_v22, %v2665_v41  ;;  %v2703_v9 = vadd.f32 %v15133_v22, %v2664_v31  ;;  %v2635_v52 = vmul.f32 %v15107_v45, %v2566_v14  ;;  %v5714_v49 = vld [vmem:[%s14348_s13 + $0x141] sm:$0xff] }
 0x2cc   : > { %v2634_v2 = vmul.f32 %v15107_v45, %v2561_v24  ;;  %v2149_v30 = vadd.f32 %v2117_v34, %v15060_v15  ;;  %v2116_v23 = vmul.f32 %v15016_v43, %v18534_v35  ;;  %v2119_v57 = vmul.f32 %v15016_v43, %v18535_v16  ;;  %5832 = vperm.xlu0 %12880, %v5709_v26   ;;  %v5713_v24 = vld [vmem:[%s14348_s13 + $0x139] sm:$0xff] }
 0x2cd   : > { %v15415_v19 = vpack.c.bf16 %v4782_v17, %v4781_v63  ;;  %v2736_v47 = vmax.f32 %v2704_v13, 0.0  ;;  %v2735_v44 = vmax.f32 %v2703_v9, 0.0  ;;  %v2667_v10 = vadd.f32 %v2635_v52, %v2406_v62  ;;  %v4784_v34 = vld [vmem:[#allocation2 + $0xe1] sm:$0xff]  ;;  %v2576_v7 = vpop.permute.xlu1 %2575  ;;  %v2571_v51 = vpop.permute.xlu0 %2570  ;;  %5847 = vperm.xlu1 %12881, %v5712_v40   ;;  %v18541_v52 = vld [vmem:[#allocation16_spill] sm:$0xff] }
 0x2ce   : > { %v2666_v5 = vadd.f32 %v2634_v2, %v2405_v39  ;;  %v2408_v56 = vadd.f32 %v2376_v20, %v2147_v8  ;;  %v2407_v50 = vadd.f32 %v2375_v36, %v2146_v58  ;;  %v2378_v15 = vmul.f32 %v15054_v12, %v18537_v3  ;;  %v4783_v38 = vld [vmem:[#allocation2 + $0xd9] sm:$0xff] }
 0x2cf   : > { %18536 = vst [vmem:[#allocation79_spill] sm:$0xff] %v15415_v19  ;;  %v2377_v59 = vmul.f32 %v15054_v12, %v18538_v54  ;;  %11745 = vmatprep.mubr.msk.bf16.mxu0 %vm269_vm0, %v15415_v19  ;;  %2769 = vst.msk [vmem:[#allocation2 + $0x111] sm:$0xff] %vm269_vm0, %v2736_v47  ;;  %v2706_v8 = vadd.f32 %v15133_v22, %v2667_v10  ;;  %v2637_v41 = vmul.f32 %v15107_v45, %v2576_v7  ;;  %v18539_v39 = vld [vmem:[#allocation45_spill] sm:$0xff]  ;;  %v5715_v7 = vld [vmem:[%s14348_s13 + $0x151] sm:$0xff] }
 0x2d0   : > { %2768 = vst.msk [vmem:[#allocation2 + $0x109] sm:$0xff] %vm269_vm0, %v2735_v44  ;;  %v2705_v58 = vadd.f32 %v15133_v22, %v2666_v5  ;;  %v2636_v31 = vmul.f32 %v15107_v45, %v2571_v51  ;;  %v2148_v26 = vadd.f32 %v2116_v23, %v15069_v28  ;;  %v2151_v62 = vadd.f32 %v2119_v57, %v15072_v6  ;;  %v18542_v28 = vld [vmem:[#allocation17_spill] sm:$0xff]  ;;  %v18543_v5 = vld [vmem:[#allocation48_spill] sm:$0xff]  ;;  %v11209_v19 = vld [vmem:[%s14348_s13 + $0x49] sm:$0xff] }
 0x2d1   : > { %v2118_v33 = vmul.f32 %v15016_v43, %v18539_v39  ;;  %5842 = vperm.xlu0 %12880, %v5711_v27   ;;  %v15435_v20 = vpack.c.bf16 %v4784_v34, %v4783_v38  ;;  %v2738_v36 = vmax.f32 %v2706_v8, 0.0  ;;  %v2669_v63 = vadd.f32 %v2637_v41, %v2408_v56  ;;  %v2586_v35 = vpop.permute.xlu1 %2585  ;;  %v2581_v23 = vpop.permute.xlu0 %2580  ;;  %5857 = vperm.xlu1 %12881, %v5714_v49   ;;  %v18544_v56 = vld [vmem:[#allocation49_spill] sm:$0xff]  ;;  %v18546_v49 = vld [vmem:[#allocation24_spill] sm:$0xff] }
 0x2d2   : > { %v2737_v17 = vmax.f32 %v2705_v58, 0.0  ;;  %v2668_v14 = vadd.f32 %v2636_v31, %v2407_v50  ;;  %v2410_v13 = vadd.f32 %v2378_v15, %v2149_v30  ;;  %v2409_v9 = vadd.f32 %v2377_v59, %v2148_v26  ;;  %v2849_v16 = vld [vmem:[#allocation2 + $0xf1] sm:$0xff]  ;;  %v2850_v44 = vld [vmem:[#allocation2 + $0xf9] sm:$0xff] }
 0x2d3   : > { %18540 = vst [vmem:[#allocation80_spill] sm:$0xff] %v15435_v20  ;;  %v2380_v2 = vmul.f32 %v15054_v12, %v18541_v52  ;;  %v2379_v6 = vmul.f32 %v15054_v12, %v18542_v28  ;;  %11746 = vmatmul.mubr.msk.bf16.gmra.mrb[16].mxu0 %vm269_vm0, %v15435_v20  ;;  %2771 = vst.msk [vmem:[#allocation2 + $0x129] sm:$0xff] %vm269_vm0, %v2738_v36  ;;  %v2708_v30 = vadd.f32 %v15133_v22, %v2669_v63  ;;  %v5716_v15 = vld [vmem:[%s14348_s13 + $0x159] sm:$0xff]  ;;  %v5949_v63 = vld [vmem:[%s14348_s13 + $0xa] sm:$0xff] }
 0x2d4   : > { %2770 = vst.msk [vmem:[#allocation2 + $0x121] sm:$0xff] %vm269_vm0, %v2737_v17  ;;  %v2707_v57 = vadd.f32 %v15133_v22, %v2668_v14  ;;  %v2639_v40 = vmul.f32 %v15107_v45, %v2586_v35  ;;  %v2638_v47 = vmul.f32 %v15107_v45, %v2581_v23  ;;  %v2150_v10 = vadd.f32 %v2118_v33, %v15079_v48  ;;  %v5948_v52 = vld [vmem:[%s14348_s13 + $0x2] sm:$0xff]  ;;  %v11210_v20 = vld [vmem:[%s14348_s13 + $0x51] sm:$0xff] }
 0x2d5   : > { %v2121_v27 = vmul.f32 %v15016_v43, %v18543_v5  ;;  %v2120_v50 = vmul.f32 %v15016_v43, %v18544_v56  ;;  %5852 = vperm.xlu0 %12880, %v5713_v24   ;;  %v2871_v3 = vpack.c.bf16 %v2850_v44, %v2849_v16  ;;  %v2740_v54 = vmax.f32 %v2708_v30, 0.0  ;;  %v2596_v43 = vpop.permute.xlu1 %2595  ;;  %v2591_v41 = vpop.permute.xlu0 %2590  ;;  %5867 = vperm.xlu1 %12881, %v5716_v15  }
 0x2d6   : > { %v2739_v59 = vmax.f32 %v2707_v57, 0.0  ;;  %v2671_v34 = vadd.f32 %v2639_v40, %v2410_v13  ;;  %v2670_v38 = vadd.f32 %v2638_v47, %v2409_v9  ;;  %v2412_v51 = vadd.f32 %v2380_v2, %v2151_v62 }
 0x2d7   : > { %v2411_v8 = vadd.f32 %v2379_v6, %v2150_v10  ;;  %v2382_v58 = vmul.f32 %v15054_v12, %v15088_v29  ;;  %v2381_v48 = vmul.f32 %v15054_v12, %v15090_v37  ;;  %11749 = vmatprep.mubr.msk.bf16.mxu0 %vm269_vm0, %v2871_v3  ;;  %v2851_v31 = vld [vmem:[#allocation2 + $0x109] sm:$0xff]  ;;  %2773 = vst.msk [vmem:[#allocation2 + $0x141] sm:$0xff] %vm269_vm0, %v2740_v54  ;;  %v2852_v12 = vld [vmem:[#allocation2 + $0x111] sm:$0xff]  ;;  %v18545_v37 = vld [vmem:[#allocation73_spill] sm:$0xff] }
 0x2d8   : > { %2772 = vst.msk [vmem:[#allocation2 + $0x139] sm:$0xff] %vm269_vm0, %v2739_v59  ;;  %v2710_v26 = vadd.f32 %v15133_v22, %v2671_v34  ;;  %v2709_v62 = vadd.f32 %v15133_v22, %v2670_v38  ;;  %v2641_v29 = vmul.f32 %v15107_v45, %v2596_v43  ;;  %v2640_v39 = vmul.f32 %v15107_v45, %v2591_v41  ;;  %v11076_v10 = vld [vmem:[%s14348_s13 + $0x20] sm:$0xff]  ;;  %v11075_v3 = vld [vmem:[%s14348_s13 + $0x18] sm:$0xff] }
 0x2d9   : > { %v2153_v33 = vadd.f32 %v2121_v27, %v18545_v37  ;;  %v2152_v36 = vadd.f32 %v2120_v50, %v18546_v49  ;;  %5862 = vperm.xlu0 %12880, %v5715_v7   ;;  %v2872_v17 = vpack.c.bf16 %v2852_v12, %v2851_v31  ;;  %v2606_v6 = vpop.permute.xlu1 %2605  ;;  %v2601_v35 = vpop.permute.xlu0 %2600  ;;  %5988 = vperm.xlu1 %12881, %v5949_v63   ;;  %v11142_v31 = vld [vmem:[%s14348_s13 + $0x22] sm:$0xff]  ;;  %v15517_v63 = vld [vmem:[%s14348_s13 + $0x32] sm:$0xff] }
 0x2da   : > { %v2742_v14 = vmax.f32 %v2710_v26, 0.0  ;;  %v2741_v24 = vmax.f32 %v2709_v62, 0.0  ;;  %v2673_v13 = vadd.f32 %v2641_v29, %v2412_v51  ;;  %v2672_v9 = vadd.f32 %v2640_v39, %v2411_v8  ;;  %v2854_v16 = vld [vmem:[#allocation2 + $0x129] sm:$0xff]  ;;  %v2780_v26 = vld [vmem:[#allocation2] sm:$0xff] }
 0x2db   : > { %v2414_v2 = vadd.f32 %v2382_v58, %v2153_v33  ;;  %v2413_v28 = vadd.f32 %v2381_v48, %v2152_v36  ;;  %11750 = vmatmul.mubr.msk.bf16.gmra.mrb[20].mxu0 %vm269_vm0, %v2872_v17  ;;  %v2853_v23 = vld [vmem:[#allocation2 + $0x121] sm:$0xff]  ;;  %v2643_v40 = vmul.f32 %v15107_v45, %v2606_v6  ;;  %v2642_v47 = vmul.f32 %v15107_v45, %v2601_v35  ;;  %v11175_v6 = vld [vmem:[%s14348_s13 + $0x38] sm:$0xff] }
 0x2dc   : > { %2775 = vst.msk [vmem:[#allocation2 + $0x159] sm:$0xff] %vm269_vm0, %v2742_v14  ;;  %2774 = vst.msk [vmem:[#allocation2 + $0x151] sm:$0xff] %vm269_vm0, %v2741_v24  ;;  %v2712_v30 = vadd.f32 %v15133_v22, %v2673_v13  ;;  %v2711_v57 = vadd.f32 %v15133_v22, %v2672_v9  ;;  %v2873_v44 = vpack.c.bf16 %v2854_v16, %v2853_v23  ;;  %v2781_v62 = vld [vmem:[#allocation2 + $0x8] sm:$0xff]  ;;  %v11141_v29 = vld [vmem:[%s14348_s13 + $0x1a] sm:$0xff]  ;;  %v3401_v16 = vsel %vm2926_vm2, %v15260_v42, 0 }
 0x2dd   : > { %5983 = vperm.xlu0 %12880, %v5948_v52   ;;  %v2675_v56 = vadd.f32 %v2643_v40, %v2414_v2  ;;  %v2674_v50 = vadd.f32 %v2642_v47, %v2413_v28  ;;  %v15483_v15 = vpop.permute.xlu1 %5466  ;;  %v15485_v54 = vpop.permute.xlu0 %5461  ;;  %6250 = vperm.xlu1 %12881, %v11076_v10   ;;  %v15514_v17 = vld [vmem:[%s14348_s13 + $0x3a] sm:$0xff]  ;;  %v4476_v13 = vld [vmem:[#allocation2 + $0x30] sm:$0xff]  ;;  %v15542_v40 = vld [vmem:[%s17967_s4 + $0xc] sm:$0xf] }
 0x2de   : > { %v2744_v5 = vmax.f32 %v2712_v30, 0.0  ;;  %v2743_v27 = vmax.f32 %v2711_v57, 0.0  ;;  %11753 = vmatprep.mubr.msk.bf16.mxu0 %vm269_vm0, %v2873_v44  ;;  %v2856_v34 = vld [vmem:[#allocation2 + $0x141] sm:$0xff]  ;;  %v2782_v14 = vld [vmem:[#allocation2 + $0x18] sm:$0xff]  ;;  %v11174_v23 = vld [vmem:[%s14348_s13 + $0x30] sm:$0xff] }
 0x2df   : > { %v2855_v59 = vld [vmem:[#allocation2 + $0x139] sm:$0xff]  ;;  %v2714_v45 = vadd.f32 %v15133_v22, %v2675_v56  ;;  %v2713_v38 = vadd.f32 %v15133_v22, %v2674_v50  ;;  %v4478_v42 = vld [vmem:[#allocation2 + $0x48] sm:$0xff]  ;;  %v4479_v47 = vld [vmem:[#allocation2 + $0x50] sm:$0xff] }
 0x2e0   : > { %2777 = vst.msk [vmem:[#allocation2 + $0x171] sm:$0xff] %vm269_vm0, %v2744_v5  ;;  %2776 = vst.msk [vmem:[#allocation2 + $0x169] sm:$0xff] %vm269_vm0, %v2743_v27  ;;  %v2874_v7 = vpack.c.bf16 %v2856_v34, %v2855_v59  ;;  %v2783_v24 = vld [vmem:[#allocation2 + $0x20] sm:$0xff]  ;;  %v4477_v9 = vld [vmem:[#allocation2 + $0x38] sm:$0xff]  ;;  %v15552_v56 = vpack.c.bf16 %v4479_v47, %v4478_v42 }
 0x2e1   : > { %6245 = vperm.xlu0 %12880, %v11075_v3   ;;  %v2746_v51 = vmax.f32 %v2714_v45, 0.0  ;;  %v2745_v8 = vmax.f32 %v2713_v38, 0.0  ;;  %v15492_v58 = vpop.permute.xlu1 %5476  ;;  %v15494_v48 = vpop.permute.xlu0 %5471  ;;  %6511 = vperm.xlu1 %12881, %v15136_v53   ;;  %v2812_v53 = vpack.c.bf16 %v2781_v62, %v2780_v26  ;;  %v15525_v28 = vpack.c.bf16 %v2783_v24, %v2782_v14  ;;  %v4480_v44 = vld [vmem:[#allocation2 + $0x60] sm:$0xff]  ;;  %v4481_v10 = vld [vmem:[#allocation2 + $0x68] sm:$0xff]  ;;  %v15555_v50 = vld [vmem:[%s14348_s13 + $0x50] sm:$0xff] }
 0x2e2   : > { %v15528_v35 = vpack.c.bf16 %v4477_v9, %v4476_v13  ;;  %18556 = vst [vmem:[#allocation88_spill] sm:$0xff] %v15552_v56  ;;  %v15557_v3 = vpack.c.bf16 %v4481_v10, %v4480_v44  ;;  %v15560_v59 = vld [vmem:[%s14348_s13 + $0x48] sm:$0xff]  ;;  %v4482_v38 = vld [vmem:[#allocation2 + $0x78] sm:$0xff] }
 0x2e3   : > { %11754 = vmatmul.mubr.msk.bf16.gmra.mrb[24].mxu0 %vm269_vm0, %v2874_v7  ;;  %v2857_v43 = vld [vmem:[#allocation2 + $0x151] sm:$0xff]  ;;  %v2858_v41 = vld [vmem:[#allocation2 + $0x159] sm:$0xff]  ;;  %2779 = vst.msk [vmem:[#allocation2 + $0x189] sm:$0xff] %vm269_vm0, %v2746_v51  ;;  %2778 = vst.msk [vmem:[#allocation2 + $0x181] sm:$0xff] %vm269_vm0, %v2745_v8 }
 0x2e4   : > { %v2875_v22 = vpack.c.bf16 %v2858_v41, %v2857_v43  ;;  %18551 = vst [vmem:[#allocation83_spill] sm:$0xff] %v15528_v35  ;;  %18557 = vst [vmem:[#allocation89_spill] sm:$0xff] %v15557_v3  ;;  %v4483_v7 = vld [vmem:[#allocation2 + $0x80] sm:$0xff]  ;;  %v2792_v43 = vld [vmem:[#allocation2 + $0x90] sm:$0xff] }
 0x2e5   : > { %6506 = vperm.xlu0 %12880, %v15145_v60   ;;  %v15503_v39 = vpop.permute.xlu1 %5486  ;;  %v15505_v12 = vpop.permute.xlu0 %5481  ;;  %6772 = vperm.xlu1 %12881, %v11142_v31   ;;  %v2793_v41 = vld [vmem:[#allocation2 + $0x98] sm:$0xff]  ;;  %v2797_v14 = vld [vmem:[#allocation2 + $0xc8] sm:$0xff] }
 0x2e6   : > { %11757 = vmatprep.mubr.msk.bf16.mxu0 %vm269_vm0, %v2875_v22  ;;  %v15578_v22 = vpack.c.bf16 %v4483_v7, %v4482_v38  ;;  %v15621_v47 = vld [vmem:[%s14348_s13 + $0x52] sm:$0xff]  ;;  %v15626_v10 = vld [vmem:[%s14348_s13 + $0x4a] sm:$0xff] }
 0x2e7   : > { %v2859_v37 = vld [vmem:[#allocation2 + $0x169] sm:$0xff]  ;;  %v2860_v33 = vld [vmem:[#allocation2 + $0x171] sm:$0xff] }
 0x2e8   : > { %v2876_v49 = vpack.c.bf16 %v2860_v33, %v2859_v37  ;;  %18562 = vst [vmem:[#allocation94_spill] sm:$0xff] %v15578_v22  ;;  %v2795_v37 = vld [vmem:[#allocation2 + $0xb0] sm:$0xff] }
 0x2e9   : > { %6767 = vperm.xlu0 %12880, %v11141_v29   ;;  %v15508_v60 = vpop.permute.xlu1 %5496  ;;  %v15510_v36 = vpop.permute.xlu0 %5491  ;;  %5998 = vperm.xlu1 %12881, %v11142_v31   ;;  %v15580_v31 = vpack.c.bf16 %v2793_v41, %v2792_v43 }
 0x2ea   : > { %18547 = vst [vmem:[#allocation81_spill] sm:$0xff] %v15508_v60  ;;  %18548 = vst [vmem:[#allocation103_spill] sm:$0xff] %v15510_v36  ;;  %v15943_v36 = vld [vmem:[%s14348_s13 + $0xb2] sm:$0xff] }
 0x2eb   : > { %11758 = vmatmul.mubr.msk.bf16.gmra.mrb[28].mxu0 %vm269_vm0, %v2876_v49 }
 0x2ec   : > { %11763 = vmatprep.mubr.msk.bf16.mxu0 %vm269_vm0, %v2812_v53  ;;  %v2796_v53 = vld [vmem:[#allocation2 + $0xc0] sm:$0xff] }
 0x2ed   : > { %5993 = vperm.xlu0 %12880, %v11141_v29   ;;  %v15519_v52 = vpop.permute.xlu1 %5506  ;;  %v15521_v2 = vpop.permute.xlu0 %5501  ;;  %6008 = vperm.xlu1 %12881, %v15514_v17   ;;  %v2794_v29 = vld [vmem:[#allocation2 + $0xa8] sm:$0xff]  ;;  %v15600_v13 = vpack.c.bf16 %v2797_v14, %v2796_v53 }
 0x2ee   : > { %18549 = vst [vmem:[#allocation104_spill] sm:$0xff] %v15519_v52  ;;  %18550 = vst [vmem:[#allocation82_spill] sm:$0xff] %v15521_v2  ;;  %v15598_v24 = vpack.c.bf16 %v2795_v37, %v2794_v29  ;;  %v2804_v29 = vld [vmem:[#allocation2 + $0x120] sm:$0xff]  ;;  %v2805_v37 = vld [vmem:[#allocation2 + $0x128] sm:$0xff] }
 0x2ef   : > { %v15646_v14 = vpack.c.bf16 %v2805_v37, %v2804_v29  ;;  %v7930_v29 = vld [vmem:[#allocation2 + $0x9] sm:$0xff] }
 0x2f0   : > { %v15667_v37 = vld [vmem:[%s14348_s13 + $0x62] sm:$0xff] }
 0x2f1   : > { %6003 = vperm.xlu0 %12880, %v15517_v63   ;;  %v15535_v30 = vpop.permute.xlu1 %5516  ;;  %v15537_v57 = vpop.permute.xlu0 %5511  ;;  %7034 = vperm.xlu1 %12881, %v11175_v6  }
 0x2f2   : > { %18552 = vst [vmem:[#allocation84_spill] sm:$0xff] %v15535_v30  ;;  %18553 = vst [vmem:[#allocation85_spill] sm:$0xff] %v15537_v57  ;;  %v15865_v57 = vld [vmem:[%s17967_s4 + $0x14] sm:$0xf] }
 0x2f3   : > { %11764 = vmatmul.mubr.msk.bf16.vlgmr.msra.gmra.mrb[0].mxu0 %vm269_vm0, %v15525_v28 }
 0x2f4   : > { %11767 = vmatprep.mubr.msk.bf16.mxu0 %vm269_vm0, %v15528_v35  ;;  %11796 = vmatpush3.bf16.msra.mxu0 %v3401_v16  ;;  %v2801_v16 = vld [vmem:[#allocation2 + $0xf8] sm:$0xff] }
 0x2f5   : > { %7029 = vperm.xlu0 %12880, %v11174_v23   ;;  %12854 = vmatprep.subr.msk.bf16.mxu0 %vm2926_vm2, %v15542_v40  ;;  %v15548_v5 = vpop.permute.xlu1 %5526  ;;  %v15550_v27 = vpop.permute.xlu0 %5521  ;;  %v3599_v35 = vld [vmem:[#allocation2 + $0x38] sm:$0xff] }
 0x2f6   : > { %18554 = vst [vmem:[#allocation86_spill] sm:$0xff] %v15548_v5  ;;  %18555 = vst [vmem:[#allocation87_spill] sm:$0xff] %v15550_v27  ;;  %6260 = vperm.xlu1 %12881, %v11175_v6  }
 0x2f9   : > { %6255 = vperm.xlu0 %12880, %v11174_v23   ;;  %v15564_v34 = vpop.permute.xlu1 %5536  ;;  %v15566_v45 = vpop.permute.xlu0 %5531  ;;  %v2800_v23 = vld [vmem:[#allocation2 + $0xf0] sm:$0xff] }
 0x2fa   : > { %18558 = vst [vmem:[#allocation90_spill] sm:$0xff] %v15564_v34  ;;  %18559 = vst [vmem:[#allocation91_spill] sm:$0xff] %v15566_v45  ;;  %6270 = vperm.xlu1 %12881, %v15555_v50   ;;  %v15623_v44 = vpack.c.bf16 %v2801_v16, %v2800_v23  ;;  %v7977_v23 = vld [vmem:[%s17967_s4 + $0x4] sm:$0xf]  ;;  %v15750_v45 = vld [vmem:[%s14348_s13 + $0x79] sm:$0xff] }
 0x2fb   : > { %11768 = vmatmul.mubr.msk.bf16.gmra.mrb[4].mxu0 %vm269_vm0, %v15552_v56  ;;  %v8027_v16 = vsel %vm2926_vm2, %v7977_v23, 0  ;;  %12860 = vmatprep.subr.msk.bf16.mxu1 %vm2926_vm2, %v7977_v23  ;;  %v3598_v56 = vld [vmem:[#allocation2 + $0x30] sm:$0xff] }
 0x2fc   : > { %11771 = vmatprep.mubr.msk.bf16.mxu0 %vm269_vm0, %v15557_v3  ;;  %12034 = vmatpush3.bf16.msra.mxu1 %v8027_v16  ;;  %v15833_v3 = vld [vmem:[%s14348_s13 + $0xb0] sm:$0xff] }
 0x2fd   : > { %6265 = vperm.xlu0 %12880, %v15560_v59   ;;  %v15572_v51 = vpop.permute.xlu1 %5546  ;;  %v15574_v8 = vpop.permute.xlu0 %5541 }
 0x2fe   : > { %18560 = vst [vmem:[#allocation92_spill] sm:$0xff] %v15572_v51  ;;  %18561 = vst [vmem:[#allocation93_spill] sm:$0xff] %v15574_v8  ;;  %7295 = vperm.xlu1 %12881, %v15168_v1   ;;  %v15747_v51 = vld [vmem:[%s14348_s13 + $0x81] sm:$0xff] }
 0x301   : > { %7290 = vperm.xlu0 %12880, %v15171_v21   ;;  %v15584_v26 = vpop.permute.xlu1 %5556  ;;  %v15586_v62 = vpop.permute.xlu0 %5551 }
 0x302   : > { %18563 = vst [vmem:[#allocation95_spill] sm:$0xff] %v15584_v26  ;;  %18564 = vst [vmem:[#allocation96_spill] sm:$0xff] %v15586_v62  ;;  %6521 = vperm.xlu1 %12881, %v15168_v1  }
 0x303   : > { %11772 = vmatmul.mubr.msk.bf16.gmra.mrb[8].mxu0 %vm269_vm0, %v15578_v22 }
 0x304   : > { %11775 = vmatprep.mubr.msk.bf16.mxu0 %vm269_vm0, %v15580_v31 }
 0x305   : > { %6516 = vperm.xlu0 %12880, %v15171_v21   ;;  %v15592_v33 = vpop.permute.xlu1 %5566  ;;  %v15594_v49 = vpop.permute.xlu0 %5561 }
 0x306   : > { %18565 = vst [vmem:[#allocation97_spill] sm:$0xff] %v15592_v33  ;;  %18566 = vst [vmem:[#allocation98_spill] sm:$0xff] %v15594_v49  ;;  %6531 = vperm.xlu1 %12881, %v15196_v55   ;;  %v2798_v55 = vld [vmem:[#allocation2 + $0xd8] sm:$0xff]  ;;  %v11178_v33 = vld [vmem:[%s14348_s13 + $0x60] sm:$0xff] }
 0x309   : > { %6526 = vperm.xlu0 %12880, %v15199_v4   ;;  %v15604_v1 = vpop.permute.xlu1 %5576  ;;  %v15606_v21 = vpop.permute.xlu0 %5571  ;;  %v2799_v4 = vld [vmem:[#allocation2 + $0xe0] sm:$0xff] }
 0x30a   : > { %18567 = vst [vmem:[#allocation3_spill] sm:$0xff] %v15604_v1  ;;  %18568 = vst [vmem:[#allocation99_spill] sm:$0xff] %v15606_v21  ;;  %7556 = vperm.xlu1 %12881, %v15514_v17   ;;  %v15618_v42 = vpack.c.bf16 %v2799_v4, %v2798_v55  ;;  %v3694_v21 = vsel %vm2926_vm2, %v15542_v40, 0 }
 0x30b   : > { %11776 = vmatmul.mubr.msk.bf16.gmra.mrb[12].mxu0 %vm269_vm0, %v15598_v24 }
 0x30c   : > { %11779 = vmatprep.mubr.msk.bf16.mxu0 %vm269_vm0, %v15600_v13 }
 0x30d   : > { %7551 = vperm.xlu0 %12880, %v15517_v63   ;;  %v15612_v9 = vpop.permute.xlu1 %5586  ;;  %v15614_v6 = vpop.permute.xlu0 %5581 }
 0x30e   : > { %18569 = vst [vmem:[#allocation4_spill] sm:$0xff] %v15612_v9  ;;  %18570 = vst [vmem:[#allocation5_spill] sm:$0xff] %v15614_v6  ;;  %6782 = vperm.xlu1 %12881, %v15514_v17   ;;  %v2802_v17 = vld [vmem:[#allocation2 + $0x108] sm:$0xff]  ;;  %v3308_v9 = vld [vmem:[#allocation2 + $0x3a] sm:$0xff] }
 0x311   : > { %6777 = vperm.xlu0 %12880, %v15517_v63   ;;  %v15630_v38 = vpop.permute.xlu1 %5596  ;;  %v15632_v7 = vpop.permute.xlu0 %5591  ;;  %v2803_v63 = vld [vmem:[#allocation2 + $0x110] sm:$0xff] }
 0x312   : > { %18571 = vst [vmem:[#allocation6_spill] sm:$0xff] %v15630_v38  ;;  %18572 = vst [vmem:[#allocation7_spill] sm:$0xff] %v15632_v7  ;;  %6792 = vperm.xlu1 %12881, %v15621_v47   ;;  %v15644_v53 = vpack.c.bf16 %v2803_v63, %v2802_v17  ;;  %v15663_v17 = vld [vmem:[%s14348_s13 + $0x6a] sm:$0xff]  ;;  %v7929_v63 = vld [vmem:[#allocation2 + $0x1] sm:$0xff] }
 0x313   : > { %11780 = vmatmul.mubr.msk.bf16.gmra.mrb[16].mxu0 %vm269_vm0, %v15618_v42  ;;  %v2808_v7 = vld [vmem:[#allocation2 + $0x150] sm:$0xff]  ;;  %v11179_v38 = vld [vmem:[%s14348_s13 + $0x68] sm:$0xff] }
 0x314   : > { %11783 = vmatprep.mubr.msk.bf16.mxu0 %vm269_vm0, %v15623_v44 }
 0x315   : > { %6787 = vperm.xlu0 %12880, %v15626_v10   ;;  %v15638_v43 = vpop.permute.xlu1 %5606  ;;  %v15640_v41 = vpop.permute.xlu0 %5601 }
 0x316   : > { %18573 = vst [vmem:[#allocation100_spill] sm:$0xff] %v15638_v43  ;;  %18574 = vst [vmem:[#allocation101_spill] sm:$0xff] %v15640_v41  ;;  %6018 = vperm.xlu1 %12881, %v15621_v47   ;;  %v7961_v41 = vpack.c.bf16 %v7930_v29, %v7929_v63 }
 0x318   : > { %12035 = vmatprep.mubr.msk.bf16.mxu1 %vm269_vm0, %v7961_v41  ;;  %v3303_v41 = vld [vmem:[#allocation2 + $0x2] sm:$0xff] }
 0x319   : > { %6013 = vperm.xlu0 %12880, %v15626_v10   ;;  %v15650_v55 = vpop.permute.xlu1 %5616  ;;  %v15652_v4 = vpop.permute.xlu0 %5611 }
 0x31a   : > { %18575 = vst [vmem:[#allocation10_spill] sm:$0xff] %v15650_v55  ;;  %18576 = vst [vmem:[#allocation11_spill] sm:$0xff] %v15652_v4  ;;  %7044 = vperm.xlu1 %12881, %v15555_v50   ;;  %v2806_v4 = vld [vmem:[#allocation2 + $0x138] sm:$0xff]  ;;  %v2807_v55 = vld [vmem:[#allocation2 + $0x140] sm:$0xff] }
 0x31b   : > { %11784 = vmatmul.mubr.msk.bf16.gmra.mrb[20].mxu0 %vm269_vm0, %v15644_v53  ;;  %v15676_v23 = vpack.c.bf16 %v2807_v55, %v2806_v4  ;;  %v3304_v55 = vld [vmem:[#allocation2 + $0xa] sm:$0xff] }
 0x31c   : > { %11787 = vmatprep.mubr.msk.bf16.mxu0 %vm269_vm0, %v15646_v14  ;;  %v2810_v4 = vld [vmem:[#allocation2 + $0x168] sm:$0xff]  ;;  %v3335_v62 = vpack.c.bf16 %v3304_v55, %v3303_v41  ;;  %v3305_v41 = vld [vmem:[#allocation2 + $0x1a] sm:$0xff] }
 0x31d   : > { %7039 = vperm.xlu0 %12880, %v15560_v59   ;;  %v15669_v43 = vpop.permute.xlu1 %5727  ;;  %v15671_v50 = vpop.permute.xlu0 %5722  ;;  %v2809_v59 = vld [vmem:[#allocation2 + $0x158] sm:$0xff]  ;;  %v3306_v55 = vld [vmem:[#allocation2 + $0x22] sm:$0xff] }
 0x31e   : > { %6028 = vperm.xlu1 %12881, %v15663_v17   ;;  %v15679_v49 = vpack.c.bf16 %v2809_v59, %v2808_v7  ;;  %v2811_v7 = vld [vmem:[#allocation2 + $0x170] sm:$0xff] }
 0x31f   : > { %v15694_v26 = vpack.c.bf16 %v2811_v7, %v2810_v4  ;;  %v3307_v7 = vld [vmem:[#allocation2 + $0x32] sm:$0xff] }
 0x321   : > { %6023 = vperm.xlu0 %12880, %v15667_v37   ;;  %v15684_v16 = vpop.permute.xlu1 %5737  ;;  %v15688_v63 = vpop.permute.xlu0 %5732 }
 0x322   : > { %7054 = vperm.xlu1 %12881, %v11179_v38  }
 0x323   : > { %11788 = vmatmul.mubr.msk.bf16.gmra.mrb[24].mxu0 %vm269_vm0, %v15676_v23 }
 0x324   : > { %11791 = vmatprep.mubr.msk.bf16.mxu0 %vm269_vm0, %v15679_v49 }
 0x325   : > { %7049 = vperm.xlu0 %12880, %v11178_v33   ;;  %v15690_v29 = vpop.permute.xlu1 %5747  ;;  %v15692_v59 = vpop.permute.xlu0 %5742 }
 0x326   : > { %6280 = vperm.xlu1 %12881, %v11179_v38   ;;  %v15706_v38 = vld [vmem:[%s14348_s13 + $0x80] sm:$0xff] }
 0x329   : > { %6275 = vperm.xlu0 %12880, %v11178_v33   ;;  %v15700_v46 = vpop.permute.xlu1 %5757  ;;  %v15702_v6 = vpop.permute.xlu0 %5752  ;;  %v15709_v33 = vld [vmem:[%s14348_s13 + $0x78] sm:$0xff] }
 0x32a   : > { %7305 = vperm.xlu1 %12881, %v11210_v20   ;;  %v3336_v20 = vpack.c.bf16 %v3306_v55, %v3305_v41  ;;  %v3310_v41 = vld [vmem:[#allocation2 + $0x52] sm:$0xff]  ;;  %v3311_v55 = vld [vmem:[#allocation2 + $0x62] sm:$0xff] }
 0x32b   : > { %11792 = vmatmul.mubr.msk.bf16.gmra.mrb[28].mxu0 %vm269_vm0, %v15694_v26 }
 0x32c   : > { %11797 = vmatprep.mubr.msk.bf16.mxu0 %vm269_vm0, %v3335_v62  ;;  %v3337_v62 = vpack.c.bf16 %v3308_v9, %v3307_v7  ;;  %v3309_v9 = vld [vmem:[#allocation2 + $0x4a] sm:$0xff] }
 0x32d   : > { %7300 = vperm.xlu0 %12880, %v11209_v19   ;;  %v15711_v4 = vpop.permute.xlu1 %5767  ;;  %v11211_v19 = vld [vmem:[%s14348_s13 + $0x61] sm:$0xff]  ;;  %v3312_v7 = vld [vmem:[#allocation2 + $0x6a] sm:$0xff] }
 0x32e   : > { %18577 = vst [vmem:[#allocation14_spill] sm:$0xff] %v15711_v4  ;;  %v15713_v32 = vpop.permute.xlu0 %5762  ;;  %6290 = vperm.xlu1 %12881, %v15706_v38   ;;  %v3339_v11 = vpack.c.bf16 %v3312_v7, %v3311_v55  ;;  %v3316_v55 = vld [vmem:[#allocation2 + $0x9a] sm:$0xff] }
 0x32f   : > { %18578 = vst [vmem:[#allocation15_spill] sm:$0xff] %v15713_v32 }
 0x331   : > { %6285 = vperm.xlu0 %12880, %v15709_v33   ;;  %v15722_v1 = vpop.permute.xlu1 %5777 }
 0x332   : > { %18579 = vst [vmem:[#allocation18_spill] sm:$0xff] %v15722_v1  ;;  %v15730_v61 = vpop.permute.xlu0 %5772  ;;  %7315 = vperm.xlu1 %12881, %v11212_v25  }
 0x333   : > { %11798 = vmatmul.mubr.msk.bf16.vlgmr.msra.gmra.mrb[0].mxu0 %vm269_vm0, %v3336_v20  ;;  %18580 = vst [vmem:[#allocation19_spill] sm:$0xff] %v15730_v61  ;;  %v15899_v61 = vld [vmem:[%s17965_s2 + $0x2] ss:$0 sm:$0xff] }
 0x334   : > { %11801 = vmatprep.mubr.msk.bf16.mxu0 %vm269_vm0, %v3337_v62  ;;  %11830 = vmatpush3.bf16.msra.mxu0 %v3694_v21  ;;  %v3338_v62 = vpack.c.bf16 %v3310_v41, %v3309_v9  ;;  %v3315_v41 = vld [vmem:[#allocation2 + $0x92] sm:$0xff] }
 0x335   : > { %7310 = vperm.xlu0 %12880, %v11211_v19   ;;  %12855 = vmatprep.subr.msk.bf16.mxu0 %vm2926_vm2, %v15727_v0  ;;  %v15734_v40 = vpop.permute.xlu1 %5787 }
 0x336   : > { %18581 = vst [vmem:[#allocation22_spill] sm:$0xff] %v15734_v40  ;;  %v15736_v20 = vpop.permute.xlu0 %5782  ;;  %6541 = vperm.xlu1 %12881, %v11212_v25   ;;  %v3313_v25 = vld [vmem:[#allocation2 + $0x7a] sm:$0xff] }
 0x337   : > { %18582 = vst [vmem:[#allocation23_spill] sm:$0xff] %v15736_v20  ;;  %v3600_v20 = vld [vmem:[#allocation2 + $0x48] sm:$0xff] }
 0x339   : > { %6536 = vperm.xlu0 %12880, %v11211_v19   ;;  %v15739_v21 = vpop.permute.xlu1 %5797  ;;  %v3314_v19 = vld [vmem:[#allocation2 + $0x82] sm:$0xff] }
 0x33a   : > { %18583 = vst [vmem:[#allocation26_spill] sm:$0xff] %v15739_v21  ;;  %v15742_v8 = vpop.permute.xlu0 %5792  ;;  %7566 = vperm.xlu1 %12881, %v15621_v47   ;;  %v3341_v47 = vpack.c.bf16 %v3316_v55, %v3315_v41 }
 0x33b   : > { %11802 = vmatmul.mubr.msk.bf16.gmra.mrb[4].mxu0 %vm269_vm0, %v3338_v62  ;;  %18584 = vst [vmem:[#allocation27_spill] sm:$0xff] %v15742_v8 }
 0x33c   : > { %11805 = vmatprep.mubr.msk.bf16.mxu0 %vm269_vm0, %v3339_v11  ;;  %v3340_v11 = vpack.c.bf16 %v3314_v19, %v3313_v25  ;;  %v3319_v25 = vld [vmem:[#allocation2 + $0xc2] sm:$0xff]  ;;  %v3320_v19 = vld [vmem:[#allocation2 + $0xca] sm:$0xff] }
 0x33d   : > { %7561 = vperm.xlu0 %12880, %v15626_v10   ;;  %v15752_v9 = vpop.permute.xlu1 %5807 }
 0x33e   : > { %18585 = vst [vmem:[#allocation30_spill] sm:$0xff] %v15752_v9  ;;  %6551 = vperm.xlu1 %12881, %v15747_v51   ;;  %v3318_v9 = vld [vmem:[#allocation2 + $0xb2] sm:$0xff] }
 0x33f   : > { %v15754_v7 = vpop.permute.xlu0 %5802 }
 0x340   : > { %18586 = vst [vmem:[#allocation31_spill] sm:$0xff] %v15754_v7  ;;  %v3317_v7 = vld [vmem:[#allocation2 + $0xaa] sm:$0xff] }
 0x341   : > { %6546 = vperm.xlu0 %12880, %v15750_v45   ;;  %v15759_v10 = vpop.permute.xlu1 %5817  ;;  %v3342_v55 = vpack.c.bf16 %v3318_v9, %v3317_v7  ;;  %v3323_v7 = vld [vmem:[#allocation2 + $0xf2] sm:$0xff] }
 0x342   : > { %18587 = vst [vmem:[#allocation34_spill] sm:$0xff] %v15759_v10  ;;  %7576 = vperm.xlu1 %12881, %v15663_v17  }
 0x343   : > { %11806 = vmatmul.mubr.msk.bf16.gmra.mrb[8].mxu0 %vm269_vm0, %v3340_v11  ;;  %v15762_v62 = vpop.permute.xlu0 %5812  ;;  %v15773_v11 = vld [vmem:[%s14348_s13 + $0x82] sm:$0xff] }
 0x344   : > { %11809 = vmatprep.mubr.msk.bf16.mxu0 %vm269_vm0, %v3341_v47  ;;  %18588 = vst [vmem:[#allocation35_spill] sm:$0xff] %v15762_v62  ;;  %v3343_v47 = vpack.c.bf16 %v3320_v19, %v3319_v25  ;;  %v15776_v62 = vld [vmem:[%s14348_s13 + $0x7a] sm:$0xff] }
 0x345   : > { %7571 = vperm.xlu0 %12880, %v15667_v37   ;;  %v15766_v34 = vpop.permute.xlu1 %5827  ;;  %v3324_v25 = vld [vmem:[#allocation2 + $0xfa] sm:$0xff] }
 0x346   : > { %18589 = vst [vmem:[#allocation38_spill] sm:$0xff] %v15766_v34  ;;  %6802 = vperm.xlu1 %12881, %v15663_v17   ;;  %v3321_v17 = vld [vmem:[#allocation2 + $0xda] sm:$0xff] }
 0x347   : > { %v15768_v41 = vpop.permute.xlu0 %5822 }
 0x348   : > { %18590 = vst [vmem:[#allocation39_spill] sm:$0xff] %v15768_v41 }
 0x349   : > { %6797 = vperm.xlu0 %12880, %v15667_v37   ;;  %v15779_v10 = vpop.permute.xlu1 %5837  ;;  %v3322_v37 = vld [vmem:[#allocation2 + $0xe2] sm:$0xff] }
 0x34a   : > { %18591 = vst [vmem:[#allocation42_spill] sm:$0xff] %v15779_v10  ;;  %6812 = vperm.xlu1 %12881, %v15773_v11  }
 0x34b   : > { %11810 = vmatmul.mubr.msk.bf16.gmra.mrb[12].mxu0 %vm269_vm0, %v3342_v55  ;;  %v15782_v34 = vpop.permute.xlu0 %5832  ;;  %v3344_v55 = vpack.c.bf16 %v3322_v37, %v3321_v17  ;;  %v3325_v17 = vld [vmem:[#allocation2 + $0x10a] sm:$0xff]  ;;  %v3326_v37 = vld [vmem:[#allocation2 + $0x112] sm:$0xff] }
 0x34c   : > { %11813 = vmatprep.mubr.msk.bf16.mxu0 %vm269_vm0, %v3343_v47  ;;  %18592 = vst [vmem:[#allocation43_spill] sm:$0xff] %v15782_v34  ;;  %v3345_v47 = vpack.c.bf16 %v3324_v25, %v3323_v7  ;;  %v3327_v25 = vld [vmem:[#allocation2 + $0x122] sm:$0xff] }
 0x34d   : > { %6807 = vperm.xlu0 %12880, %v15776_v62   ;;  %v15786_v9 = vpop.permute.xlu1 %5847 }
 0x34e   : > { %18593 = vst [vmem:[#allocation46_spill] sm:$0xff] %v15786_v9  ;;  %6038 = vperm.xlu1 %12881, %v15773_v11   ;;  %v15804_v9 = vld [vmem:[%s14348_s13 + $0x92] sm:$0xff] }
 0x350   : > { %v15788_v19 = vpop.permute.xlu0 %5842 }
 0x351   : > { %18594 = vst [vmem:[#allocation47_spill] sm:$0xff] %v15788_v19  ;;  %6033 = vperm.xlu0 %12880, %v15776_v62   ;;  %v15793_v41 = vpop.permute.xlu1 %5857  ;;  %v15801_v19 = vld [vmem:[%s14348_s13 + $0x9a] sm:$0xff] }
 0x352   : > { %18595 = vst [vmem:[#allocation50_spill] sm:$0xff] %v15793_v41  ;;  %7064 = vperm.xlu1 %12881, %v15706_v38   ;;  %v11183_v38 = vld [vmem:[%s14348_s13 + $0x98] sm:$0xff] }
 0x353   : > { %11814 = vmatmul.mubr.msk.bf16.gmra.mrb[16].mxu0 %vm269_vm0, %v3344_v55  ;;  %v3328_v55 = vld [vmem:[#allocation2 + $0x12a] sm:$0xff] }
 0x354   : > { %11817 = vmatprep.mubr.msk.bf16.mxu0 %vm269_vm0, %v3345_v47  ;;  %v15796_v34 = vpop.permute.xlu0 %5852  ;;  %v3346_v47 = vpack.c.bf16 %v3326_v37, %v3325_v17  ;;  %v3331_v17 = vld [vmem:[#allocation2 + $0x152] sm:$0xff]  ;;  %v3332_v37 = vld [vmem:[#allocation2 + $0x15a] sm:$0xff] }
 0x355   : > { %18596 = vst [vmem:[#allocation51_spill] sm:$0xff] %v15796_v34  ;;  %7059 = vperm.xlu0 %12880, %v15709_v33   ;;  %v15806_v7 = vpop.permute.xlu1 %5867  ;;  %v3347_v34 = vpack.c.bf16 %v3328_v55, %v3327_v25  ;;  %v11182_v33 = vld [vmem:[%s14348_s13 + $0x90] sm:$0xff] }
 0x356   : > { %18597 = vst [vmem:[#allocation54_spill] sm:$0xff] %v15806_v7  ;;  %6048 = vperm.xlu1 %12881, %v15801_v19   ;;  %v3329_v7 = vld [vmem:[#allocation2 + $0x13a] sm:$0xff] }
 0x358   : > { %v15808_v41 = vpop.permute.xlu0 %5862 }
 0x359   : > { %18598 = vst [vmem:[#allocation55_spill] sm:$0xff] %v15808_v41  ;;  %6043 = vperm.xlu0 %12880, %v15804_v9   ;;  %v15815_v10 = vpop.permute.xlu1 %5988  ;;  %v3330_v41 = vld [vmem:[#allocation2 + $0x142] sm:$0xff] }
 0x35a   : > { %7074 = vperm.xlu1 %12881, %v11183_v38   ;;  %v3348_v55 = vpack.c.bf16 %v3330_v41, %v3329_v7  ;;  %v3333_v41 = vld [vmem:[#allocation2 + $0x16a] sm:$0xff]  ;;  %v3334_v7 = vld [vmem:[#allocation2 + $0x172] sm:$0xff] }
 0x35b   : > { %11818 = vmatmul.mubr.msk.bf16.gmra.mrb[20].mxu0 %vm269_vm0, %v3346_v47  ;;  %v3349_v47 = vpack.c.bf16 %v3332_v37, %v3331_v17  ;;  %v3350_v37 = vpack.c.bf16 %v3334_v7, %v3333_v41  ;;  %v3601_v41 = vld [vmem:[#allocation2 + $0x50] sm:$0xff] }
 0x35c   : > { %11821 = vmatprep.mubr.msk.bf16.mxu0 %vm269_vm0, %v3347_v34  ;;  %v15818_v8 = vpop.permute.xlu0 %5983  ;;  %v3630_v5 = vpack.c.bf16 %v3601_v41, %v3600_v20  ;;  %v3603_v20 = vld [vmem:[#allocation2 + $0x68] sm:$0xff] }
 0x35d   : > { %7069 = vperm.xlu0 %12880, %v11182_v33   ;;  %v15820_v21 = vpop.permute.xlu1 %6250 }
 0x35e   : > { %6300 = vperm.xlu1 %12881, %v11183_v38   ;;  %v15836_v38 = vld [vmem:[%s14348_s13 + $0xa8] sm:$0xff] }
 0x360   : > { %v15822_v25 = vpop.permute.xlu0 %6245 }
 0x361   : > { %6295 = vperm.xlu0 %12880, %v11182_v33   ;;  %v15825_v34 = vpop.permute.xlu1 %6511 }
 0x362   : > { %7325 = vperm.xlu1 %12881, %v15747_v51  }
 0x363   : > { %11822 = vmatmul.mubr.msk.bf16.gmra.mrb[24].mxu0 %vm269_vm0, %v3348_v55  ;;  %v11216_v55 = vld [vmem:[%s14348_s13 + $0x99] sm:$0xff] }
 0x364   : > { %11825 = vmatprep.mubr.msk.bf16.mxu0 %vm269_vm0, %v3349_v47  ;;  %v15828_v22 = vpop.permute.xlu0 %6506  ;;  %v11215_v47 = vld [vmem:[%s14348_s13 + $0x91] sm:$0xff] }
 0x365   : > { %7320 = vperm.xlu0 %12880, %v15750_v45   ;;  %v15838_v33 = vpop.permute.xlu1 %6772 }
 0x366   : > { %6310 = vperm.xlu1 %12881, %v15833_v3  }
 0x368   : > { %v15840_v17 = vpop.permute.xlu0 %6767 }
 0x369   : > { %6305 = vperm.xlu0 %12880, %v15836_v38   ;;  %v15847_v45 = vpop.permute.xlu1 %5998 }
 0x36a   : > { %7335 = vperm.xlu1 %12881, %v11216_v55  }
 0x36b   : > { %11826 = vmatmul.mubr.msk.bf16.gmra.mrb[28].mxu0 %vm269_vm0, %v3350_v37  ;;  %v3629_v37 = vpack.c.bf16 %v3599_v35, %v3598_v56  ;;  %v15873_v35 = vld [vmem:[%s14348_s13 + $0xb1] sm:$0xff]  ;;  %v3602_v56 = vld [vmem:[#allocation2 + $0x60] sm:$0xff] }
 0x36c   : > { %11831 = vmatprep.mubr.msk.bf16.mxu0 %vm269_vm0, %v15525_v28  ;;  %v15851_v51 = vpop.permute.xlu0 %5993  ;;  %v3987_v28 = vsel %vm2926_vm2, %v15727_v0, 0  ;;  %v15876_v0 = vld [vmem:[%s14348_s13 + $0xa9] sm:$0xff] }
 0x36d   : > { %7330 = vperm.xlu0 %12880, %v11215_v47   ;;  %v15853_v27 = vpop.permute.xlu1 %6008 }
 0x36e   : > { %6561 = vperm.xlu1 %12881, %v11216_v55  }
 0x370   : > { %v15855_v7 = vpop.permute.xlu0 %6003 }
 0x371   : > { %6556 = vperm.xlu0 %12880, %v11215_v47   ;;  %v15860_v40 = vpop.permute.xlu1 %7034  ;;  %v3604_v47 = vld [vmem:[#allocation2 + $0x78] sm:$0xff] }
 0x372   : > { %7586 = vperm.xlu1 %12881, %v15773_v11   ;;  %v3631_v11 = vpack.c.bf16 %v3603_v20, %v3602_v56 }
 0x373   : > { %11832 = vmatmul.mubr.msk.bf16.vlgmr.msra.gmra.mrb[0].mxu0 %vm269_vm0, %v3629_v37 }
 0x374   : > { %11835 = vmatprep.mubr.msk.bf16.mxu0 %vm269_vm0, %v3630_v5  ;;  %v15868_v30 = vpop.permute.xlu0 %7029  ;;  %11864 = vmatpush3.bf16.msra.mxu0 %v3987_v28  ;;  %v3605_v5 = vld [vmem:[#allocation2 + $0x80] sm:$0xff] }
 0x375   : > { %7581 = vperm.xlu0 %12880, %v15776_v62   ;;  %12856 = vmatprep.subr.msk.bf16.mxu0 %vm2926_vm2, %v15865_v57  ;;  %v15880_v55 = vpop.permute.xlu1 %6260  ;;  %v15888_v62 = vld [vmem:[%s17965_s2 + $0x1] ss:$0 sm:$0xff]  ;;  %v3632_v37 = vpack.c.bf16 %v3605_v5, %v3604_v47  ;;  %v15894_v28 = vld [vmem:[%s17965_s2] ss:$0 sm:$0xff]  ;;  %v15915_v47 = vld [vmem:[%s17965_s2 + $0x3] ss:$0 sm:$0xff]  ;;  %v6146_v5 = vmul.f32 %v15899_v61, %v15815_v10 }
 0x376   : > { %6571 = vperm.xlu1 %12881, %v15873_v35   ;;  %v5885_v2 = vmul.f32 %v15888_v62, %v15669_v43  ;;  %v5884_v20 = vmul.f32 %v15888_v62, %v15671_v50  ;;  %v5624_v43 = vmul.f32 %v15894_v28, %v15483_v15  ;;  %v6145_v50 = vmul.f32 %v15899_v61, %v15818_v8  ;;  %v15939_v8 = vld [vmem:[%s17965_s2 + $0x5] ss:$0 sm:$0xff] }
 0x377   : > { %v6408_v15 = vmul.f32 %v15915_v47, %v15820_v21 }
 0x378   : > { %v15882_v41 = vpop.permute.xlu0 %6255  ;;  %v5917_v32 = vadd.f32 %v5885_v2, %v5624_v43  ;;  %v15948_v43 = vld [vmem:[%s14348_s13 + $0xaa] sm:$0xff] }
 0x379   : > { %6566 = vperm.xlu0 %12880, %v15876_v0   ;;  %v15902_v1 = vpop.permute.xlu1 %6270 }
 0x37a   : > { %7596 = vperm.xlu1 %12881, %v15801_v19   ;;  %v6178_v2 = vadd.f32 %v6146_v5, %v5917_v32 }
 0x37b   : > { %11836 = vmatmul.mubr.msk.bf16.gmra.mrb[4].mxu0 %vm269_vm0, %v3631_v11  ;;  %v5623_v11 = vmul.f32 %v15894_v28, %v15485_v54  ;;  %v6407_v54 = vmul.f32 %v15915_v47, %v15822_v25  ;;  %v15955_v25 = vld [vmem:[%s17965_s2 + $0x6] ss:$0 sm:$0xff] }
 0x37c   : > { %11839 = vmatprep.mubr.msk.bf16.mxu0 %vm269_vm0, %v3632_v37  ;;  %v15907_v56 = vpop.permute.xlu0 %6265  ;;  %v15929_v37 = vld [vmem:[%s17965_s2 + $0x4] ss:$0 sm:$0xff]  ;;  %v6440_v32 = vadd.f32 %v6408_v15, %v6178_v2  ;;  %v7191_v15 = vmul.f32 %v15955_v25, %v15868_v30 }
 0x37d   : > { %7591 = vperm.xlu0 %12880, %v15804_v9   ;;  %v7296_v52 = vpop.permute.xlu1 %7295  ;;  %v5916_v10 = vadd.f32 %v5884_v20, %v5623_v11  ;;  %v6669_v21 = vmul.f32 %v15929_v37, %v15825_v34  ;;  %v6668_v20 = vmul.f32 %v15929_v37, %v15828_v22  ;;  %v6930_v34 = vmul.f32 %v15939_v8, %v15838_v33 }
 0x37e   : > { %6822 = vperm.xlu1 %12881, %v15801_v19   ;;  %v6929_v11 = vmul.f32 %v15939_v8, %v15840_v17  ;;  %v7192_v33 = vmul.f32 %v15955_v25, %v15860_v40  ;;  %v15991_v40 = vld [vmem:[%s17965_s2 + $0x8] ss:$0 sm:$0xff] }
 0x37f   : > { %v6177_v19 = vadd.f32 %v6145_v50, %v5916_v10  ;;  %v6701_v50 = vadd.f32 %v6669_v21, %v6440_v32 }
 0x380   : > { %v7291_v4 = vpop.permute.xlu0 %7290 }
 0x381   : > { %6817 = vperm.xlu0 %12880, %v15804_v9   ;;  %v15959_v9 = vpop.permute.xlu1 %6521  ;;  %v6439_v22 = vadd.f32 %v6407_v54, %v6177_v19  ;;  %v6962_v54 = vadd.f32 %v6930_v34, %v6701_v50 }
 0x382   : > { %6832 = vperm.xlu1 %12881, %v15943_v36  }
 0x383   : > { %11840 = vmatmul.mubr.msk.bf16.gmra.mrb[8].mxu0 %vm269_vm0, %v15580_v31  ;;  %v15973_v31 = vld [vmem:[%s17965_s2 + $0x7] ss:$0 sm:$0xff]  ;;  %v7224_v30 = vadd.f32 %v7192_v33, %v6962_v54  ;;  %v11187_v54 = vld [vmem:[%s14348_s13 + $0xc8] sm:$0xff] }
 0x384   : > { %11843 = vmatprep.mubr.msk.bf16.mxu0 %vm269_vm0, %v15598_v24  ;;  %v15965_v5 = vpop.permute.xlu0 %6516  ;;  %v6700_v24 = vadd.f32 %v6668_v20, %v6439_v22  ;;  %v7453_v17 = vmul.f32 %v15973_v31, %v7296_v52  ;;  %v7452_v60 = vmul.f32 %v15973_v31, %v7291_v4  ;;  %v16002_v22 = vld [vmem:[%s17966_s3] ss:$0 sm:$0xff]  ;;  %v16010_v33 = vld [vmem:[%s14348_s13 + $0xc2] sm:$0xff] }
 0x385   : > { %6827 = vperm.xlu0 %12880, %v15948_v43   ;;  %v15980_v10 = vpop.permute.xlu1 %6531 }
 0x386   : > { %6058 = vperm.xlu1 %12881, %v15943_v36   ;;  %v6961_v19 = vadd.f32 %v6929_v11, %v6700_v24  ;;  %v7485_v20 = vadd.f32 %v7453_v17, %v7224_v30  ;;  %v16007_v11 = vld [vmem:[%s14348_s13 + $0xca] sm:$0xff]  ;;  %v11186_v17 = vld [vmem:[%s14348_s13 + $0xc0] sm:$0xff] }
 0x387   : > { %v16024_v30 = vld [vmem:[#allocation2 + $0x1a] sm:$0xff] }
 0x388   : > { %v15983_v2 = vpop.permute.xlu0 %6526  ;;  %v7223_v21 = vadd.f32 %v7191_v15, %v6961_v19  ;;  %v16022_v19 = vld [vmem:[#allocation2 + $0x22] sm:$0xff]  ;;  %18600 = vst [vmem:[#allocation59_spill] sm:$0xff] %v16024_v30  ;;  %v6410_v30 = vmul.f32 %v15915_v47, %v15880_v55  ;;  %v4280_v55 = vsel %vm2926_vm2, %v15865_v57, 0 }
 0x389   : > { %6053 = vperm.xlu0 %12880, %v15948_v43   ;;  %v7557_v52 = vpop.permute.xlu1 %7556  ;;  %18599 = vst [vmem:[#allocation58_spill] sm:$0xff] %v16022_v19 }
 0x38a   : > { %v7714_v32 = vmul.f32 %v15991_v40, %v7557_v52  ;;  %7084 = vperm.xlu1 %12881, %v15833_v3   ;;  %v7484_v34 = vadd.f32 %v7452_v60, %v7223_v21 }
 0x38b   : > { %11844 = vmatmul.mubr.msk.bf16.gmra.mrb[12].mxu0 %vm269_vm0, %v15600_v13 }
 0x38c   : > { %11847 = vmatprep.mubr.msk.bf16.mxu0 %vm269_vm0, %v15618_v42  ;;  %v7552_v4 = vpop.permute.xlu0 %7551  ;;  %v7746_v50 = vadd.f32 %v7714_v32, %v7485_v20 }
 0x38d   : > { %v7713_v13 = vmul.f32 %v15991_v40, %v7552_v4  ;;  %7079 = vperm.xlu0 %12880, %v15836_v38   ;;  %v16012_v24 = vpop.permute.xlu1 %6782 }
 0x38e   : > { %v7785_v60 = vadd.f32 %v16002_v22, %v7746_v50  ;;  %6068 = vperm.xlu1 %12881, %v16007_v11  }
 0x38f   : > { %v7745_v42 = vadd.f32 %v7713_v13, %v7484_v34 }
 0x390   : > { %v16015_v3 = vpop.permute.xlu0 %6777  ;;  %v7817_v38 = vmax.f32 %v7785_v60, 0.0  ;;  %v16054_v60 = vld [vmem:[%s14348_s13 + $0xd8] sm:$0xff] }
 0x391   : > { %v7784_v15 = vadd.f32 %v16002_v22, %v7745_v42  ;;  %6063 = vperm.xlu0 %12880, %v16010_v33   ;;  %v16028_v52 = vpop.permute.xlu1 %6792  ;;  %v16051_v42 = vld [vmem:[%s14348_s13 + $0xe0] sm:$0xff] }
 0x392   : > { %7849 = vst.msk [vmem:[#allocation2 + $0x21] sm:$0xff] %vm269_vm0, %v7817_v38  ;;  %7094 = vperm.xlu1 %12881, %v11187_v54   ;;  %v3626_v38 = vld [vmem:[#allocation2 + $0x180] sm:$0xff] }
 0x393   : > { %v7816_v21 = vmax.f32 %v7784_v15, 0.0  ;;  %11848 = vmatmul.mubr.msk.bf16.gmra.mrb[16].mxu0 %vm269_vm0, %v15623_v44 }
 0x394   : > { %11851 = vmatprep.mubr.msk.bf16.mxu0 %vm269_vm0, %v15644_v53  ;;  %v16033_v20 = vpop.permute.xlu0 %6787 }
 0x395   : > { %7848 = vst.msk [vmem:[#allocation2 + $0x19] sm:$0xff] %vm269_vm0, %v7816_v21  ;;  %7089 = vperm.xlu0 %12880, %v11186_v17   ;;  %v16036_v32 = vpop.permute.xlu1 %6018 }
 0x396   : > { %6320 = vperm.xlu1 %12881, %v11187_v54  }
 0x398   : > { %v16038_v4 = vpop.permute.xlu0 %6013 }
 0x399   : > { %6315 = vperm.xlu0 %12880, %v11186_v17   ;;  %v16042_v44 = vpop.permute.xlu1 %7044  ;;  %v7932_v53 = vld [vmem:[#allocation2 + $0x21] sm:$0xff] }
 0x39a   : > { %7345 = vperm.xlu1 %12881, %v15873_v35   ;;  %v11219_v35 = vld [vmem:[%s14348_s13 + $0xc1] sm:$0xff] }
 0x39b   : > { %11852 = vmatmul.mubr.msk.bf16.gmra.mrb[20].mxu0 %vm269_vm0, %v15646_v14  ;;  %v3627_v17 = vld [vmem:[#allocation2 + $0x188] sm:$0xff] }
 0x39c   : > { %11855 = vmatprep.mubr.msk.bf16.mxu0 %vm269_vm0, %v15676_v23  ;;  %v16046_v34 = vpop.permute.xlu0 %7039  ;;  %v7931_v13 = vld [vmem:[#allocation2 + $0x19] sm:$0xff]  ;;  %v11220_v23 = vld [vmem:[%s14348_s13 + $0xc9] sm:$0xff] }
 0x39d   : > { %7340 = vperm.xlu0 %12880, %v15876_v0   ;;  %v7962_v50 = vpack.c.bf16 %v7932_v53, %v7931_v13  ;;  %v16057_v14 = vpop.permute.xlu1 %6028 }
 0x39e   : > { %18601 = vst [vmem:[#allocation62_spill] sm:$0xff] %v16057_v14  ;;  %6330 = vperm.xlu1 %12881, %v16051_v42   ;;  %v3894_v14 = vld [vmem:[#allocation2 + $0x51] sm:$0xff] }
 0x39f   : > { %12036 = vmatmul.mubr.msk.bf16.vlgmr.msra.gmra.mrb[0].mxu1 %vm269_vm0, %v7962_v50 }
 0x3a0   : > { %v16059_v15 = vpop.permute.xlu0 %6023 }
 0x3a1   : > { %18602 = vst [vmem:[#allocation102_spill] sm:$0xff] %v16059_v15  ;;  %6325 = vperm.xlu0 %12880, %v16054_v60   ;;  %v16067_v0 = vpop.permute.xlu1 %7054  ;;  %v3893_v15 = vld [vmem:[#allocation2 + $0x49] sm:$0xff] }
 0x3a2   : > { %7355 = vperm.xlu1 %12881, %v11220_v23  }
 0x3a3   : > { %11856 = vmatmul.mubr.msk.bf16.gmra.mrb[24].mxu0 %vm269_vm0, %v15679_v49  ;;  %v3643_v49 = vpack.c.bf16 %v3627_v17, %v3626_v38  ;;  %v3891_v38 = vld [vmem:[#allocation2 + $0x31] sm:$0xff]  ;;  %v3892_v17 = vld [vmem:[#allocation2 + $0x39] sm:$0xff] }
 0x3a4   : > { %11859 = vmatprep.mubr.msk.bf16.mxu0 %vm269_vm0, %v15694_v26  ;;  %v16071_v54 = vpop.permute.xlu0 %7049  ;;  %v5887_v26 = vmul.f32 %v15888_v62, %v15684_v16  ;;  %v6148_v16 = vmul.f32 %v15899_v61, %v15847_v45 }
 0x3a5   : > { %7350 = vperm.xlu0 %12880, %v11219_v35   ;;  %v16073_v21 = vpop.permute.xlu1 %6280 }
 0x3a6   : > { %18603 = vst [vmem:[#allocation105_spill] sm:$0xff] %v16073_v21  ;;  %6581 = vperm.xlu1 %12881, %v11220_v23   ;;  %v5886_v23 = vmul.f32 %v15888_v62, %v15688_v63  ;;  %v6147_v63 = vmul.f32 %v15899_v61, %v15851_v51  ;;  %v3923_v21 = vpack.c.bf16 %v3894_v14, %v3893_v15 }
 0x3a7   : > { %v5889_v51 = vmul.f32 %v15888_v62, %v15690_v29  ;;  %v16130_v29 = vld [vmem:[%s17967_s4 + $0x18] sm:$0xf] }
 0x3a8   : > { %v16075_v53 = vpop.permute.xlu0 %6275 }
 0x3a9   : > { %18604 = vst [vmem:[#allocation106_spill] sm:$0xff] %v16075_v53  ;;  %6576 = vperm.xlu0 %12880, %v11219_v35   ;;  %v16078_v13 = vpop.permute.xlu1 %7305  ;;  %v16091_v35 = vld [vmem:[%s14348_s13 + $0xe1] sm:$0xff]  ;;  %v6409_v53 = vmul.f32 %v15915_v47, %v15882_v41  ;;  %v6670_v41 = vmul.f32 %v15929_v37, %v15965_v5  ;;  %v6150_v5 = vmul.f32 %v15899_v61, %v15853_v27 }
 0x3aa   : > { %7606 = vperm.xlu1 %12881, %v15943_v36   ;;  %v5625_v36 = vmul.f32 %v15894_v28, %v15494_v48  ;;  %v3922_v48 = vpack.c.bf16 %v3892_v17, %v3891_v38  ;;  %v6931_v38 = vmul.f32 %v15939_v8, %v16015_v3  ;;  %v6149_v27 = vmul.f32 %v15899_v61, %v15855_v7 }
 0x3ab   : > { %11860 = vmatmul.mubr.msk.bf16.gmra.mrb[28].mxu0 %vm269_vm0, %v3643_v49  ;;  %v5626_v49 = vmul.f32 %v15894_v28, %v15492_v58  ;;  %v6412_v3 = vmul.f32 %v15915_v47, %v15902_v1 }
 0x3ac   : > { %11865 = vmatprep.mubr.msk.bf16.mxu0 %vm269_vm0, %v15243_v18  ;;  %v16084_v50 = vpop.permute.xlu0 %7300  ;;  %v16098_v18 = vld [vmem:[%s14348_s13 + $0xd9] sm:$0xff]  ;;  %v5918_v45 = vadd.f32 %v5886_v23, %v5625_v36  ;;  %v5628_v23 = vmul.f32 %v15894_v28, %v15503_v39  ;;  %v6932_v39 = vmul.f32 %v15939_v8, %v16012_v24  ;;  %v5627_v24 = vmul.f32 %v15894_v28, %v15505_v12 }
 0x3ad   : > { %7601 = vperm.xlu0 %12880, %v15948_v43   ;;  %v16104_v43 = vpop.permute.xlu1 %6290  ;;  %v5919_v19 = vadd.f32 %v5887_v26, %v5626_v49  ;;  %v6671_v26 = vmul.f32 %v15929_v37, %v15959_v9  ;;  %v5888_v9 = vmul.f32 %v15888_v62, %v15692_v59  ;;  %v3895_v59 = vld [vmem:[#allocation2 + $0x61] sm:$0xff]  ;;  %v7193_v36 = vmul.f32 %v15955_v25, %v16046_v34 }
 0x3ae   : > { %18605 = vst [vmem:[#allocation107_spill] sm:$0xff] %v16104_v43  ;;  %6591 = vperm.xlu1 %12881, %v16091_v35   ;;  %v6179_v49 = vadd.f32 %v6147_v63, %v5918_v45  ;;  %v3897_v63 = vld [vmem:[#allocation2 + $0x79] sm:$0xff] }
 0x3af   : > { %v6180_v43 = vadd.f32 %v6148_v16, %v5919_v19  ;;  %v7194_v16 = vmul.f32 %v15955_v25, %v16042_v44  ;;  %v5920_v44 = vadd.f32 %v5888_v9, %v5627_v24  ;;  %v16175_v9 = vld [vmem:[%s14348_s13 + $0xda] sm:$0xff] }
 0x3b0   : > { %v16108_v58 = vpop.permute.xlu0 %6285  ;;  %v6441_v15 = vadd.f32 %v6409_v53, %v6179_v49 }
 0x3b1   : > { %6586 = vperm.xlu0 %12880, %v16098_v18   ;;  %v16125_v14 = vpop.permute.xlu1 %7315  ;;  %v6442_v57 = vadd.f32 %v6410_v30, %v6180_v43  ;;  %v3896_v30 = vld [vmem:[#allocation2 + $0x69] sm:$0xff]  ;;  %v3898_v43 = vld [vmem:[#allocation2 + $0x81] sm:$0xff] }
 0x3b2   : > { %7616 = vperm.xlu1 %12881, %v16007_v11   ;;  %v6702_v53 = vadd.f32 %v6670_v41, %v6441_v15  ;;  %v3924_v1 = vpack.c.bf16 %v3896_v30, %v3895_v59  ;;  %v3925_v41 = vpack.c.bf16 %v3898_v43, %v3897_v63  ;;  %v6933_v59 = vmul.f32 %v15939_v8, %v16033_v20  ;;  %v3901_v20 = vld [vmem:[#allocation2 + $0xa9] sm:$0xff]  ;;  %v3902_v63 = vld [vmem:[#allocation2 + $0xb1] sm:$0xff] }
 0x3b3   : > { %11866 = vmatmul.mubr.msk.bf16.vlgmr.msra.gmra.mrb[0].mxu0 %vm269_vm0, %v3922_v48  ;;  %v6703_v17 = vadd.f32 %v6671_v26, %v6442_v57  ;;  %v7455_v48 = vmul.f32 %v15973_v31, %v16078_v13  ;;  %v6411_v26 = vmul.f32 %v15915_v47, %v15907_v56  ;;  %v6673_v13 = vmul.f32 %v15929_v37, %v15980_v10 }
 0x3b4   : > { %11869 = vmatprep.mubr.msk.bf16.mxu0 %vm269_vm0, %v3923_v21  ;;  %v16137_v19 = vpop.permute.xlu0 %7310  ;;  %11898 = vmatpush3.bf16.msra.mxu0 %v4280_v55  ;;  %v5921_v21 = vadd.f32 %v5889_v51, %v5628_v23  ;;  %v6963_v34 = vadd.f32 %v6931_v38, %v6702_v53  ;;  %v7454_v55 = vmul.f32 %v15973_v31, %v16084_v50  ;;  %v16170_v23 = vld [vmem:[%s14348_s13 + $0xe2] sm:$0xff] }
 0x3b5   : > { %7611 = vperm.xlu0 %12880, %v16010_v33   ;;  %12857 = vmatprep.subr.msk.bf16.mxu0 %vm2926_vm2, %v16130_v29  ;;  %v16157_v12 = vpop.permute.xlu1 %6541  ;;  %v6964_v45 = vadd.f32 %v6932_v39, %v6703_v17  ;;  %v6672_v56 = vmul.f32 %v15929_v37, %v15983_v2  ;;  %v3899_v17 = vld [vmem:[#allocation2 + $0x91] sm:$0xff] }
 0x3b6   : > { %6842 = vperm.xlu1 %12881, %v16007_v11   ;;  %v6182_v7 = vadd.f32 %v6150_v5, %v5921_v21  ;;  %v6181_v11 = vadd.f32 %v6149_v27, %v5920_v44  ;;  %v7225_v39 = vadd.f32 %v7193_v36, %v6963_v34  ;;  %v7457_v44 = vmul.f32 %v15973_v31, %v16125_v14  ;;  %v16207_v14 = vld [vmem:[#allocation2 + $0x32] sm:$0xff] }
 0x3b7   : > { %v7226_v49 = vadd.f32 %v7194_v16, %v6964_v45  ;;  %v3900_v16 = vld [vmem:[#allocation2 + $0x99] sm:$0xff] }
 0x3b8   : > { %v16161_v51 = vpop.permute.xlu0 %6536  ;;  %v6444_v57 = vadd.f32 %v6412_v3, %v6182_v7  ;;  %v6443_v38 = vadd.f32 %v6411_v26, %v6181_v11  ;;  %v7486_v2 = vadd.f32 %v7454_v55, %v7225_v39  ;;  %v7195_v3 = vmul.f32 %v15955_v25, %v16071_v54 }
 0x3b9   : > { %6837 = vperm.xlu0 %12880, %v16010_v33   ;;  %v7567_v50 = vpop.permute.xlu1 %7566  ;;  %v6934_v33 = vmul.f32 %v15939_v8, %v16028_v52  ;;  %v7487_v5 = vadd.f32 %v7455_v48, %v7226_v49  ;;  %v7196_v52 = vmul.f32 %v15955_v25, %v16067_v0  ;;  %v3926_v7 = vpack.c.bf16 %v3900_v16, %v3899_v17  ;;  %v11191_v17 = vld [vmem:[%s14348_s13 + $0xf8] sm:$0xff] }
 0x3ba   : > { %v7716_v15 = vmul.f32 %v15991_v40, %v7567_v50  ;;  %6852 = vperm.xlu1 %12881, %v16170_v23   ;;  %v6705_v24 = vadd.f32 %v6673_v13, %v6444_v57  ;;  %v6704_v27 = vadd.f32 %v6672_v56, %v6443_v38  ;;  %v3927_v55 = vpack.c.bf16 %v3902_v63, %v3901_v20  ;;  %v16205_v13 = vld [vmem:[#allocation2 + $0x3a] sm:$0xff]  ;;  %v3904_v38 = vld [vmem:[#allocation2 + $0xc9] sm:$0xff] }
 0x3bb   : > { %11870 = vmatmul.mubr.msk.bf16.gmra.mrb[4].mxu0 %vm269_vm0, %v3924_v1  ;;  %v7456_v1 = vmul.f32 %v15973_v31, %v16137_v19  ;;  %v16235_v20 = vld [vmem:[#allocation2 + $0x4a] sm:$0xff] }
 0x3bc   : > { %11873 = vmatprep.mubr.msk.bf16.mxu0 %vm269_vm0, %v3925_v41  ;;  %v7562_v10 = vpop.permute.xlu0 %7561  ;;  %v7748_v21 = vadd.f32 %v7716_v15, %v7487_v5  ;;  %v6966_v43 = vadd.f32 %v6934_v33, %v6705_v24  ;;  %v6965_v0 = vadd.f32 %v6933_v59, %v6704_v27  ;;  %v16218_v33 = vld [vmem:[%s14348_s13 + $0xfa] sm:$0xff]  ;;  %v16221_v15 = vld [vmem:[%s14348_s13 + $0xf2] sm:$0xff] }
 0x3bd   : > { %v7715_v30 = vmul.f32 %v15991_v40, %v7562_v10  ;;  %6847 = vperm.xlu0 %12880, %v16175_v9   ;;  %v16193_v36 = vpop.permute.xlu1 %6551  ;;  %v3903_v10 = vld [vmem:[#allocation2 + $0xc1] sm:$0xff] }
 0x3be   : > { %v7787_v45 = vadd.f32 %v16002_v22, %v7748_v21  ;;  %6078 = vperm.xlu1 %12881, %v16170_v23   ;;  %v7228_v26 = vadd.f32 %v7196_v52, %v6966_v43  ;;  %v7227_v49 = vadd.f32 %v7195_v3, %v6965_v0  ;;  %v3928_v21 = vpack.c.bf16 %v3904_v38, %v3903_v10  ;;  %v11190_v3 = vld [vmem:[%s14348_s13 + $0xf0] sm:$0xff]  ;;  %v16262_v10 = vld [vmem:[%s14348_s13 + $0x108] sm:$0xff] }
 0x3bf   : > { %v7747_v53 = vadd.f32 %v7715_v30, %v7486_v2  ;;  %v3906_v30 = vld [vmem:[#allocation2 + $0xe1] sm:$0xff] }
 0x3c0   : > { %v16198_v48 = vpop.permute.xlu0 %6546  ;;  %v7819_v34 = vmax.f32 %v7787_v45, 0.0  ;;  %v7489_v19 = vadd.f32 %v7457_v44, %v7228_v26  ;;  %v7488_v39 = vadd.f32 %v7456_v1, %v7227_v49  ;;  %v3911_v38 = vld [vmem:[#allocation2 + $0x121] sm:$0xff] }
 0x3c1   : > { %v7786_v54 = vadd.f32 %v16002_v22, %v7747_v53  ;;  %6073 = vperm.xlu0 %12880, %v16175_v9   ;;  %v7577_v11 = vpop.permute.xlu1 %7576  ;;  %v16233_v53 = vld [vmem:[#allocation2 + $0x52] sm:$0xff] }
 0x3c2   : > { %7851 = vst.msk [vmem:[#allocation2 + $0x39] sm:$0xff] %vm269_vm0, %v7819_v34  ;;  %v7718_v57 = vmul.f32 %v15991_v40, %v7577_v11  ;;  %7104 = vperm.xlu1 %12881, %v16051_v42   ;;  %v3905_v42 = vld [vmem:[#allocation2 + $0xd9] sm:$0xff]  ;;  %v3909_v34 = vld [vmem:[#allocation2 + $0x109] sm:$0xff] }
 0x3c3   : > { %v7818_v41 = vmax.f32 %v7786_v54, 0.0  ;;  %11874 = vmatmul.mubr.msk.bf16.gmra.mrb[8].mxu0 %vm269_vm0, %v3926_v7  ;;  %v3929_v27 = vpack.c.bf16 %v3906_v30, %v3905_v42  ;;  %v3907_v54 = vld [vmem:[#allocation2 + $0xf1] sm:$0xff]  ;;  %v3908_v7 = vld [vmem:[#allocation2 + $0xf9] sm:$0xff] }
 0x3c4   : > { %11877 = vmatprep.mubr.msk.bf16.mxu0 %vm269_vm0, %v3927_v55  ;;  %v7572_v56 = vpop.permute.xlu0 %7571  ;;  %v7750_v5 = vadd.f32 %v7718_v57, %v7489_v19  ;;  %v3910_v55 = vld [vmem:[#allocation2 + $0x111] sm:$0xff]  ;;  %v3913_v30 = vld [vmem:[#allocation2 + $0x139] sm:$0xff] }
 0x3c5   : > { %7850 = vst.msk [vmem:[#allocation2 + $0x31] sm:$0xff] %vm269_vm0, %v7818_v41  ;;  %v7717_v50 = vmul.f32 %v15991_v40, %v7572_v56  ;;  %7099 = vperm.xlu0 %12880, %v16054_v60   ;;  %v16223_v2 = vpop.permute.xlu1 %6802  ;;  %v3930_v41 = vpack.c.bf16 %v3908_v7, %v3907_v54  ;;  %v3931_v11 = vpack.c.bf16 %v3910_v55, %v3909_v34 }
 0x3c6   : > { %v7789_v24 = vadd.f32 %v16002_v22, %v7750_v5  ;;  %6088 = vperm.xlu1 %12881, %v16218_v33   ;;  %v16259_v5 = vld [vmem:[%s14348_s13 + $0x110] sm:$0xff] }
 0x3c7   : > { %v7749_v59 = vadd.f32 %v7717_v50, %v7488_v39 }
 0x3c8   : > { %v16226_v52 = vpop.permute.xlu0 %6797  ;;  %v7821_v16 = vmax.f32 %v7789_v24, 0.0  ;;  %v3914_v24 = vld [vmem:[#allocation2 + $0x141] sm:$0xff] }
 0x3c9   : > { %v7788_v60 = vadd.f32 %v16002_v22, %v7749_v59  ;;  %6083 = vperm.xlu0 %12880, %v16221_v15   ;;  %v16238_v43 = vpop.permute.xlu1 %6812  ;;  %v7934_v44 = vld [vmem:[#allocation2 + $0x39] sm:$0xff]  ;;  %v3912_v59 = vld [vmem:[#allocation2 + $0x129] sm:$0xff] }
 0x3ca   : > { %7853 = vst.msk [vmem:[#allocation2 + $0x51] sm:$0xff] %vm269_vm0, %v7821_v16  ;;  %7114 = vperm.xlu1 %12881, %v11191_v17  }
 0x3cb   : > { %v7820_v63 = vmax.f32 %v7788_v60, 0.0  ;;  %11878 = vmatmul.mubr.msk.bf16.gmra.mrb[12].mxu0 %vm269_vm0, %v3928_v21  ;;  %v3933_v21 = vpack.c.bf16 %v3914_v24, %v3913_v30  ;;  %v16299_v30 = vld [vmem:[%s14348_s13 + $0x109] sm:$0xff] }
 0x3cc   : > { %11881 = vmatprep.mubr.msk.bf16.mxu0 %vm269_vm0, %v3929_v27  ;;  %v16242_v45 = vpop.permute.xlu0 %6807  ;;  %v7933_v0 = vld [vmem:[#allocation2 + $0x31] sm:$0xff]  ;;  %v3920_v24 = vld [vmem:[#allocation2 + $0x189] sm:$0xff] }
 0x3cd   : > { %7852 = vst.msk [vmem:[#allocation2 + $0x49] sm:$0xff] %vm269_vm0, %v7820_v63  ;;  %7109 = vperm.xlu0 %12880, %v11190_v3   ;;  %v7963_v1 = vpack.c.bf16 %v7934_v44, %v7933_v0  ;;  %v16246_v26 = vpop.permute.xlu1 %6038  ;;  %v3916_v63 = vld [vmem:[#allocation2 + $0x159] sm:$0xff]  ;;  %v3917_v0 = vld [vmem:[#allocation2 + $0x169] sm:$0xff] }
 0x3ce   : > { %6340 = vperm.xlu1 %12881, %v11191_v17   ;;  %v11223_v17 = vld [vmem:[%s14348_s13 + $0xf1] sm:$0xff] }
 0x3cf   : > { %12039 = vmatprep.mubr.msk.bf16.mxu1 %vm269_vm0, %v7963_v1  ;;  %v3918_v1 = vld [vmem:[#allocation2 + $0x171] sm:$0xff] }
 0x3d0   : > { %v16248_v49 = vpop.permute.xlu0 %6033  ;;  %v3935_v34 = vpack.c.bf16 %v3918_v1, %v3917_v0 }
 0x3d1   : > { %6335 = vperm.xlu0 %12880, %v11190_v3   ;;  %v16251_v19 = vpop.permute.xlu1 %7064  ;;  %v7936_v57 = vld [vmem:[#allocation2 + $0x51] sm:$0xff] }
 0x3d2   : > { %7365 = vperm.xlu1 %12881, %v16091_v35   ;;  %v3932_v35 = vpack.c.bf16 %v3912_v59, %v3911_v38  ;;  %v3915_v3 = vld [vmem:[#allocation2 + $0x151] sm:$0xff]  ;;  %v6152_v59 = vmul.f32 %v15899_v61, %v16036_v32 }
 0x3d3   : > { %11882 = vmatmul.mubr.msk.bf16.gmra.mrb[16].mxu0 %vm269_vm0, %v3930_v41  ;;  %v3934_v7 = vpack.c.bf16 %v3916_v63, %v3915_v3  ;;  %v5891_v41 = vmul.f32 %v15888_v62, %v15700_v46  ;;  %v3919_v46 = vld [vmem:[#allocation2 + $0x181] sm:$0xff] }
 0x3d4   : > { %11885 = vmatprep.mubr.msk.bf16.mxu0 %vm269_vm0, %v3931_v11  ;;  %v16254_v56 = vpop.permute.xlu0 %7059  ;;  %v7935_v39 = vld [vmem:[#allocation2 + $0x49] sm:$0xff]  ;;  %v3936_v1 = vpack.c.bf16 %v3920_v24, %v3919_v46  ;;  %v6674_v46 = vmul.f32 %v15929_v37, %v16161_v51 }
 0x3d5   : > { %7360 = vperm.xlu0 %12880, %v16098_v18   ;;  %v7964_v50 = vpack.c.bf16 %v7936_v57, %v7935_v39  ;;  %v16265_v42 = vpop.permute.xlu1 %6048  ;;  %v11224_v18 = vld [vmem:[%s14348_s13 + $0xf9] sm:$0xff]  ;;  %v5890_v57 = vmul.f32 %v15888_v62, %v15702_v6  ;;  %v16292_v39 = vld [vmem:[%s14348_s13 + $0x111] sm:$0xff]  ;;  %v6151_v6 = vmul.f32 %v15899_v61, %v16038_v4  ;;  %v18610_v63 = vld [vmem:[#allocation106_spill] sm:$0xff] }
 0x3d6   : > { %6350 = vperm.xlu1 %12881, %v16259_v5   ;;  %v6413_v0 = vmul.f32 %v15915_v47, %v18610_v63 }
 0x3d7   : > { %12040 = vmatmul.mubr.msk.bf16.gmra.mrb[4].mxu1 %vm269_vm0, %v7964_v50  ;;  %v18606_v50 = vld [vmem:[#allocation81_spill] sm:$0xff] }
 0x3d8   : > { %v16267_v60 = vpop.permute.xlu0 %6043  ;;  %v5630_v38 = vmul.f32 %v15894_v28, %v18606_v50  ;;  %v18613_v50 = vld [vmem:[#allocation14_spill] sm:$0xff] }
 0x3d9   : > { %6345 = vperm.xlu0 %12880, %v16262_v10   ;;  %v16274_v16 = vpop.permute.xlu1 %7074 }
 0x3da   : > { %7375 = vperm.xlu1 %12881, %v11224_v18  }
 0x3db   : > { %11886 = vmatmul.mubr.msk.bf16.gmra.mrb[20].mxu0 %vm269_vm0, %v3932_v35  ;;  %v18607_v35 = vld [vmem:[#allocation103_spill] sm:$0xff] }
 0x3dc   : > { %11889 = vmatprep.mubr.msk.bf16.mxu0 %vm269_vm0, %v3933_v21  ;;  %v16277_v27 = vpop.permute.xlu0 %7069  ;;  %v18608_v21 = vld [vmem:[#allocation105_spill] sm:$0xff] }
 0x3dd   : > { %7370 = vperm.xlu0 %12880, %v11223_v17   ;;  %v16279_v44 = vpop.permute.xlu1 %6300 }
 0x3de   : > { %6601 = vperm.xlu1 %12881, %v11224_v18  }
 0x3e0   : > { %v16281_v54 = vpop.permute.xlu0 %6295 }
 0x3e1   : > { %6596 = vperm.xlu0 %12880, %v11223_v17   ;;  %v7326_v55 = vpop.permute.xlu1 %7325  ;;  %v6414_v17 = vmul.f32 %v15915_v47, %v18608_v21 }
 0x3e2   : > { %7626 = vperm.xlu1 %12881, %v16170_v23   ;;  %v5629_v23 = vmul.f32 %v15894_v28, %v18607_v35 }
 0x3e3   : > { %11890 = vmatmul.mubr.msk.bf16.gmra.mrb[24].mxu0 %vm269_vm0, %v3934_v7  ;;  %v18611_v7 = vld [vmem:[#allocation59_spill] sm:$0xff] }
 0x3e4   : > { %11893 = vmatprep.mubr.msk.bf16.mxu0 %vm269_vm0, %v3935_v34  ;;  %v7321_v11 = vpop.permute.xlu0 %7320  ;;  %v5922_v32 = vadd.f32 %v5890_v57, %v5629_v23  ;;  %v18612_v34 = vld [vmem:[#allocation58_spill] sm:$0xff]  ;;  %v18615_v57 = vld [vmem:[#allocation104_spill] sm:$0xff] }
 0x3e5   : > { %7621 = vperm.xlu0 %12880, %v16175_v9   ;;  %v16305_v18 = vpop.permute.xlu1 %6310  ;;  %v5923_v9 = vadd.f32 %v5891_v41, %v5630_v38  ;;  %v4214_v4 = vpack.c.bf16 %v18612_v34, %v18611_v7  ;;  %v5893_v41 = vmul.f32 %v15888_v62, %v18613_v50  ;;  %v18614_v38 = vld [vmem:[#allocation15_spill] sm:$0xff]  ;;  %v5632_v23 = vmul.f32 %v15894_v28, %v18615_v57  ;;  %v18616_v7 = vld [vmem:[#allocation82_spill] sm:$0xff] }
 0x3e6   : > { %6611 = vperm.xlu1 %12881, %v16292_v39   ;;  %v5892_v35 = vmul.f32 %v15888_v62, %v18614_v38  ;;  %v6183_v63 = vadd.f32 %v6151_v6, %v5922_v32  ;;  %v5631_v34 = vmul.f32 %v15894_v28, %v18616_v7  ;;  %v6936_v62 = vmul.f32 %v15939_v8, %v16223_v2  ;;  %v18618_v6 = vld [vmem:[#allocation102_spill] sm:$0xff]  ;;  %v18619_v38 = vld [vmem:[#allocation107_spill] sm:$0xff] }
 0x3e7   : > { %v6184_v21 = vadd.f32 %v6152_v59, %v5923_v9  ;;  %v18617_v59 = vld [vmem:[#allocation62_spill] sm:$0xff]  ;;  %v6153_v9 = vmul.f32 %v15899_v61, %v18618_v6  ;;  %v6935_v28 = vmul.f32 %v15939_v8, %v16226_v52  ;;  %v6415_v57 = vmul.f32 %v15915_v47, %v16108_v58 }
 0x3e8   : > { %v16309_v3 = vpop.permute.xlu0 %6305  ;;  %v6154_v51 = vmul.f32 %v15899_v61, %v18617_v59  ;;  %v6445_v32 = vadd.f32 %v6413_v0, %v6183_v63  ;;  %v5924_v2 = vadd.f32 %v5892_v35, %v5631_v34  ;;  %v7197_v0 = vmul.f32 %v15955_v25, %v16254_v56  ;;  %v16366_v56 = vld [vmem:[%s14348_s13 + $0x112] sm:$0xff]  ;;  %v16375_v7 = vld [vmem:[%s14348_s13 + $0x10a] sm:$0xff] }
 0x3e9   : > { %18609 = vst [vmem:[#allocation108_spill] sm:$0xff] %v16309_v3  ;;  %6606 = vperm.xlu0 %12880, %v16299_v30   ;;  %v6675_v3 = vmul.f32 %v15929_v37, %v16157_v12  ;;  %v16328_v24 = vpop.permute.xlu1 %7335  ;;  %v6446_v50 = vadd.f32 %v6414_v17, %v6184_v21  ;;  %v5925_v17 = vadd.f32 %v5893_v41, %v5632_v23 }
 0x3ea   : > { %7636 = vperm.xlu1 %12881, %v16218_v33   ;;  %v6416_v21 = vmul.f32 %v15915_v47, %v18619_v38  ;;  %v6706_v61 = vadd.f32 %v6674_v46, %v6445_v32  ;;  %v6185_v47 = vadd.f32 %v6153_v9, %v5924_v2  ;;  %v7458_v63 = vmul.f32 %v15973_v31, %v7321_v11  ;;  %v4188_v9 = vld [vmem:[#allocation2 + $0x62] sm:$0xff]  ;;  %v4189_v32 = vld [vmem:[#allocation2 + $0x6a] sm:$0xff]  ;;  %v4190_v2 = vld [vmem:[#allocation2 + $0x7a] sm:$0xff] }
 0x3eb   : > { %11894 = vmatmul.mubr.msk.bf16.gmra.mrb[28].mxu0 %vm269_vm0, %v3936_v1  ;;  %v6707_v1 = vadd.f32 %v6675_v3, %v6446_v50  ;;  %v7459_v3 = vmul.f32 %v15973_v31, %v7326_v55  ;;  %v6186_v23 = vadd.f32 %v6154_v51, %v5925_v17  ;;  %v6677_v55 = vmul.f32 %v15929_v37, %v16193_v36 }
 0x3ec   : > { %11899 = vmatprep.mubr.msk.bf16.mxu0 %vm269_vm0, %v4214_v4  ;;  %v16335_v12 = vpop.permute.xlu0 %7330  ;;  %v7198_v4 = vmul.f32 %v15955_v25, %v16251_v19  ;;  %v16361_v19 = vpack.c.bf16 %v16205_v13, %v16207_v14  ;;  %v6967_v58 = vadd.f32 %v6935_v28, %v6706_v61  ;;  %v4574_v13 = vsel %vm2926_vm2, %v16130_v29, 0 }
 0x3ed   : > { %7631 = vperm.xlu0 %12880, %v16221_v15   ;;  %v16353_v52 = vpop.permute.xlu1 %6561  ;;  %v6968_v41 = vadd.f32 %v6936_v62, %v6707_v1  ;;  %v6448_v14 = vadd.f32 %v6416_v21, %v6186_v23  ;;  %v6447_v34 = vadd.f32 %v6415_v57, %v6185_v47  ;;  %v6938_v50 = vmul.f32 %v15939_v8, %v16238_v43  ;;  %v16396_v43 = vld [vmem:[%s17967_s4 + $0x1c] sm:$0xf]  ;;  %v4191_v1 = vld [vmem:[#allocation2 + $0x82] sm:$0xff]  ;;  %v16416_v23 = vld [vmem:[#allocation2 + $0x6a] sm:$0xff] }
 0x3ee   : > { %6862 = vperm.xlu1 %12881, %v16218_v33   ;;  %18620 = vst [vmem:[#allocation109_spill] sm:$0xff] %v16361_v19  ;;  %v16372_v33 = vpack.c.bf16 %v16233_v53, %v16235_v20  ;;  %v7229_v11 = vadd.f32 %v7197_v0, %v6967_v58  ;;  %v7200_v51 = vmul.f32 %v15955_v25, %v16274_v16  ;;  %18622 = vst [vmem:[#allocation111_spill] sm:$0xff] %v16416_v23 }
 0x3ef   : > { %v7230_v46 = vadd.f32 %v7198_v4, %v6968_v41  ;;  %v6709_v59 = vadd.f32 %v6677_v55, %v6448_v14  ;;  %v7461_v38 = vmul.f32 %v15973_v31, %v16328_v24  ;;  %v7460_v61 = vmul.f32 %v15973_v31, %v16335_v12  ;;  %v16418_v24 = vld [vmem:[#allocation2 + $0x62] sm:$0xff]  ;;  %v16429_v14 = vld [vmem:[%s14348_s13 + $0x12a] sm:$0xff] }
 0x3f0   : > { %v16356_v35 = vpop.permute.xlu0 %6556  ;;  %18621 = vst [vmem:[#allocation110_spill] sm:$0xff] %v16372_v33  ;;  %18623 = vst [vmem:[#allocation112_spill] sm:$0xff] %v16418_v24 }
 0x3f1   : > { %6857 = vperm.xlu0 %12880, %v16221_v15   ;;  %v6676_v15 = vmul.f32 %v15929_v37, %v16198_v48  ;;  %v7587_v36 = vpop.permute.xlu1 %7586  ;;  %v7491_v53 = vadd.f32 %v7459_v3, %v7230_v46  ;;  %v6937_v37 = vmul.f32 %v15939_v8, %v16242_v45  ;;  %v7490_v48 = vadd.f32 %v7458_v63, %v7229_v11  ;;  %v4192_v11 = vld [vmem:[#allocation2 + $0x92] sm:$0xff] }
 0x3f2   : > { %v7720_v20 = vmul.f32 %v15991_v40, %v7587_v36  ;;  %6872 = vperm.xlu1 %12881, %v16366_v56   ;;  %v7199_v45 = vmul.f32 %v15955_v25, %v16277_v27  ;;  %v6970_v4 = vadd.f32 %v6938_v50, %v6709_v59  ;;  %v4217_v27 = vpack.c.bf16 %v4189_v32, %v4188_v9  ;;  %v4193_v36 = vld [vmem:[#allocation2 + $0x9a] sm:$0xff] }
 0x3f3   : > { %11900 = vmatmul.mubr.msk.bf16.vlgmr.msra.gmra.mrb[0].mxu0 %vm269_vm0, %v16361_v19  ;;  %v6708_v8 = vadd.f32 %v6676_v15, %v6447_v34  ;;  %v4218_v3 = vpack.c.bf16 %v4191_v1, %v4190_v2  ;;  %v16432_v15 = vld [vmem:[%s14348_s13 + $0x122] sm:$0xff]  ;;  %v16446_v9 = vld [vmem:[#allocation2 + $0x7a] sm:$0xff] }
 0x3f4   : > { %11903 = vmatprep.mubr.msk.bf16.mxu0 %vm269_vm0, %v16372_v33  ;;  %v7582_v29 = vpop.permute.xlu0 %7581  ;;  %11932 = vmatpush3.bf16.msra.mxu0 %v4574_v13  ;;  %v7752_v6 = vadd.f32 %v7720_v20, %v7491_v53  ;;  %v7232_v0 = vadd.f32 %v7200_v51, %v6970_v4  ;;  %v4195_v20 = vld [vmem:[#allocation2 + $0xb2] sm:$0xff]  ;;  %v11194_v51 = vld [vmem:[%s14348_s13 + $0x120] sm:$0xff]  ;;  %18625 = vst [vmem:[#allocation114_spill] sm:$0xff] %v16446_v9  ;;  %v4197_v4 = vld [vmem:[#allocation2 + $0xca] sm:$0xff] }
 0x3f5   : > { %v7719_v62 = vmul.f32 %v15991_v40, %v7582_v29  ;;  %6867 = vperm.xlu0 %12880, %v16375_v7   ;;  %12858 = vmatprep.subr.msk.bf16.mxu0 %vm2926_vm2, %v16396_v43  ;;  %v16404_v17 = vpop.permute.xlu1 %6571  ;;  %v6969_v57 = vadd.f32 %v6937_v37, %v6708_v8  ;;  %v4196_v1 = vld [vmem:[#allocation2 + $0xc2] sm:$0xff] }
 0x3f6   : > { %v7791_v16 = vadd.f32 %v16002_v22, %v7752_v6  ;;  %6098 = vperm.xlu1 %12881, %v16366_v56   ;;  %v7493_v31 = vadd.f32 %v7461_v38, %v7232_v0  ;;  %v16444_v6 = vld [vmem:[#allocation2 + $0x82] sm:$0xff] }
 0x3f7   : > { %v7751_v28 = vadd.f32 %v7719_v62, %v7490_v48  ;;  %v7231_v47 = vadd.f32 %v7199_v45, %v6969_v57  ;;  %v11195_v48 = vld [vmem:[%s14348_s13 + $0x128] sm:$0xff]  ;;  %18624 = vst [vmem:[#allocation113_spill] sm:$0xff] %v16444_v6 }
 0x3f8   : > { %v16409_v21 = vpop.permute.xlu0 %6566  ;;  %v7823_v41 = vmax.f32 %v7791_v16, 0.0  ;;  %v4198_v16 = vld [vmem:[#allocation2 + $0xda] sm:$0xff]  ;;  %v4199_v57 = vld [vmem:[#allocation2 + $0xe2] sm:$0xff] }
 0x3f9   : > { %v7790_v25 = vadd.f32 %v16002_v22, %v7751_v28  ;;  %6093 = vperm.xlu0 %12880, %v16375_v7   ;;  %v7597_v63 = vpop.permute.xlu1 %7596  ;;  %v7492_v46 = vadd.f32 %v7460_v61, %v7231_v47 }
 0x3fa   : > { %7855 = vst.msk [vmem:[#allocation2 + $0x69] sm:$0xff] %vm269_vm0, %v7823_v41  ;;  %v7722_v12 = vmul.f32 %v15991_v40, %v7597_v63  ;;  %7124 = vperm.xlu1 %12881, %v16259_v5   ;;  %v4194_v5 = vld [vmem:[#allocation2 + $0xaa] sm:$0xff]  ;;  %v16470_v63 = vld [vmem:[%s14348_s13 + $0x140] sm:$0xff] }
 0x3fb   : > { %v7822_v58 = vmax.f32 %v7790_v25, 0.0  ;;  %11904 = vmatmul.mubr.msk.bf16.gmra.mrb[4].mxu0 %vm269_vm0, %v4217_v27  ;;  %v4220_v59 = vpack.c.bf16 %v4195_v20, %v4194_v5  ;;  %v4221_v25 = vpack.c.bf16 %v4197_v4, %v4196_v1  ;;  %v4222_v27 = vpack.c.bf16 %v4199_v57, %v4198_v16  ;;  %v18627_v16 = vld [vmem:[#allocation19_spill] sm:$0xff] }
 0x3fc   : > { %11907 = vmatprep.mubr.msk.bf16.mxu0 %vm269_vm0, %v4218_v3  ;;  %v7592_v55 = vpop.permute.xlu0 %7591  ;;  %v7754_v34 = vadd.f32 %v7722_v12, %v7493_v31  ;;  %v16473_v31 = vld [vmem:[%s14348_s13 + $0x138] sm:$0xff] }
 0x3fd   : > { %7854 = vst.msk [vmem:[#allocation2 + $0x61] sm:$0xff] %vm269_vm0, %v7822_v58  ;;  %v7721_v13 = vmul.f32 %v15991_v40, %v7592_v55  ;;  %7119 = vperm.xlu0 %12880, %v16262_v10   ;;  %v16434_v53 = vpop.permute.xlu1 %6822  ;;  %v4219_v10 = vpack.c.bf16 %v4193_v36, %v4192_v11  ;;  %v4200_v12 = vld [vmem:[#allocation2 + $0xf2] sm:$0xff]  ;;  %v4201_v55 = vld [vmem:[#allocation2 + $0xfa] sm:$0xff] }
 0x3fe   : > { %v7793_v29 = vadd.f32 %v16002_v22, %v7754_v34  ;;  %6108 = vperm.xlu1 %12881, %v16429_v14   ;;  %v4203_v34 = vld [vmem:[#allocation2 + $0x112] sm:$0xff] }
 0x3ff   : > { %v7753_v50 = vadd.f32 %v7721_v13, %v7492_v46  ;;  %v4202_v13 = vld [vmem:[#allocation2 + $0x10a] sm:$0xff] }
 0x400   : > { %v16437_v37 = vpop.permute.xlu0 %6817  ;;  %v7825_v62 = vmax.f32 %v7793_v29, 0.0  ;;  %v4224_v36 = vpack.c.bf16 %v4203_v34, %v4202_v13  ;;  %v4204_v29 = vld [vmem:[#allocation2 + $0x122] sm:$0xff] }
 0x401   : > { %v7792_v40 = vadd.f32 %v16002_v22, %v7753_v50  ;;  %6103 = vperm.xlu0 %12880, %v16432_v15   ;;  %v16449_v8 = vpop.permute.xlu1 %6832  ;;  %v7938_v45 = vld [vmem:[#allocation2 + $0x69] sm:$0xff]  ;;  %v11227_v50 = vld [vmem:[%s14348_s13 + $0x121] sm:$0xff] }
 0x402   : > { %7857 = vst.msk [vmem:[#allocation2 + $0x81] sm:$0xff] %vm269_vm0, %v7825_v62  ;;  %7134 = vperm.xlu1 %12881, %v11195_v48   ;;  %v4207_v62 = vld [vmem:[#allocation2 + $0x142] sm:$0xff] }
 0x403   : > { %v7824_v32 = vmax.f32 %v7792_v40, 0.0  ;;  %11908 = vmatmul.mubr.msk.bf16.gmra.mrb[8].mxu0 %vm269_vm0, %v4219_v10  ;;  %v4205_v40 = vld [vmem:[#allocation2 + $0x12a] sm:$0xff]  ;;  %v18629_v13 = vld [vmem:[#allocation85_spill] sm:$0xff] }
 0x404   : > { %11911 = vmatprep.mubr.msk.bf16.mxu0 %vm269_vm0, %v4220_v59  ;;  %v16453_v22 = vpop.permute.xlu0 %6827  ;;  %v7937_v28 = vld [vmem:[#allocation2 + $0x61] sm:$0xff] }
 0x405   : > { %7856 = vst.msk [vmem:[#allocation2 + $0x79] sm:$0xff] %vm269_vm0, %v7824_v32  ;;  %7129 = vperm.xlu0 %12880, %v11194_v51   ;;  %v7965_v2 = vpack.c.bf16 %v7938_v45, %v7937_v28  ;;  %v16457_v38 = vpop.permute.xlu1 %6058  ;;  %v16500_v28 = vld [vmem:[%s17965_s2 + $0x1] ss:$0 sm:$0xff] }
 0x406   : > { %6360 = vperm.xlu1 %12881, %v11195_v48   ;;  %v4206_v48 = vld [vmem:[#allocation2 + $0x13a] sm:$0xff]  ;;  %v5894_v57 = vmul.f32 %v16500_v28, %v18627_v16  ;;  %v16555_v16 = vld [vmem:[%s17965_s2 + $0x4] ss:$0 sm:$0xff] }
 0x407   : > { %12043 = vmatprep.mubr.msk.bf16.mxu1 %vm269_vm0, %v7965_v2  ;;  %v4226_v32 = vpack.c.bf16 %v4207_v62, %v4206_v48  ;;  %v18626_v2 = vld [vmem:[#allocation18_spill] sm:$0xff] }
 0x408   : > { %v16459_v61 = vpop.permute.xlu0 %6053  ;;  %v5895_v1 = vmul.f32 %v16500_v28, %v18626_v2 }
 0x409   : > { %6355 = vperm.xlu0 %12880, %v11194_v51   ;;  %v16462_v0 = vpop.permute.xlu1 %7084  ;;  %v7940_v41 = vld [vmem:[#allocation2 + $0x81] sm:$0xff]  ;;  %v4225_v51 = vpack.c.bf16 %v4205_v40, %v4204_v29 }
 0x40a   : > { %7385 = vperm.xlu1 %12881, %v16292_v39   ;;  %v4223_v39 = vpack.c.bf16 %v4201_v55, %v4200_v12  ;;  %v16529_v12 = vld [vmem:[%s14348_s13 + $0x139] sm:$0xff]  ;;  %v16540_v40 = vld [vmem:[%s17965_s2 + $0x3] ss:$0 sm:$0xff] }
 0x40b   : > { %11912 = vmatmul.mubr.msk.bf16.gmra.mrb[12].mxu0 %vm269_vm0, %v4221_v25  ;;  %v16512_v25 = vld [vmem:[%s14348_s13 + $0x141] sm:$0xff] }
 0x40c   : > { %11915 = vmatprep.mubr.msk.bf16.mxu0 %vm269_vm0, %v4222_v27  ;;  %v16465_v3 = vpop.permute.xlu0 %7079  ;;  %v7939_v47 = vld [vmem:[#allocation2 + $0x79] sm:$0xff] }
 0x40d   : > { %7380 = vperm.xlu0 %12880, %v16299_v30   ;;  %v7966_v58 = vpack.c.bf16 %v7940_v41, %v7939_v47  ;;  %v16476_v46 = vpop.permute.xlu1 %6068  ;;  %v11228_v30 = vld [vmem:[%s14348_s13 + $0x129] sm:$0xff]  ;;  %v16517_v27 = vld [vmem:[%s17965_s2] ss:$0 sm:$0xff]  ;;  %v18628_v41 = vld [vmem:[#allocation84_spill] sm:$0xff] }
 0x40e   : > { %6370 = vperm.xlu1 %12881, %v16470_v63   ;;  %v5634_v47 = vmul.f32 %v16517_v27, %v18628_v41  ;;  %v4209_v55 = vld [vmem:[#allocation2 + $0x15a] sm:$0xff]  ;;  %v5633_v34 = vmul.f32 %v16517_v27, %v18629_v13 }
 0x40f   : > { %12044 = vmatmul.mubr.msk.bf16.gmra.mrb[8].mxu1 %vm269_vm0, %v7966_v58  ;;  %v16524_v58 = vld [vmem:[%s17965_s2 + $0x2] ss:$0 sm:$0xff] }
 0x410   : > { %v16478_v11 = vpop.permute.xlu0 %6063  ;;  %v5927_v29 = vadd.f32 %v5895_v1, %v5634_v47  ;;  %v5926_v62 = vadd.f32 %v5894_v57, %v5633_v34  ;;  %v18631_v57 = vld [vmem:[#allocation86_spill] sm:$0xff] }
 0x411   : > { %6365 = vperm.xlu0 %12880, %v16473_v31   ;;  %v16485_v5 = vpop.permute.xlu1 %7094  ;;  %v5636_v47 = vmul.f32 %v16517_v27, %v18631_v57 }
 0x412   : > { %7395 = vperm.xlu1 %12881, %v11228_v30  }
 0x413   : > { %11916 = vmatmul.mubr.msk.bf16.gmra.mrb[16].mxu0 %vm269_vm0, %v4223_v39  ;;  %v6155_v39 = vmul.f32 %v16524_v58, %v16248_v49  ;;  %v6417_v49 = vmul.f32 %v16540_v40, %v16281_v54 }
 0x414   : > { %11919 = vmatprep.mubr.msk.bf16.mxu0 %vm269_vm0, %v4224_v36  ;;  %v16488_v20 = vpop.permute.xlu0 %7089  ;;  %v4210_v36 = vld [vmem:[#allocation2 + $0x16a] sm:$0xff] }
 0x415   : > { %7390 = vperm.xlu0 %12880, %v11227_v50   ;;  %v16490_v10 = vpop.permute.xlu1 %6320  ;;  %v6187_v54 = vadd.f32 %v6155_v39, %v5926_v62  ;;  %v4213_v62 = vld [vmem:[#allocation2 + $0x18a] sm:$0xff] }
 0x416   : > { %6621 = vperm.xlu1 %12881, %v11228_v30  }
 0x418   : > { %v16492_v59 = vpop.permute.xlu0 %6315 }
 0x419   : > { %6616 = vperm.xlu0 %12880, %v11227_v50   ;;  %v16495_v45 = vpop.permute.xlu1 %7345  ;;  %v4211_v50 = vld [vmem:[#allocation2 + $0x172] sm:$0xff]  ;;  %v6421_v33 = vmul.f32 %v16540_v40, %v16492_v59 }
 0x41a   : > { %7646 = vperm.xlu1 %12881, %v16366_v56   ;;  %v6156_v56 = vmul.f32 %v16524_v58, %v16246_v26  ;;  %v6418_v26 = vmul.f32 %v16540_v40, %v16279_v44  ;;  %v6679_v44 = vmul.f32 %v16555_v16, %v16353_v52  ;;  %v4228_v41 = vpack.c.bf16 %v4211_v50, %v4210_v36  ;;  %v16571_v52 = vld [vmem:[%s17965_s2 + $0x5] ss:$0 sm:$0xff] }
 0x41b   : > { %11920 = vmatmul.mubr.msk.bf16.gmra.mrb[20].mxu0 %vm269_vm0, %v4225_v51  ;;  %v6940_v36 = vmul.f32 %v16571_v52, %v16434_v53  ;;  %v6449_v50 = vadd.f32 %v6417_v49, %v6187_v54  ;;  %v6420_v49 = vmul.f32 %v16540_v40, %v16305_v18 }
 0x41c   : > { %11923 = vmatprep.mubr.msk.bf16.mxu0 %vm269_vm0, %v4226_v32  ;;  %v16505_v4 = vpop.permute.xlu0 %7340  ;;  %v18630_v32 = vld [vmem:[#allocation22_spill] sm:$0xff]  ;;  %v6188_v1 = vadd.f32 %v6156_v56, %v5927_v29  ;;  %v18632_v56 = vld [vmem:[#allocation23_spill] sm:$0xff]  ;;  %v6939_v29 = vmul.f32 %v16571_v52, %v16437_v37  ;;  %v6157_v37 = vmul.f32 %v16524_v58, %v16267_v60 }
 0x41d   : > { %7641 = vperm.xlu0 %12880, %v16375_v7   ;;  %v4208_v7 = vld [vmem:[#allocation2 + $0x152] sm:$0xff]  ;;  %v16535_v30 = vpop.permute.xlu1 %6330  ;;  %v5897_v2 = vmul.f32 %v16500_v28, %v18630_v32  ;;  %v5896_v13 = vmul.f32 %v16500_v28, %v18632_v56 }
 0x41e   : > { %6631 = vperm.xlu1 %12881, %v16512_v25   ;;  %v4227_v51 = vpack.c.bf16 %v4209_v55, %v4208_v7  ;;  %v6678_v7 = vmul.f32 %v16555_v16, %v16356_v35  ;;  %v6450_v34 = vadd.f32 %v6418_v26, %v6188_v1  ;;  %v6158_v35 = vmul.f32 %v16524_v58, %v16265_v42  ;;  %v4212_v26 = vld [vmem:[#allocation2 + $0x182] sm:$0xff] }
 0x41f   : > { %v5929_v32 = vadd.f32 %v5897_v2, %v5636_v47  ;;  %v4229_v18 = vpack.c.bf16 %v4213_v62, %v4212_v26 }
 0x420   : > { %v16544_v48 = vpop.permute.xlu0 %6325  ;;  %v6711_v1 = vadd.f32 %v6679_v44, %v6450_v34  ;;  %v6710_v57 = vadd.f32 %v6678_v7, %v6449_v50 }
 0x421   : > { %6626 = vperm.xlu0 %12880, %v16529_v12   ;;  %v16564_v55 = vpop.permute.xlu1 %7355  ;;  %v6190_v7 = vadd.f32 %v6158_v35, %v5929_v32  ;;  %v6680_v35 = vmul.f32 %v16555_v16, %v16409_v21 }
 0x422   : > { %7656 = vperm.xlu1 %12881, %v16429_v14   ;;  %v6972_v54 = vadd.f32 %v6940_v36, %v6711_v1  ;;  %v6971_v50 = vadd.f32 %v6939_v29, %v6710_v57  ;;  %v16617_v36 = vld [vmem:[%s14348_s13 + $0x142] sm:$0xff]  ;;  %v18635_v1 = vld [vmem:[#allocation83_spill] sm:$0xff] }
 0x423   : > { %11924 = vmatmul.mubr.msk.bf16.gmra.mrb[24].mxu0 %vm269_vm0, %v4227_v51  ;;  %v18633_v51 = vld [vmem:[#allocation87_spill] sm:$0xff]  ;;  %v6452_v26 = vadd.f32 %v6420_v49, %v6190_v7 }
 0x424   : > { %11927 = vmatprep.mubr.msk.bf16.mxu0 %vm269_vm0, %v4228_v41  ;;  %v16576_v39 = vpop.permute.xlu0 %7350  ;;  %v5635_v53 = vmul.f32 %v16517_v27, %v18633_v51  ;;  %v16589_v41 = vld [vmem:[%s17965_s2 + $0x6] ss:$0 sm:$0xff] }
 0x425   : > { %7651 = vperm.xlu0 %12880, %v16432_v15   ;;  %v7202_v42 = vmul.f32 %v16589_v41, %v16462_v0  ;;  %v7201_v2 = vmul.f32 %v16589_v41, %v16465_v3  ;;  %v16599_v44 = vpop.permute.xlu1 %6581  ;;  %v16604_v0 = vld [vmem:[%s17965_s2 + $0x7] ss:$0 sm:$0xff]  ;;  %v18634_v3 = vld [vmem:[#allocation108_spill] sm:$0xff] }
 0x426   : > { %v5928_v47 = vadd.f32 %v5896_v13, %v5635_v53  ;;  %v7463_v60 = vmul.f32 %v16604_v0, %v16495_v45  ;;  %6882 = vperm.xlu1 %12881, %v16429_v14   ;;  %v6419_v34 = vmul.f32 %v16540_v40, %v18634_v3  ;;  %v7462_v13 = vmul.f32 %v16604_v0, %v16505_v4  ;;  %v16622_v53 = vld [vmem:[%s14348_s13 + $0x13a] sm:$0xff] }
 0x427   : > { %v6681_v45 = vmul.f32 %v16555_v16, %v16404_v17  ;;  %v7234_v51 = vadd.f32 %v7202_v42, %v6972_v54  ;;  %v7233_v62 = vadd.f32 %v7201_v2, %v6971_v50  ;;  %v16632_v17 = vld [vmem:[%s17965_s2 + $0x8] ss:$0 sm:$0xff]  ;;  %v7204_v2 = vmul.f32 %v16589_v41, %v16485_v5 }
 0x428   : > { %v16608_v56 = vpop.permute.xlu0 %6576  ;;  %v6189_v14 = vadd.f32 %v6157_v37, %v5928_v47  ;;  %v6941_v37 = vmul.f32 %v16571_v52, %v16453_v22  ;;  %v7465_v22 = vmul.f32 %v16604_v0, %v16564_v55  ;;  %v16663_v55 = vld [vmem:[#allocation2 + $0x9a] sm:$0xff] }
 0x429   : > { %6877 = vperm.xlu0 %12880, %v16432_v15   ;;  %v7607_v29 = vpop.permute.xlu1 %7606  ;;  %v6942_v15 = vmul.f32 %v16571_v52, %v16449_v8  ;;  %v7495_v4 = vadd.f32 %v7463_v60, %v7234_v51  ;;  %v7494_v49 = vadd.f32 %v7462_v13, %v7233_v62  ;;  %v6713_v57 = vadd.f32 %v6681_v45, %v6452_v26 }
 0x42a   : > { %v7724_v32 = vmul.f32 %v16632_v17, %v7607_v29  ;;  %6892 = vperm.xlu1 %12881, %v16617_v36   ;;  %v6451_v21 = vadd.f32 %v6419_v34, %v6189_v14  ;;  %v7203_v60 = vmul.f32 %v16589_v41, %v16488_v20  ;;  %v16653_v34 = vld [vmem:[%s17966_s3] ss:$0 sm:$0xff]  ;;  %v7464_v20 = vmul.f32 %v16604_v0, %v16576_v39 }
 0x42b   : > { %11928 = vmatmul.mubr.msk.bf16.gmra.mrb[28].mxu0 %vm269_vm0, %v4229_v18  ;;  %v6974_v3 = vadd.f32 %v6942_v15, %v6713_v57  ;;  %18636 = vst [vmem:[#allocation115_spill] sm:$0xff] %v16663_v55  ;;  %v4867_v26 = vsel %vm2926_vm2, %v16396_v43, 0  ;;  %v18638_v15 = vld [vmem:[#allocation88_spill] sm:$0xff]  ;;  %v18639_v43 = vld [vmem:[#allocation89_spill] sm:$0xff] }
 0x42c   : > { %11933 = vmatprep.mubr.msk.bf16.mxu0 %vm269_vm0, %v18635_v1  ;;  %v7602_v42 = vpop.permute.xlu0 %7601  ;;  %v7756_v47 = vadd.f32 %v7724_v32, %v7495_v4  ;;  %v6712_v54 = vadd.f32 %v6680_v35, %v6451_v21  ;;  %v16667_v35 = vld [vmem:[#allocation2 + $0x92] sm:$0xff]  ;;  %v16674_v32 = vld [vmem:[%s17967_s4 + $0x20] sm:$0xf] }
 0x42d   : > { %v7723_v8 = vmul.f32 %v16632_v17, %v7602_v42  ;;  %6887 = vperm.xlu0 %12880, %v16622_v53   ;;  %v16646_v7 = vpop.permute.xlu1 %6591  ;;  %v7236_v51 = vadd.f32 %v7204_v2, %v6974_v3  ;;  %18637 = vst [vmem:[#allocation116_spill] sm:$0xff] %v16667_v35  ;;  %v4485_v4 = vld [vmem:[#allocation2 + $0x98] sm:$0xff] }
 0x42e   : > { %v7795_v50 = vadd.f32 %v16653_v34, %v7756_v47  ;;  %6118 = vperm.xlu1 %12881, %v16617_v36   ;;  %v6973_v13 = vadd.f32 %v6941_v37, %v6712_v54  ;;  %v4484_v37 = vld [vmem:[#allocation2 + $0x90] sm:$0xff]  ;;  %v16684_v57 = vld [vmem:[%s14348_s13 + $0x15a] sm:$0xff] }
 0x42f   : > { %v7755_v18 = vadd.f32 %v7723_v8, %v7494_v49  ;;  %v7497_v1 = vadd.f32 %v7465_v22, %v7236_v51  ;;  %v16688_v47 = vld [vmem:[%s14348_s13 + $0x152] sm:$0xff] }
 0x430   : > { %v16656_v5 = vpop.permute.xlu0 %6586  ;;  %v7827_v14 = vmax.f32 %v7795_v50, 0.0  ;;  %v7235_v62 = vadd.f32 %v7203_v60, %v6973_v13  ;;  %v11199_v3 = vld [vmem:[%s14348_s13 + $0x158] sm:$0xff]  ;;  %v4512_v13 = vpack.c.bf16 %v4485_v4, %v4484_v37 }
 0x431   : > { %v7794_v45 = vadd.f32 %v16653_v34, %v7755_v18  ;;  %6113 = vperm.xlu0 %12880, %v16622_v53   ;;  %v7617_v39 = vpop.permute.xlu1 %7616  ;;  %v16701_v22 = vld [vmem:[#allocation2 + $0xb2] sm:$0xff] }
 0x432   : > { %v7726_v42 = vmul.f32 %v16632_v17, %v7617_v39  ;;  %7144 = vperm.xlu1 %12881, %v16470_v63   ;;  %7859 = vst.msk [vmem:[#allocation2 + $0x99] sm:$0xff] %vm269_vm0, %v7827_v14  ;;  %v7496_v49 = vadd.f32 %v7464_v20, %v7235_v62  ;;  %18640 = vst [vmem:[#allocation117_spill] sm:$0xff] %v16701_v22  ;;  %v11198_v20 = vld [vmem:[%s14348_s13 + $0x150] sm:$0xff]  ;;  %v18642_v14 = vld [vmem:[#allocation94_spill] sm:$0xff] }
 0x433   : > { %v7826_v29 = vmax.f32 %v7794_v45, 0.0  ;;  %11934 = vmatmul.mubr.msk.bf16.vlgmr.msra.gmra.mrb[0].mxu0 %vm269_vm0, %v18638_v15  ;;  %v16704_v45 = vld [vmem:[#allocation2 + $0xaa] sm:$0xff]  ;;  %v4501_v35 = vld [vmem:[#allocation2 + $0x158] sm:$0xff] }
 0x434   : > { %11937 = vmatprep.mubr.msk.bf16.mxu0 %vm269_vm0, %v18639_v43  ;;  %v7612_v21 = vpop.permute.xlu0 %7611  ;;  %11966 = vmatpush3.bf16.msra.mxu0 %v4867_v26  ;;  %v7758_v2 = vadd.f32 %v7726_v42, %v7497_v1  ;;  %18641 = vst [vmem:[#allocation118_spill] sm:$0xff] %v16704_v45  ;;  %v4486_v1 = vld [vmem:[#allocation2 + $0xa8] sm:$0xff]  ;;  %v4488_v43 = vld [vmem:[#allocation2 + $0xc0] sm:$0xff]  ;;  %v18644_v45 = vld [vmem:[#allocation27_spill] sm:$0xff] }
 0x435   : > { %v7725_v8 = vmul.f32 %v16632_v17, %v7612_v21  ;;  %7139 = vperm.xlu0 %12880, %v16473_v31   ;;  %7858 = vst.msk [vmem:[#allocation2 + $0x91] sm:$0xff] %vm269_vm0, %v7826_v29  ;;  %12859 = vmatprep.subr.msk.bf16.mxu0 %vm2926_vm2, %v16674_v32  ;;  %v16692_v54 = vpop.permute.xlu1 %6842  ;;  %v4487_v29 = vld [vmem:[#allocation2 + $0xb0] sm:$0xff]  ;;  %v4489_v21 = vld [vmem:[#allocation2 + $0xc8] sm:$0xff]  ;;  %v5898_v55 = vmul.f32 %v16500_v28, %v18644_v45 }
 0x436   : > { %v7797_v60 = vadd.f32 %v16653_v34, %v7758_v2  ;;  %6128 = vperm.xlu1 %12881, %v16684_v57   ;;  %v6159_v45 = vmul.f32 %v16524_v58, %v16459_v61  ;;  %v18648_v61 = vld [vmem:[#allocation30_spill] sm:$0xff] }
 0x437   : > { %v7757_v63 = vadd.f32 %v7725_v8, %v7496_v49  ;;  %v4513_v49 = vpack.c.bf16 %v4487_v29, %v4486_v1  ;;  %v4514_v8 = vpack.c.bf16 %v4489_v21, %v4488_v43  ;;  %v4493_v29 = vld [vmem:[#allocation2 + $0xf8] sm:$0xff]  ;;  %v5901_v23 = vmul.f32 %v16500_v28, %v18648_v61 }
 0x438   : > { %v16695_v18 = vpop.permute.xlu0 %6837  ;;  %v7829_v50 = vmax.f32 %v7797_v60, 0.0 }
 0x439   : > { %v7796_v31 = vadd.f32 %v16653_v34, %v7757_v63  ;;  %6123 = vperm.xlu0 %12880, %v16688_v47   ;;  %v16708_v26 = vpop.permute.xlu1 %6852  ;;  %v7942_v62 = vld [vmem:[#allocation2 + $0x99] sm:$0xff] }
 0x43a   : > { %7154 = vperm.xlu1 %12881, %v11199_v3   ;;  %7861 = vst.msk [vmem:[#allocation2 + $0xb1] sm:$0xff] %vm269_vm0, %v7829_v50  ;;  %v16729_v50 = vld [vmem:[%s14348_s13 + $0x170] sm:$0xff] }
 0x43b   : > { %v7828_v51 = vmax.f32 %v7796_v31, 0.0  ;;  %11938 = vmatmul.mubr.msk.bf16.gmra.mrb[4].mxu0 %vm269_vm0, %v18642_v14 }
 0x43c   : > { %11941 = vmatprep.mubr.msk.bf16.mxu0 %vm269_vm0, %v4512_v13  ;;  %v16711_v15 = vpop.permute.xlu0 %6847  ;;  %v7941_v39 = vld [vmem:[#allocation2 + $0x91] sm:$0xff]  ;;  %v16732_v13 = vld [vmem:[%s14348_s13 + $0x168] sm:$0xff] }
 0x43d   : > { %7149 = vperm.xlu0 %12880, %v11198_v20   ;;  %v7967_v4 = vpack.c.bf16 %v7942_v62, %v7941_v39  ;;  %7860 = vst.msk [vmem:[#allocation2 + $0xa9] sm:$0xff] %vm269_vm0, %v7828_v51  ;;  %v16716_v42 = vpop.permute.xlu1 %6078  ;;  %v4491_v51 = vld [vmem:[#allocation2 + $0xe0] sm:$0xff]  ;;  %v4492_v62 = vld [vmem:[#allocation2 + $0xf0] sm:$0xff] }
 0x43e   : > { %6380 = vperm.xlu1 %12881, %v11199_v3   ;;  %v4516_v1 = vpack.c.bf16 %v4493_v29, %v4492_v62 }
 0x43f   : > { %12047 = vmatprep.mubr.msk.bf16.mxu1 %vm269_vm0, %v7967_v4  ;;  %v11231_v4 = vld [vmem:[%s14348_s13 + $0x151] sm:$0xff] }
 0x440   : > { %v16718_v37 = vpop.permute.xlu0 %6073 }
 0x441   : > { %6375 = vperm.xlu0 %12880, %v11198_v20   ;;  %v16721_v2 = vpop.permute.xlu1 %7104  ;;  %v7944_v63 = vld [vmem:[#allocation2 + $0xb1] sm:$0xff] }
 0x442   : > { %7405 = vperm.xlu1 %12881, %v16512_v25   ;;  %v4490_v20 = vld [vmem:[#allocation2 + $0xd8] sm:$0xff]  ;;  %v7206_v61 = vmul.f32 %v16589_v41, %v16721_v2 }
 0x443   : > { %11942 = vmatmul.mubr.msk.bf16.gmra.mrb[8].mxu0 %vm269_vm0, %v4513_v49  ;;  %v4515_v25 = vpack.c.bf16 %v4491_v51, %v4490_v20  ;;  %v4494_v49 = vld [vmem:[#allocation2 + $0x108] sm:$0xff] }
 0x444   : > { %11945 = vmatprep.mubr.msk.bf16.mxu0 %vm269_vm0, %v4514_v8  ;;  %v16724_v60 = vpop.permute.xlu0 %7099  ;;  %v7943_v31 = vld [vmem:[#allocation2 + $0xa9] sm:$0xff] }
 0x445   : > { %7400 = vperm.xlu0 %12880, %v16529_v12   ;;  %v7968_v3 = vpack.c.bf16 %v7944_v63, %v7943_v31  ;;  %v16735_v14 = vpop.permute.xlu1 %6088  ;;  %v11232_v12 = vld [vmem:[%s14348_s13 + $0x159] sm:$0xff]  ;;  %v4495_v8 = vld [vmem:[#allocation2 + $0x110] sm:$0xff] }
 0x446   : > { %6390 = vperm.xlu1 %12881, %v16729_v50   ;;  %v4496_v31 = vld [vmem:[#allocation2 + $0x120] sm:$0xff]  ;;  %v4517_v51 = vpack.c.bf16 %v4495_v8, %v4494_v49  ;;  %v6160_v8 = vmul.f32 %v16524_v58, %v16457_v38 }
 0x447   : > { %12048 = vmatmul.mubr.msk.bf16.gmra.mrb[12].mxu1 %vm269_vm0, %v7968_v3  ;;  %v4497_v3 = vld [vmem:[#allocation2 + $0x128] sm:$0xff] }
 0x448   : > { %v16737_v39 = vpop.permute.xlu0 %6083  ;;  %v4518_v62 = vpack.c.bf16 %v4497_v3, %v4496_v31  ;;  %v16773_v31 = vld [vmem:[%s14348_s13 + $0x169] sm:$0xff]  ;;  %v4498_v3 = vld [vmem:[#allocation2 + $0x138] sm:$0xff] }
 0x449   : > { %6385 = vperm.xlu0 %12880, %v16732_v13   ;;  %v16744_v43 = vpop.permute.xlu1 %7114 }
 0x44a   : > { %7415 = vperm.xlu1 %12881, %v11232_v12  }
 0x44b   : > { %11946 = vmatmul.mubr.msk.bf16.gmra.mrb[12].mxu0 %vm269_vm0, %v4515_v25  ;;  %v18643_v25 = vld [vmem:[#allocation26_spill] sm:$0xff] }
 0x44c   : > { %11949 = vmatprep.mubr.msk.bf16.mxu0 %vm269_vm0, %v4516_v1  ;;  %v16747_v21 = vpop.permute.xlu0 %7109  ;;  %v5899_v1 = vmul.f32 %v16500_v28, %v18643_v25 }
 0x44d   : > { %7410 = vperm.xlu0 %12880, %v11231_v4   ;;  %v16749_v63 = vpop.permute.xlu1 %6340 }
 0x44e   : > { %6641 = vperm.xlu1 %12881, %v11232_v12   ;;  %v16766_v12 = vld [vmem:[%s14348_s13 + $0x171] sm:$0xff] }
 0x450   : > { %v16751_v20 = vpop.permute.xlu0 %6335 }
 0x451   : > { %6636 = vperm.xlu0 %12880, %v11231_v4   ;;  %v16754_v29 = vpop.permute.xlu1 %7365  ;;  %v18645_v4 = vld [vmem:[#allocation90_spill] sm:$0xff] }
 0x452   : > { %7666 = vperm.xlu1 %12881, %v16617_v36   ;;  %v5638_v49 = vmul.f32 %v16517_v27, %v18645_v4  ;;  %v6422_v4 = vmul.f32 %v16540_v40, %v16490_v10  ;;  %v18649_v10 = vld [vmem:[#allocation92_spill] sm:$0xff] }
 0x453   : > { %11950 = vmatmul.mubr.msk.bf16.gmra.mrb[16].mxu0 %vm269_vm0, %v4517_v51  ;;  %v4499_v51 = vld [vmem:[#allocation2 + $0x140] sm:$0xff]  ;;  %v5640_v19 = vmul.f32 %v16517_v27, %v18649_v10 }
 0x454   : > { %11953 = vmatprep.mubr.msk.bf16.mxu0 %vm269_vm0, %v4518_v62  ;;  %v16759_v22 = vpop.permute.xlu0 %7360  ;;  %v18646_v62 = vld [vmem:[#allocation91_spill] sm:$0xff]  ;;  %v5931_v6 = vadd.f32 %v5899_v1, %v5638_v49  ;;  %v6683_v1 = vmul.f32 %v16555_v16, %v16599_v44 }
 0x455   : > { %7661 = vperm.xlu0 %12880, %v16622_v53   ;;  %v5637_v36 = vmul.f32 %v16517_v27, %v18646_v62  ;;  %v16779_v25 = vpop.permute.xlu1 %6350  ;;  %v4500_v53 = vld [vmem:[#allocation2 + $0x150] sm:$0xff]  ;;  %v4519_v62 = vpack.c.bf16 %v4499_v51, %v4498_v3 }
 0x456   : > { %6651 = vperm.xlu1 %12881, %v16766_v12   ;;  %v6192_v24 = vadd.f32 %v6160_v8, %v5931_v6  ;;  %v4520_v49 = vpack.c.bf16 %v4501_v35, %v4500_v53  ;;  %v18650_v3 = vld [vmem:[#allocation31_spill] sm:$0xff]  ;;  %v6944_v6 = vmul.f32 %v16571_v52, %v16692_v54  ;;  %v18651_v35 = vld [vmem:[#allocation93_spill] sm:$0xff]  ;;  %v6162_v8 = vmul.f32 %v16524_v58, %v16476_v46 }
 0x457   : > { %v5930_v38 = vadd.f32 %v5898_v55, %v5637_v36  ;;  %v6682_v55 = vmul.f32 %v16555_v16, %v16608_v56  ;;  %v5900_v51 = vmul.f32 %v16500_v28, %v18650_v3  ;;  %v5639_v56 = vmul.f32 %v16517_v27, %v18651_v35  ;;  %v4503_v54 = vld [vmem:[#allocation2 + $0x170] sm:$0xff] }
 0x458   : > { %v16783_v9 = vpop.permute.xlu0 %6345  ;;  %v6454_v36 = vadd.f32 %v6422_v4, %v6192_v24  ;;  %v6943_v53 = vmul.f32 %v16571_v52, %v16695_v18  ;;  %v4502_v24 = vld [vmem:[#allocation2 + $0x168] sm:$0xff]  ;;  %v7928_v4 = vld [vmem:[%s17967_s4] sm:$0xf]  ;;  %v6424_v46 = vmul.f32 %v16540_v40, %v16535_v30  ;;  %v7467_v3 = vmul.f32 %v16604_v0, %v16754_v29 }
 0x459   : > { %18647 = vst [vmem:[#allocation119_spill] sm:$0xff] %v16783_v9  ;;  %6646 = vperm.xlu0 %12880, %v16773_v31   ;;  %v6191_v9 = vadd.f32 %v6159_v45, %v5930_v38  ;;  %v16798_v59 = vpop.permute.xlu1 %7375  ;;  %v5933_v38 = vadd.f32 %v5901_v23, %v5640_v19  ;;  %12861 = vmatprep.subr.msk.bf16.mxu1 %vm2926_vm2, %v7928_v4  ;;  %v4504_v23 = vld [vmem:[#allocation2 + $0x180] sm:$0xff] }
 0x45a   : > { %7676 = vperm.xlu1 %12881, %v16684_v57   ;;  %v5932_v2 = vadd.f32 %v5900_v51, %v5639_v56  ;;  %v4521_v30 = vpack.c.bf16 %v4503_v54, %v4502_v24  ;;  %v7466_v35 = vmul.f32 %v16604_v0, %v16759_v22  ;;  %v16841_v51 = vld [vmem:[%s14348_s13 + $0x172] sm:$0xff]  ;;  %v6685_v29 = vmul.f32 %v16555_v16, %v16646_v7 }
 0x45b   : > { %11954 = vmatmul.mubr.msk.bf16.gmra.mrb[20].mxu0 %vm269_vm0, %v4519_v62  ;;  %v6453_v45 = vadd.f32 %v6421_v33, %v6191_v9  ;;  %v6715_v62 = vadd.f32 %v6683_v1, %v6454_v36  ;;  %v8239_v33 = vsel %vm2926_vm2, %v7928_v4, 0  ;;  %v6161_v9 = vmul.f32 %v16524_v58, %v16478_v11  ;;  %v4505_v1 = vld [vmem:[#allocation2 + $0x188] sm:$0xff]  ;;  %v4506_v4 = vld [vmem:[#allocation2 + $0x198] sm:$0xff] }
 0x45c   : > { %11957 = vmatprep.mubr.msk.bf16.mxu0 %vm269_vm0, %v4520_v49  ;;  %v16805_v44 = vpop.permute.xlu0 %7370  ;;  %v7205_v49 = vmul.f32 %v16589_v41, %v16724_v60  ;;  %12068 = vmatpush3.bf16.msra.mxu1 %v8239_v33  ;;  %v6423_v60 = vmul.f32 %v16540_v40, %v16544_v48  ;;  %v4522_v56 = vpack.c.bf16 %v4505_v1, %v4504_v23 }
 0x45d   : > { %7671 = vperm.xlu0 %12880, %v16688_v47   ;;  %v6714_v18 = vadd.f32 %v6682_v55, %v6453_v45  ;;  %v16828_v19 = vpop.permute.xlu1 %6601  ;;  %v6976_v10 = vadd.f32 %v6944_v6, %v6715_v62  ;;  %v6194_v55 = vadd.f32 %v6162_v8, %v5933_v38  ;;  %v16846_v45 = vld [vmem:[%s14348_s13 + $0x16a] sm:$0xff]  ;;  %v6684_v48 = vmul.f32 %v16555_v16, %v16656_v5  ;;  %v4507_v38 = vld [vmem:[#allocation2 + $0x1a0] sm:$0xff] }
 0x45e   : > { %6902 = vperm.xlu1 %12881, %v16684_v57   ;;  %v6193_v57 = vadd.f32 %v6161_v9, %v5932_v2  ;;  %v6945_v5 = vmul.f32 %v16571_v52, %v16711_v15  ;;  %v7208_v9 = vmul.f32 %v16589_v41, %v16744_v43  ;;  %v4523_v15 = vpack.c.bf16 %v4507_v38, %v4506_v4 }
 0x45f   : > { %v6975_v36 = vadd.f32 %v6943_v53, %v6714_v18  ;;  %v7238_v6 = vadd.f32 %v7206_v61, %v6976_v10  ;;  %v6456_v8 = vadd.f32 %v6424_v46, %v6194_v55  ;;  %v7469_v10 = vmul.f32 %v16604_v0, %v16798_v59  ;;  %v16882_v59 = vld [vmem:[#allocation2 + $0xca] sm:$0xff] }
 0x460   : > { %v16832_v11 = vpop.permute.xlu0 %6596  ;;  %v6455_v62 = vadd.f32 %v6423_v60, %v6193_v57  ;;  %v7468_v55 = vmul.f32 %v16604_v0, %v16805_v44  ;;  %v16877_v60 = vld [vmem:[%s14348_s13 + $0x188] sm:$0xff] }
 0x461   : > { %6897 = vperm.xlu0 %12880, %v16688_v47   ;;  %v7237_v53 = vadd.f32 %v7205_v49, %v6975_v36  ;;  %v7627_v22 = vpop.permute.xlu1 %7626  ;;  %v6946_v47 = vmul.f32 %v16571_v52, %v16708_v26  ;;  %v7499_v24 = vadd.f32 %v7467_v3, %v7238_v6  ;;  %v6717_v26 = vadd.f32 %v6685_v29, %v6456_v8  ;;  %v16880_v29 = vld [vmem:[%s14348_s13 + $0x180] sm:$0xff] }
 0x462   : > { %v7728_v54 = vmul.f32 %v16632_v17, %v7627_v22  ;;  %6912 = vperm.xlu1 %12881, %v16841_v51   ;;  %v6716_v18 = vadd.f32 %v6684_v48, %v6455_v62  ;;  %v7207_v49 = vmul.f32 %v16589_v41, %v16747_v21  ;;  %v16884_v6 = vld [vmem:[#allocation2 + $0xc2] sm:$0xff] }
 0x463   : > { %11958 = vmatmul.mubr.msk.bf16.gmra.mrb[24].mxu0 %vm269_vm0, %v4521_v30  ;;  %v7498_v61 = vadd.f32 %v7466_v35, %v7237_v53  ;;  %v6978_v2 = vadd.f32 %v6946_v47, %v6717_v26  ;;  %v18652_v8 = vld [vmem:[#allocation25_spill] sm:$0xff]  ;;  %v16904_v62 = vld [vmem:[%s14348_s13 + $0x189] sm:$0xff] }
 0x464   : > { %11961 = vmatprep.mubr.msk.bf16.mxu0 %vm269_vm0, %v4522_v56  ;;  %v7622_v7 = vpop.permute.xlu0 %7621  ;;  %v7760_v46 = vadd.f32 %v7728_v54, %v7499_v24  ;;  %v6977_v43 = vadd.f32 %v6945_v5, %v6716_v18  ;;  %v16911_v26 = vld [vmem:[#allocation2 + $0xe2] sm:$0xff] }
 0x465   : > { %v7727_v33 = vmul.f32 %v16632_v17, %v7622_v7  ;;  %6907 = vperm.xlu0 %12880, %v16846_v45   ;;  %v16864_v1 = vpop.permute.xlu1 %6611  ;;  %v7240_v36 = vadd.f32 %v7208_v9, %v6978_v2  ;;  %v16913_v9 = vld [vmem:[#allocation2 + $0xda] sm:$0xff]  ;;  %v18653_v18 = vld [vmem:[#allocation74_spill] sm:$0xff] }
 0x466   : > { %v7799_v3 = vadd.f32 %v16653_v34, %v7760_v46  ;;  %7164 = vperm.xlu1 %12881, %v16729_v50   ;;  %v7239_v56 = vadd.f32 %v7207_v49, %v6977_v43  ;;  %v18656_v43 = vld [vmem:[#allocation43_spill] sm:$0xff] }
 0x467   : > { %v7759_v23 = vadd.f32 %v7727_v33, %v7498_v61  ;;  %v7501_v44 = vadd.f32 %v7469_v10, %v7240_v36  ;;  %v16907_v61 = vld [vmem:[%s14348_s13 + $0x181] sm:$0xff]  ;;  %v5160_v33 = vsel %vm2926_vm2, %v16674_v32, 0  ;;  %v18655_v10 = vld [vmem:[#allocation75_spill] sm:$0xff] }
 0x468   : > { %v16869_v30 = vpop.permute.xlu0 %6606  ;;  %v7831_v35 = vmax.f32 %v7799_v3, 0.0  ;;  %v7500_v53 = vadd.f32 %v7468_v55, %v7239_v56  ;;  %v5906_v55 = vmul.f32 %v16500_v28, %v18656_v43  ;;  %v18657_v36 = vld [vmem:[#allocation3_spill] sm:$0xff] }
 0x469   : > { %v7798_v21 = vadd.f32 %v16653_v34, %v7759_v23  ;;  %7159 = vperm.xlu0 %12880, %v16732_v13   ;;  %v7637_v57 = vpop.permute.xlu1 %7636  ;;  %v18658_v56 = vld [vmem:[#allocation99_spill] sm:$0xff] }
 0x46a   : > { %7863 = vst.msk [vmem:[#allocation2 + $0xc9] sm:$0xff] %vm269_vm0, %v7831_v35  ;;  %v7730_v13 = vmul.f32 %v16632_v17, %v7637_v57  ;;  %7174 = vperm.xlu1 %12881, %v16877_v60   ;;  %v5646_v35 = vmul.f32 %v16517_v27, %v18657_v36  ;;  %v18664_v36 = vld [vmem:[#allocation5_spill] sm:$0xff] }
 0x46b   : > { %v7830_v50 = vmax.f32 %v7798_v21, 0.0  ;;  %11962 = vmatmul.mubr.msk.bf16.gmra.mrb[28].mxu0 %vm269_vm0, %v4523_v15  ;;  %v18654_v15 = vld [vmem:[#allocation42_spill] sm:$0xff] }
 0x46c   : > { %11967 = vmatprep.mubr.msk.bf16.mxu0 %vm269_vm0, %v18652_v8  ;;  %v7632_v48 = vpop.permute.xlu0 %7631  ;;  %v7762_v47 = vadd.f32 %v7730_v13, %v7501_v44  ;;  %v5907_v2 = vmul.f32 %v16500_v28, %v18654_v15 }
 0x46d   : > { %7862 = vst.msk [vmem:[#allocation2 + $0xc1] sm:$0xff] %vm269_vm0, %v7830_v50  ;;  %v7729_v22 = vmul.f32 %v16632_v17, %v7632_v48  ;;  %7169 = vperm.xlu0 %12880, %v16880_v29   ;;  %v16895_v54 = vpop.permute.xlu1 %6862  ;;  %v5645_v50 = vmul.f32 %v16517_v27, %v18658_v56 }
 0x46e   : > { %v7801_v7 = vadd.f32 %v16653_v34, %v7762_v47  ;;  %7425 = vperm.xlu1 %12881, %v16766_v12   ;;  %v5939_v44 = vadd.f32 %v5907_v2, %v5646_v35  ;;  %v5647_v35 = vmul.f32 %v16517_v27, %v18664_v36  ;;  %v18668_v36 = vld [vmem:[#allocation34_spill] sm:$0xff] }
 0x46f   : > { %v7761_v24 = vadd.f32 %v7729_v22, %v7500_v53  ;;  %v5938_v48 = vadd.f32 %v5906_v55, %v5645_v50  ;;  %v16941_v22 = vld [vmem:[%s14348_s13 + $0x18a] sm:$0xff]  ;;  %v18663_v55 = vld [vmem:[#allocation4_spill] sm:$0xff] }
 0x470   : > { %v16898_v4 = vpop.permute.xlu0 %6857  ;;  %v7833_v5 = vmax.f32 %v7801_v7, 0.0 }
 0x471   : > { %v7800_v38 = vadd.f32 %v16653_v34, %v7761_v24  ;;  %7420 = vperm.xlu0 %12880, %v16773_v31   ;;  %v16917_v49 = vpop.permute.xlu1 %6872  ;;  %v7946_v23 = vld [vmem:[#allocation2 + $0xc9] sm:$0xff] }
 0x472   : > { %7865 = vst.msk [vmem:[#allocation2 + $0xe1] sm:$0xff] %vm269_vm0, %v7833_v5  ;;  %7435 = vperm.xlu1 %12881, %v16904_v62   ;;  %v16944_v24 = vld [vmem:[%s14348_s13 + $0x182] sm:$0xff] }
 0x473   : > { %v7832_v46 = vmax.f32 %v7800_v38, 0.0  ;;  %11968 = vmatmul.mubr.msk.bf16.vlgmr.msra.gmra.mrb[0].mxu0 %vm269_vm0, %v18653_v18  ;;  %v18659_v38 = vld [vmem:[#allocation76_spill] sm:$0xff] }
 0x474   : > { %11971 = vmatprep.mubr.msk.bf16.mxu0 %vm269_vm0, %v18655_v10  ;;  %v16924_v32 = vpop.permute.xlu0 %6867  ;;  %v7945_v3 = vld [vmem:[#allocation2 + $0xc1] sm:$0xff]  ;;  %12000 = vmatpush3.bf16.msra.mxu0 %v5160_v33  ;;  %v18662_v10 = vld [vmem:[#allocation47_spill] sm:$0xff] }
 0x475   : > { %7864 = vst.msk [vmem:[#allocation2 + $0xd9] sm:$0xff] %vm269_vm0, %v7832_v46  ;;  %7430 = vperm.xlu0 %12880, %v16907_v61   ;;  %v7969_v21 = vpack.c.bf16 %v7946_v23, %v7945_v3  ;;  %v6099_v57 = vpop.permute.xlu1 %6098  ;;  %v18660_v46 = vld [vmem:[#allocation46_spill] sm:$0xff]  ;;  %v18661_v23 = vld [vmem:[#allocation77_spill] sm:$0xff]  ;;  %v5908_v3 = vmul.f32 %v16500_v28, %v18662_v10 }
 0x476   : > { %v6168_v13 = vmul.f32 %v16524_v58, %v6099_v57  ;;  %7686 = vperm.xlu1 %12881, %v16841_v51   ;;  %v5909_v18 = vmul.f32 %v16500_v28, %v18660_v46  ;;  %v18666_v46 = vld [vmem:[#allocation79_spill] sm:$0xff] }
 0x477   : > { %12051 = vmatprep.mubr.msk.bf16.mxu1 %vm269_vm0, %v7969_v21  ;;  %v5648_v21 = vmul.f32 %v16517_v27, %v18663_v55 }
 0x478   : > { %v6094_v8 = vpop.permute.xlu0 %6093  ;;  %v6200_v47 = vadd.f32 %v6168_v13, %v5939_v44  ;;  %v5940_v13 = vadd.f32 %v5908_v3, %v5647_v35  ;;  %v5903_v35 = vmul.f32 %v16500_v28, %v18668_v36  ;;  %v18672_v36 = vld [vmem:[#allocation38_spill] sm:$0xff] }
 0x479   : > { %v6167_v53 = vmul.f32 %v16524_v58, %v6094_v8  ;;  %7681 = vperm.xlu0 %12880, %v16846_v45   ;;  %v16948_v5 = vpop.permute.xlu1 %7124  ;;  %v7948_v33 = vld [vmem:[#allocation2 + $0xe1] sm:$0xff]  ;;  %v5941_v50 = vadd.f32 %v5909_v18, %v5648_v21 }
 0x47a   : > { %7696 = vperm.xlu1 %12881, %v16941_v22  }
 0x47b   : > { %v6199_v7 = vadd.f32 %v6167_v53, %v5938_v48  ;;  %11972 = vmatmul.mubr.msk.bf16.gmra.mrb[4].mxu0 %vm269_vm0, %v18659_v38  ;;  %v18665_v38 = vld [vmem:[#allocation78_spill] sm:$0xff] }
 0x47c   : > { %11975 = vmatprep.mubr.msk.bf16.mxu0 %vm269_vm0, %v18661_v23  ;;  %v16954_v15 = vpop.permute.xlu0 %7119  ;;  %v7947_v2 = vld [vmem:[#allocation2 + $0xd9] sm:$0xff]  ;;  %v4785_v23 = vld [vmem:[#allocation2 + $0xf1] sm:$0xff] }
 0x47d   : > { %7691 = vperm.xlu0 %12880, %v16944_v24   ;;  %v7970_v43 = vpack.c.bf16 %v7948_v33, %v7947_v2  ;;  %v6109_v56 = vpop.permute.xlu1 %6108  ;;  %v4786_v2 = vld [vmem:[#allocation2 + $0xf9] sm:$0xff] }
 0x47e   : > { %v6170_v57 = vmul.f32 %v16524_v58, %v6109_v56  ;;  %5877 = vperm.xlu1 %12881, %v16766_v12   ;;  %v4809_v55 = vpack.c.bf16 %v4786_v2, %v4785_v23  ;;  %v4788_v56 = vld [vmem:[#allocation2 + $0x111] sm:$0xff] }
 0x47f   : > { %12052 = vmatmul.mubr.msk.bf16.gmra.mrb[16].mxu1 %vm269_vm0, %v7970_v43 }
 0x480   : > { %v6104_v44 = vpop.permute.xlu0 %6103  ;;  %v6202_v48 = vadd.f32 %v6170_v57, %v5941_v50  ;;  %v18670_v50 = vld [vmem:[#allocation95_spill] sm:$0xff] }
 0x481   : > { %v6169_v8 = vmul.f32 %v16524_v58, %v6104_v44  ;;  %5872 = vperm.xlu0 %12880, %v16773_v31   ;;  %v16971_v33 = vpop.permute.xlu1 %7134  ;;  %v5642_v57 = vmul.f32 %v16517_v27, %v18670_v50  ;;  %v6164_v44 = vmul.f32 %v16524_v58, %v16716_v42 }
 0x482   : > { %6138 = vperm.xlu1 %12881, %v16841_v51   ;;  %v18667_v51 = vld [vmem:[#allocation80_spill] sm:$0xff] }
 0x483   : > { %v6201_v53 = vadd.f32 %v6169_v8, %v5940_v13  ;;  %11976 = vmatmul.mubr.msk.bf16.gmra.mrb[8].mxu0 %vm269_vm0, %v18665_v38  ;;  %v4789_v13 = vld [vmem:[#allocation2 + $0x121] sm:$0xff]  ;;  %v4790_v8 = vld [vmem:[#allocation2 + $0x129] sm:$0xff]  ;;  %v18671_v38 = vld [vmem:[#allocation96_spill] sm:$0xff]  ;;  %v5935_v23 = vadd.f32 %v5903_v35, %v5642_v57  ;;  %v5905_v35 = vmul.f32 %v16500_v28, %v18672_v36 }
 0x484   : > { %11979 = vmatprep.mubr.msk.bf16.mxu0 %vm269_vm0, %v18666_v46  ;;  %v16975_v18 = vpop.permute.xlu0 %7129  ;;  %v5641_v46 = vmul.f32 %v16517_v27, %v18671_v38  ;;  %v6948_v38 = vmul.f32 %v16571_v52, %v16895_v54  ;;  %v18676_v36 = vld [vmem:[#allocation119_spill] sm:$0xff] }
 0x485   : > { %6133 = vperm.xlu0 %12880, %v16846_v45   ;;  %v6361_v12 = vpop.permute.xlu1 %6360 }
 0x486   : > { %v6430_v31 = vmul.f32 %v16540_v40, %v6361_v12  ;;  %6400 = vperm.xlu1 %12881, %v16877_v60  }
 0x488   : > { %v6356_v10 = vpop.permute.xlu0 %6355  ;;  %v16983_v43 = vadd.f32 %v6430_v31, %v6200_v47 }
 0x489   : > { %v6429_v3 = vmul.f32 %v16540_v40, %v6356_v10  ;;  %6395 = vperm.xlu0 %12880, %v16880_v29   ;;  %v16989_v45 = vpop.permute.xlu1 %7385  ;;  %v18669_v29 = vld [vmem:[#allocation35_spill] sm:$0xff] }
 0x48a   : > { %6661 = vperm.xlu1 %12881, %v16904_v62   ;;  %v5902_v47 = vmul.f32 %v16500_v28, %v18669_v29  ;;  %v6163_v62 = vmul.f32 %v16524_v58, %v16718_v37  ;;  %v4811_v37 = vpack.c.bf16 %v4790_v8, %v4789_v13  ;;  %v6687_v29 = vmul.f32 %v16555_v16, %v16828_v19  ;;  %v18674_v19 = vld [vmem:[#allocation39_spill] sm:$0xff] }
 0x48b   : > { %v16985_v21 = vadd.f32 %v6429_v3, %v6199_v7  ;;  %11980 = vmatmul.mubr.msk.bf16.gmra.mrb[12].mxu0 %vm269_vm0, %v18667_v51  ;;  %v4787_v7 = vld [vmem:[#allocation2 + $0x109] sm:$0xff]  ;;  %v6425_v3 = vmul.f32 %v16540_v40, %v16751_v20  ;;  %v11205_v51 = vld [vmem:[%s14348_s13 + $0x1a0] sm:$0xff] }
 0x48c   : > { %11983 = vmatprep.mubr.msk.bf16.mxu0 %vm269_vm0, %v4809_v55  ;;  %v16994_v60 = vpop.permute.xlu0 %7380  ;;  %v4810_v42 = vpack.c.bf16 %v4788_v56, %v4787_v7  ;;  %v5934_v10 = vadd.f32 %v5902_v47, %v5641_v46  ;;  %v4791_v47 = vld [vmem:[#allocation2 + $0x139] sm:$0xff]  ;;  %v4792_v7 = vld [vmem:[#allocation2 + $0x141] sm:$0xff] }
 0x48d   : > { %6656 = vperm.xlu0 %12880, %v16907_v61   ;;  %v6371_v12 = vpop.permute.xlu1 %6370  ;;  %v6426_v61 = vmul.f32 %v16540_v40, %v16749_v63  ;;  %v6196_v63 = vadd.f32 %v6164_v44, %v5935_v23  ;;  %v18673_v56 = vld [vmem:[#allocation97_spill] sm:$0xff]  ;;  %v18675_v23 = vld [vmem:[#allocation98_spill] sm:$0xff] }
 0x48e   : > { %v6432_v2 = vmul.f32 %v16540_v40, %v6371_v12  ;;  %6922 = vperm.xlu1 %12881, %v16941_v22   ;;  %v11204_v22 = vld [vmem:[%s14348_s13 + $0x198] sm:$0xff]  ;;  %v5644_v20 = vmul.f32 %v16517_v27, %v18673_v56  ;;  %v6195_v57 = vadd.f32 %v6163_v62, %v5934_v10  ;;  %v6947_v62 = vmul.f32 %v16571_v52, %v16898_v4  ;;  %v11238_v12 = vld [vmem:[%s14348_s13 + $0x1a1] sm:$0xff] }
 0x48f   : > { %v6458_v8 = vadd.f32 %v6426_v61, %v6196_v63  ;;  %v5643_v61 = vmul.f32 %v16517_v27, %v18675_v23  ;;  %v6165_v10 = vmul.f32 %v16524_v58, %v16737_v39  ;;  %v7209_v4 = vmul.f32 %v16589_v41, %v16954_v15  ;;  %v4793_v27 = vld [vmem:[#allocation2 + $0x151] sm:$0xff]  ;;  %v11270_v56 = vld [vmem:[%s14348_s13 + $0x19a] sm:$0xff] }
 0x490   : > { %v6366_v31 = vpop.permute.xlu0 %6365  ;;  %v17021_v50 = vadd.f32 %v6432_v2, %v6202_v48  ;;  %v5904_v48 = vmul.f32 %v16500_v28, %v18674_v19  ;;  %v4812_v28 = vpack.c.bf16 %v4792_v7, %v4791_v47  ;;  %v5937_v2 = vadd.f32 %v5905_v35, %v5644_v20 }
 0x491   : > { %v6431_v55 = vmul.f32 %v16540_v40, %v6366_v31  ;;  %6917 = vperm.xlu0 %12880, %v16944_v24   ;;  %v6686_v24 = vmul.f32 %v16555_v16, %v16832_v11  ;;  %v17031_v44 = vpop.permute.xlu1 %7395  ;;  %v6166_v11 = vmul.f32 %v16524_v58, %v16735_v14  ;;  %v6719_v54 = vadd.f32 %v6687_v29, %v6458_v8 }
 0x492   : > { %7184 = vperm.xlu1 %12881, %v11205_v51   ;;  %v7210_v31 = vmul.f32 %v16589_v41, %v16948_v5  ;;  %v6428_v14 = vmul.f32 %v16540_v40, %v16779_v25  ;;  %v17061_v5 = vld [vmem:[%s17967_s4 + $0x8] sm:$0xf]  ;;  %v5936_v51 = vadd.f32 %v5904_v48, %v5643_v61  ;;  %v7471_v39 = vmul.f32 %v16604_v0, %v16989_v45 }
 0x493   : > { %v17028_v13 = vadd.f32 %v6431_v55, %v6201_v53  ;;  %11984 = vmatmul.mubr.msk.bf16.gmra.mrb[16].mxu0 %vm269_vm0, %v4810_v42  ;;  %v6457_v53 = vadd.f32 %v6425_v3, %v6195_v57  ;;  %v11237_v42 = vld [vmem:[%s14348_s13 + $0x199] sm:$0xff]  ;;  %v6980_v58 = vadd.f32 %v6948_v38, %v6719_v54  ;;  %12862 = vmatprep.subr.msk.bf16.mxu1 %vm2926_vm2, %v17061_v5 }
 0x494   : > { %11987 = vmatprep.mubr.msk.bf16.mxu0 %vm269_vm0, %v4811_v37  ;;  %v17038_v46 = vpop.permute.xlu0 %7390  ;;  %v4794_v37 = vld [vmem:[#allocation2 + $0x159] sm:$0xff]  ;;  %v6198_v15 = vadd.f32 %v6166_v11, %v5937_v2  ;;  %v6427_v35 = vmul.f32 %v16540_v40, %v18676_v36  ;;  %v7470_v29 = vmul.f32 %v16604_v0, %v16994_v60  ;;  %v6689_v47 = vmul.f32 %v16555_v16, %v16864_v1 }
 0x495   : > { %7179 = vperm.xlu0 %12880, %v11204_v22   ;;  %v6718_v3 = vadd.f32 %v6686_v24, %v6457_v53  ;;  %v17056_v55 = vpop.permute.xlu1 %6621  ;;  %v11271_v22 = vld [vmem:[%s14348_s13 + $0x1a2] sm:$0xff]  ;;  %v7242_v45 = vadd.f32 %v7210_v31, %v6980_v58  ;;  %v4813_v7 = vpack.c.bf16 %v4794_v37, %v4793_v27  ;;  %v6197_v20 = vadd.f32 %v6165_v10, %v5936_v51  ;;  %v17101_v51 = vld [vmem:[#allocation2 + $0xfa] sm:$0xff]  ;;  %v17103_v58 = vld [vmem:[#allocation2 + $0xf2] sm:$0xff] }
 0x496   : > { %7445 = vperm.xlu1 %12881, %v11238_v12   ;;  %v6460_v57 = vadd.f32 %v6428_v14, %v6198_v15  ;;  %v6688_v24 = vmul.f32 %v16555_v16, %v16869_v30  ;;  %v6950_v60 = vmul.f32 %v16571_v52, %v16917_v49  ;;  %v6949_v11 = vmul.f32 %v16571_v52, %v16924_v32  ;;  %v4795_v12 = vld [vmem:[#allocation2 + $0x169] sm:$0xff]  ;;  %v4797_v31 = vld [vmem:[#allocation2 + $0x181] sm:$0xff] }
 0x497   : > { %v6979_v63 = vadd.f32 %v6947_v62, %v6718_v3  ;;  %v7503_v48 = vadd.f32 %v7471_v39, %v7242_v45  ;;  %v6459_v38 = vadd.f32 %v6427_v35, %v6197_v20  ;;  %v7212_v62 = vmul.f32 %v16589_v41, %v16971_v33  ;;  %v4798_v52 = vld [vmem:[#allocation2 + $0x189] sm:$0xff]  ;;  %v4799_v35 = vld [vmem:[#allocation2 + $0x199] sm:$0xff] }
 0x498   : > { %v17065_v25 = vpop.permute.xlu0 %6616  ;;  %v6721_v30 = vadd.f32 %v6689_v47, %v6460_v57  ;;  %v7211_v61 = vmul.f32 %v16589_v41, %v16975_v18  ;;  %v7472_v3 = vmul.f32 %v16604_v0, %v17038_v46  ;;  %v4815_v37 = vpack.c.bf16 %v4798_v52, %v4797_v31 }
 0x499   : > { %7440 = vperm.xlu0 %12880, %v11237_v42   ;;  %v7241_v19 = vadd.f32 %v7209_v4, %v6979_v63  ;;  %v7647_v40 = vpop.permute.xlu1 %7646  ;;  %v6720_v23 = vadd.f32 %v6688_v24, %v6459_v38  ;;  %v7473_v42 = vmul.f32 %v16604_v0, %v17031_v44  ;;  %v4800_v63 = vld [vmem:[#allocation2 + $0x1a1] sm:$0xff] }
 0x49a   : > { %v7732_v8 = vmul.f32 %v16632_v17, %v7647_v40  ;;  %7706 = vperm.xlu1 %12881, %v11271_v22   ;;  %v6982_v32 = vadd.f32 %v6950_v60, %v6721_v30  ;;  %v17113_v40 = vld [vmem:[#allocation2 + $0x112] sm:$0xff]  ;;  %v17115_v60 = vld [vmem:[#allocation2 + $0x10a] sm:$0xff] }
 0x49b   : > { %11988 = vmatmul.mubr.msk.bf16.gmra.mrb[20].mxu0 %vm269_vm0, %v4812_v28  ;;  %v7502_v53 = vadd.f32 %v7470_v29, %v7241_v19  ;;  %v4796_v28 = vld [vmem:[#allocation2 + $0x171] sm:$0xff]  ;;  %v6981_v33 = vadd.f32 %v6949_v11, %v6720_v23 }
 0x49c   : > { %11991 = vmatprep.mubr.msk.bf16.mxu0 %vm269_vm0, %v4813_v7  ;;  %v7642_v1 = vpop.permute.xlu0 %7641  ;;  %v7764_v49 = vadd.f32 %v7732_v8, %v7503_v48  ;;  %v4814_v41 = vpack.c.bf16 %v4796_v28, %v4795_v12  ;;  %v7244_v18 = vadd.f32 %v7212_v62, %v6982_v32  ;;  %v18678_v30 = vld [vmem:[#allocation112_spill] sm:$0xff]  ;;  %v18679_v62 = vld [vmem:[#allocation111_spill] sm:$0xff]  ;;  %v18680_v12 = vld [vmem:[#allocation110_spill] sm:$0xff] }
 0x49d   : > { %v7731_v16 = vmul.f32 %v16632_v17, %v7642_v1  ;;  %7701 = vperm.xlu0 %12880, %v11270_v56   ;;  %v17091_v54 = vpop.permute.xlu1 %6631  ;;  %v7243_v39 = vadd.f32 %v7211_v61, %v6981_v33  ;;  %v4816_v56 = vpack.c.bf16 %v4800_v63, %v4799_v35  ;;  %v18677_v1 = vld [vmem:[#allocation109_spill] sm:$0xff] }
 0x49e   : > { %v7803_v10 = vadd.f32 %v16653_v34, %v7764_v49  ;;  %v7505_v36 = vadd.f32 %v7473_v42, %v7244_v18  ;;  %v5096_v49 = vpack.c.bf16 %v18679_v62, %v18678_v30  ;;  %v18681_v42 = vld [vmem:[#allocation114_spill] sm:$0xff] }
 0x49f   : > { %v7763_v2 = vadd.f32 %v7731_v16, %v7502_v53  ;;  %v7504_v29 = vadd.f32 %v7472_v3, %v7243_v39  ;;  %v18683_v3 = vld [vmem:[#allocation116_spill] sm:$0xff] }
 0x4a0   : > { %v17096_v14 = vpop.permute.xlu0 %6626  ;;  %v7835_v27 = vmax.f32 %v7803_v10, 0.0  ;;  %v18682_v10 = vld [vmem:[#allocation113_spill] sm:$0xff] }
 0x4a1   : > { %v7802_v4 = vadd.f32 %v16653_v34, %v7763_v2  ;;  %v7657_v15 = vpop.permute.xlu1 %7656  ;;  %v5097_v33 = vpack.c.bf16 %v18682_v10, %v18681_v42 }
 0x4a2   : > { %7867 = vst.msk [vmem:[#allocation2 + $0xf9] sm:$0xff] %vm269_vm0, %v7835_v27  ;;  %v7734_v0 = vmul.f32 %v16632_v17, %v7657_v15  ;;  %v18686_v15 = vld [vmem:[#allocation117_spill] sm:$0xff] }
 0x4a3   : > { %v7834_v44 = vmax.f32 %v7802_v4, 0.0  ;;  %11992 = vmatmul.mubr.msk.bf16.gmra.mrb[24].mxu0 %vm269_vm0, %v4814_v41  ;;  %v18684_v4 = vld [vmem:[#allocation115_spill] sm:$0xff] }
 0x4a4   : > { %11995 = vmatprep.mubr.msk.bf16.mxu0 %vm269_vm0, %v4815_v37  ;;  %v7652_v46 = vpop.permute.xlu0 %7651  ;;  %v7766_v47 = vadd.f32 %v7734_v0, %v7505_v36  ;;  %v5098_v41 = vpack.c.bf16 %v18684_v4, %v18683_v3  ;;  %v5100_v0 = vpack.c.bf16 %v16882_v59, %v16884_v6  ;;  %v5102_v6 = vpack.c.bf16 %v17101_v51, %v17103_v58  ;;  %v5084_v4 = vld [vmem:[#allocation2 + $0x13a] sm:$0xff] }
 0x4a5   : > { %7866 = vst.msk [vmem:[#allocation2 + $0xf1] sm:$0xff] %vm269_vm0, %v7834_v44  ;;  %v7733_v22 = vmul.f32 %v16632_v17, %v7652_v46  ;;  %v6883_v7 = vpop.permute.xlu1 %6882  ;;  %v18685_v44 = vld [vmem:[#allocation118_spill] sm:$0xff] }
 0x4a6   : > { %v7805_v20 = vadd.f32 %v16653_v34, %v7766_v47  ;;  %v5099_v36 = vpack.c.bf16 %v18686_v15, %v18685_v44  ;;  %v17166_v47 = vld [vmem:[%s17965_s2 + $0x4] ss:$0 sm:$0xff] }
 0x4a7   : > { %v7765_v45 = vadd.f32 %v7733_v22, %v7504_v29  ;;  %v5101_v22 = vpack.c.bf16 %v16911_v26, %v16913_v9  ;;  %v6691_v59 = vmul.f32 %v17166_v47, %v17056_v55  ;;  %v17178_v26 = vld [vmem:[%s17965_s2 + $0x5] ss:$0 sm:$0xff]  ;;  %v6693_v62 = vmul.f32 %v17166_v47, %v17091_v54 }
 0x4a8   : > { %v6878_v57 = vpop.permute.xlu0 %6877  ;;  %v7837_v19 = vmax.f32 %v7805_v20, 0.0  ;;  %v6952_v9 = vmul.f32 %v17178_v26, %v6883_v7  ;;  %v5082_v7 = vld [vmem:[#allocation2 + $0x122] sm:$0xff] }
 0x4a9   : > { %v7804_v24 = vadd.f32 %v16653_v34, %v7765_v45  ;;  %v17118_v8 = vpop.permute.xlu1 %6892  ;;  %v7950_v17 = vld [vmem:[#allocation2 + $0xf9] sm:$0xff]  ;;  %v6690_v45 = vmul.f32 %v17166_v47, %v17065_v25  ;;  %v6951_v55 = vmul.f32 %v17178_v26, %v6878_v57  ;;  %v6723_v51 = vadd.f32 %v6691_v59, %v16983_v43  ;;  %v17187_v25 = vld [vmem:[%s17965_s2 + $0x6] ss:$0 sm:$0xff]  ;;  %v17197_v43 = vld [vmem:[%s17965_s2 + $0x7] ss:$0 sm:$0xff] }
 0x4aa   : > { %7869 = vst.msk [vmem:[#allocation2 + $0x111] sm:$0xff] %vm269_vm0, %v7837_v19 }
 0x4ab   : > { %v7836_v48 = vmax.f32 %v7804_v24, 0.0  ;;  %11996 = vmatmul.mubr.msk.bf16.gmra.mrb[28].mxu0 %vm269_vm0, %v4816_v56  ;;  %v6722_v24 = vadd.f32 %v6690_v45, %v16985_v21  ;;  %v5103_v21 = vpack.c.bf16 %v17113_v40, %v17115_v60  ;;  %v17215_v40 = vld [vmem:[%s17965_s2 + $0x8] ss:$0 sm:$0xff] }
 0x4ac   : > { %12001 = vmatprep.mubr.msk.bf16.mxu0 %vm269_vm0, %v18677_v1  ;;  %v17123_v38 = vpop.permute.xlu0 %6887  ;;  %v7949_v11 = vld [vmem:[#allocation2 + $0xf1] sm:$0xff]  ;;  %v6984_v1 = vadd.f32 %v6952_v9, %v6723_v51 }
 0x4ad   : > { %7868 = vst.msk [vmem:[#allocation2 + $0x109] sm:$0xff] %vm269_vm0, %v7836_v48  ;;  %v7971_v34 = vpack.c.bf16 %v7950_v17, %v7949_v11  ;;  %v17127_v53 = vpop.permute.xlu1 %6118  ;;  %v5083_v17 = vld [vmem:[#allocation2 + $0x12a] sm:$0xff] }
 0x4af   : > { %12055 = vmatprep.mubr.msk.bf16.mxu1 %vm269_vm0, %v7971_v34  ;;  %v6983_v34 = vadd.f32 %v6951_v55, %v6722_v24 }
 0x4b0   : > { %v17129_v16 = vpop.permute.xlu0 %6113 }
 0x4b1   : > { %v7145_v28 = vpop.permute.xlu1 %7144  ;;  %v7952_v23 = vld [vmem:[#allocation2 + $0x111] sm:$0xff] }
 0x4b2   : > { %v7214_v58 = vmul.f32 %v17187_v25, %v7145_v28  ;;  %v6692_v28 = vmul.f32 %v17166_v47, %v17096_v14  ;;  %v6953_v14 = vmul.f32 %v17178_v26, %v17123_v38 }
 0x4b3   : > { %12002 = vmatmul.mubr.msk.bf16.vlgmr.msra.gmra.mrb[0].mxu0 %vm269_vm0, %v18680_v12  ;;  %v5104_v12 = vpack.c.bf16 %v5083_v17, %v5082_v7 }
 0x4b4   : > { %12005 = vmatprep.mubr.msk.bf16.mxu0 %vm269_vm0, %v5096_v49  ;;  %v7140_v61 = vpop.permute.xlu0 %7139  ;;  %v7951_v2 = vld [vmem:[#allocation2 + $0x109] sm:$0xff]  ;;  %v7246_v49 = vadd.f32 %v7214_v58, %v6984_v1  ;;  %v6724_v44 = vadd.f32 %v6692_v28, %v17028_v13 }
 0x4b5   : > { %v7972_v31 = vpack.c.bf16 %v7952_v23, %v7951_v2  ;;  %v17137_v52 = vpop.permute.xlu1 %6128  ;;  %v7213_v19 = vmul.f32 %v17187_v25, %v7140_v61  ;;  %v6954_v2 = vmul.f32 %v17178_v26, %v17118_v8 }
 0x4b6   : > { %v6985_v13 = vadd.f32 %v6953_v14, %v6724_v44 }
 0x4b7   : > { %12056 = vmatmul.mubr.msk.bf16.gmra.mrb[20].mxu1 %vm269_vm0, %v7972_v31  ;;  %v7245_v23 = vadd.f32 %v7213_v19, %v6983_v34  ;;  %v5088_v34 = vld [vmem:[#allocation2 + $0x16a] sm:$0xff] }
 0x4b8   : > { %v17139_v32 = vpop.permute.xlu0 %6123 }
 0x4b9   : > { %v7155_v18 = vpop.permute.xlu1 %7154 }
 0x4ba   : > { %v7216_v8 = vmul.f32 %v17187_v25, %v7155_v18 }
 0x4bb   : > { %12006 = vmatmul.mubr.msk.bf16.gmra.mrb[4].mxu0 %vm269_vm0, %v5097_v33  ;;  %v6725_v33 = vadd.f32 %v6693_v62, %v17021_v50  ;;  %v17232_v50 = vld [vmem:[%s17966_s3] ss:$0 sm:$0xff] }
 0x4bc   : > { %12009 = vmatprep.mubr.msk.bf16.mxu0 %vm269_vm0, %v5098_v41  ;;  %v7150_v27 = vpop.permute.xlu0 %7149  ;;  %v5085_v41 = vld [vmem:[#allocation2 + $0x142] sm:$0xff] }
 0x4bd   : > { %v17147_v37 = vpop.permute.xlu1 %6380  ;;  %v7215_v15 = vmul.f32 %v17187_v25, %v7150_v27  ;;  %v6986_v38 = vadd.f32 %v6954_v2, %v6725_v33  ;;  %v5105_v45 = vpack.c.bf16 %v5085_v41, %v5084_v4 }
 0x4bf   : > { %v7248_v9 = vadd.f32 %v7216_v8, %v6986_v38  ;;  %v7247_v58 = vadd.f32 %v7215_v15, %v6985_v13  ;;  %v5092_v8 = vld [vmem:[#allocation2 + $0x19a] sm:$0xff]  ;;  %v18688_v38 = vld [vmem:[#allocation51_spill] sm:$0xff]  ;;  %v18689_v13 = vld [vmem:[#allocation6_spill] sm:$0xff] }
 0x4c0   : > { %v17149_v39 = vpop.permute.xlu0 %6375  ;;  %v17262_v15 = vld [vmem:[%s17965_s2 + $0x1] ss:$0 sm:$0xff] }
 0x4c1   : > { %v7406_v46 = vpop.permute.xlu1 %7405 }
 0x4c2   : > { %v7475_v57 = vmul.f32 %v17197_v43, %v7406_v46  ;;  %v5086_v46 = vld [vmem:[#allocation2 + $0x152] sm:$0xff] }
 0x4c3   : > { %12010 = vmatmul.mubr.msk.bf16.gmra.mrb[8].mxu0 %vm269_vm0, %v5099_v36 }
 0x4c4   : > { %12013 = vmatprep.mubr.msk.bf16.mxu0 %vm269_vm0, %v5100_v0  ;;  %v7401_v35 = vpop.permute.xlu0 %7400  ;;  %v7507_v31 = vadd.f32 %v7475_v57, %v7246_v49  ;;  %v5090_v49 = vld [vmem:[#allocation2 + $0x182] sm:$0xff] }
 0x4c5   : > { %v17157_v63 = vpop.permute.xlu1 %6390  ;;  %v7474_v30 = vmul.f32 %v17197_v43, %v7401_v35  ;;  %v5087_v35 = vld [vmem:[#allocation2 + $0x15a] sm:$0xff] }
 0x4c6   : > { %v5106_v51 = vpack.c.bf16 %v5087_v35, %v5086_v46 }
 0x4c7   : > { %v7506_v42 = vadd.f32 %v7474_v30, %v7245_v23  ;;  %v5089_v30 = vld [vmem:[#allocation2 + $0x172] sm:$0xff] }
 0x4c8   : > { %v17159_v29 = vpop.permute.xlu0 %6385  ;;  %v5107_v2 = vpack.c.bf16 %v5089_v30, %v5088_v34 }
 0x4c9   : > { %v7416_v56 = vpop.permute.xlu1 %7415 }
 0x4cb   : > { %12014 = vmatmul.mubr.msk.bf16.gmra.mrb[12].mxu0 %vm269_vm0, %v5101_v22  ;;  %v7477_v22 = vmul.f32 %v17197_v43, %v7416_v56 }
 0x4cc   : > { %12017 = vmatprep.mubr.msk.bf16.mxu0 %vm269_vm0, %v5102_v6  ;;  %v7411_v20 = vpop.permute.xlu0 %7410 }
 0x4cd   : > { %v17192_v48 = vpop.permute.xlu1 %6641  ;;  %v7476_v27 = vmul.f32 %v17197_v43, %v7411_v20  ;;  %v7509_v19 = vadd.f32 %v7477_v22, %v7248_v9  ;;  %v5910_v22 = vmul.f32 %v17262_v15, %v18688_v38  ;;  %v18690_v9 = vld [vmem:[#allocation7_spill] sm:$0xff] }
 0x4cf   : > { %v7508_v20 = vadd.f32 %v7476_v27, %v7247_v58 }
 0x4d0   : > { %v17200_v11 = vpop.permute.xlu0 %6636 }
 0x4d1   : > { %v7667_v61 = vpop.permute.xlu1 %7666 }
 0x4d2   : > { %v7736_v54 = vmul.f32 %v17215_v40, %v7667_v61 }
 0x4d3   : > { %12018 = vmatmul.mubr.msk.bf16.gmra.mrb[16].mxu0 %vm269_vm0, %v5103_v21 }
 0x4d4   : > { %12021 = vmatprep.mubr.msk.bf16.mxu0 %vm269_vm0, %v5104_v12  ;;  %v7662_v60 = vpop.permute.xlu0 %7661  ;;  %v7768_v3 = vadd.f32 %v7736_v54, %v7507_v31  ;;  %v5091_v12 = vld [vmem:[#allocation2 + $0x18a] sm:$0xff] }
 0x4d5   : > { %v7735_v10 = vmul.f32 %v17215_v40, %v7662_v60  ;;  %v17226_v0 = vpop.permute.xlu1 %6651  ;;  %v5108_v54 = vpack.c.bf16 %v5091_v12, %v5090_v49  ;;  %v18693_v49 = vld [vmem:[#allocation100_spill] sm:$0xff] }
 0x4d6   : > { %v7807_v18 = vadd.f32 %v17232_v50, %v7768_v3  ;;  %v5093_v3 = vld [vmem:[#allocation2 + $0x1a2] sm:$0xff] }
 0x4d7   : > { %v7767_v36 = vadd.f32 %v7735_v10, %v7506_v42  ;;  %v5109_v44 = vpack.c.bf16 %v5093_v3, %v5092_v8 }
 0x4d8   : > { %v17235_v59 = vpop.permute.xlu0 %6646  ;;  %v7839_v55 = vmax.f32 %v7807_v18, 0.0  ;;  %v17271_v18 = vld [vmem:[%s17965_s2] ss:$0 sm:$0xff] }
 0x4d9   : > { %v7806_v6 = vadd.f32 %v17232_v50, %v7767_v36  ;;  %v7677_v24 = vpop.permute.xlu1 %7676  ;;  %v18687_v36 = vld [vmem:[#allocation50_spill] sm:$0xff]  ;;  %v5650_v27 = vmul.f32 %v17271_v18, %v18689_v13  ;;  %v5652_v12 = vmul.f32 %v17271_v18, %v18693_v49 }
 0x4da   : > { %7871 = vst.msk [vmem:[#allocation2 + $0x129] sm:$0xff] %vm269_vm0, %v7839_v55  ;;  %v7738_v7 = vmul.f32 %v17215_v40, %v7677_v24  ;;  %v5911_v46 = vmul.f32 %v17262_v15, %v18687_v36  ;;  %v5649_v55 = vmul.f32 %v17271_v18, %v18690_v9 }
 0x4db   : > { %v7838_v56 = vmax.f32 %v7806_v6, 0.0  ;;  %12022 = vmatmul.mubr.msk.bf16.gmra.mrb[20].mxu0 %vm269_vm0, %v5105_v45  ;;  %v17278_v6 = vld [vmem:[%s17965_s2 + $0x2] ss:$0 sm:$0xff] }
 0x4dc   : > { %12025 = vmatprep.mubr.msk.bf16.mxu0 %vm269_vm0, %v5106_v51  ;;  %v7672_v17 = vpop.permute.xlu0 %7671  ;;  %v7770_v57 = vadd.f32 %v7738_v7, %v7509_v19  ;;  %v6172_v45 = vmul.f32 %v17278_v6, %v17127_v53  ;;  %v6171_v51 = vmul.f32 %v17278_v6, %v17129_v16  ;;  %v5943_v24 = vadd.f32 %v5911_v46, %v5650_v27  ;;  %v18691_v19 = vld [vmem:[#allocation54_spill] sm:$0xff]  ;;  %v18692_v16 = vld [vmem:[#allocation55_spill] sm:$0xff] }
 0x4dd   : > { %7870 = vst.msk [vmem:[#allocation2 + $0x121] sm:$0xff] %vm269_vm0, %v7838_v56  ;;  %v7737_v1 = vmul.f32 %v17215_v40, %v7672_v17  ;;  %v6903_v62 = vpop.permute.xlu1 %6902  ;;  %v5913_v7 = vmul.f32 %v17262_v15, %v18691_v19  ;;  %v17292_v17 = vld [vmem:[%s17965_s2 + $0x3] ss:$0 sm:$0xff]  ;;  %v5912_v34 = vmul.f32 %v17262_v15, %v18692_v16 }
 0x4de   : > { %v7809_v28 = vadd.f32 %v17232_v50, %v7770_v57  ;;  %v6434_v53 = vmul.f32 %v17292_v17, %v17147_v37  ;;  %v5942_v57 = vadd.f32 %v5910_v22, %v5649_v55  ;;  %v6433_v30 = vmul.f32 %v17292_v17, %v17149_v39 }
 0x4df   : > { %v7769_v21 = vadd.f32 %v7737_v1, %v7508_v20  ;;  %v6695_v37 = vmul.f32 %v17166_v47, %v17192_v48  ;;  %v6694_v39 = vmul.f32 %v17166_v47, %v17200_v11  ;;  %v6956_v48 = vmul.f32 %v17178_v26, %v6903_v62 }
 0x4e0   : > { %v6898_v23 = vpop.permute.xlu0 %6897  ;;  %v7841_v31 = vmax.f32 %v7809_v28, 0.0  ;;  %v6204_v28 = vadd.f32 %v6172_v45, %v5943_v24  ;;  %v6697_v22 = vmul.f32 %v17166_v47, %v17226_v0 }
 0x4e1   : > { %v7808_v61 = vadd.f32 %v17232_v50, %v7769_v21  ;;  %v17248_v14 = vpop.permute.xlu1 %6912  ;;  %v7954_v42 = vld [vmem:[#allocation2 + $0x129] sm:$0xff]  ;;  %v6955_v46 = vmul.f32 %v17178_v26, %v6898_v23 }
 0x4e2   : > { %7873 = vst.msk [vmem:[#allocation2 + $0x141] sm:$0xff] %vm269_vm0, %v7841_v31  ;;  %v6466_v8 = vadd.f32 %v6434_v53, %v6204_v28 }
 0x4e3   : > { %v7840_v60 = vmax.f32 %v7808_v61, 0.0  ;;  %12026 = vmatmul.mubr.msk.bf16.gmra.mrb[24].mxu0 %vm269_vm0, %v5107_v2  ;;  %v6174_v61 = vmul.f32 %v17278_v6, %v17137_v52  ;;  %v18694_v2 = vld [vmem:[#allocation101_spill] sm:$0xff]  ;;  %v6436_v52 = vmul.f32 %v17292_v17, %v17157_v63  ;;  %v6696_v63 = vmul.f32 %v17166_v47, %v17235_v59 }
 0x4e4   : > { %12029 = vmatprep.mubr.msk.bf16.mxu0 %vm269_vm0, %v5108_v54  ;;  %v17252_v10 = vpop.permute.xlu0 %6907  ;;  %v7953_v33 = vld [vmem:[#allocation2 + $0x121] sm:$0xff]  ;;  %v5651_v31 = vmul.f32 %v17271_v18, %v18694_v2  ;;  %v6203_v54 = vadd.f32 %v6171_v51, %v5942_v57  ;;  %v6727_v38 = vadd.f32 %v6695_v37, %v6466_v8 }
 0x4e5   : > { %7872 = vst.msk [vmem:[#allocation2 + $0x139] sm:$0xff] %vm269_vm0, %v7840_v60  ;;  %v17255_v4 = vpack.c.bf16 %v7954_v42, %v7953_v33  ;;  %v7165_v41 = vpop.permute.xlu1 %7164  ;;  %v6173_v60 = vmul.f32 %v17278_v6, %v17139_v32  ;;  %v5945_v33 = vadd.f32 %v5913_v7, %v5652_v12  ;;  %v6435_v32 = vmul.f32 %v17292_v17, %v17159_v29 }
 0x4e6   : > { %v6465_v36 = vadd.f32 %v6433_v30, %v6203_v54  ;;  %v7218_v13 = vmul.f32 %v17187_v25, %v7165_v41  ;;  %v6988_v51 = vadd.f32 %v6956_v48, %v6727_v38  ;;  %v6958_v29 = vmul.f32 %v17178_v26, %v17248_v14 }
 0x4e7   : > { %12059 = vmatprep.mubr.msk.bf16.mxu1 %vm269_vm0, %v17255_v4  ;;  %v6206_v11 = vadd.f32 %v6174_v61, %v5945_v33  ;;  %v6957_v41 = vmul.f32 %v17178_v26, %v17252_v10 }
 0x4e8   : > { %v7160_v35 = vpop.permute.xlu0 %7159  ;;  %v6726_v45 = vadd.f32 %v6694_v39, %v6465_v36  ;;  %v7250_v59 = vadd.f32 %v7218_v13, %v6988_v51 }
 0x4e9   : > { %v7175_v58 = vpop.permute.xlu1 %7174  ;;  %v7956_v56 = vld [vmem:[#allocation2 + $0x141] sm:$0xff]  ;;  %v7217_v62 = vmul.f32 %v17187_v25, %v7160_v35  ;;  %v6468_v55 = vadd.f32 %v6436_v52, %v6206_v11 }
 0x4ea   : > { %v6987_v0 = vadd.f32 %v6955_v46, %v6726_v45  ;;  %v7220_v35 = vmul.f32 %v17187_v25, %v7175_v58 }
 0x4eb   : > { %12030 = vmatmul.mubr.msk.bf16.gmra.mrb[28].mxu0 %vm269_vm0, %v5109_v44  ;;  %v5944_v44 = vadd.f32 %v5912_v34, %v5651_v31  ;;  %v6729_v7 = vadd.f32 %v6697_v22, %v6468_v55 }
 0x4ec   : > { %v7170_v20 = vpop.permute.xlu0 %7169  ;;  %v7955_v1 = vld [vmem:[#allocation2 + $0x139] sm:$0xff] }
 0x4ed   : > { %v17300_v21 = vpack.c.bf16 %v7956_v56, %v7955_v1  ;;  %v7426_v42 = vpop.permute.xlu1 %7425  ;;  %v6205_v27 = vadd.f32 %v6173_v60, %v5944_v44  ;;  %v7249_v1 = vadd.f32 %v7217_v62, %v6987_v0  ;;  %v7219_v57 = vmul.f32 %v17187_v25, %v7170_v20 }
 0x4ee   : > { %v7479_v23 = vmul.f32 %v17197_v43, %v7426_v42  ;;  %v6990_v14 = vadd.f32 %v6958_v29, %v6729_v7 }
 0x4ef   : > { %12060 = vmatmul.mubr.msk.bf16.gmra.mrb[24].mxu1 %vm269_vm0, %v17300_v21  ;;  %v6467_v24 = vadd.f32 %v6435_v32, %v6205_v27 }
 0x4f0   : > { %v7421_v3 = vpop.permute.xlu0 %7420  ;;  %v7511_v34 = vadd.f32 %v7479_v23, %v7250_v59  ;;  %v7252_v2 = vadd.f32 %v7220_v35, %v6990_v14  ;;  %v7880_v23 = vld [vmem:[#allocation2] sm:$0xff]  ;;  %v18696_v14 = vld [vmem:[#allocation11_spill] sm:$0xff] }
 0x4f1   : > { %v7436_v9 = vpop.permute.xlu1 %7435  ;;  %v7478_v19 = vmul.f32 %v17197_v43, %v7421_v3  ;;  %v6728_v53 = vadd.f32 %v6696_v63, %v6467_v24 }
 0x4f2   : > { %v7481_v30 = vmul.f32 %v17197_v43, %v7436_v9 }
 0x4f3   : > { %v6989_v28 = vadd.f32 %v6957_v41, %v6728_v53  ;;  %v7510_v10 = vadd.f32 %v7478_v19, %v7249_v1  ;;  %v18695_v1 = vld [vmem:[#allocation10_spill] sm:$0xff] }
 0x4f4   : > { %v7431_v56 = vpop.permute.xlu0 %7430  ;;  %v7513_v20 = vadd.f32 %v7481_v30, %v7252_v2 }
 0x4f5   : > { %v7687_v16 = vpop.permute.xlu1 %7686  ;;  %v7480_v61 = vmul.f32 %v17197_v43, %v7431_v56  ;;  %v7251_v31 = vadd.f32 %v7219_v57, %v6989_v28  ;;  %v7881_v56 = vld [vmem:[#allocation2 + $0x8] sm:$0xff]  ;;  %v5654_v57 = vmul.f32 %v17271_v18, %v18695_v1 }
 0x4f6   : > { %v7740_v49 = vmul.f32 %v17215_v40, %v7687_v16  ;;  %v7912_v59 = vpack.c.bf16 %v7881_v56, %v7880_v23 }
 0x4f7   : > { %v7512_v8 = vadd.f32 %v7480_v61, %v7251_v31 }
 0x4f8   : > { %v7682_v12 = vpop.permute.xlu0 %7681  ;;  %v7772_v58 = vadd.f32 %v7740_v49, %v7511_v34  ;;  %v5653_v34 = vmul.f32 %v17271_v18, %v18696_v14  ;;  %v7883_v18 = vld [vmem:[#allocation2 + $0x20] sm:$0xff]  ;;  %v7892_v14 = vld [vmem:[#allocation2 + $0x90] sm:$0xff] }
 0x4f9   : > { %v7739_v37 = vmul.f32 %v17215_v40, %v7682_v12  ;;  %v7697_v60 = vpop.permute.xlu1 %7696 }
 0x4fa   : > { %v7811_v39 = vadd.f32 %v17232_v50, %v7772_v58  ;;  %v7742_v42 = vmul.f32 %v17215_v40, %v7697_v60  ;;  %v7882_v58 = vld [vmem:[#allocation2 + $0x18] sm:$0xff]  ;;  %v7884_v60 = vld [vmem:[#allocation2 + $0x30] sm:$0xff] }
 0x4fb   : > { %v7771_v54 = vadd.f32 %v7739_v37, %v7510_v10 }
 0x4fc   : > { %v7692_v33 = vpop.permute.xlu0 %7691  ;;  %v7843_v3 = vmax.f32 %v7811_v39, 0.0  ;;  %v7774_v44 = vadd.f32 %v7742_v42, %v7513_v20  ;;  %v7885_v20 = vld [vmem:[#allocation2 + $0x38] sm:$0xff] }
 0x4fd   : > { %v7810_v52 = vadd.f32 %v17232_v50, %v7771_v54  ;;  %v7741_v48 = vmul.f32 %v17215_v40, %v7692_v33  ;;  %v5878_v46 = vpop.permute.xlu1 %5877 }
 0x4fe   : > { %7875 = vst.msk [vmem:[#allocation2 + $0x159] sm:$0xff] %vm269_vm0, %v7843_v3  ;;  %v7813_v11 = vadd.f32 %v17232_v50, %v7774_v44  ;;  %v5915_v41 = vmul.f32 %v17262_v15, %v5878_v46 }
 0x4ff   : > { %v7842_v36 = vmax.f32 %v7810_v52, 0.0  ;;  %v7773_v32 = vadd.f32 %v7741_v48, %v7512_v8  ;;  %v17373_v48 = vpack.c.bf16 %v7883_v18, %v7882_v58  ;;  %v7900_v58 = vld [vmem:[#allocation2 + $0xf0] sm:$0xff]  ;;  %v7901_v18 = vld [vmem:[#allocation2 + $0xf8] sm:$0xff] }
 0x500   : > { %v5873_v38 = vpop.permute.xlu0 %5872  ;;  %v7845_v13 = vmax.f32 %v7813_v11, 0.0  ;;  %v5947_v12 = vadd.f32 %v5915_v41, %v5654_v57  ;;  %v7890_v57 = vld [vmem:[#allocation2 + $0x78] sm:$0xff] }
 0x501   : > { %7874 = vst.msk [vmem:[#allocation2 + $0x151] sm:$0xff] %vm269_vm0, %v7842_v36  ;;  %v7812_v22 = vadd.f32 %v17232_v50, %v7773_v32  ;;  %v6139_v45 = vpop.permute.xlu1 %6138  ;;  %v5914_v35 = vmul.f32 %v17262_v15, %v5873_v38  ;;  %v17378_v36 = vpack.c.bf16 %v7885_v20, %v7884_v60  ;;  %v7903_v60 = vld [vmem:[#allocation2 + $0x110] sm:$0xff]  ;;  %v7904_v20 = vld [vmem:[#allocation2 + $0x120] sm:$0xff] }
 0x502   : > { %7877 = vst.msk [vmem:[#allocation2 + $0x171] sm:$0xff] %vm269_vm0, %v7845_v13  ;;  %v6176_v16 = vmul.f32 %v17278_v6, %v6139_v45  ;;  %v7887_v45 = vld [vmem:[#allocation2 + $0x50] sm:$0xff] }
 0x503   : > { %v7844_v27 = vmax.f32 %v7812_v22, 0.0  ;;  %v5946_v10 = vadd.f32 %v5914_v35, %v5653_v34  ;;  %v7893_v34 = vld [vmem:[#allocation2 + $0x98] sm:$0xff] }
 0x504   : > { %v6134_v63 = vpop.permute.xlu0 %6133  ;;  %v6208_v37 = vadd.f32 %v6176_v16, %v5947_v12  ;;  %v7891_v16 = vld [vmem:[#allocation2 + $0x80] sm:$0xff]  ;;  %v7895_v12 = vld [vmem:[#allocation2 + $0xb0] sm:$0xff] }
 0x505   : > { %7876 = vst.msk [vmem:[#allocation2 + $0x169] sm:$0xff] %vm269_vm0, %v7844_v27  ;;  %v6401_v62 = vpop.permute.xlu1 %6400  ;;  %v7958_v9 = vld [vmem:[#allocation2 + $0x159] sm:$0xff]  ;;  %v6175_v30 = vmul.f32 %v17278_v6, %v6134_v63 }
 0x506   : > { %v6438_v28 = vmul.f32 %v17292_v17, %v6401_v62 }
 0x507   : > { %v6207_v31 = vadd.f32 %v6175_v30, %v5946_v10  ;;  %v17408_v30 = vpack.c.bf16 %v7891_v16, %v7890_v57  ;;  %v8416_v16 = vld [vmem:[#allocation2 + $0xaa] sm:$0xff] }
 0x508   : > { %v6396_v55 = vpop.permute.xlu0 %6395  ;;  %v7957_v51 = vld [vmem:[#allocation2 + $0x151] sm:$0xff]  ;;  %v6470_v39 = vadd.f32 %v6438_v28, %v6208_v37  ;;  %v7896_v28 = vld [vmem:[#allocation2 + $0xc0] sm:$0xff] }
 0x509   : > { %v17350_v29 = vpack.c.bf16 %v7958_v9, %v7957_v51  ;;  %v6662_v24 = vpop.permute.xlu1 %6661  ;;  %v7960_v0 = vld [vmem:[#allocation2 + $0x171] sm:$0xff]  ;;  %v6437_v61 = vmul.f32 %v17292_v17, %v6396_v55  ;;  %v8500_v17 = vsel %vm2926_vm2, %v17061_v5, 0  ;;  %v7888_v9 = vld [vmem:[#allocation2 + $0x60] sm:$0xff]  ;;  %v7889_v55 = vld [vmem:[#allocation2 + $0x68] sm:$0xff] }
 0x50a   : > { %v6699_v2 = vmul.f32 %v17166_v47, %v6662_v24  ;;  %v7898_v37 = vld [vmem:[#allocation2 + $0xd8] sm:$0xff] }
 0x50b   : > { %12063 = vmatprep.mubr.msk.bf16.mxu1 %vm269_vm0, %v17350_v29  ;;  %v6469_v8 = vadd.f32 %v6437_v61, %v6207_v31 }
 0x50c   : > { %v6657_v19 = vpop.permute.xlu0 %6656  ;;  %v7959_v7 = vld [vmem:[#allocation2 + $0x169] sm:$0xff]  ;;  %v6731_v3 = vadd.f32 %v6699_v2, %v6470_v39  ;;  %v7899_v2 = vld [vmem:[#allocation2 + $0xe0] sm:$0xff] }
 0x50d   : > { %v17356_v53 = vpack.c.bf16 %v7960_v0, %v7959_v7  ;;  %v6923_v49 = vpop.permute.xlu1 %6922  ;;  %v6698_v6 = vmul.f32 %v17166_v47, %v6657_v19  ;;  %v17383_v47 = vld [vmem:[%s17967_s4 + $0xc] sm:$0xf]  ;;  %v17398_v19 = vpack.c.bf16 %v7889_v55, %v7888_v9  ;;  %v17424_v31 = vpack.c.bf16 %v7899_v2, %v7898_v37  ;;  %v17462_v55 = vld [vmem:[%s17967_s4 + $0x10] sm:$0xf]  ;;  %v8423_v2 = vld [vmem:[#allocation2 + $0xfa] sm:$0xff] }
 0x50e   : > { %v6960_v42 = vmul.f32 %v17178_v26, %v6923_v49  ;;  %v17410_v49 = vpack.c.bf16 %v7893_v34, %v7892_v14  ;;  %v7905_v39 = vld [vmem:[#allocation2 + $0x128] sm:$0xff]  ;;  %v8422_v37 = vld [vmem:[#allocation2 + $0xf2] sm:$0xff] }
 0x50f   : > { %12064 = vmatmul.mubr.msk.bf16.gmra.mrb[28].mxu1 %vm269_vm0, %v17356_v53  ;;  %v6730_v32 = vadd.f32 %v6698_v6, %v6469_v8  ;;  %v17426_v6 = vpack.c.bf16 %v7901_v18, %v7900_v58  ;;  %v7906_v8 = vld [vmem:[#allocation2 + $0x138] sm:$0xff]  ;;  %v8418_v14 = vld [vmem:[#allocation2 + $0xc2] sm:$0xff]  ;;  %v8419_v34 = vld [vmem:[#allocation2 + $0xca] sm:$0xff]  ;;  %v17496_v18 = vpack.c.bf16 %v8423_v2, %v8422_v37 }
 0x510   : > { %v6918_v15 = vpop.permute.xlu0 %6917  ;;  %12069 = vmatprep.mubr.msk.bf16.mxu1 %vm269_vm0, %v7912_v59  ;;  %v6992_v11 = vadd.f32 %v6960_v42, %v6731_v3  ;;  %v7909_v3 = vld [vmem:[#allocation2 + $0x158] sm:$0xff] }
 0x511   : > { %v7185_v54 = vpop.permute.xlu1 %7184  ;;  %v6959_v52 = vmul.f32 %v17178_v26, %v6918_v15  ;;  %v7897_v15 = vld [vmem:[#allocation2 + $0xc8] sm:$0xff] }
 0x512   : > { %v7222_v44 = vmul.f32 %v17187_v25, %v7185_v54  ;;  %v17418_v61 = vpack.c.bf16 %v7897_v15, %v7896_v28  ;;  %v7902_v54 = vld [vmem:[#allocation2 + $0x108] sm:$0xff]  ;;  %v8420_v28 = vld [vmem:[#allocation2 + $0xda] sm:$0xff] }
 0x513   : > { %v6991_v22 = vadd.f32 %v6959_v52, %v6730_v32  ;;  %v17432_v42 = vpack.c.bf16 %v7903_v60, %v7902_v54  ;;  %v7907_v52 = vld [vmem:[#allocation2 + $0x140] sm:$0xff]  ;;  %v8424_v54 = vld [vmem:[#allocation2 + $0x10a] sm:$0xff]  ;;  %v8425_v60 = vld [vmem:[#allocation2 + $0x112] sm:$0xff] }
 0x514   : > { %v7180_v33 = vpop.permute.xlu0 %7179  ;;  %v7254_v27 = vadd.f32 %v7222_v44, %v6992_v11  ;;  %v17440_v44 = vpack.c.bf16 %v7907_v52, %v7906_v8  ;;  %v7910_v11 = vld [vmem:[#allocation2 + $0x168] sm:$0xff]  ;;  %v17502_v8 = vpack.c.bf16 %v8425_v60, %v8424_v54 }
 0x515   : > { %v7221_v46 = vmul.f32 %v17187_v25, %v7180_v33  ;;  %v7446_v26 = vpop.permute.xlu1 %7445  ;;  %v7886_v25 = vld [vmem:[#allocation2 + $0x48] sm:$0xff]  ;;  %v17434_v33 = vpack.c.bf16 %v7905_v39, %v7904_v20 }
 0x516   : > { %v7483_v5 = vmul.f32 %v17197_v43, %v7446_v26  ;;  %v17396_v41 = vpack.c.bf16 %v7887_v45, %v7886_v25  ;;  %v8403_v26 = vld [vmem:[#allocation2 + $0xa] sm:$0xff]  ;;  %v8406_v25 = vld [vmem:[#allocation2 + $0x32] sm:$0xff]  ;;  %v8407_v45 = vld [vmem:[#allocation2 + $0x3a] sm:$0xff] }
 0x517   : > { %12070 = vmatmul.mubr.msk.bf16.vlgmr.msra.gmra.mrb[0].mxu1 %vm269_vm0, %v17373_v48  ;;  %v7253_v63 = vadd.f32 %v7221_v46, %v6991_v22  ;;  %v8402_v46 = vld [vmem:[#allocation2 + $0x2] sm:$0xff]  ;;  %v17457_v9 = vpack.c.bf16 %v8407_v45, %v8406_v25  ;;  %v8427_v39 = vld [vmem:[#allocation2 + $0x12a] sm:$0xff] }
 0x518   : > { %12102 = vmatpush3.bf16.msra.mxu1 %v8500_v17  ;;  %12073 = vmatprep.mubr.msk.bf16.mxu1 %vm269_vm0, %v17378_v36  ;;  %v7441_v38 = vpop.permute.xlu0 %7440  ;;  %v7515_v51 = vadd.f32 %v7483_v5, %v7254_v27  ;;  %v7908_v17 = vld [vmem:[#allocation2 + $0x150] sm:$0xff]  ;;  %v8405_v27 = vld [vmem:[#allocation2 + $0x22] sm:$0xff] }
 0x519   : > { %v7482_v13 = vmul.f32 %v17197_v43, %v7441_v38  ;;  %12863 = vmatprep.subr.msk.bf16.mxu1 %vm2926_vm2, %v17383_v47  ;;  %v7707_v62 = vpop.permute.xlu1 %7706  ;;  %v17442_v32 = vpack.c.bf16 %v7909_v3, %v7908_v17  ;;  %v7911_v5 = vld [vmem:[#allocation2 + $0x170] sm:$0xff]  ;;  %v8434_v38 = vpack.c.bf16 %v8403_v26, %v8402_v46  ;;  %v8421_v15 = vld [vmem:[#allocation2 + $0xe2] sm:$0xff]  ;;  %v8428_v17 = vld [vmem:[#allocation2 + $0x13a] sm:$0xff] }
 0x51a   : > { %v7744_v23 = vmul.f32 %v17215_v40, %v7707_v62  ;;  %v17448_v22 = vpack.c.bf16 %v7911_v5, %v7910_v11  ;;  %v8793_v62 = vsel %vm2926_vm2, %v17383_v47, 0  ;;  %v8410_v47 = vld [vmem:[#allocation2 + $0x62] sm:$0xff]  ;;  %v17494_v58 = vpack.c.bf16 %v8421_v15, %v8420_v28  ;;  %v8430_v46 = vld [vmem:[#allocation2 + $0x152] sm:$0xff]  ;;  %v8431_v26 = vld [vmem:[#allocation2 + $0x15a] sm:$0xff] }
 0x51b   : > { %v7514_v24 = vadd.f32 %v7482_v13, %v7253_v63  ;;  %v8404_v13 = vld [vmem:[#allocation2 + $0x1a] sm:$0xff]  ;;  %v8426_v20 = vld [vmem:[#allocation2 + $0x122] sm:$0xff]  ;;  %v8432_v45 = vld [vmem:[#allocation2 + $0x16a] sm:$0xff] }
 0x51c   : > { %v7702_v56 = vpop.permute.xlu0 %7701  ;;  %v7776_v43 = vadd.f32 %v7744_v23, %v7515_v51  ;;  %v17453_v63 = vpack.c.bf16 %v8405_v27, %v8404_v13  ;;  %v8408_v51 = vld [vmem:[#allocation2 + $0x4a] sm:$0xff]  ;;  %v8409_v23 = vld [vmem:[#allocation2 + $0x52] sm:$0xff]  ;;  %v17504_v52 = vpack.c.bf16 %v8427_v39, %v8426_v20  ;;  %v8429_v3 = vld [vmem:[#allocation2 + $0x142] sm:$0xff] }
 0x51d   : > { %v7743_v0 = vmul.f32 %v17215_v40, %v7702_v56  ;;  %v8411_v56 = vld [vmem:[#allocation2 + $0x6a] sm:$0xff]  ;;  %v17510_v11 = vpack.c.bf16 %v8429_v3, %v8428_v17 }
 0x51e   : > { %v7815_v59 = vadd.f32 %v17232_v50, %v7776_v43  ;;  %v8412_v43 = vld [vmem:[#allocation2 + $0x7a] sm:$0xff] }
 0x51f   : > { %v7775_v7 = vadd.f32 %v7743_v0, %v7514_v24  ;;  %12074 = vmatmul.mubr.msk.bf16.gmra.mrb[4].mxu1 %vm269_vm0, %v17396_v41  ;;  %v17470_v24 = vpack.c.bf16 %v8409_v23, %v8408_v51  ;;  %v17472_v0 = vpack.c.bf16 %v8411_v56, %v8410_v47 }
 0x520   : > { %12077 = vmatprep.mubr.msk.bf16.mxu1 %vm269_vm0, %v17398_v19  ;;  %v7847_v1 = vmax.f32 %v7815_v59, 0.0  ;;  %v8414_v59 = vld [vmem:[#allocation2 + $0x92] sm:$0xff] }
 0x521   : > { %v7814_v35 = vadd.f32 %v17232_v50, %v7775_v7  ;;  %v7894_v50 = vld [vmem:[#allocation2 + $0xa8] sm:$0xff] }
 0x522   : > { %7879 = vst.msk [vmem:[#allocation2 + $0x189] sm:$0xff] %vm269_vm0, %v7847_v1  ;;  %v17416_v10 = vpack.c.bf16 %v7895_v12, %v7894_v50  ;;  %v8413_v7 = vld [vmem:[#allocation2 + $0x82] sm:$0xff]  ;;  %v17488_v12 = vpack.c.bf16 %v8419_v34, %v8418_v14 }
 0x523   : > { %v7846_v40 = vmax.f32 %v7814_v35, 0.0  ;;  %v8415_v35 = vld [vmem:[#allocation2 + $0x9a] sm:$0xff]  ;;  %v17478_v1 = vpack.c.bf16 %v8413_v7, %v8412_v43  ;;  %v9086_v7 = vsel %vm2926_vm2, %v17462_v55, 0 }
 0x524   : > { %v17480_v57 = vpack.c.bf16 %v8415_v35, %v8414_v59  ;;  %v9329_v35 = vld [vmem:[%s17967_s4 + $0x14] sm:$0xf] }
 0x525   : > { %7878 = vst.msk [vmem:[#allocation2 + $0x181] sm:$0xff] %vm269_vm0, %v7846_v40  ;;  %v8417_v40 = vld [vmem:[#allocation2 + $0xb2] sm:$0xff] }
 0x526   : > { %v17486_v50 = vpack.c.bf16 %v8417_v40, %v8416_v16 }
 0x527   : > { %12078 = vmatmul.mubr.msk.bf16.gmra.mrb[8].mxu1 %vm269_vm0, %v17408_v30 }
 0x528   : > { %12081 = vmatprep.mubr.msk.bf16.mxu1 %vm269_vm0, %v17410_v49 }
 0x52f   : > { %12082 = vmatmul.mubr.msk.bf16.gmra.mrb[12].mxu1 %vm269_vm0, %v17416_v10 }
 0x530   : > { %12085 = vmatprep.mubr.msk.bf16.mxu1 %vm269_vm0, %v17418_v61 }
 0x537   : > { %12086 = vmatmul.mubr.msk.bf16.gmra.mrb[16].mxu1 %vm269_vm0, %v17424_v31 }
 0x538   : > { %12089 = vmatprep.mubr.msk.bf16.mxu1 %vm269_vm0, %v17426_v6 }
 0x53f   : > { %12090 = vmatmul.mubr.msk.bf16.gmra.mrb[20].mxu1 %vm269_vm0, %v17432_v42 }
 0x540   : > { %12093 = vmatprep.mubr.msk.bf16.mxu1 %vm269_vm0, %v17434_v33 }
 0x547   : > { %12094 = vmatmul.mubr.msk.bf16.gmra.mrb[24].mxu1 %vm269_vm0, %v17440_v44 }
 0x548   : > { %12097 = vmatprep.mubr.msk.bf16.mxu1 %vm269_vm0, %v17442_v32 }
 0x54f   : > { %12098 = vmatmul.mubr.msk.bf16.gmra.mrb[28].mxu1 %vm269_vm0, %v17448_v22 }
 0x550   : > { %12103 = vmatprep.mubr.msk.bf16.mxu1 %vm269_vm0, %v8434_v38  ;;  %v17514_v38 = vpack.c.bf16 %v8431_v26, %v8430_v46 }
 0x557   : > { %12104 = vmatmul.mubr.msk.bf16.vlgmr.msra.gmra.mrb[0].mxu1 %vm269_vm0, %v17453_v63 }
 0x558   : > { %12136 = vmatpush3.bf16.msra.mxu1 %v8793_v62  ;;  %12107 = vmatprep.mubr.msk.bf16.mxu1 %vm269_vm0, %v17457_v9  ;;  %v8433_v62 = vld [vmem:[#allocation2 + $0x172] sm:$0xff] }
 0x559   : > { %12864 = vmatprep.subr.msk.bf16.mxu1 %vm2926_vm2, %v17462_v55  ;;  %v17526_v51 = vpack.c.bf16 %v8433_v62, %v8432_v45 }
 0x55f   : > { %12108 = vmatmul.mubr.msk.bf16.gmra.mrb[4].mxu1 %vm269_vm0, %v17470_v24 }
 0x560   : > { %12111 = vmatprep.mubr.msk.bf16.mxu1 %vm269_vm0, %v17472_v0 }
 0x567   : > { %12112 = vmatmul.mubr.msk.bf16.gmra.mrb[8].mxu1 %vm269_vm0, %v17478_v1 }
 0x568   : > { %12115 = vmatprep.mubr.msk.bf16.mxu1 %vm269_vm0, %v17480_v57 }
 0x56f   : > { %12116 = vmatmul.mubr.msk.bf16.gmra.mrb[12].mxu1 %vm269_vm0, %v17486_v50 }
 0x570   : > { %12119 = vmatprep.mubr.msk.bf16.mxu1 %vm269_vm0, %v17488_v12 }
 0x577   : > { %12120 = vmatmul.mubr.msk.bf16.gmra.mrb[16].mxu1 %vm269_vm0, %v17494_v58 }
 0x578   : > { %12123 = vmatprep.mubr.msk.bf16.mxu1 %vm269_vm0, %v17496_v18 }
 0x57f   : > { %12124 = vmatmul.mubr.msk.bf16.gmra.mrb[20].mxu1 %vm269_vm0, %v17502_v8 }
 0x580   : > { %12127 = vmatprep.mubr.msk.bf16.mxu1 %vm269_vm0, %v17504_v52 }
 0x586   : > { %v17512_v5 = vpop.f32.mrb[0].mxu0 }
 0x587   : > { %v17516_v13 = vpop.f32.mrb[1].mxu0  ;;  %12128 = vmatmul.mubr.msk.bf16.gmra.mrb[24].mxu1 %vm269_vm0, %v17510_v11 }
 0x588   : > { %v17520_v27 = vpop.f32.mrb[2].mxu0  ;;  %12131 = vmatprep.mubr.msk.bf16.mxu1 %vm269_vm0, %v17514_v38 }
 0x589   : > { %v17524_v25 = vpop.f32.mrb[3].mxu0 }
 0x58e   : > { %v17528_v23 = vpop.f32.mrb[4].mxu0 }
 0x58f   : > { %v17530_v47 = vpop.f32.mrb[5].mxu0  ;;  %12132 = vmatmul.mubr.msk.bf16.gmra.mrb[28].mxu1 %vm269_vm0, %v17526_v51 }
 0x590   : > { %v17534_v56 = vpop.f32.mrb[6].mxu0  ;;  %12137 = vmatprep.mubr.msk.bf16.mxu1 %vm269_vm0, %v17373_v48 }
 0x591   : > { %v17538_v43 = vpop.f32.mrb[7].mxu0 }
 0x596   : > { %v17542_v59 = vpop.f32.mrb[8].mxu0 }
 0x597   : > { %v17547_v16 = vpop.f32.mrb[9].mxu0  ;;  %12138 = vmatmul.mubr.msk.bf16.vlgmr.msra.gmra.mrb[0].mxu1 %vm269_vm0, %v17378_v36 }
 0x598   : > { %12170 = vmatpush3.bf16.msra.mxu1 %v9086_v7  ;;  %v17551_v40 = vpop.f32.mrb[10].mxu0  ;;  %12141 = vmatprep.mubr.msk.bf16.mxu1 %vm269_vm0, %v17396_v41 }
 0x599   : > { %v17555_v48 = vpop.f32.mrb[11].mxu0  ;;  %12865 = vmatprep.subr.msk.bf16.mxu1 %vm2926_vm2, %v9329_v35 }
 0x59a   : > { %18697 = vst [vmem:[#allocation120_spill] sm:$0xff] %v17555_v48 }
 0x59e   : > { %v17558_v55 = vpop.f32.mrb[12].mxu0 }
 0x59f   : > { %18698 = vst [vmem:[#allocation121_spill] sm:$0xff] %v17558_v55  ;;  %v17560_v14 = vpop.f32.mrb[13].mxu0  ;;  %12142 = vmatmul.mubr.msk.bf16.gmra.mrb[4].mxu1 %vm269_vm0, %v17398_v19 }
 0x5a0   : > { %18699 = vst [vmem:[#allocation122_spill] sm:$0xff] %v17560_v14  ;;  %v17564_v34 = vpop.f32.mrb[14].mxu0  ;;  %12145 = vmatprep.mubr.msk.bf16.mxu1 %vm269_vm0, %v17408_v30 }
 0x5a1   : > { %18700 = vst [vmem:[#allocation123_spill] sm:$0xff] %v17564_v34  ;;  %v17568_v28 = vpop.f32.mrb[15].mxu0 }
 0x5a2   : > { %18701 = vst [vmem:[#allocation124_spill] sm:$0xff] %v17568_v28 }
 0x5a6   : > { %v17570_v15 = vpop.f32.mrb[16].mxu0 }
 0x5a7   : > { %18702 = vst [vmem:[#allocation125_spill] sm:$0xff] %v17570_v15  ;;  %v17572_v37 = vpop.f32.mrb[17].mxu0  ;;  %12146 = vmatmul.mubr.msk.bf16.gmra.mrb[8].mxu1 %vm269_vm0, %v17410_v49 }
 0x5a8   : > { %18703 = vst [vmem:[#allocation126_spill] sm:$0xff] %v17572_v37  ;;  %v17576_v2 = vpop.f32.mrb[18].mxu0  ;;  %12149 = vmatprep.mubr.msk.bf16.mxu1 %vm269_vm0, %v17416_v10 }
 0x5a9   : > { %18704 = vst [vmem:[#allocation127_spill] sm:$0xff] %v17576_v2  ;;  %v17580_v54 = vpop.f32.mrb[19].mxu0  ;;  %v9379_v2 = vsel %vm2926_vm2, %v9329_v35, 0 }
 0x5aa   : > { %18705 = vst [vmem:[#allocation128_spill] sm:$0xff] %v17580_v54 }
 0x5ae   : > { %v17582_v60 = vpop.f32.mrb[20].mxu0 }
 0x5af   : > { %18706 = vst [vmem:[#allocation129_spill] sm:$0xff] %v17582_v60  ;;  %v17584_v20 = vpop.f32.mrb[21].mxu0  ;;  %12150 = vmatmul.mubr.msk.bf16.gmra.mrb[12].mxu1 %vm269_vm0, %v17418_v61  ;;  %v8993_v60 = vld [vmem:[#allocation2 + $0x51] sm:$0xff] }
 0x5b0   : > { %18707 = vst [vmem:[#allocation130_spill] sm:$0xff] %v17584_v20  ;;  %v17588_v39 = vpop.f32.mrb[22].mxu0  ;;  %12153 = vmatprep.mubr.msk.bf16.mxu1 %vm269_vm0, %v17424_v31  ;;  %v8992_v20 = vld [vmem:[#allocation2 + $0x49] sm:$0xff] }
 0x5b1   : > { %18708 = vst [vmem:[#allocation131_spill] sm:$0xff] %v17588_v39  ;;  %v17592_v17 = vpop.f32.mrb[23].mxu0  ;;  %v17630_v37 = vpack.c.bf16 %v8993_v60, %v8992_v20  ;;  %v8999_v20 = vld [vmem:[#allocation2 + $0x99] sm:$0xff] }
 0x5b2   : > { %18709 = vst [vmem:[#allocation132_spill] sm:$0xff] %v17592_v17 }
 0x5b6   : > { %v17594_v3 = vpop.f32.mrb[24].mxu0 }
 0x5b7   : > { %18710 = vst [vmem:[#allocation133_spill] sm:$0xff] %v17594_v3  ;;  %v17596_v46 = vpop.f32.mrb[25].mxu0  ;;  %12154 = vmatmul.mubr.msk.bf16.gmra.mrb[16].mxu1 %vm269_vm0, %v17426_v6 }
 0x5b8   : > { %18711 = vst [vmem:[#allocation134_spill] sm:$0xff] %v17596_v46  ;;  %v17600_v26 = vpop.f32.mrb[26].mxu0  ;;  %12157 = vmatprep.mubr.msk.bf16.mxu1 %vm269_vm0, %v17432_v42 }
 0x5b9   : > { %18712 = vst [vmem:[#allocation135_spill] sm:$0xff] %v17600_v26  ;;  %v17604_v45 = vpop.f32.mrb[27].mxu0  ;;  %v8988_v26 = vld [vmem:[#allocation2 + $0x19] sm:$0xff] }
 0x5ba   : > { %18713 = vst [vmem:[#allocation136_spill] sm:$0xff] %v17604_v45  ;;  %v8725_v45 = vld [vmem:[#allocation2 + $0x180] sm:$0xff] }
 0x5be   : > { %v17606_v62 = vpop.f32.mrb[28].mxu0 }
 0x5bf   : > { %18714 = vst [vmem:[#allocation137_spill] sm:$0xff] %v17606_v62  ;;  %v17608_v7 = vpop.f32.mrb[29].mxu0  ;;  %12158 = vmatmul.mubr.msk.bf16.gmra.mrb[20].mxu1 %vm269_vm0, %v17434_v33  ;;  %v8726_v62 = vld [vmem:[#allocation2 + $0x188] sm:$0xff] }
 0x5c0   : > { %18715 = vst [vmem:[#allocation138_spill] sm:$0xff] %v17608_v7  ;;  %v17612_v3 = vpop.f32.mrb[30].mxu0  ;;  %12161 = vmatprep.mubr.msk.bf16.mxu1 %vm269_vm0, %v17440_v44  ;;  %v8989_v7 = vld [vmem:[#allocation2 + $0x21] sm:$0xff]  ;;  %v17622_v17 = vpack.c.bf16 %v8726_v62, %v8725_v45  ;;  %v9622_v45 = vld [vmem:[%s17967_s4 + $0x18] sm:$0xf]  ;;  %v9000_v62 = vld [vmem:[#allocation2 + $0xa9] sm:$0xff] }
 0x5c1   : > { %18716 = vst [vmem:[#allocation139_spill] sm:$0xff] %v17612_v3  ;;  %v17616_v46 = vpop.f32.mrb[31].mxu0  ;;  %v9020_v39 = vpack.c.bf16 %v8989_v7, %v8988_v26  ;;  %v8990_v3 = vld [vmem:[#allocation2 + $0x31] sm:$0xff]  ;;  %v8997_v26 = vld [vmem:[#allocation2 + $0x81] sm:$0xff] }
 0x5c2   : > { %18717 = vst [vmem:[#allocation140_spill] sm:$0xff] %v17616_v46  ;;  %v8991_v46 = vld [vmem:[#allocation2 + $0x39] sm:$0xff]  ;;  %v9001_v7 = vld [vmem:[#allocation2 + $0xb1] sm:$0xff] }
 0x5c3   : > { %v17627_v54 = vpack.c.bf16 %v8991_v46, %v8990_v3  ;;  %v8995_v3 = vld [vmem:[#allocation2 + $0x69] sm:$0xff]  ;;  %v8996_v46 = vld [vmem:[#allocation2 + $0x79] sm:$0xff]  ;;  %v17650_v28 = vpack.c.bf16 %v9001_v7, %v9000_v62  ;;  %v9009_v7 = vld [vmem:[#allocation2 + $0x111] sm:$0xff] }
 0x5c4   : > { %v17642_v60 = vpack.c.bf16 %v8997_v26, %v8996_v46  ;;  %v9004_v46 = vld [vmem:[#allocation2 + $0xd9] sm:$0xff]  ;;  %v9005_v26 = vld [vmem:[#allocation2 + $0xe1] sm:$0xff]  ;;  %v9008_v62 = vld [vmem:[#allocation2 + $0x109] sm:$0xff] }
 0x5c5   : > { %v17658_v14 = vpack.c.bf16 %v9005_v26, %v9004_v46  ;;  %v17666_v48 = vpack.c.bf16 %v9009_v7, %v9008_v62  ;;  %v10208_v26 = vld [vmem:[%s17967_s4 + $0x20] sm:$0xf] }
 0x5c7   : > { %12162 = vmatmul.mubr.msk.bf16.gmra.mrb[24].mxu1 %vm269_vm0, %v17442_v32 }
 0x5c8   : > { %12165 = vmatprep.mubr.msk.bf16.mxu1 %vm269_vm0, %v17448_v22 }
 0x5cf   : > { %12166 = vmatmul.mubr.msk.bf16.gmra.mrb[28].mxu1 %vm269_vm0, %v17622_v17 }
 0x5d0   : > { %12171 = vmatprep.mubr.msk.bf16.mxu1 %vm269_vm0, %v9020_v39  ;;  %v8994_v39 = vld [vmem:[#allocation2 + $0x61] sm:$0xff] }
 0x5d1   : > { %v17640_v35 = vpack.c.bf16 %v8995_v3, %v8994_v39  ;;  %v9002_v39 = vld [vmem:[#allocation2 + $0xc1] sm:$0xff]  ;;  %v9003_v3 = vld [vmem:[#allocation2 + $0xc9] sm:$0xff] }
 0x5d2   : > { %v17656_v34 = vpack.c.bf16 %v9003_v3, %v9002_v39  ;;  %v9018_v39 = vld [vmem:[#allocation2 + $0x181] sm:$0xff]  ;;  %v9019_v3 = vld [vmem:[#allocation2 + $0x189] sm:$0xff] }
 0x5d3   : > { %v17680_v46 = vpack.c.bf16 %v9019_v3, %v9018_v39 }
 0x5d7   : > { %12172 = vmatmul.mubr.msk.bf16.vlgmr.msra.gmra.mrb[0].mxu1 %vm269_vm0, %v17627_v54 }
 0x5d8   : > { %12204 = vmatpush3.bf16.msra.mxu1 %v9379_v2  ;;  %12175 = vmatprep.mubr.msk.bf16.mxu1 %vm269_vm0, %v17630_v37  ;;  %v8998_v2 = vld [vmem:[#allocation2 + $0x91] sm:$0xff] }
 0x5d9   : > { %12866 = vmatprep.subr.msk.bf16.mxu1 %vm2926_vm2, %v9622_v45  ;;  %v17648_v15 = vpack.c.bf16 %v8999_v20, %v8998_v2  ;;  %v9006_v2 = vld [vmem:[#allocation2 + $0xf1] sm:$0xff]  ;;  %v9007_v20 = vld [vmem:[#allocation2 + $0xf9] sm:$0xff] }
 0x5da   : > { %v17664_v55 = vpack.c.bf16 %v9007_v20, %v9006_v2 }
 0x5df   : > { %12176 = vmatmul.mubr.msk.bf16.gmra.mrb[4].mxu1 %vm269_vm0, %v17640_v35 }
 0x5e0   : > { %12179 = vmatprep.mubr.msk.bf16.mxu1 %vm269_vm0, %v17642_v60 }
 0x5e7   : > { %12180 = vmatmul.mubr.msk.bf16.gmra.mrb[8].mxu1 %vm269_vm0, %v17648_v15 }
 0x5e8   : > { %12183 = vmatprep.mubr.msk.bf16.mxu1 %vm269_vm0, %v17650_v28 }
 0x5ef   : > { %12184 = vmatmul.mubr.msk.bf16.gmra.mrb[12].mxu1 %vm269_vm0, %v17656_v34 }
 0x5f0   : > { %12187 = vmatprep.mubr.msk.bf16.mxu1 %vm269_vm0, %v17658_v14 }
 0x5f7   : > { %12188 = vmatmul.mubr.msk.bf16.gmra.mrb[16].mxu1 %vm269_vm0, %v17664_v55 }
 0x5f8   : > { %12191 = vmatprep.mubr.msk.bf16.mxu1 %vm269_vm0, %v17666_v48 }
 0x5ff   : > { %12192 = vmatmul.mubr.msk.bf16.gmra.mrb[20].mxu1 %vm269_vm0, %v17255_v4  ;;  %v9672_v4 = vsel %vm2926_vm2, %v9622_v45, 0 }
 0x600   : > { %12195 = vmatprep.mubr.msk.bf16.mxu1 %vm269_vm0, %v17300_v21  ;;  %v9915_v21 = vld [vmem:[%s17967_s4 + $0x1c] sm:$0xf] }
 0x601   : > { %v9965_v45 = vsel %vm2926_vm2, %v9915_v21, 0 }
 0x607   : > { %12196 = vmatmul.mubr.msk.bf16.gmra.mrb[24].mxu1 %vm269_vm0, %v17350_v29  ;;  %v9311_v29 = vld [vmem:[#allocation2 + $0x182] sm:$0xff] }
 0x608   : > { %12199 = vmatprep.mubr.msk.bf16.mxu1 %vm269_vm0, %v17356_v53  ;;  %v9312_v53 = vld [vmem:[#allocation2 + $0x18a] sm:$0xff] }
 0x60f   : > { %12200 = vmatmul.mubr.msk.bf16.gmra.mrb[28].mxu1 %vm269_vm0, %v17680_v46 }
 0x610   : > { %12205 = vmatprep.mubr.msk.bf16.mxu1 %vm269_vm0, %v17453_v63  ;;  %v17719_v63 = vpack.c.bf16 %v9312_v53, %v9311_v29 }
 0x617   : > { %12206 = vmatmul.mubr.msk.bf16.vlgmr.msra.gmra.mrb[0].mxu1 %vm269_vm0, %v17457_v9 }
 0x618   : > { %12238 = vmatpush3.bf16.msra.mxu1 %v9672_v4  ;;  %12209 = vmatprep.mubr.msk.bf16.mxu1 %vm269_vm0, %v17470_v24 }
 0x619   : > { %12867 = vmatprep.subr.msk.bf16.mxu1 %vm2926_vm2, %v9915_v21 }
 0x61f   : > { %12210 = vmatmul.mubr.msk.bf16.gmra.mrb[4].mxu1 %vm269_vm0, %v17472_v0 }
 0x620   : > { %12213 = vmatprep.mubr.msk.bf16.mxu1 %vm269_vm0, %v17478_v1 }
 0x627   : > { %12214 = vmatmul.mubr.msk.bf16.gmra.mrb[8].mxu1 %vm269_vm0, %v17480_v57 }
 0x628   : > { %12217 = vmatprep.mubr.msk.bf16.mxu1 %vm269_vm0, %v17486_v50 }
 0x62f   : > { %12218 = vmatmul.mubr.msk.bf16.gmra.mrb[12].mxu1 %vm269_vm0, %v17488_v12 }
 0x630   : > { %12221 = vmatprep.mubr.msk.bf16.mxu1 %vm269_vm0, %v17494_v58 }
 0x637   : > { %12222 = vmatmul.mubr.msk.bf16.gmra.mrb[16].mxu1 %vm269_vm0, %v17496_v18 }
 0x638   : > { %12225 = vmatprep.mubr.msk.bf16.mxu1 %vm269_vm0, %v17502_v8 }
 0x63f   : > { %12226 = vmatmul.mubr.msk.bf16.gmra.mrb[20].mxu1 %vm269_vm0, %v17504_v52 }
 0x640   : > { %12229 = vmatprep.mubr.msk.bf16.mxu1 %vm269_vm0, %v17510_v11 }
 0x647   : > { %12230 = vmatmul.mubr.msk.bf16.gmra.mrb[24].mxu1 %vm269_vm0, %v17514_v38 }
 0x648   : > { %12233 = vmatprep.mubr.msk.bf16.mxu1 %vm269_vm0, %v17526_v51 }
 0x64f   : > { %12234 = vmatmul.mubr.msk.bf16.gmra.mrb[28].mxu1 %vm269_vm0, %v17719_v63 }
 0x650   : > { %12239 = vmatprep.mubr.msk.bf16.mxu1 %vm269_vm0, %v17378_v36  ;;  %v9604_v36 = vld [vmem:[#allocation2 + $0x198] sm:$0xff] }
 0x657   : > { %12240 = vmatmul.mubr.msk.bf16.vlgmr.msra.gmra.mrb[0].mxu1 %vm269_vm0, %v17396_v41  ;;  %v9605_v41 = vld [vmem:[#allocation2 + $0x1a0] sm:$0xff] }
 0x658   : > { %12272 = vmatpush3.bf16.msra.mxu1 %v9965_v45  ;;  %12243 = vmatprep.mubr.msk.bf16.mxu1 %vm269_vm0, %v17398_v19  ;;  %v9621_v19 = vpack.c.bf16 %v9605_v41, %v9604_v36 }
 0x659   : > { %12868 = vmatprep.subr.msk.bf16.mxu1 %vm2926_vm2, %v10208_v26 }
 0x65f   : > { %12244 = vmatmul.mubr.msk.bf16.gmra.mrb[4].mxu1 %vm269_vm0, %v17408_v30  ;;  %v10258_v30 = vsel %vm2926_vm2, %v10208_v26, 0 }
 0x660   : > { %12247 = vmatprep.mubr.msk.bf16.mxu1 %vm269_vm0, %v17410_v49  ;;  %v9887_v49 = vld [vmem:[#allocation2 + $0x121] sm:$0xff] }
 0x667   : > { %12248 = vmatmul.mubr.msk.bf16.gmra.mrb[8].mxu1 %vm269_vm0, %v17416_v10  ;;  %v9888_v10 = vld [vmem:[#allocation2 + $0x129] sm:$0xff] }
 0x668   : > { %12251 = vmatprep.mubr.msk.bf16.mxu1 %vm269_vm0, %v17418_v61  ;;  %v9909_v61 = vpack.c.bf16 %v9888_v10, %v9887_v49 }
 0x66f   : > { %12252 = vmatmul.mubr.msk.bf16.gmra.mrb[12].mxu1 %vm269_vm0, %v17424_v31  ;;  %v9889_v31 = vld [vmem:[#allocation2 + $0x139] sm:$0xff] }
 0x670   : > { %12255 = vmatprep.mubr.msk.bf16.mxu1 %vm269_vm0, %v17426_v6  ;;  %v9890_v6 = vld [vmem:[#allocation2 + $0x141] sm:$0xff] }
 0x677   : > { %12256 = vmatmul.mubr.msk.bf16.gmra.mrb[16].mxu1 %vm269_vm0, %v17432_v42  ;;  %v9891_v42 = vld [vmem:[#allocation2 + $0x151] sm:$0xff] }
 0x678   : > { %12259 = vmatprep.mubr.msk.bf16.mxu1 %vm269_vm0, %v17434_v33  ;;  %v9892_v33 = vld [vmem:[#allocation2 + $0x159] sm:$0xff] }
 0x67f   : > { %12260 = vmatmul.mubr.msk.bf16.gmra.mrb[20].mxu1 %vm269_vm0, %v17440_v44  ;;  %v9910_v44 = vpack.c.bf16 %v9890_v6, %v9889_v31 }
 0x680   : > { %12263 = vmatprep.mubr.msk.bf16.mxu1 %vm269_vm0, %v17442_v32  ;;  %v9911_v32 = vpack.c.bf16 %v9892_v33, %v9891_v42 }
 0x687   : > { %12264 = vmatmul.mubr.msk.bf16.gmra.mrb[24].mxu1 %vm269_vm0, %v17448_v22  ;;  %v9893_v22 = vld [vmem:[#allocation2 + $0x169] sm:$0xff] }
 0x688   : > { %12267 = vmatprep.mubr.msk.bf16.mxu1 %vm269_vm0, %v17622_v17 }
 0x68f   : > { %12268 = vmatmul.mubr.msk.bf16.gmra.mrb[28].mxu1 %vm269_vm0, %v9621_v19 }
 0x690   : > { %12273 = vmatprep.mubr.msk.bf16.mxu1 %vm269_vm0, %v17627_v54 }
 0x697   : > { %12274 = vmatmul.mubr.msk.bf16.vlgmr.msra.gmra.mrb[0].mxu1 %vm269_vm0, %v17630_v37 }
 0x698   : > { %12306 = vmatpush3.bf16.msra.mxu1 %v10258_v30  ;;  %12277 = vmatprep.mubr.msk.bf16.mxu1 %vm269_vm0, %v17640_v35 }
 0x69f   : > { %12278 = vmatmul.mubr.msk.bf16.gmra.mrb[4].mxu1 %vm269_vm0, %v17642_v60 }
 0x6a0   : > { %12281 = vmatprep.mubr.msk.bf16.mxu1 %vm269_vm0, %v17648_v15 }
 0x6a7   : > { %12282 = vmatmul.mubr.msk.bf16.gmra.mrb[8].mxu1 %vm269_vm0, %v17650_v28 }
 0x6a8   : > { %12285 = vmatprep.mubr.msk.bf16.mxu1 %vm269_vm0, %v17656_v34  ;;  %v9898_v34 = vld [vmem:[#allocation2 + $0x1a1] sm:$0xff] }
 0x6af   : > { %12286 = vmatmul.mubr.msk.bf16.gmra.mrb[12].mxu1 %vm269_vm0, %v17658_v14 }
 0x6b0   : > { %12289 = vmatprep.mubr.msk.bf16.mxu1 %vm269_vm0, %v17664_v55  ;;  %v9894_v55 = vld [vmem:[#allocation2 + $0x171] sm:$0xff] }
 0x6b1   : > { %v9912_v14 = vpack.c.bf16 %v9894_v55, %v9893_v22 }
 0x6b7   : > { %12290 = vmatmul.mubr.msk.bf16.gmra.mrb[16].mxu1 %vm269_vm0, %v17666_v48  ;;  %v9897_v48 = vld [vmem:[#allocation2 + $0x199] sm:$0xff] }
 0x6b8   : > { %12293 = vmatprep.mubr.msk.bf16.mxu1 %vm269_vm0, %v9909_v61  ;;  %v9914_v28 = vpack.c.bf16 %v9898_v34, %v9897_v48 }
 0x6bf   : > { %12294 = vmatmul.mubr.msk.bf16.gmra.mrb[20].mxu1 %vm269_vm0, %v9910_v44 }
 0x6c0   : > { %12297 = vmatprep.mubr.msk.bf16.mxu1 %vm269_vm0, %v9911_v32 }
 0x6c7   : > { %12298 = vmatmul.mubr.msk.bf16.gmra.mrb[24].mxu1 %vm269_vm0, %v9912_v14 }
 0x6c8   : > { %12301 = vmatprep.mubr.msk.bf16.mxu1 %vm269_vm0, %v17680_v46 }
 0x6cf   : > { %12302 = vmatmul.mubr.msk.bf16.gmra.mrb[28].mxu1 %vm269_vm0, %v9914_v28 }
 0x6d0   : > { %12307 = vmatprep.mubr.msk.bf16.mxu1 %vm269_vm0, %v17457_v9  ;;  %v10190_v9 = vld [vmem:[#allocation2 + $0x19a] sm:$0xff] }
 0x6d7   : > { %12308 = vmatmul.mubr.msk.bf16.vlgmr.msra.gmra.mrb[0].mxu1 %vm269_vm0, %v17470_v24  ;;  %v10191_v24 = vld [vmem:[#allocation2 + $0x1a2] sm:$0xff] }
 0x6d8   : > { %12311 = vmatprep.mubr.msk.bf16.mxu1 %vm269_vm0, %v17472_v0  ;;  %v10207_v0 = vpack.c.bf16 %v10191_v24, %v10190_v9 }
 0x6df   : > { %12312 = vmatmul.mubr.msk.bf16.gmra.mrb[4].mxu1 %vm269_vm0, %v17478_v1  ;;  %v17821_v1 = vld [vmem:[%s17968_s5] ss:$0 sm:$0xff] }
 0x6e0   : > { %12315 = vmatprep.mubr.msk.bf16.mxu1 %vm269_vm0, %v17480_v57  ;;  %v17826_v57 = vld [vmem:[%s17968_s5] ss:$0 sm:$0xff]  ;;  %v5366_v2 = vadd.f32 %v17821_v1, %v17530_v47  ;;  %v5367_v45 = vadd.f32 %v17821_v1, %v17538_v43  ;;  %v5370_v49 = vadd.f32 %v17821_v1, %v17547_v16  ;;  %v5373_v44 = vadd.f32 %v17551_v40, %v17821_v1 }
 0x6e2   : > { %v5399_v14 = vmax.f32 %v5367_v45, 0.0  ;;  %v5402_v9 = vmax.f32 %v5370_v49, 0.0 }
 0x6e7   : > { %12316 = vmatmul.mubr.msk.bf16.gmra.mrb[8].mxu1 %vm269_vm0, %v17486_v50  ;;  %v5364_v50 = vadd.f32 %v17512_v5, %v17821_v1 }
 0x6e8   : > { %12319 = vmatprep.mubr.msk.bf16.mxu1 %vm269_vm0, %v17488_v12  ;;  %v5362_v12 = vadd.f32 %v17821_v1, %v17516_v13 }
 0x6e9   : > { %v5396_v15 = vmax.f32 %v5364_v50, 0.0  ;;  %v18718_v50 = vld [vmem:[#allocation120_spill] sm:$0xff] }
 0x6ea   : > { %v5394_v37 = vmax.f32 %v5362_v12, 0.0  ;;  %v5371_v12 = vadd.f32 %v17821_v1, %v18718_v50 }
 0x6ef   : > { %12320 = vmatmul.mubr.msk.bf16.gmra.mrb[12].mxu1 %vm269_vm0, %v17494_v58  ;;  %v5365_v58 = vadd.f32 %v17520_v27, %v17821_v1  ;;  %v5368_v27 = vadd.f32 %v17528_v23, %v17821_v1  ;;  %v5398_v23 = vmax.f32 %v5366_v2, 0.0 }
 0x6f0   : > { %12323 = vmatprep.mubr.msk.bf16.mxu1 %vm269_vm0, %v17496_v18 }
 0x6f1   : > { %v5397_v13 = vmax.f32 %v5365_v58, 0.0  ;;  %v5400_v4 = vmax.f32 %v5368_v27, 0.0 }
 0x6f7   : > { %12324 = vmatmul.mubr.msk.bf16.gmra.mrb[16].mxu1 %vm269_vm0, %v17502_v8 }
 0x6f8   : > { %12327 = vmatprep.mubr.msk.bf16.mxu1 %vm269_vm0, %v17504_v52 }
 0x6ff   : > { %12328 = vmatmul.mubr.msk.bf16.gmra.mrb[20].mxu1 %vm269_vm0, %v17510_v11  ;;  %v5363_v11 = vadd.f32 %v17821_v1, %v17524_v25  ;;  %v5369_v25 = vadd.f32 %v17534_v56, %v17821_v1  ;;  %v5372_v56 = vadd.f32 %v17542_v59, %v17821_v1 }
 0x700   : > { %12331 = vmatprep.mubr.msk.bf16.mxu1 %vm269_vm0, %v17514_v38 }
 0x701   : > { %v5395_v7 = vmax.f32 %v5363_v11, 0.0  ;;  %v5404_v28 = vmax.f32 %v5372_v56, 0.0  ;;  %v18719_v11 = vld [vmem:[#allocation121_spill] sm:$0xff] }
 0x707   : > { %12332 = vmatmul.mubr.msk.bf16.gmra.mrb[24].mxu1 %vm269_vm0, %v17526_v51 }
 0x708   : > { %12335 = vmatprep.mubr.msk.bf16.mxu1 %vm269_vm0, %v17719_v63  ;;  %v5401_v63 = vmax.f32 %v5369_v25, 0.0 }
 0x70f   : > { %12336 = vmatmul.mubr.msk.bf16.gmra.mrb[28].mxu1 %vm269_vm0, %v10207_v0 }
 0x7aa   : > { %v12309_v18 = vpop.f32.mrb[0].mxu1 }
 0x7ab   : > { %v10462_v8 = vadd.f32 %v12309_v18, %v17826_v57  ;;  %v10294_v52 = vpop.f32.mrb[1].mxu1 }
 0x7ac   : > { %v10460_v38 = vadd.f32 %v17826_v57, %v10294_v52  ;;  %v12310_v51 = vpop.f32.mrb[2].mxu1  ;;  %v5405_v52 = vmax.f32 %v5373_v44, 0.0 }
 0x7ad   : > { %v10494_v54 = vmax.f32 %v10462_v8, 0.0  ;;  %v10463_v5 = vadd.f32 %v12310_v51, %v17826_v57  ;;  %v10297_v17 = vpop.f32.mrb[3].mxu1 }
 0x7ae   : > { %v10492_v35 = vmax.f32 %v10460_v38, 0.0  ;;  %v10461_v60 = vadd.f32 %v17826_v57, %v10297_v17  ;;  %v5376_v38 = vadd.f32 %v18719_v11, %v17821_v1 }
 0x7af   : > { %v10526_v20 = vsub.f32 %v5396_v15, %v10494_v54  ;;  %v10495_v62 = vmax.f32 %v10463_v5, 0.0 }
 0x7b0   : > { %v10524_v39 = vsub.f32 %v5394_v37, %v10492_v35  ;;  %v10493_v3 = vmax.f32 %v10461_v60, 0.0  ;;  %v18720_v35 = vld [vmem:[#allocation122_spill] sm:$0xff]  ;;  %v5408_v56 = vmax.f32 %v5376_v38, 0.0 }
 0x7b1   : > { %v10527_v46 = vsub.f32 %v5397_v13, %v10495_v62  ;;  %v10558_v36 = vmul.f32 %v10526_v20, %v10526_v20  ;;  %v5374_v60 = vadd.f32 %v17821_v1, %v18720_v35 }
 0x7b2   : > { %v10556_v21 = vmul.f32 %v10524_v39, %v10524_v39  ;;  %v10525_v29 = vsub.f32 %v5395_v7, %v10493_v3  ;;  %v12313_v53 = vpop.f32.mrb[4].mxu1 }
 0x7b3   : > { %v10466_v47 = vadd.f32 %v12313_v53, %v17826_v57  ;;  %v10310_v26 = vpop.f32.mrb[5].mxu1  ;;  %v10559_v10 = vmul.f32 %v10527_v46, %v10527_v46  ;;  %v10591_v16 = vsel %vm269_vm0, %v10558_v36, 0.0  ;;  %v5406_v36 = vmax.f32 %v5374_v60, 0.0  ;;  %v18726_v60 = vld [vmem:[#allocation128_spill] sm:$0xff] }
 0x7b4   : > { %v10557_v41 = vmul.f32 %v10525_v29, %v10525_v29  ;;  %v10464_v19 = vadd.f32 %v17826_v57, %v10310_v26  ;;  %v12314_v30 = vpop.f32.mrb[6].mxu1  ;;  %v10588_v43 = vsel %vm269_vm0, %v10556_v21, 0.0 }
 0x7b5   : > { %v10498_v61 = vmax.f32 %v10466_v47, 0.0  ;;  %v10467_v31 = vadd.f32 %v12314_v30, %v17826_v57  ;;  %v10313_v6 = vpop.f32.mrb[7].mxu1  ;;  %v10593_v58 = vsel %vm269_vm0, %v10559_v10, 0.0  ;;  %v18722_v30 = vld [vmem:[#allocation124_spill] sm:$0xff] }
 0x7b6   : > { %v10589_v42 = vsel %vm269_vm0, %v10557_v41, 0.0  ;;  %v10496_v33 = vmax.f32 %v10464_v19, 0.0  ;;  %v10465_v59 = vadd.f32 %v17826_v57, %v10313_v6  ;;  %v5375_v49 = vadd.f32 %v17821_v1, %v18722_v30 }
 0x7b7   : > { %v10590_v32 = vadd.f32 %v10589_v42, %v10588_v43  ;;  %v10530_v22 = vsub.f32 %v5400_v4, %v10498_v61  ;;  %v10499_v55 = vmax.f32 %v10467_v31, 0.0  ;;  %v18721_v4 = vld [vmem:[#allocation123_spill] sm:$0xff]  ;;  %v18723_v42 = vld [vmem:[#allocation125_spill] sm:$0xff] }
 0x7b8   : > { %v10528_v48 = vsub.f32 %v5398_v23, %v10496_v33  ;;  %v10497_v34 = vmax.f32 %v10465_v59, 0.0  ;;  %v5377_v21 = vadd.f32 %v18721_v4, %v17821_v1  ;;  %v5380_v33 = vadd.f32 %v18723_v42, %v17821_v1 }
 0x7b9   : > { %v10592_v24 = vadd.f32 %v10591_v16, %v10590_v32  ;;  %v10531_v0 = vsub.f32 %v5401_v63, %v10499_v55  ;;  %v10562_v54 = vmul.f32 %v10530_v22, %v10530_v22  ;;  %v5403_v63 = vmax.f32 %v5371_v12, 0.0 }
 0x7ba   : > { %v10560_v18 = vmul.f32 %v10528_v48, %v10528_v48  ;;  %v10529_v8 = vsub.f32 %v5399_v14, %v10497_v34  ;;  %v12317_v40 = vpop.f32.mrb[8].mxu1  ;;  %v5409_v43 = vmax.f32 %v5377_v21, 0.0  ;;  %v18724_v34 = vld [vmem:[#allocation126_spill] sm:$0xff] }
 0x7bb   : > { %v10594_v51 = vadd.f32 %v10593_v58, %v10592_v24  ;;  %v10470_v15 = vadd.f32 %v12317_v40, %v17826_v57  ;;  %v10326_v37 = vpop.f32.mrb[9].mxu1  ;;  %v10563_v7 = vmul.f32 %v10531_v0, %v10531_v0  ;;  %v10599_v45 = vsel %vm269_vm0, %v10562_v54, 0.0  ;;  %v18725_v40 = vld [vmem:[#allocation127_spill] sm:$0xff] }
 0x7bc   : > { %v10595_v5 = vsel %vm269_vm0, %v10560_v18, 0.0  ;;  %v10561_v17 = vmul.f32 %v10529_v8, %v10529_v8  ;;  %v10468_v13 = vadd.f32 %v17826_v57, %v10326_v37  ;;  %v12318_v27 = vpop.f32.mrb[10].mxu1 }
 0x7bd   : > { %v10596_v2 = vadd.f32 %v10595_v5, %v10594_v51  ;;  %v10502_v25 = vmax.f32 %v10470_v15, 0.0  ;;  %v10471_v20 = vadd.f32 %v12318_v27, %v17826_v57  ;;  %v10329_v62 = vpop.f32.mrb[11].mxu1  ;;  %v10601_v10 = vsel %vm269_vm0, %v10563_v7, 0.0 }
 0x7be   : > { %v10597_v39 = vsel %vm269_vm0, %v10561_v17, 0.0  ;;  %v10500_v3 = vmax.f32 %v10468_v13, 0.0  ;;  %v10469_v46 = vadd.f32 %v17826_v57, %v10329_v62  ;;  %v5407_v15 = vmax.f32 %v5375_v49, 0.0 }
 0x7bf   : > { %v10598_v29 = vadd.f32 %v10597_v39, %v10596_v2  ;;  %v10534_v53 = vsub.f32 %v5404_v28, %v10502_v25  ;;  %v10503_v23 = vmax.f32 %v10471_v20, 0.0  ;;  %v5378_v28 = vadd.f32 %v17821_v1, %v18724_v34 }
 0x7c0   : > { %v10532_v47 = vsub.f32 %v5402_v9, %v10500_v3  ;;  %v10501_v26 = vmax.f32 %v10469_v46, 0.0  ;;  %v5412_v17 = vmax.f32 %v5380_v33, 0.0  ;;  %v5379_v2 = vadd.f32 %v17821_v1, %v18726_v60  ;;  %v18727_v3 = vld [vmem:[#allocation129_spill] sm:$0xff] }
 0x7c1   : > { %v10600_v41 = vadd.f32 %v10599_v45, %v10598_v29  ;;  %v10535_v19 = vsub.f32 %v5405_v52, %v10503_v23  ;;  %v10566_v22 = vmul.f32 %v10534_v53, %v10534_v53  ;;  %v5381_v52 = vadd.f32 %v18725_v40, %v17821_v1 }
 0x7c2   : > { %v10564_v61 = vmul.f32 %v10532_v47, %v10532_v47  ;;  %v10533_v31 = vsub.f32 %v5403_v63, %v10501_v26  ;;  %v12321_v6 = vpop.f32.mrb[12].mxu1  ;;  %v5410_v13 = vmax.f32 %v5378_v28, 0.0  ;;  %v5384_v46 = vadd.f32 %v18727_v3, %v17821_v1  ;;  %v18728_v26 = vld [vmem:[#allocation130_spill] sm:$0xff] }
 0x7c3   : > { %v10602_v59 = vadd.f32 %v10601_v10, %v10600_v41  ;;  %v10474_v44 = vadd.f32 %v12321_v6, %v17826_v57  ;;  %v10342_v32 = vpop.f32.mrb[13].mxu1  ;;  %v10567_v12 = vmul.f32 %v10535_v19, %v10535_v19  ;;  %v10607_v37 = vsel %vm269_vm0, %v10566_v22, 0.0  ;;  %v18729_v6 = vld [vmem:[#allocation131_spill] sm:$0xff] }
 0x7c4   : > { %v10603_v55 = vsel %vm269_vm0, %v10564_v61, 0.0  ;;  %v10565_v14 = vmul.f32 %v10533_v31, %v10533_v31  ;;  %v10472_v16 = vadd.f32 %v17826_v57, %v10342_v32  ;;  %v12322_v48 = vpop.f32.mrb[14].mxu1  ;;  %v5413_v39 = vmax.f32 %v5381_v52, 0.0 }
 0x7c5   : > { %v10604_v9 = vadd.f32 %v10603_v55, %v10602_v59  ;;  %v10506_v24 = vmax.f32 %v10474_v44, 0.0  ;;  %v10475_v0 = vadd.f32 %v12322_v48, %v17826_v57  ;;  %v10345_v50 = vpop.f32.mrb[15].mxu1  ;;  %v10609_v25 = vsel %vm269_vm0, %v10567_v12, 0.0  ;;  %v18730_v12 = vld [vmem:[#allocation132_spill] sm:$0xff] }
 0x7c6   : > { %v10605_v58 = vsel %vm269_vm0, %v10565_v14, 0.0  ;;  %v10504_v18 = vmax.f32 %v10472_v16, 0.0  ;;  %v10473_v8 = vadd.f32 %v17826_v57, %v10345_v50  ;;  %v5411_v44 = vmax.f32 %v5379_v2, 0.0 }
 0x7c7   : > { %v10606_v11 = vadd.f32 %v10605_v58, %v10604_v9  ;;  %v10538_v38 = vsub.f32 %v5408_v56, %v10506_v24  ;;  %v10507_v51 = vmax.f32 %v10475_v0, 0.0  ;;  %v5382_v56 = vadd.f32 %v17821_v1, %v18728_v26 }
 0x7c8   : > { %v10536_v54 = vsub.f32 %v5406_v36, %v10504_v18  ;;  %v10505_v5 = vmax.f32 %v10473_v8, 0.0  ;;  %v5416_v14 = vmax.f32 %v5384_v46, 0.0  ;;  %v5383_v58 = vadd.f32 %v17821_v1, %v18730_v12 }
 0x7c9   : > { %v10608_v27 = vadd.f32 %v10607_v37, %v10606_v11  ;;  %v10539_v35 = vsub.f32 %v5409_v43, %v10507_v51  ;;  %v10570_v53 = vmul.f32 %v10538_v38, %v10538_v38  ;;  %v5385_v43 = vadd.f32 %v18729_v6, %v17821_v1  ;;  %v18731_v37 = vld [vmem:[#allocation133_spill] sm:$0xff] }
 0x7ca   : > { %v10568_v20 = vmul.f32 %v10536_v54, %v10536_v54  ;;  %v10537_v62 = vsub.f32 %v5407_v15, %v10505_v5  ;;  %v12325_v7 = vpop.f32.mrb[16].mxu1  ;;  %v5414_v34 = vmax.f32 %v5382_v56, 0.0  ;;  %v5388_v54 = vadd.f32 %v18731_v37, %v17821_v1 }
 0x7cb   : > { %v10610_v4 = vadd.f32 %v10609_v25, %v10608_v27  ;;  %v10478_v21 = vadd.f32 %v12325_v7, %v17826_v57  ;;  %v10358_v29 = vpop.f32.mrb[17].mxu1  ;;  %v10571_v49 = vmul.f32 %v10539_v35, %v10539_v35  ;;  %v10615_v32 = vsel %vm269_vm0, %v10570_v53, 0.0 }
 0x7cc   : > { %v10611_v23 = vsel %vm269_vm0, %v10568_v20, 0.0  ;;  %v10569_v63 = vmul.f32 %v10537_v62, %v10537_v62  ;;  %v10476_v45 = vadd.f32 %v17826_v57, %v10358_v29  ;;  %v12326_v47 = vpop.f32.mrb[18].mxu1  ;;  %v5417_v50 = vmax.f32 %v5385_v43, 0.0  ;;  %v18732_v20 = vld [vmem:[#allocation134_spill] sm:$0xff] }
 0x7cd   : > { %v10612_v36 = vadd.f32 %v10611_v23, %v10610_v4  ;;  %v10510_v41 = vmax.f32 %v10478_v21, 0.0  ;;  %v10479_v19 = vadd.f32 %v12326_v47, %v17826_v57  ;;  %v10361_v30 = vpop.f32.mrb[19].mxu1  ;;  %v10617_v28 = vsel %vm269_vm0, %v10571_v49, 0.0 }
 0x7ce   : > { %v10613_v10 = vsel %vm269_vm0, %v10569_v63, 0.0  ;;  %v10508_v61 = vmax.f32 %v10476_v45, 0.0  ;;  %v10477_v31 = vadd.f32 %v17826_v57, %v10361_v30  ;;  %v5386_v62 = vadd.f32 %v17821_v1, %v18732_v20  ;;  %v18733_v45 = vld [vmem:[#allocation135_spill] sm:$0xff]  ;;  %v18734_v30 = vld [vmem:[#allocation136_spill] sm:$0xff] }
 0x7cf   : > { %v10614_v42 = vadd.f32 %v10613_v10, %v10612_v36  ;;  %v10542_v33 = vsub.f32 %v5412_v17, %v10510_v41  ;;  %v10511_v59 = vmax.f32 %v10479_v19, 0.0  ;;  %v5415_v46 = vmax.f32 %v5383_v58, 0.0 }
 0x7d0   : > { %v10540_v22 = vsub.f32 %v5410_v13, %v10508_v61  ;;  %v10509_v55 = vmax.f32 %v10477_v31, 0.0  ;;  %v5420_v53 = vmax.f32 %v5388_v54, 0.0  ;;  %v5389_v47 = vadd.f32 %v18733_v45, %v17821_v1 }
 0x7d1   : > { %v10616_v16 = vadd.f32 %v10615_v32, %v10614_v42  ;;  %v10543_v48 = vsub.f32 %v5413_v39, %v10511_v59  ;;  %v10574_v52 = vmul.f32 %v10542_v33, %v10542_v33  ;;  %v5418_v19 = vmax.f32 %v5386_v62, 0.0 }
 0x7d2   : > { %v10572_v9 = vmul.f32 %v10540_v22, %v10540_v22  ;;  %v10541_v24 = vsub.f32 %v5411_v44, %v10509_v55  ;;  %v12329_v0 = vpop.f32.mrb[20].mxu1  ;;  %v5387_v49 = vadd.f32 %v17821_v1, %v18734_v30  ;;  %v18735_v44 = vld [vmem:[#allocation137_spill] sm:$0xff] }
 0x7d3   : > { %v10618_v18 = vadd.f32 %v10617_v28, %v10616_v16  ;;  %v10482_v8 = vadd.f32 %v12329_v0, %v17826_v57  ;;  %v10374_v40 = vpop.f32.mrb[21].mxu1  ;;  %v10575_v35 = vmul.f32 %v10543_v48, %v10543_v48  ;;  %v10623_v4 = vsel %vm269_vm0, %v10574_v52, 0.0  ;;  %v18736_v52 = vld [vmem:[#allocation138_spill] sm:$0xff] }
 0x7d4   : > { %v10619_v11 = vsel %vm269_vm0, %v10572_v9, 0.0  ;;  %v10573_v38 = vmul.f32 %v10541_v24, %v10541_v24  ;;  %v10480_v51 = vadd.f32 %v17826_v57, %v10374_v40  ;;  %v12330_v15 = vpop.f32.mrb[22].mxu1  ;;  %v5392_v32 = vadd.f32 %v18735_v44, %v17821_v1 }
 0x7d5   : > { %v10620_v5 = vadd.f32 %v10619_v11, %v10618_v18  ;;  %v10514_v17 = vmax.f32 %v10482_v8, 0.0  ;;  %v10483_v13 = vadd.f32 %v12330_v15, %v17826_v57  ;;  %v10377_v27 = vpop.f32.mrb[23].mxu1  ;;  %v10625_v26 = vsel %vm269_vm0, %v10575_v35, 0.0  ;;  %v18738_v35 = vld [vmem:[#allocation140_spill] sm:$0xff] }
 0x7d6   : > { %v10621_v60 = vsel %vm269_vm0, %v10573_v38, 0.0  ;;  %v10512_v2 = vmax.f32 %v10480_v51, 0.0  ;;  %v10481_v25 = vadd.f32 %v17826_v57, %v10377_v27  ;;  %v5421_v24 = vmax.f32 %v5389_v47, 0.0 }
 0x7d7   : > { %v10622_v7 = vadd.f32 %v10621_v60, %v10620_v5  ;;  %v10546_v39 = vsub.f32 %v5416_v14, %v10514_v17  ;;  %v10515_v3 = vmax.f32 %v10483_v13, 0.0  ;;  %v5419_v58 = vmax.f32 %v5387_v49, 0.0  ;;  %v18737_v13 = vld [vmem:[#allocation139_spill] sm:$0xff] }
 0x7d8   : > { %v10544_v21 = vsub.f32 %v5414_v34, %v10512_v2  ;;  %v10513_v29 = vmax.f32 %v10481_v25, 0.0  ;;  %v5390_v11 = vadd.f32 %v17821_v1, %v18736_v52  ;;  %v5424_v15 = vmax.f32 %v5392_v32, 0.0 }
 0x7d9   : > { %v10624_v23 = vadd.f32 %v10623_v4, %v10622_v7  ;;  %v10547_v63 = vsub.f32 %v5417_v50, %v10515_v3  ;;  %v10578_v6 = vmul.f32 %v10546_v39, %v10546_v39  ;;  %v5393_v27 = vadd.f32 %v18737_v13, %v17821_v1 }
 0x7da   : > { %v10576_v56 = vmul.f32 %v10544_v21, %v10544_v21  ;;  %v10545_v36 = vsub.f32 %v5415_v46, %v10513_v29  ;;  %v12333_v41 = vpop.f32.mrb[24].mxu1  ;;  %v5391_v60 = vadd.f32 %v17821_v1, %v18738_v35  ;;  %v5422_v4 = vmax.f32 %v5390_v11, 0.0 }
 0x7db   : > { %v10626_v10 = vadd.f32 %v10625_v26, %v10624_v23  ;;  %v10486_v61 = vadd.f32 %v12333_v41, %v17826_v57  ;;  %v10390_v31 = vpop.f32.mrb[25].mxu1  ;;  %v10579_v48 = vmul.f32 %v10547_v63, %v10547_v63  ;;  %v10631_v18 = vsel %vm269_vm0, %v10578_v6, 0.0 }
 0x7dc   : > { %v10627_v43 = vsel %vm269_vm0, %v10576_v56, 0.0  ;;  %v10577_v42 = vmul.f32 %v10545_v36, %v10545_v36  ;;  %v10484_v33 = vadd.f32 %v17826_v57, %v10390_v31  ;;  %v12334_v59 = vpop.f32.mrb[26].mxu1  ;;  %v5425_v26 = vmax.f32 %v5393_v27, 0.0 }
 0x7dd   : > { %v10628_v22 = vadd.f32 %v10627_v43, %v10626_v10  ;;  %v10518_v55 = vmax.f32 %v10486_v61, 0.0  ;;  %v10487_v14 = vadd.f32 %v12334_v59, %v17826_v57  ;;  %v10393_v16 = vpop.f32.mrb[27].mxu1  ;;  %v10633_v37 = vsel %vm269_vm0, %v10579_v48, 0.0 }
 0x7de   : > { %v10629_v34 = vsel %vm269_vm0, %v10577_v42, 0.0  ;;  %v10516_v28 = vmax.f32 %v10484_v33, 0.0  ;;  %v10485_v9 = vadd.f32 %v17826_v57, %v10393_v16 }
 0x7df   : > { %v10630_v0 = vadd.f32 %v10629_v34, %v10628_v22  ;;  %v10550_v50 = vsub.f32 %v5420_v53, %v10518_v55  ;;  %v10519_v12 = vmax.f32 %v10487_v14, 0.0 }
 0x7e0   : > { %v10548_v8 = vsub.f32 %v5418_v19, %v10516_v28  ;;  %v10517_v40 = vmax.f32 %v10485_v9, 0.0  ;;  %v5423_v19 = vmax.f32 %v5391_v60, 0.0 }
 0x7e1   : > { %v10632_v38 = vadd.f32 %v10631_v18, %v10630_v0  ;;  %v10551_v51 = vsub.f32 %v5421_v24, %v10519_v12  ;;  %v10582_v62 = vmul.f32 %v10550_v50, %v10550_v50 }
 0x7e2   : > { %v10580_v54 = vmul.f32 %v10548_v8, %v10548_v8  ;;  %v10549_v5 = vsub.f32 %v5419_v58, %v10517_v40  ;;  %v12337_v17 = vpop.f32.mrb[28].mxu1 }
 0x7e3   : > { %v10634_v2 = vadd.f32 %v10633_v37, %v10632_v38  ;;  %v10490_v25 = vadd.f32 %v12337_v17, %v17826_v57  ;;  %v10406_v20 = vpop.f32.mrb[29].mxu1  ;;  %v10583_v63 = vmul.f32 %v10551_v51, %v10551_v51  ;;  %v10639_v30 = vsel %vm269_vm0, %v10582_v62, 0.0 }
 0x7e4   : > { %v10635_v7 = vsel %vm269_vm0, %v10580_v54, 0.0  ;;  %v10581_v39 = vmul.f32 %v10549_v5, %v10549_v5  ;;  %v10488_v3 = vadd.f32 %v17826_v57, %v10406_v20  ;;  %v12338_v46 = vpop.f32.mrb[30].mxu1 }
 0x7e5   : > { %v10636_v21 = vadd.f32 %v10635_v7, %v10634_v2  ;;  %v10522_v29 = vmax.f32 %v10490_v25, 0.0  ;;  %v10491_v53 = vadd.f32 %v12338_v46, %v17826_v57  ;;  %v10409_v23 = vpop.f32.mrb[31].mxu1  ;;  %v10641_v6 = vsel %vm269_vm0, %v10583_v63, 0.0 }
 0x7e6   : > { %v10637_v1 = vsel %vm269_vm0, %v10581_v39, 0.0  ;;  %v10520_v45 = vmax.f32 %v10488_v3, 0.0  ;;  %v10489_v47 = vadd.f32 %v17826_v57, %v10409_v23 }
 0x7e7   : > { %v10638_v56 = vadd.f32 %v10637_v1, %v10636_v21  ;;  %v10554_v36 = vsub.f32 %v5424_v15, %v10522_v29  ;;  %v10523_v41 = vmax.f32 %v10491_v53, 0.0 }
 0x7e8   : > { %v10552_v49 = vsub.f32 %v5422_v4, %v10520_v45  ;;  %v10521_v10 = vmax.f32 %v10489_v47, 0.0 }
 0x7e9   : > { %v10640_v61 = vadd.f32 %v10639_v30, %v10638_v56  ;;  %v10555_v31 = vsub.f32 %v5425_v26, %v10523_v41  ;;  %v10586_v59 = vmul.f32 %v10554_v36, %v10554_v36 }
 0x7ea   : > { %v10584_v43 = vmul.f32 %v10552_v49, %v10552_v49  ;;  %v10553_v42 = vsub.f32 %v5423_v19, %v10521_v10 }
 0x7eb   : > { %v10642_v33 = vadd.f32 %v10641_v6, %v10640_v61  ;;  %v10587_v22 = vmul.f32 %v10555_v31, %v10555_v31  ;;  %v10647_v16 = vsel %vm269_vm0, %v10586_v59, 0.0 }
 0x7ec   : > { %v10643_v57 = vsel %vm269_vm0, %v10584_v43, 0.0  ;;  %v10585_v44 = vmul.f32 %v10553_v42, %v10553_v42 }
 0x7ed   : > { %v10644_v32 = vadd.f32 %v10643_v57, %v10642_v33  ;;  %v10649_v34 = vsel %vm269_vm0, %v10587_v22, 0.0 }
 0x7ee   : > { %v10645_v55 = vsel %vm269_vm0, %v10585_v44, 0.0 }
 0x7ef   : > { %v10646_v14 = vadd.f32 %v10645_v55, %v10644_v32 }
 0x7f1   : > { %v10648_v48 = vadd.f32 %v10647_v16, %v10646_v14 }
 0x7f3   : > { %v10650_v28 = vadd.f32 %v10649_v34, %v10648_v48 }
 0x7f5   : > { %v10651_v9 = vrot.slane %v10650_v28, 4 }
 0x7f7   : > { %v10652_v24 = vadd.f32 %v10651_v9, %v10650_v28 }
 0x7f9   : > { %v10653_v0 = vrot.slane %v10652_v24, 2 }
 0x7fb   : > { %v10654_v50 = vadd.f32 %v10653_v0, %v10652_v24 }
 0x7fd   : > { %v10655_v12 = vrot.slane %v10654_v50, 1 }
 0x7ff   : > { %v10656_v58 = vadd.f32 %v10655_v12, %v10654_v50 }
 0x801   : > { %10658 = vst.msk [vmem:[%s267_s23] sm:$0x1] %vm10657_vm3, %v10656_v58 }
 0x802 PF: > { %s16_s21 = sadd.s32 1, %s12908_s21  }
 0x803   : > { %p13_p4 = scmp.ge.s32.totalorder %s16_s21, 4  }
 0x805   :  { %15 = sbr.rel (!%p13_p4) target bundleno = 1 (0x1), region = 83 }

</bundles_post_ra>
